<compile_context>
chip_gen: v5e
topology: v5e:2x2
jax: 0.10.0
libtpu: 0.0.40
codegen_flags: <defaults>
</compile_context>

<pallas_src>
import functools

import jax
import jax.numpy as jnp
from jax import lax
from jax.experimental import pallas as pl
from jax.experimental.pallas import tpu as pltpu

# --- module constants (from models.py) ---
D = 100            # audio_feature_Dimension == text_embedding_Dimension == audio_Linear
HD = 50            # gru_hidden
E = 2 * HD         # bidirectional GRU feature dim == attention_weight_num == 100
C = 5              # label_classes
GP = 128           # lane-aligned segment width (one 128-lane tile)
ATTN_SCALE = 1.0 / float(E) ** 0.5
NEG_MASK = -1e9    # additive attention mask for invalid keys
NEG_LOGIT = -1e30  # classifier pad-lane logit -> softmax pad lanes are exactly 0


def dialogue_kernel(x_ref, vmask_ref, amask_ref,
                    wcat_ref, omega_ref,
                    wx_ref, bx_ref,
                    whf_ref, bhf_ref, whb_ref, bhb_ref,
                    wqkv_ref, bqkv_ref, wout_ref, bout_ref,
                    wcls_ref, bcls_ref,
                    o_ref,
                    gx_s, h_s,
                    *, T, BP):
    """Single-program kernel; activation rows are time-major (row = t*BP + b)."""
    f32 = jnp.float32
    bf16 = jnp.bfloat16
    TB = T * BP

    # ---- modality fusion: one matmul over stacked [audio; text] rows ----
    u = jnp.dot(x_ref[...], wcat_ref[...], preferred_element_type=f32)       # [2*TB, D]
    # TODO(synk): dropout(p=0.2) on tanh(u_cat) is an identity (eval mode).
    alpha = jnp.sum(jnp.tanh(u) * omega_ref[...], axis=-1, keepdims=True)    # [2*TB, 1]
    fusion = u[0:TB] * alpha[0:TB] + u[TB:2 * TB] * alpha[TB:2 * TB]         # [TB, D]

    # ---- GRU input gates, both directions, one fused matmul (lane-aligned) ----
    gx_s[...] = (jnp.dot(fusion.astype(bf16), wx_ref[...],
                         preferred_element_type=f32) + bx_ref[...])          # [TB, 6*GP]

    # ---- bidirectional GRU: fused fwd/bwd recurrence on batched [BP, GP] state ----
    def cell(gx, gh, h):
        r = jax.nn.sigmoid(gx[:, 0:GP] + gh[:, 0:GP])
        z = jax.nn.sigmoid(gx[:, GP:2 * GP] + gh[:, GP:2 * GP])
        n = jnp.tanh(gx[:, 2 * GP:3 * GP] + r * gh[:, 2 * GP:3 * GP])
        return (1.0 - z) * n + z * h

    hf = jnp.zeros((BP, GP), f32)
    hb = jnp.zeros((BP, GP), f32)
    # Static Python unroll (T is small and static) => all slice offsets are constants.
    for s in range(T):
        rf = s * BP                # forward direction processes time s
        rb = (T - 1 - s) * BP      # backward direction processes time T-1-s
        gxf = gx_s[pl.ds(rf, BP), 0:3 * GP]
        gxb = gx_s[pl.ds(rb, BP), 3 * GP:6 * GP]
        mf = vmask_ref[pl.ds(rf, BP), :]          # 1.0 where t < seqlen[b], else 0.0
        mb = vmask_ref[pl.ds(rb, BP), :]
        ghf = jnp.dot(hf, whf_ref[...], preferred_element_type=f32) + bhf_ref[...]
        ghb = jnp.dot(hb, whb_ref[...], preferred_element_type=f32) + bhb_ref[...]
        hf_new = cell(gxf, ghf, hf)
        hb_new = cell(gxb, ghb, hb)
        hf = mf * hf_new + (1.0 - mf) * hf        # packed-sequence semantics
        hb = mb * hb_new + (1.0 - mb) * hb
        h_s[pl.ds(rf, BP), 0:GP] = mf * hf_new            # padded timesteps -> 0
        h_s[pl.ds(rb, BP), GP:2 * GP] = mb * hb_new

    # ---- single-head self-attention, all batches at once (cross-batch masked) ----
    hcat = h_s[...]                                                    # [TB, 2*GP]
    qkv = (jnp.dot(hcat.astype(bf16), wqkv_ref[...],
                   preferred_element_type=f32) + bqkv_ref[...])        # [TB, 3*GP]
    q = qkv[:, 0:GP] * ATTN_SCALE
    k = qkv[:, GP:2 * GP]
    v = qkv[:, 2 * GP:3 * GP]
    scores = lax.dot_general(q, k, (((1,), (1,)), ((), ())),
                             preferred_element_type=f32) + amask_ref[...]   # [TB, TB]
    scores = scores - jnp.max(scores, axis=-1, keepdims=True)
    p = jnp.exp(scores)
    attn = p / jnp.sum(p, axis=-1, keepdims=True)
    # TODO(synk): attention-probability dropout(p=0.2) is an identity (eval mode).
    ctx = jnp.dot(attn, v, preferred_element_type=f32)                      # [TB, GP]
    sa = (jnp.dot(ctx.astype(bf16), wout_ref[...],
                  preferred_element_type=f32) + bout_ref[...])              # [TB, E]

    # ---- emotion classifier + softmax (lane-dense 128-wide padded output) ----
    logits = (jnp.dot(sa.astype(bf16), wcls_ref[...],
                      preferred_element_type=f32) + bcls_ref[...])          # [TB, GP]
    logits = logits - jnp.max(logits, axis=-1, keepdims=True)
    e = jnp.exp(logits)
    o_ref[...] = e / jnp.sum(e, axis=-1, keepdims=True)


# ----------------------------------------------------------------------------
# Host-side layout plumbing (weights + activations + masks)
# ----------------------------------------------------------------------------
def _gate_pad(w):
    """[K, 3*HD] with gates r|z|n -> [K, 3*GP], each gate at a 128-lane-aligned offset."""
    k = w.shape[0]
    out = jnp.zeros((k, 3 * GP), w.dtype)
    for g in range(3):
        out = out.at[:, g * GP:g * GP + HD].set(w[:, g * HD:(g + 1) * HD])
    return out


def _row_pad(w, rows):
    return jnp.pad(w, ((0, rows - w.shape[0]), (0, 0)))


def _prep_weights(p):
    f32, bf16 = jnp.float32, jnp.bfloat16
    wx_all = jnp.concatenate([_gate_pad(p["wx_f"]), _gate_pad(p["wx_b"])],
                             axis=1).astype(bf16)                        # [D, 6*GP]
    bx_all = jnp.concatenate([_gate_pad(p["bx_f"]), _gate_pad(p["bx_b"])],
                             axis=1).astype(f32)                         # [1, 6*GP]
    whf = _row_pad(_gate_pad(p["wh_f"]), GP).astype(f32)                 # [GP, 3*GP]
    whb = _row_pad(_gate_pad(p["wh_b"]), GP).astype(f32)
    bhf = _gate_pad(p["bh_f"]).astype(f32)                               # [1, 3*GP]
    bhb = _gate_pad(p["bh_b"]).astype(f32)

    # MHA in-projection, re-laid-out for the padded GRU output [*, 2*GP]
    # (fwd hidden at lanes 0:HD, bwd hidden at lanes GP:GP+HD); q/k/v columns
    # at 128-lane-aligned offsets.
    w_inp = p["w_inp_T"]                                                 # [E, 3*E]
    wqkv = jnp.zeros((2 * GP, 3 * GP), jnp.float32)
    bqkv = jnp.zeros((1, 3 * GP), jnp.float32)
    for m in range(3):
        wqkv = wqkv.at[0:HD, m * GP:m * GP + E].set(w_inp[0:HD, m * E:(m + 1) * E])
        wqkv = wqkv.at[GP:GP + HD, m * GP:m * GP + E].set(w_inp[HD:E, m * E:(m + 1) * E])
        bqkv = bqkv.at[:, m * GP:m * GP + E].set(p["b_inp"][:, m * E:(m + 1) * E])
    wqkv = wqkv.astype(jnp.bfloat16)

    wout = _row_pad(p["w_out_T"], GP).astype(bf16)                       # [GP, E]
    bout = p["b_out"].astype(f32)                                        # [1, E]
    wcls = jnp.pad(p["w_cls_T"], ((0, 0), (0, GP - C))).astype(bf16)     # [E, GP]
    bcls = jnp.full((1, GP), NEG_LOGIT, f32).at[:, 0:C].set(p["b_cls"])  # [1, GP]
    return dict(wcat=p["w_cat_T"].astype(bf16), omega=p["omega"].astype(f32),
                wx_all=wx_all, bx_all=bx_all, whf=whf, bhf=bhf, whb=whb, bhb=bhb,
                wqkv=wqkv, bqkv=bqkv, wout=wout, bout=bout, wcls=wcls, bcls=bcls)


def _prep_activations(audio, text, seqlen, BP):
    B, T, _ = audio.shape
    TB = T * BP

    def to_rows(x):  # [B, T, D] -> [T*BP, D] time-major, batch padded to BP
        x = jnp.transpose(x, (1, 0, 2))
        x = jnp.pad(x, ((0, 0), (0, BP - B), (0, 0)))
        return x.reshape(TB, D)

    x_at = jnp.concatenate([to_rows(audio), to_rows(text)],
                           axis=0).astype(jnp.bfloat16)                  # [2*TB, D]

    L = jnp.zeros((BP,), jnp.int32).at[:B].set(seqlen.astype(jnp.int32))
    t_idx = jnp.arange(T, dtype=jnp.int32)
    valid = (t_idx[:, None] < L[None, :]).astype(jnp.float32)            # [T, BP]
    vmask = jnp.broadcast_to(valid.reshape(TB, 1), (TB, GP))             # [TB, GP]

    # Additive attention mask: key j is valid for query i iff same batch slot
    # and t_j < seqlen[b].  Padded batch slots get effective length 1 so every
    # query row keeps at least one finite key (results are sliced away anyway).
    leff = jnp.maximum(L, (jnp.arange(BP) >= B).astype(jnp.int32))
    bi = jnp.arange(TB, dtype=jnp.int32) % BP
    ti = jnp.arange(TB, dtype=jnp.int32) // BP
    ok = (bi[:, None] == bi[None, :]) & (ti[None, :] < leff[bi][None, :])
    amask = jnp.where(ok, 0.0, NEG_MASK).astype(jnp.float32)             # [TB, TB]
    return x_at, vmask, amask


def make_params(key):
    """Deterministic synthetic parameters (shapes from DialogueModal.__init__)."""
    ks = jax.random.split(key, 16)
    n = lambda k, s, sc=0.05: jax.random.normal(k, s, jnp.float32) * sc
    return dict(
        w_cat_T=n(ks[0], (D, D)),             # Concat1_Linear.weight^T   (bias=False)
        omega=n(ks[1], (1, D), 1.0),           # Omega_f^T (torch.randn)
        wx_f=n(ks[2], (D, 3 * HD)),            # GRU weight_ih_l0^T        (r|z|n)
        wh_f=n(ks[3], (HD, 3 * HD)),           # GRU weight_hh_l0^T
        bx_f=n(ks[4], (1, 3 * HD)),            # GRU bias_ih_l0
        bh_f=n(ks[5], (1, 3 * HD)),            # GRU bias_hh_l0
        wx_b=n(ks[6], (D, 3 * HD)),            # GRU weight_ih_l0_reverse^T
        wh_b=n(ks[7], (HD, 3 * HD)),
        bx_b=n(ks[8], (1, 3 * HD)),
        bh_b=n(ks[9], (1, 3 * HD)),
        w_inp_T=n(ks[10], (E, 3 * E)),         # MHA in_proj_weight^T (q|k|v cols)
        b_inp=n(ks[11], (1, 3 * E)),           # MHA in_proj_bias
        w_out_T=n(ks[12], (E, E)),             # MHA out_proj.weight^T
        b_out=n(ks[13], (1, E)),               # MHA out_proj.bias
        w_cls_T=n(ks[14], (E, C)),             # Emotion_Classify.weight^T
        b_cls=n(ks[15], (1, C)),               # Emotion_Classify.bias
    )


@jax.jit
def dialogue_modal_forward(audio, text, seqlen, params):
    B, T, _ = audio.shape
    BP = max(8, ((B + 7) // 8) * 8)        # batch padded to a sublane multiple
    TB = T * BP

    x_at, vmask, amask = _prep_activations(audio, text, seqlen, BP)
    w = _prep_weights(params)

    args = (x_at, vmask, amask,
            w["wcat"], w["omega"], w["wx_all"], w["bx_all"],
            w["whf"], w["bhf"], w["whb"], w["bhb"],
            w["wqkv"], w["bqkv"], w["wout"], w["bout"],
            w["wcls"], w["bcls"])

    out = pl.pallas_call(
        functools.partial(dialogue_kernel, T=T, BP=BP),
        out_shape=jax.ShapeDtypeStruct((TB, GP), jnp.float32),
        grid=(1,),
        in_specs=[pl.BlockSpec(a.shape, lambda i: (0, 0)) for a in args],
        out_specs=pl.BlockSpec((TB, GP), lambda i: (0, 0)),
        scratch_shapes=[pltpu.VMEM((TB, 6 * GP), jnp.float32),   # input gates (fwd|bwd)
                        pltpu.VMEM((TB, 2 * GP), jnp.float32)],  # GRU outputs (fwd|bwd)
        compiler_params=pltpu.CompilerParams(dimension_semantics=("arbitrary",)),
    )(*args)

    # [T*BP, 128] -> [T_max, B, C]  (PyTorch pad_packed time-first convention;
    # assumes max(seqlen) == T like the reference pack/pad round trip).
    return out.reshape(T, BP, GP)[:, :B, :C]


if __name__ == "__main__":
    key = jax.random.PRNGKey(0)
    k_a, k_t, k_p = jax.random.split(key, 3)

    B, T = 2, 8
    audio = jax.random.normal(k_a, (B, T, D), jnp.float32)
    text = jax.random.normal(k_t, (B, T, D), jnp.float32)
    # max(seqlen) == T so the padded output length matches T
    seqlen = jnp.array([8, 5], dtype=jnp.int32)
    params = make_params(k_p)

    out = dialogue_modal_forward(audio, text, seqlen, params)
    out = jax.block_until_ready(out)

    assert out.shape == (T, B, C), out.shape
    assert bool(jnp.all(jnp.isfinite(out)))
    row_sums = jnp.sum(out, axis=-1)
    assert bool(jnp.all(jnp.abs(row_sums - 1.0) < 1e-4)), row_sums
    print("KERNEL_OK")
</pallas_src>

<mosaic_0001>
module attributes {stable_mosaic.version = 11 : i64} {
  func.func @dialogue_kernel(%arg0: i32, %arg1: memref<128x100xbf16, #tpu.memory_space<vmem>>, %arg2: memref<64x128xf32, #tpu.memory_space<vmem>>, %arg3: memref<64x64xf32, #tpu.memory_space<vmem>>, %arg4: memref<100x100xbf16, #tpu.memory_space<vmem>>, %arg5: memref<1x100xf32, #tpu.memory_space<vmem>>, %arg6: memref<100x768xbf16, #tpu.memory_space<vmem>>, %arg7: memref<1x768xf32, #tpu.memory_space<vmem>>, %arg8: memref<128x384xf32, #tpu.memory_space<vmem>>, %arg9: memref<1x384xf32, #tpu.memory_space<vmem>>, %arg10: memref<128x384xf32, #tpu.memory_space<vmem>>, %arg11: memref<1x384xf32, #tpu.memory_space<vmem>>, %arg12: memref<256x384xbf16, #tpu.memory_space<vmem>>, %arg13: memref<1x384xf32, #tpu.memory_space<vmem>>, %arg14: memref<128x100xbf16, #tpu.memory_space<vmem>>, %arg15: memref<1x100xf32, #tpu.memory_space<vmem>>, %arg16: memref<100x128xbf16, #tpu.memory_space<vmem>>, %arg17: memref<1x128xf32, #tpu.memory_space<vmem>>, %arg18: memref<64x128xf32, #tpu.memory_space<vmem>>, %arg19: memref<64x768xf32, #tpu.memory_space<vmem>>, %arg20: memref<64x256xf32, #tpu.memory_space<vmem>>) attributes {dimension_semantics = [#tpu.dimension_semantics<arbitrary>], iteration_bounds = array<i64: 1>, scalar_prefetch = 0 : i64, scratch_operands = 2 : i64, tpu.core_type = #tpu.core_type<tc>, window_params = [{pipeline_mode = #tpu.pipeline_mode<synchronous>, transform_indices = @transform_0, window_bounds = array<i64: 128, 100>}, {pipeline_mode = #tpu.pipeline_mode<synchronous>, transform_indices = @transform_1, window_bounds = array<i64: 64, 128>}, {pipeline_mode = #tpu.pipeline_mode<synchronous>, transform_indices = @transform_2, window_bounds = array<i64: 64, 64>}, {pipeline_mode = #tpu.pipeline_mode<synchronous>, transform_indices = @transform_3, window_bounds = array<i64: 100, 100>}, {pipeline_mode = #tpu.pipeline_mode<synchronous>, transform_indices = @transform_4, window_bounds = array<i64: 1, 100>}, {pipeline_mode = #tpu.pipeline_mode<synchronous>, transform_indices = @transform_5, window_bounds = array<i64: 100, 768>}, {pipeline_mode = #tpu.pipeline_mode<synchronous>, transform_indices = @transform_6, window_bounds = array<i64: 1, 768>}, {pipeline_mode = #tpu.pipeline_mode<synchronous>, transform_indices = @transform_7, window_bounds = array<i64: 128, 384>}, {pipeline_mode = #tpu.pipeline_mode<synchronous>, transform_indices = @transform_8, window_bounds = array<i64: 1, 384>}, {pipeline_mode = #tpu.pipeline_mode<synchronous>, transform_indices = @transform_9, window_bounds = array<i64: 128, 384>}, {pipeline_mode = #tpu.pipeline_mode<synchronous>, transform_indices = @transform_10, window_bounds = array<i64: 1, 384>}, {pipeline_mode = #tpu.pipeline_mode<synchronous>, transform_indices = @transform_11, window_bounds = array<i64: 256, 384>}, {pipeline_mode = #tpu.pipeline_mode<synchronous>, transform_indices = @transform_12, window_bounds = array<i64: 1, 384>}, {pipeline_mode = #tpu.pipeline_mode<synchronous>, transform_indices = @transform_13, window_bounds = array<i64: 128, 100>}, {pipeline_mode = #tpu.pipeline_mode<synchronous>, transform_indices = @transform_14, window_bounds = array<i64: 1, 100>}, {pipeline_mode = #tpu.pipeline_mode<synchronous>, transform_indices = @transform_15, window_bounds = array<i64: 100, 128>}, {pipeline_mode = #tpu.pipeline_mode<synchronous>, transform_indices = @transform_16, window_bounds = array<i64: 1, 128>}, {pipeline_mode = #tpu.pipeline_mode<synchronous>, transform_indices = @transform_17, window_bounds = array<i64: 64, 128>}]} {
    %c0 = arith.constant 0 : index
    %c0_0 = arith.constant 0 : index
    %0 = vector.load %arg1[%c0, %c0_0] : memref<128x100xbf16, #tpu.memory_space<vmem>>, vector<128x100xbf16>
    %c0_1 = arith.constant 0 : index
    %c0_2 = arith.constant 0 : index
    %1 = vector.load %arg4[%c0_1, %c0_2] : memref<100x100xbf16, #tpu.memory_space<vmem>>, vector<100x100xbf16>
    %cst = arith.constant dense<0.000000e+00> : vector<128x100xf32>
    %2 = tpu.matmul %0, %1, %cst {dimension_numbers = #tpu.dot_dimension_numbers<[1], [0], [0], [1], [0, 0, 1, 1], [], []>} : vector<128x100xbf16>, vector<100x100xbf16>, vector<128x100xf32> -> vector<128x100xf32>
    %3 = math.tanh %2 : vector<128x100xf32>
    %c0_3 = arith.constant 0 : index
    %c0_4 = arith.constant 0 : index
    %4 = vector.load %arg5[%c0_3, %c0_4] : memref<1x100xf32, #tpu.memory_space<vmem>>, vector<1x100xf32>
    %5 = vector.broadcast %4 : vector<1x100xf32> to vector<128x100xf32>
    %6 = arith.mulf %3, %5 : vector<128x100xf32>
    %cst_5 = arith.constant dense<0.000000e+00> : vector<128xf32>
    %7 = vector.multi_reduction <add>, %6, %cst_5 [1] : vector<128x100xf32> to vector<128xf32>
    %8 = vector.shape_cast %7 : vector<128xf32> to vector<128x1xf32>
    %9 = vector.extract_strided_slice %2 {offsets = [0, 0], sizes = [64, 100], strides = [1, 1]} : vector<128x100xf32> to vector<64x100xf32>
    %10 = vector.extract_strided_slice %8 {offsets = [0, 0], sizes = [64, 1], strides = [1, 1]} : vector<128x1xf32> to vector<64x1xf32>
    %11 = vector.broadcast %10 : vector<64x1xf32> to vector<64x100xf32>
    %12 = arith.mulf %9, %11 : vector<64x100xf32>
    %13 = vector.extract_strided_slice %2 {offsets = [64, 0], sizes = [64, 100], strides = [1, 1]} : vector<128x100xf32> to vector<64x100xf32>
    %14 = vector.extract_strided_slice %8 {offsets = [64, 0], sizes = [64, 1], strides = [1, 1]} : vector<128x1xf32> to vector<64x1xf32>
    %15 = vector.broadcast %14 : vector<64x1xf32> to vector<64x100xf32>
    %16 = arith.mulf %13, %15 : vector<64x100xf32>
    %17 = arith.addf %12, %16 : vector<64x100xf32>
    %18 = arith.truncf %17 : vector<64x100xf32> to vector<64x100xbf16>
    %c0_6 = arith.constant 0 : index
    %c0_7 = arith.constant 0 : index
    %19 = vector.load %arg6[%c0_6, %c0_7] : memref<100x768xbf16, #tpu.memory_space<vmem>>, vector<100x768xbf16>
    %cst_8 = arith.constant dense<0.000000e+00> : vector<64x768xf32>
    %20 = tpu.matmul %18, %19, %cst_8 {dimension_numbers = #tpu.dot_dimension_numbers<[1], [0], [0], [1], [0, 0, 1, 1], [], []>} : vector<64x100xbf16>, vector<100x768xbf16>, vector<64x768xf32> -> vector<64x768xf32>
    %c0_9 = arith.constant 0 : index
    %c0_10 = arith.constant 0 : index
    %21 = vector.load %arg7[%c0_9, %c0_10] : memref<1x768xf32, #tpu.memory_space<vmem>>, vector<1x768xf32>
    %22 = vector.broadcast %21 : vector<1x768xf32> to vector<64x768xf32>
    %23 = arith.addf %20, %22 : vector<64x768xf32>
    %c0_11 = arith.constant 0 : index
    %c0_12 = arith.constant 0 : index
    %24 = vector.load %arg19[%c0_11, %c0_12] : memref<64x768xf32, #tpu.memory_space<vmem>>, vector<64x768xf32>
    tpu.vector_store %arg19[%c0_11, %c0_12], %23 {strides = array<i32>} : memref<64x768xf32, #tpu.memory_space<vmem>>, vector<64x768xf32>,
    %cst_13 = arith.constant 0.000000e+00 : f32
    %25 = vector.broadcast %cst_13 : f32 to vector<8x128xf32>
    %cst_14 = arith.constant 0.000000e+00 : f32
    %26 = vector.broadcast %cst_14 : f32 to vector<8x128xf32>
    %c0_15 = arith.constant 0 : index
    %c0_16 = arith.constant 0 : index
    %27 = vector.load %arg19[%c0_15, %c0_16] : memref<64x768xf32, #tpu.memory_space<vmem>>, vector<8x384xf32>
    %c56 = arith.constant 56 : index
    %c384 = arith.constant 384 : index
    %28 = vector.load %arg19[%c56, %c384] : memref<64x768xf32, #tpu.memory_space<vmem>>, vector<8x384xf32>
    %c0_17 = arith.constant 0 : index
    %c0_18 = arith.constant 0 : index
    %29 = vector.load %arg2[%c0_17, %c0_18] : memref<64x128xf32, #tpu.memory_space<vmem>>, vector<8x128xf32>
    %c56_19 = arith.constant 56 : index
    %c0_20 = arith.constant 0 : index
    %30 = vector.load %arg2[%c56_19, %c0_20] : memref<64x128xf32, #tpu.memory_space<vmem>>, vector<8x128xf32>
    %c0_21 = arith.constant 0 : index
    %c0_22 = arith.constant 0 : index
    %31 = vector.load %arg8[%c0_21, %c0_22] : memref<128x384xf32, #tpu.memory_space<vmem>>, vector<128x384xf32>
    %cst_23 = arith.constant dense<0.000000e+00> : vector<8x384xf32>
    %32 = tpu.matmul %25, %31, %cst_23 {dimension_numbers = #tpu.dot_dimension_numbers<[1], [0], [0], [1], [0, 0, 1, 1], [], []>} : vector<8x128xf32>, vector<128x384xf32>, vector<8x384xf32> -> vector<8x384xf32>
    %c0_24 = arith.constant 0 : index
    %c0_25 = arith.constant 0 : index
    %33 = vector.load %arg9[%c0_24, %c0_25] : memref<1x384xf32, #tpu.memory_space<vmem>>, vector<1x384xf32>
    %34 = vector.broadcast %33 : vector<1x384xf32> to vector<8x384xf32>
    %35 = arith.addf %32, %34 : vector<8x384xf32>
    %c0_26 = arith.constant 0 : index
    %c0_27 = arith.constant 0 : index
    %36 = vector.load %arg10[%c0_26, %c0_27] : memref<128x384xf32, #tpu.memory_space<vmem>>, vector<128x384xf32>
    %cst_28 = arith.constant dense<0.000000e+00> : vector<8x384xf32>
    %37 = tpu.matmul %26, %36, %cst_28 {dimension_numbers = #tpu.dot_dimension_numbers<[1], [0], [0], [1], [0, 0, 1, 1], [], []>} : vector<8x128xf32>, vector<128x384xf32>, vector<8x384xf32> -> vector<8x384xf32>
    %c0_29 = arith.constant 0 : index
    %c0_30 = arith.constant 0 : index
    %38 = vector.load %arg11[%c0_29, %c0_30] : memref<1x384xf32, #tpu.memory_space<vmem>>, vector<1x384xf32>
    %39 = vector.broadcast %38 : vector<1x384xf32> to vector<8x384xf32>
    %40 = arith.addf %37, %39 : vector<8x384xf32>
    %41 = vector.extract_strided_slice %27 {offsets = [0, 0], sizes = [8, 128], strides = [1, 1]} : vector<8x384xf32> to vector<8x128xf32>
    %42 = vector.extract_strided_slice %35 {offsets = [0, 0], sizes = [8, 128], strides = [1, 1]} : vector<8x384xf32> to vector<8x128xf32>
    %43 = arith.addf %41, %42 : vector<8x128xf32>
    %44 = arith.negf %43 : vector<8x128xf32>
    %45 = math.exp %44 : vector<8x128xf32>
    %cst_31 = arith.constant 1.000000e+00 : f32
    %46 = vector.broadcast %cst_31 : f32 to vector<8x128xf32>
    %47 = arith.addf %46, %45 : vector<8x128xf32>
    %48 = arith.divf %46, %47 : vector<8x128xf32>
    %49 = vector.extract_strided_slice %27 {offsets = [0, 128], sizes = [8, 128], strides = [1, 1]} : vector<8x384xf32> to vector<8x128xf32>
    %50 = vector.extract_strided_slice %35 {offsets = [0, 128], sizes = [8, 128], strides = [1, 1]} : vector<8x384xf32> to vector<8x128xf32>
    %51 = arith.addf %49, %50 : vector<8x128xf32>
    %52 = arith.negf %51 : vector<8x128xf32>
    %53 = math.exp %52 : vector<8x128xf32>
    %cst_32 = arith.constant 1.000000e+00 : f32
    %54 = vector.broadcast %cst_32 : f32 to vector<8x128xf32>
    %55 = arith.addf %54, %53 : vector<8x128xf32>
    %56 = arith.divf %54, %55 : vector<8x128xf32>
    %57 = vector.extract_strided_slice %27 {offsets = [0, 256], sizes = [8, 128], strides = [1, 1]} : vector<8x384xf32> to vector<8x128xf32>
    %58 = vector.extract_strided_slice %35 {offsets = [0, 256], sizes = [8, 128], strides = [1, 1]} : vector<8x384xf32> to vector<8x128xf32>
    %59 = arith.mulf %48, %58 : vector<8x128xf32>
    %60 = arith.addf %57, %59 : vector<8x128xf32>
    %61 = math.tanh %60 : vector<8x128xf32>
    %cst_33 = arith.constant 1.000000e+00 : f32
    %62 = vector.broadcast %cst_33 : f32 to vector<8x128xf32>
    %63 = arith.subf %62, %56 : vector<8x128xf32>
    %64 = arith.mulf %63, %61 : vector<8x128xf32>
    %65 = arith.mulf %56, %25 : vector<8x128xf32>
    %66 = arith.addf %64, %65 : vector<8x128xf32>
    %67 = vector.extract_strided_slice %28 {offsets = [0, 0], sizes = [8, 128], strides = [1, 1]} : vector<8x384xf32> to vector<8x128xf32>
    %68 = vector.extract_strided_slice %40 {offsets = [0, 0], sizes = [8, 128], strides = [1, 1]} : vector<8x384xf32> to vector<8x128xf32>
    %69 = arith.addf %67, %68 : vector<8x128xf32>
    %70 = arith.negf %69 : vector<8x128xf32>
    %71 = math.exp %70 : vector<8x128xf32>
    %cst_34 = arith.constant 1.000000e+00 : f32
    %72 = vector.broadcast %cst_34 : f32 to vector<8x128xf32>
    %73 = arith.addf %72, %71 : vector<8x128xf32>
    %74 = arith.divf %72, %73 : vector<8x128xf32>
    %75 = vector.extract_strided_slice %28 {offsets = [0, 128], sizes = [8, 128], strides = [1, 1]} : vector<8x384xf32> to vector<8x128xf32>
    %76 = vector.extract_strided_slice %40 {offsets = [0, 128], sizes = [8, 128], strides = [1, 1]} : vector<8x384xf32> to vector<8x128xf32>
    %77 = arith.addf %75, %76 : vector<8x128xf32>
    %78 = arith.negf %77 : vector<8x128xf32>
    %79 = math.exp %78 : vector<8x128xf32>
    %cst_35 = arith.constant 1.000000e+00 : f32
    %80 = vector.broadcast %cst_35 : f32 to vector<8x128xf32>
    %81 = arith.addf %80, %79 : vector<8x128xf32>
    %82 = arith.divf %80, %81 : vector<8x128xf32>
    %83 = vector.extract_strided_slice %28 {offsets = [0, 256], sizes = [8, 128], strides = [1, 1]} : vector<8x384xf32> to vector<8x128xf32>
    %84 = vector.extract_strided_slice %40 {offsets = [0, 256], sizes = [8, 128], strides = [1, 1]} : vector<8x384xf32> to vector<8x128xf32>
    %85 = arith.mulf %74, %84 : vector<8x128xf32>
    %86 = arith.addf %83, %85 : vector<8x128xf32>
    %87 = math.tanh %86 : vector<8x128xf32>
    %cst_36 = arith.constant 1.000000e+00 : f32
    %88 = vector.broadcast %cst_36 : f32 to vector<8x128xf32>
    %89 = arith.subf %88, %82 : vector<8x128xf32>
    %90 = arith.mulf %89, %87 : vector<8x128xf32>
    %91 = arith.mulf %82, %26 : vector<8x128xf32>
    %92 = arith.addf %90, %91 : vector<8x128xf32>
    %93 = arith.mulf %29, %66 : vector<8x128xf32>
    %cst_37 = arith.constant 1.000000e+00 : f32
    %94 = vector.broadcast %cst_37 : f32 to vector<8x128xf32>
    %95 = arith.subf %94, %29 : vector<8x128xf32>
    %96 = arith.mulf %95, %25 : vector<8x128xf32>
    %97 = arith.addf %93, %96 : vector<8x128xf32>
    %98 = arith.mulf %30, %92 : vector<8x128xf32>
    %cst_38 = arith.constant 1.000000e+00 : f32
    %99 = vector.broadcast %cst_38 : f32 to vector<8x128xf32>
    %100 = arith.subf %99, %30 : vector<8x128xf32>
    %101 = arith.mulf %100, %26 : vector<8x128xf32>
    %102 = arith.addf %98, %101 : vector<8x128xf32>
    %103 = arith.mulf %29, %66 : vector<8x128xf32>
    %c0_39 = arith.constant 0 : index
    %c0_40 = arith.constant 0 : index
    %104 = vector.load %arg20[%c0_39, %c0_40] : memref<64x256xf32, #tpu.memory_space<vmem>>, vector<8x128xf32>
    tpu.vector_store %arg20[%c0_39, %c0_40], %103 {strides = array<i32>} : memref<64x256xf32, #tpu.memory_space<vmem>>, vector<8x128xf32>,
    %105 = arith.mulf %30, %92 : vector<8x128xf32>
    %c56_41 = arith.constant 56 : index
    %c128 = arith.constant 128 : index
    %106 = vector.load %arg20[%c56_41, %c128] : memref<64x256xf32, #tpu.memory_space<vmem>>, vector<8x128xf32>
    tpu.vector_store %arg20[%c56_41, %c128], %105 {strides = array<i32>} : memref<64x256xf32, #tpu.memory_space<vmem>>, vector<8x128xf32>,
    %c8 = arith.constant 8 : index
    %c0_42 = arith.constant 0 : index
    %107 = vector.load %arg19[%c8, %c0_42] : memref<64x768xf32, #tpu.memory_space<vmem>>, vector<8x384xf32>
    %c48 = arith.constant 48 : index
    %c384_43 = arith.constant 384 : index
    %108 = vector.load %arg19[%c48, %c384_43] : memref<64x768xf32, #tpu.memory_space<vmem>>, vector<8x384xf32>
    %c8_44 = arith.constant 8 : index
    %c0_45 = arith.constant 0 : index
    %109 = vector.load %arg2[%c8_44, %c0_45] : memref<64x128xf32, #tpu.memory_space<vmem>>, vector<8x128xf32>
    %c48_46 = arith.constant 48 : index
    %c0_47 = arith.constant 0 : index
    %110 = vector.load %arg2[%c48_46, %c0_47] : memref<64x128xf32, #tpu.memory_space<vmem>>, vector<8x128xf32>
    %c0_48 = arith.constant 0 : index
    %c0_49 = arith.constant 0 : index
    %111 = vector.load %arg8[%c0_48, %c0_49] : memref<128x384xf32, #tpu.memory_space<vmem>>, vector<128x384xf32>
    %cst_50 = arith.constant dense<0.000000e+00> : vector<8x384xf32>
    %112 = tpu.matmul %97, %111, %cst_50 {dimension_numbers = #tpu.dot_dimension_numbers<[1], [0], [0], [1], [0, 0, 1, 1], [], []>} : vector<8x128xf32>, vector<128x384xf32>, vector<8x384xf32> -> vector<8x384xf32>
    %c0_51 = arith.constant 0 : index
    %c0_52 = arith.constant 0 : index
    %113 = vector.load %arg9[%c0_51, %c0_52] : memref<1x384xf32, #tpu.memory_space<vmem>>, vector<1x384xf32>
    %114 = vector.broadcast %113 : vector<1x384xf32> to vector<8x384xf32>
    %115 = arith.addf %112, %114 : vector<8x384xf32>
    %c0_53 = arith.constant 0 : index
    %c0_54 = arith.constant 0 : index
    %116 = vector.load %arg10[%c0_53, %c0_54] : memref<128x384xf32, #tpu.memory_space<vmem>>, vector<128x384xf32>
    %cst_55 = arith.constant dense<0.000000e+00> : vector<8x384xf32>
    %117 = tpu.matmul %102, %116, %cst_55 {dimension_numbers = #tpu.dot_dimension_numbers<[1], [0], [0], [1], [0, 0, 1, 1], [], []>} : vector<8x128xf32>, vector<128x384xf32>, vector<8x384xf32> -> vector<8x384xf32>
    %c0_56 = arith.constant 0 : index
    %c0_57 = arith.constant 0 : index
    %118 = vector.load %arg11[%c0_56, %c0_57] : memref<1x384xf32, #tpu.memory_space<vmem>>, vector<1x384xf32>
    %119 = vector.broadcast %118 : vector<1x384xf32> to vector<8x384xf32>
    %120 = arith.addf %117, %119 : vector<8x384xf32>
    %121 = vector.extract_strided_slice %107 {offsets = [0, 0], sizes = [8, 128], strides = [1, 1]} : vector<8x384xf32> to vector<8x128xf32>
    %122 = vector.extract_strided_slice %115 {offsets = [0, 0], sizes = [8, 128], strides = [1, 1]} : vector<8x384xf32> to vector<8x128xf32>
    %123 = arith.addf %121, %122 : vector<8x128xf32>
    %124 = arith.negf %123 : vector<8x128xf32>
    %125 = math.exp %124 : vector<8x128xf32>
    %cst_58 = arith.constant 1.000000e+00 : f32
    %126 = vector.broadcast %cst_58 : f32 to vector<8x128xf32>
    %127 = arith.addf %126, %125 : vector<8x128xf32>
    %128 = arith.divf %126, %127 : vector<8x128xf32>
    %129 = vector.extract_strided_slice %107 {offsets = [0, 128], sizes = [8, 128], strides = [1, 1]} : vector<8x384xf32> to vector<8x128xf32>
    %130 = vector.extract_strided_slice %115 {offsets = [0, 128], sizes = [8, 128], strides = [1, 1]} : vector<8x384xf32> to vector<8x128xf32>
    %131 = arith.addf %129, %130 : vector<8x128xf32>
    %132 = arith.negf %131 : vector<8x128xf32>
    %133 = math.exp %132 : vector<8x128xf32>
    %cst_59 = arith.constant 1.000000e+00 : f32
    %134 = vector.broadcast %cst_59 : f32 to vector<8x128xf32>
    %135 = arith.addf %134, %133 : vector<8x128xf32>
    %136 = arith.divf %134, %135 : vector<8x128xf32>
    %137 = vector.extract_strided_slice %107 {offsets = [0, 256], sizes = [8, 128], strides = [1, 1]} : vector<8x384xf32> to vector<8x128xf32>
    %138 = vector.extract_strided_slice %115 {offsets = [0, 256], sizes = [8, 128], strides = [1, 1]} : vector<8x384xf32> to vector<8x128xf32>
    %139 = arith.mulf %128, %138 : vector<8x128xf32>
    %140 = arith.addf %137, %139 : vector<8x128xf32>
    %141 = math.tanh %140 : vector<8x128xf32>
    %cst_60 = arith.constant 1.000000e+00 : f32
    %142 = vector.broadcast %cst_60 : f32 to vector<8x128xf32>
    %143 = arith.subf %142, %136 : vector<8x128xf32>
    %144 = arith.mulf %143, %141 : vector<8x128xf32>
    %145 = arith.mulf %136, %97 : vector<8x128xf32>
    %146 = arith.addf %144, %145 : vector<8x128xf32>
    %147 = vector.extract_strided_slice %108 {offsets = [0, 0], sizes = [8, 128], strides = [1, 1]} : vector<8x384xf32> to vector<8x128xf32>
    %148 = vector.extract_strided_slice %120 {offsets = [0, 0], sizes = [8, 128], strides = [1, 1]} : vector<8x384xf32> to vector<8x128xf32>
    %149 = arith.addf %147, %148 : vector<8x128xf32>
    %150 = arith.negf %149 : vector<8x128xf32>
    %151 = math.exp %150 : vector<8x128xf32>
    %cst_61 = arith.constant 1.000000e+00 : f32
    %152 = vector.broadcast %cst_61 : f32 to vector<8x128xf32>
    %153 = arith.addf %152, %151 : vector<8x128xf32>
    %154 = arith.divf %152, %153 : vector<8x128xf32>
    %155 = vector.extract_strided_slice %108 {offsets = [0, 128], sizes = [8, 128], strides = [1, 1]} : vector<8x384xf32> to vector<8x128xf32>
    %156 = vector.extract_strided_slice %120 {offsets = [0, 128], sizes = [8, 128], strides = [1, 1]} : vector<8x384xf32> to vector<8x128xf32>
    %157 = arith.addf %155, %156 : vector<8x128xf32>
    %158 = arith.negf %157 : vector<8x128xf32>
    %159 = math.exp %158 : vector<8x128xf32>
    %cst_62 = arith.constant 1.000000e+00 : f32
    %160 = vector.broadcast %cst_62 : f32 to vector<8x128xf32>
    %161 = arith.addf %160, %159 : vector<8x128xf32>
    %162 = arith.divf %160, %161 : vector<8x128xf32>
    %163 = vector.extract_strided_slice %108 {offsets = [0, 256], sizes = [8, 128], strides = [1, 1]} : vector<8x384xf32> to vector<8x128xf32>
    %164 = vector.extract_strided_slice %120 {offsets = [0, 256], sizes = [8, 128], strides = [1, 1]} : vector<8x384xf32> to vector<8x128xf32>
    %165 = arith.mulf %154, %164 : vector<8x128xf32>
    %166 = arith.addf %163, %165 : vector<8x128xf32>
    %167 = math.tanh %166 : vector<8x128xf32>
    %cst_63 = arith.constant 1.000000e+00 : f32
    %168 = vector.broadcast %cst_63 : f32 to vector<8x128xf32>
    %169 = arith.subf %168, %162 : vector<8x128xf32>
    %170 = arith.mulf %169, %167 : vector<8x128xf32>
    %171 = arith.mulf %162, %102 : vector<8x128xf32>
    %172 = arith.addf %170, %171 : vector<8x128xf32>
    %173 = arith.mulf %109, %146 : vector<8x128xf32>
    %cst_64 = arith.constant 1.000000e+00 : f32
    %174 = vector.broadcast %cst_64 : f32 to vector<8x128xf32>
    %175 = arith.subf %174, %109 : vector<8x128xf32>
    %176 = arith.mulf %175, %97 : vector<8x128xf32>
    %177 = arith.addf %173, %176 : vector<8x128xf32>
    %178 = arith.mulf %110, %172 : vector<8x128xf32>
    %cst_65 = arith.constant 1.000000e+00 : f32
    %179 = vector.broadcast %cst_65 : f32 to vector<8x128xf32>
    %180 = arith.subf %179, %110 : vector<8x128xf32>
    %181 = arith.mulf %180, %102 : vector<8x128xf32>
    %182 = arith.addf %178, %181 : vector<8x128xf32>
    %183 = arith.mulf %109, %146 : vector<8x128xf32>
    %c8_66 = arith.constant 8 : index
    %c0_67 = arith.constant 0 : index
    %184 = vector.load %arg20[%c8_66, %c0_67] : memref<64x256xf32, #tpu.memory_space<vmem>>, vector<8x128xf32>
    tpu.vector_store %arg20[%c8_66, %c0_67], %183 {strides = array<i32>} : memref<64x256xf32, #tpu.memory_space<vmem>>, vector<8x128xf32>,
    %185 = arith.mulf %110, %172 : vector<8x128xf32>
    %c48_68 = arith.constant 48 : index
    %c128_69 = arith.constant 128 : index
    %186 = vector.load %arg20[%c48_68, %c128_69] : memref<64x256xf32, #tpu.memory_space<vmem>>, vector<8x128xf32>
    tpu.vector_store %arg20[%c48_68, %c128_69], %185 {strides = array<i32>} : memref<64x256xf32, #tpu.memory_space<vmem>>, vector<8x128xf32>,
    %c16 = arith.constant 16 : index
    %c0_70 = arith.constant 0 : index
    %187 = vector.load %arg19[%c16, %c0_70] : memref<64x768xf32, #tpu.memory_space<vmem>>, vector<8x384xf32>
    %c40 = arith.constant 40 : index
    %c384_71 = arith.constant 384 : index
    %188 = vector.load %arg19[%c40, %c384_71] : memref<64x768xf32, #tpu.memory_space<vmem>>, vector<8x384xf32>
    %c16_72 = arith.constant 16 : index
    %c0_73 = arith.constant 0 : index
    %189 = vector.load %arg2[%c16_72, %c0_73] : memref<64x128xf32, #tpu.memory_space<vmem>>, vector<8x128xf32>
    %c40_74 = arith.constant 40 : index
    %c0_75 = arith.constant 0 : index
    %190 = vector.load %arg2[%c40_74, %c0_75] : memref<64x128xf32, #tpu.memory_space<vmem>>, vector<8x128xf32>
    %c0_76 = arith.constant 0 : index
    %c0_77 = arith.constant 0 : index
    %191 = vector.load %arg8[%c0_76, %c0_77] : memref<128x384xf32, #tpu.memory_space<vmem>>, vector<128x384xf32>
    %cst_78 = arith.constant dense<0.000000e+00> : vector<8x384xf32>
    %192 = tpu.matmul %177, %191, %cst_78 {dimension_numbers = #tpu.dot_dimension_numbers<[1], [0], [0], [1], [0, 0, 1, 1], [], []>} : vector<8x128xf32>, vector<128x384xf32>, vector<8x384xf32> -> vector<8x384xf32>
    %c0_79 = arith.constant 0 : index
    %c0_80 = arith.constant 0 : index
    %193 = vector.load %arg9[%c0_79, %c0_80] : memref<1x384xf32, #tpu.memory_space<vmem>>, vector<1x384xf32>
    %194 = vector.broadcast %193 : vector<1x384xf32> to vector<8x384xf32>
    %195 = arith.addf %192, %194 : vector<8x384xf32>
    %c0_81 = arith.constant 0 : index
    %c0_82 = arith.constant 0 : index
    %196 = vector.load %arg10[%c0_81, %c0_82] : memref<128x384xf32, #tpu.memory_space<vmem>>, vector<128x384xf32>
    %cst_83 = arith.constant dense<0.000000e+00> : vector<8x384xf32>
    %197 = tpu.matmul %182, %196, %cst_83 {dimension_numbers = #tpu.dot_dimension_numbers<[1], [0], [0], [1], [0, 0, 1, 1], [], []>} : vector<8x128xf32>, vector<128x384xf32>, vector<8x384xf32> -> vector<8x384xf32>
    %c0_84 = arith.constant 0 : index
    %c0_85 = arith.constant 0 : index
    %198 = vector.load %arg11[%c0_84, %c0_85] : memref<1x384xf32, #tpu.memory_space<vmem>>, vector<1x384xf32>
    %199 = vector.broadcast %198 : vector<1x384xf32> to vector<8x384xf32>
    %200 = arith.addf %197, %199 : vector<8x384xf32>
    %201 = vector.extract_strided_slice %187 {offsets = [0, 0], sizes = [8, 128], strides = [1, 1]} : vector<8x384xf32> to vector<8x128xf32>
    %202 = vector.extract_strided_slice %195 {offsets = [0, 0], sizes = [8, 128], strides = [1, 1]} : vector<8x384xf32> to vector<8x128xf32>
    %203 = arith.addf %201, %202 : vector<8x128xf32>
    %204 = arith.negf %203 : vector<8x128xf32>
    %205 = math.exp %204 : vector<8x128xf32>
    %cst_86 = arith.constant 1.000000e+00 : f32
    %206 = vector.broadcast %cst_86 : f32 to vector<8x128xf32>
    %207 = arith.addf %206, %205 : vector<8x128xf32>
    %208 = arith.divf %206, %207 : vector<8x128xf32>
    %209 = vector.extract_strided_slice %187 {offsets = [0, 128], sizes = [8, 128], strides = [1, 1]} : vector<8x384xf32> to vector<8x128xf32>
    %210 = vector.extract_strided_slice %195 {offsets = [0, 128], sizes = [8, 128], strides = [1, 1]} : vector<8x384xf32> to vector<8x128xf32>
    %211 = arith.addf %209, %210 : vector<8x128xf32>
    %212 = arith.negf %211 : vector<8x128xf32>
    %213 = math.exp %212 : vector<8x128xf32>
    %cst_87 = arith.constant 1.000000e+00 : f32
    %214 = vector.broadcast %cst_87 : f32 to vector<8x128xf32>
    %215 = arith.addf %214, %213 : vector<8x128xf32>
    %216 = arith.divf %214, %215 : vector<8x128xf32>
    %217 = vector.extract_strided_slice %187 {offsets = [0, 256], sizes = [8, 128], strides = [1, 1]} : vector<8x384xf32> to vector<8x128xf32>
    %218 = vector.extract_strided_slice %195 {offsets = [0, 256], sizes = [8, 128], strides = [1, 1]} : vector<8x384xf32> to vector<8x128xf32>
    %219 = arith.mulf %208, %218 : vector<8x128xf32>
    %220 = arith.addf %217, %219 : vector<8x128xf32>
    %221 = math.tanh %220 : vector<8x128xf32>
    %cst_88 = arith.constant 1.000000e+00 : f32
    %222 = vector.broadcast %cst_88 : f32 to vector<8x128xf32>
    %223 = arith.subf %222, %216 : vector<8x128xf32>
    %224 = arith.mulf %223, %221 : vector<8x128xf32>
    %225 = arith.mulf %216, %177 : vector<8x128xf32>
    %226 = arith.addf %224, %225 : vector<8x128xf32>
    %227 = vector.extract_strided_slice %188 {offsets = [0, 0], sizes = [8, 128], strides = [1, 1]} : vector<8x384xf32> to vector<8x128xf32>
    %228 = vector.extract_strided_slice %200 {offsets = [0, 0], sizes = [8, 128], strides = [1, 1]} : vector<8x384xf32> to vector<8x128xf32>
    %229 = arith.addf %227, %228 : vector<8x128xf32>
    %230 = arith.negf %229 : vector<8x128xf32>
    %231 = math.exp %230 : vector<8x128xf32>
    %cst_89 = arith.constant 1.000000e+00 : f32
    %232 = vector.broadcast %cst_89 : f32 to vector<8x128xf32>
    %233 = arith.addf %232, %231 : vector<8x128xf32>
    %234 = arith.divf %232, %233 : vector<8x128xf32>
    %235 = vector.extract_strided_slice %188 {offsets = [0, 128], sizes = [8, 128], strides = [1, 1]} : vector<8x384xf32> to vector<8x128xf32>
    %236 = vector.extract_strided_slice %200 {offsets = [0, 128], sizes = [8, 128], strides = [1, 1]} : vector<8x384xf32> to vector<8x128xf32>
    %237 = arith.addf %235, %236 : vector<8x128xf32>
    %238 = arith.negf %237 : vector<8x128xf32>
    %239 = math.exp %238 : vector<8x128xf32>
    %cst_90 = arith.constant 1.000000e+00 : f32
    %240 = vector.broadcast %cst_90 : f32 to vector<8x128xf32>
    %241 = arith.addf %240, %239 : vector<8x128xf32>
    %242 = arith.divf %240, %241 : vector<8x128xf32>
    %243 = vector.extract_strided_slice %188 {offsets = [0, 256], sizes = [8, 128], strides = [1, 1]} : vector<8x384xf32> to vector<8x128xf32>
    %244 = vector.extract_strided_slice %200 {offsets = [0, 256], sizes = [8, 128], strides = [1, 1]} : vector<8x384xf32> to vector<8x128xf32>
    %245 = arith.mulf %234, %244 : vector<8x128xf32>
    %246 = arith.addf %243, %245 : vector<8x128xf32>
    %247 = math.tanh %246 : vector<8x128xf32>
    %cst_91 = arith.constant 1.000000e+00 : f32
    %248 = vector.broadcast %cst_91 : f32 to vector<8x128xf32>
    %249 = arith.subf %248, %242 : vector<8x128xf32>
    %250 = arith.mulf %249, %247 : vector<8x128xf32>
    %251 = arith.mulf %242, %182 : vector<8x128xf32>
    %252 = arith.addf %250, %251 : vector<8x128xf32>
    %253 = arith.mulf %189, %226 : vector<8x128xf32>
    %cst_92 = arith.constant 1.000000e+00 : f32
    %254 = vector.broadcast %cst_92 : f32 to vector<8x128xf32>
    %255 = arith.subf %254, %189 : vector<8x128xf32>
    %256 = arith.mulf %255, %177 : vector<8x128xf32>
    %257 = arith.addf %253, %256 : vector<8x128xf32>
    %258 = arith.mulf %190, %252 : vector<8x128xf32>
    %cst_93 = arith.constant 1.000000e+00 : f32
    %259 = vector.broadcast %cst_93 : f32 to vector<8x128xf32>
    %260 = arith.subf %259, %190 : vector<8x128xf32>
    %261 = arith.mulf %260, %182 : vector<8x128xf32>
    %262 = arith.addf %258, %261 : vector<8x128xf32>
    %263 = arith.mulf %189, %226 : vector<8x128xf32>
    %c16_94 = arith.constant 16 : index
    %c0_95 = arith.constant 0 : index
    %264 = vector.load %arg20[%c16_94, %c0_95] : memref<64x256xf32, #tpu.memory_space<vmem>>, vector<8x128xf32>
    tpu.vector_store %arg20[%c16_94, %c0_95], %263 {strides = array<i32>} : memref<64x256xf32, #tpu.memory_space<vmem>>, vector<8x128xf32>,
    %265 = arith.mulf %190, %252 : vector<8x128xf32>
    %c40_96 = arith.constant 40 : index
    %c128_97 = arith.constant 128 : index
    %266 = vector.load %arg20[%c40_96, %c128_97] : memref<64x256xf32, #tpu.memory_space<vmem>>, vector<8x128xf32>
    tpu.vector_store %arg20[%c40_96, %c128_97], %265 {strides = array<i32>} : memref<64x256xf32, #tpu.memory_space<vmem>>, vector<8x128xf32>,
    %c24 = arith.constant 24 : index
    %c0_98 = arith.constant 0 : index
    %267 = vector.load %arg19[%c24, %c0_98] : memref<64x768xf32, #tpu.memory_space<vmem>>, vector<8x384xf32>
    %c32 = arith.constant 32 : index
    %c384_99 = arith.constant 384 : index
    %268 = vector.load %arg19[%c32, %c384_99] : memref<64x768xf32, #tpu.memory_space<vmem>>, vector<8x384xf32>
    %c24_100 = arith.constant 24 : index
    %c0_101 = arith.constant 0 : index
    %269 = vector.load %arg2[%c24_100, %c0_101] : memref<64x128xf32, #tpu.memory_space<vmem>>, vector<8x128xf32>
    %c32_102 = arith.constant 32 : index
    %c0_103 = arith.constant 0 : index
    %270 = vector.load %arg2[%c32_102, %c0_103] : memref<64x128xf32, #tpu.memory_space<vmem>>, vector<8x128xf32>
    %c0_104 = arith.constant 0 : index
    %c0_105 = arith.constant 0 : index
    %271 = vector.load %arg8[%c0_104, %c0_105] : memref<128x384xf32, #tpu.memory_space<vmem>>, vector<128x384xf32>
    %cst_106 = arith.constant dense<0.000000e+00> : vector<8x384xf32>
    %272 = tpu.matmul %257, %271, %cst_106 {dimension_numbers = #tpu.dot_dimension_numbers<[1], [0], [0], [1], [0, 0, 1, 1], [], []>} : vector<8x128xf32>, vector<128x384xf32>, vector<8x384xf32> -> vector<8x384xf32>
    %c0_107 = arith.constant 0 : index
    %c0_108 = arith.constant 0 : index
    %273 = vector.load %arg9[%c0_107, %c0_108] : memref<1x384xf32, #tpu.memory_space<vmem>>, vector<1x384xf32>
    %274 = vector.broadcast %273 : vector<1x384xf32> to vector<8x384xf32>
    %275 = arith.addf %272, %274 : vector<8x384xf32>
    %c0_109 = arith.constant 0 : index
    %c0_110 = arith.constant 0 : index
    %276 = vector.load %arg10[%c0_109, %c0_110] : memref<128x384xf32, #tpu.memory_space<vmem>>, vector<128x384xf32>
    %cst_111 = arith.constant dense<0.000000e+00> : vector<8x384xf32>
    %277 = tpu.matmul %262, %276, %cst_111 {dimension_numbers = #tpu.dot_dimension_numbers<[1], [0], [0], [1], [0, 0, 1, 1], [], []>} : vector<8x128xf32>, vector<128x384xf32>, vector<8x384xf32> -> vector<8x384xf32>
    %c0_112 = arith.constant 0 : index
    %c0_113 = arith.constant 0 : index
    %278 = vector.load %arg11[%c0_112, %c0_113] : memref<1x384xf32, #tpu.memory_space<vmem>>, vector<1x384xf32>
    %279 = vector.broadcast %278 : vector<1x384xf32> to vector<8x384xf32>
    %280 = arith.addf %277, %279 : vector<8x384xf32>
    %281 = vector.extract_strided_slice %267 {offsets = [0, 0], sizes = [8, 128], strides = [1, 1]} : vector<8x384xf32> to vector<8x128xf32>
    %282 = vector.extract_strided_slice %275 {offsets = [0, 0], sizes = [8, 128], strides = [1, 1]} : vector<8x384xf32> to vector<8x128xf32>
    %283 = arith.addf %281, %282 : vector<8x128xf32>
    %284 = arith.negf %283 : vector<8x128xf32>
    %285 = math.exp %284 : vector<8x128xf32>
    %cst_114 = arith.constant 1.000000e+00 : f32
    %286 = vector.broadcast %cst_114 : f32 to vector<8x128xf32>
    %287 = arith.addf %286, %285 : vector<8x128xf32>
    %288 = arith.divf %286, %287 : vector<8x128xf32>
    %289 = vector.extract_strided_slice %267 {offsets = [0, 128], sizes = [8, 128], strides = [1, 1]} : vector<8x384xf32> to vector<8x128xf32>
    %290 = vector.extract_strided_slice %275 {offsets = [0, 128], sizes = [8, 128], strides = [1, 1]} : vector<8x384xf32> to vector<8x128xf32>
    %291 = arith.addf %289, %290 : vector<8x128xf32>
    %292 = arith.negf %291 : vector<8x128xf32>
    %293 = math.exp %292 : vector<8x128xf32>
    %cst_115 = arith.constant 1.000000e+00 : f32
    %294 = vector.broadcast %cst_115 : f32 to vector<8x128xf32>
    %295 = arith.addf %294, %293 : vector<8x128xf32>
    %296 = arith.divf %294, %295 : vector<8x128xf32>
    %297 = vector.extract_strided_slice %267 {offsets = [0, 256], sizes = [8, 128], strides = [1, 1]} : vector<8x384xf32> to vector<8x128xf32>
    %298 = vector.extract_strided_slice %275 {offsets = [0, 256], sizes = [8, 128], strides = [1, 1]} : vector<8x384xf32> to vector<8x128xf32>
    %299 = arith.mulf %288, %298 : vector<8x128xf32>
    %300 = arith.addf %297, %299 : vector<8x128xf32>
    %301 = math.tanh %300 : vector<8x128xf32>
    %cst_116 = arith.constant 1.000000e+00 : f32
    %302 = vector.broadcast %cst_116 : f32 to vector<8x128xf32>
    %303 = arith.subf %302, %296 : vector<8x128xf32>
    %304 = arith.mulf %303, %301 : vector<8x128xf32>
    %305 = arith.mulf %296, %257 : vector<8x128xf32>
    %306 = arith.addf %304, %305 : vector<8x128xf32>
    %307 = vector.extract_strided_slice %268 {offsets = [0, 0], sizes = [8, 128], strides = [1, 1]} : vector<8x384xf32> to vector<8x128xf32>
    %308 = vector.extract_strided_slice %280 {offsets = [0, 0], sizes = [8, 128], strides = [1, 1]} : vector<8x384xf32> to vector<8x128xf32>
    %309 = arith.addf %307, %308 : vector<8x128xf32>
    %310 = arith.negf %309 : vector<8x128xf32>
    %311 = math.exp %310 : vector<8x128xf32>
    %cst_117 = arith.constant 1.000000e+00 : f32
    %312 = vector.broadcast %cst_117 : f32 to vector<8x128xf32>
    %313 = arith.addf %312, %311 : vector<8x128xf32>
    %314 = arith.divf %312, %313 : vector<8x128xf32>
    %315 = vector.extract_strided_slice %268 {offsets = [0, 128], sizes = [8, 128], strides = [1, 1]} : vector<8x384xf32> to vector<8x128xf32>
    %316 = vector.extract_strided_slice %280 {offsets = [0, 128], sizes = [8, 128], strides = [1, 1]} : vector<8x384xf32> to vector<8x128xf32>
    %317 = arith.addf %315, %316 : vector<8x128xf32>
    %318 = arith.negf %317 : vector<8x128xf32>
    %319 = math.exp %318 : vector<8x128xf32>
    %cst_118 = arith.constant 1.000000e+00 : f32
    %320 = vector.broadcast %cst_118 : f32 to vector<8x128xf32>
    %321 = arith.addf %320, %319 : vector<8x128xf32>
    %322 = arith.divf %320, %321 : vector<8x128xf32>
    %323 = vector.extract_strided_slice %268 {offsets = [0, 256], sizes = [8, 128], strides = [1, 1]} : vector<8x384xf32> to vector<8x128xf32>
    %324 = vector.extract_strided_slice %280 {offsets = [0, 256], sizes = [8, 128], strides = [1, 1]} : vector<8x384xf32> to vector<8x128xf32>
    %325 = arith.mulf %314, %324 : vector<8x128xf32>
    %326 = arith.addf %323, %325 : vector<8x128xf32>
    %327 = math.tanh %326 : vector<8x128xf32>
    %cst_119 = arith.constant 1.000000e+00 : f32
    %328 = vector.broadcast %cst_119 : f32 to vector<8x128xf32>
    %329 = arith.subf %328, %322 : vector<8x128xf32>
    %330 = arith.mulf %329, %327 : vector<8x128xf32>
    %331 = arith.mulf %322, %262 : vector<8x128xf32>
    %332 = arith.addf %330, %331 : vector<8x128xf32>
    %333 = arith.mulf %269, %306 : vector<8x128xf32>
    %cst_120 = arith.constant 1.000000e+00 : f32
    %334 = vector.broadcast %cst_120 : f32 to vector<8x128xf32>
    %335 = arith.subf %334, %269 : vector<8x128xf32>
    %336 = arith.mulf %335, %257 : vector<8x128xf32>
    %337 = arith.addf %333, %336 : vector<8x128xf32>
    %338 = arith.mulf %270, %332 : vector<8x128xf32>
    %cst_121 = arith.constant 1.000000e+00 : f32
    %339 = vector.broadcast %cst_121 : f32 to vector<8x128xf32>
    %340 = arith.subf %339, %270 : vector<8x128xf32>
    %341 = arith.mulf %340, %262 : vector<8x128xf32>
    %342 = arith.addf %338, %341 : vector<8x128xf32>
    %343 = arith.mulf %269, %306 : vector<8x128xf32>
    %c24_122 = arith.constant 24 : index
    %c0_123 = arith.constant 0 : index
    %344 = vector.load %arg20[%c24_122, %c0_123] : memref<64x256xf32, #tpu.memory_space<vmem>>, vector<8x128xf32>
    tpu.vector_store %arg20[%c24_122, %c0_123], %343 {strides = array<i32>} : memref<64x256xf32, #tpu.memory_space<vmem>>, vector<8x128xf32>,
    %345 = arith.mulf %270, %332 : vector<8x128xf32>
    %c32_124 = arith.constant 32 : index
    %c128_125 = arith.constant 128 : index
    %346 = vector.load %arg20[%c32_124, %c128_125] : memref<64x256xf32, #tpu.memory_space<vmem>>, vector<8x128xf32>
    tpu.vector_store %arg20[%c32_124, %c128_125], %345 {strides = array<i32>} : memref<64x256xf32, #tpu.memory_space<vmem>>, vector<8x128xf32>,
    %c32_126 = arith.constant 32 : index
    %c0_127 = arith.constant 0 : index
    %347 = vector.load %arg19[%c32_126, %c0_127] : memref<64x768xf32, #tpu.memory_space<vmem>>, vector<8x384xf32>
    %c24_128 = arith.constant 24 : index
    %c384_129 = arith.constant 384 : index
    %348 = vector.load %arg19[%c24_128, %c384_129] : memref<64x768xf32, #tpu.memory_space<vmem>>, vector<8x384xf32>
    %c32_130 = arith.constant 32 : index
    %c0_131 = arith.constant 0 : index
    %349 = vector.load %arg2[%c32_130, %c0_131] : memref<64x128xf32, #tpu.memory_space<vmem>>, vector<8x128xf32>
    %c24_132 = arith.constant 24 : index
    %c0_133 = arith.constant 0 : index
    %350 = vector.load %arg2[%c24_132, %c0_133] : memref<64x128xf32, #tpu.memory_space<vmem>>, vector<8x128xf32>
    %c0_134 = arith.constant 0 : index
    %c0_135 = arith.constant 0 : index
    %351 = vector.load %arg8[%c0_134, %c0_135] : memref<128x384xf32, #tpu.memory_space<vmem>>, vector<128x384xf32>
    %cst_136 = arith.constant dense<0.000000e+00> : vector<8x384xf32>
    %352 = tpu.matmul %337, %351, %cst_136 {dimension_numbers = #tpu.dot_dimension_numbers<[1], [0], [0], [1], [0, 0, 1, 1], [], []>} : vector<8x128xf32>, vector<128x384xf32>, vector<8x384xf32> -> vector<8x384xf32>
    %c0_137 = arith.constant 0 : index
    %c0_138 = arith.constant 0 : index
    %353 = vector.load %arg9[%c0_137, %c0_138] : memref<1x384xf32, #tpu.memory_space<vmem>>, vector<1x384xf32>
    %354 = vector.broadcast %353 : vector<1x384xf32> to vector<8x384xf32>
    %355 = arith.addf %352, %354 : vector<8x384xf32>
    %c0_139 = arith.constant 0 : index
    %c0_140 = arith.constant 0 : index
    %356 = vector.load %arg10[%c0_139, %c0_140] : memref<128x384xf32, #tpu.memory_space<vmem>>, vector<128x384xf32>
    %cst_141 = arith.constant dense<0.000000e+00> : vector<8x384xf32>
    %357 = tpu.matmul %342, %356, %cst_141 {dimension_numbers = #tpu.dot_dimension_numbers<[1], [0], [0], [1], [0, 0, 1, 1], [], []>} : vector<8x128xf32>, vector<128x384xf32>, vector<8x384xf32> -> vector<8x384xf32>
    %c0_142 = arith.constant 0 : index
    %c0_143 = arith.constant 0 : index
    %358 = vector.load %arg11[%c0_142, %c0_143] : memref<1x384xf32, #tpu.memory_space<vmem>>, vector<1x384xf32>
    %359 = vector.broadcast %358 : vector<1x384xf32> to vector<8x384xf32>
    %360 = arith.addf %357, %359 : vector<8x384xf32>
    %361 = vector.extract_strided_slice %347 {offsets = [0, 0], sizes = [8, 128], strides = [1, 1]} : vector<8x384xf32> to vector<8x128xf32>
    %362 = vector.extract_strided_slice %355 {offsets = [0, 0], sizes = [8, 128], strides = [1, 1]} : vector<8x384xf32> to vector<8x128xf32>
    %363 = arith.addf %361, %362 : vector<8x128xf32>
    %364 = arith.negf %363 : vector<8x128xf32>
    %365 = math.exp %364 : vector<8x128xf32>
    %cst_144 = arith.constant 1.000000e+00 : f32
    %366 = vector.broadcast %cst_144 : f32 to vector<8x128xf32>
    %367 = arith.addf %366, %365 : vector<8x128xf32>
    %368 = arith.divf %366, %367 : vector<8x128xf32>
    %369 = vector.extract_strided_slice %347 {offsets = [0, 128], sizes = [8, 128], strides = [1, 1]} : vector<8x384xf32> to vector<8x128xf32>
    %370 = vector.extract_strided_slice %355 {offsets = [0, 128], sizes = [8, 128], strides = [1, 1]} : vector<8x384xf32> to vector<8x128xf32>
    %371 = arith.addf %369, %370 : vector<8x128xf32>
    %372 = arith.negf %371 : vector<8x128xf32>
    %373 = math.exp %372 : vector<8x128xf32>
    %cst_145 = arith.constant 1.000000e+00 : f32
    %374 = vector.broadcast %cst_145 : f32 to vector<8x128xf32>
    %375 = arith.addf %374, %373 : vector<8x128xf32>
    %376 = arith.divf %374, %375 : vector<8x128xf32>
    %377 = vector.extract_strided_slice %347 {offsets = [0, 256], sizes = [8, 128], strides = [1, 1]} : vector<8x384xf32> to vector<8x128xf32>
    %378 = vector.extract_strided_slice %355 {offsets = [0, 256], sizes = [8, 128], strides = [1, 1]} : vector<8x384xf32> to vector<8x128xf32>
    %379 = arith.mulf %368, %378 : vector<8x128xf32>
    %380 = arith.addf %377, %379 : vector<8x128xf32>
    %381 = math.tanh %380 : vector<8x128xf32>
    %cst_146 = arith.constant 1.000000e+00 : f32
    %382 = vector.broadcast %cst_146 : f32 to vector<8x128xf32>
    %383 = arith.subf %382, %376 : vector<8x128xf32>
    %384 = arith.mulf %383, %381 : vector<8x128xf32>
    %385 = arith.mulf %376, %337 : vector<8x128xf32>
    %386 = arith.addf %384, %385 : vector<8x128xf32>
    %387 = vector.extract_strided_slice %348 {offsets = [0, 0], sizes = [8, 128], strides = [1, 1]} : vector<8x384xf32> to vector<8x128xf32>
    %388 = vector.extract_strided_slice %360 {offsets = [0, 0], sizes = [8, 128], strides = [1, 1]} : vector<8x384xf32> to vector<8x128xf32>
    %389 = arith.addf %387, %388 : vector<8x128xf32>
    %390 = arith.negf %389 : vector<8x128xf32>
    %391 = math.exp %390 : vector<8x128xf32>
    %cst_147 = arith.constant 1.000000e+00 : f32
    %392 = vector.broadcast %cst_147 : f32 to vector<8x128xf32>
    %393 = arith.addf %392, %391 : vector<8x128xf32>
    %394 = arith.divf %392, %393 : vector<8x128xf32>
    %395 = vector.extract_strided_slice %348 {offsets = [0, 128], sizes = [8, 128], strides = [1, 1]} : vector<8x384xf32> to vector<8x128xf32>
    %396 = vector.extract_strided_slice %360 {offsets = [0, 128], sizes = [8, 128], strides = [1, 1]} : vector<8x384xf32> to vector<8x128xf32>
    %397 = arith.addf %395, %396 : vector<8x128xf32>
    %398 = arith.negf %397 : vector<8x128xf32>
    %399 = math.exp %398 : vector<8x128xf32>
    %cst_148 = arith.constant 1.000000e+00 : f32
    %400 = vector.broadcast %cst_148 : f32 to vector<8x128xf32>
    %401 = arith.addf %400, %399 : vector<8x128xf32>
    %402 = arith.divf %400, %401 : vector<8x128xf32>
    %403 = vector.extract_strided_slice %348 {offsets = [0, 256], sizes = [8, 128], strides = [1, 1]} : vector<8x384xf32> to vector<8x128xf32>
    %404 = vector.extract_strided_slice %360 {offsets = [0, 256], sizes = [8, 128], strides = [1, 1]} : vector<8x384xf32> to vector<8x128xf32>
    %405 = arith.mulf %394, %404 : vector<8x128xf32>
    %406 = arith.addf %403, %405 : vector<8x128xf32>
    %407 = math.tanh %406 : vector<8x128xf32>
    %cst_149 = arith.constant 1.000000e+00 : f32
    %408 = vector.broadcast %cst_149 : f32 to vector<8x128xf32>
    %409 = arith.subf %408, %402 : vector<8x128xf32>
    %410 = arith.mulf %409, %407 : vector<8x128xf32>
    %411 = arith.mulf %402, %342 : vector<8x128xf32>
    %412 = arith.addf %410, %411 : vector<8x128xf32>
    %413 = arith.mulf %349, %386 : vector<8x128xf32>
    %cst_150 = arith.constant 1.000000e+00 : f32
    %414 = vector.broadcast %cst_150 : f32 to vector<8x128xf32>
    %415 = arith.subf %414, %349 : vector<8x128xf32>
    %416 = arith.mulf %415, %337 : vector<8x128xf32>
    %417 = arith.addf %413, %416 : vector<8x128xf32>
    %418 = arith.mulf %350, %412 : vector<8x128xf32>
    %cst_151 = arith.constant 1.000000e+00 : f32
    %419 = vector.broadcast %cst_151 : f32 to vector<8x128xf32>
    %420 = arith.subf %419, %350 : vector<8x128xf32>
    %421 = arith.mulf %420, %342 : vector<8x128xf32>
    %422 = arith.addf %418, %421 : vector<8x128xf32>
    %423 = arith.mulf %349, %386 : vector<8x128xf32>
    %c32_152 = arith.constant 32 : index
    %c0_153 = arith.constant 0 : index
    %424 = vector.load %arg20[%c32_152, %c0_153] : memref<64x256xf32, #tpu.memory_space<vmem>>, vector<8x128xf32>
    tpu.vector_store %arg20[%c32_152, %c0_153], %423 {strides = array<i32>} : memref<64x256xf32, #tpu.memory_space<vmem>>, vector<8x128xf32>,
    %425 = arith.mulf %350, %412 : vector<8x128xf32>
    %c24_154 = arith.constant 24 : index
    %c128_155 = arith.constant 128 : index
    %426 = vector.load %arg20[%c24_154, %c128_155] : memref<64x256xf32, #tpu.memory_space<vmem>>, vector<8x128xf32>
    tpu.vector_store %arg20[%c24_154, %c128_155], %425 {strides = array<i32>} : memref<64x256xf32, #tpu.memory_space<vmem>>, vector<8x128xf32>,
    %c40_156 = arith.constant 40 : index
    %c0_157 = arith.constant 0 : index
    %427 = vector.load %arg19[%c40_156, %c0_157] : memref<64x768xf32, #tpu.memory_space<vmem>>, vector<8x384xf32>
    %c16_158 = arith.constant 16 : index
    %c384_159 = arith.constant 384 : index
    %428 = vector.load %arg19[%c16_158, %c384_159] : memref<64x768xf32, #tpu.memory_space<vmem>>, vector<8x384xf32>
    %c40_160 = arith.constant 40 : index
    %c0_161 = arith.constant 0 : index
    %429 = vector.load %arg2[%c40_160, %c0_161] : memref<64x128xf32, #tpu.memory_space<vmem>>, vector<8x128xf32>
    %c16_162 = arith.constant 16 : index
    %c0_163 = arith.constant 0 : index
    %430 = vector.load %arg2[%c16_162, %c0_163] : memref<64x128xf32, #tpu.memory_space<vmem>>, vector<8x128xf32>
    %c0_164 = arith.constant 0 : index
    %c0_165 = arith.constant 0 : index
    %431 = vector.load %arg8[%c0_164, %c0_165] : memref<128x384xf32, #tpu.memory_space<vmem>>, vector<128x384xf32>
    %cst_166 = arith.constant dense<0.000000e+00> : vector<8x384xf32>
    %432 = tpu.matmul %417, %431, %cst_166 {dimension_numbers = #tpu.dot_dimension_numbers<[1], [0], [0], [1], [0, 0, 1, 1], [], []>} : vector<8x128xf32>, vector<128x384xf32>, vector<8x384xf32> -> vector<8x384xf32>
    %c0_167 = arith.constant 0 : index
    %c0_168 = arith.constant 0 : index
    %433 = vector.load %arg9[%c0_167, %c0_168] : memref<1x384xf32, #tpu.memory_space<vmem>>, vector<1x384xf32>
    %434 = vector.broadcast %433 : vector<1x384xf32> to vector<8x384xf32>
    %435 = arith.addf %432, %434 : vector<8x384xf32>
    %c0_169 = arith.constant 0 : index
    %c0_170 = arith.constant 0 : index
    %436 = vector.load %arg10[%c0_169, %c0_170] : memref<128x384xf32, #tpu.memory_space<vmem>>, vector<128x384xf32>
    %cst_171 = arith.constant dense<0.000000e+00> : vector<8x384xf32>
    %437 = tpu.matmul %422, %436, %cst_171 {dimension_numbers = #tpu.dot_dimension_numbers<[1], [0], [0], [1], [0, 0, 1, 1], [], []>} : vector<8x128xf32>, vector<128x384xf32>, vector<8x384xf32> -> vector<8x384xf32>
    %c0_172 = arith.constant 0 : index
    %c0_173 = arith.constant 0 : index
    %438 = vector.load %arg11[%c0_172, %c0_173] : memref<1x384xf32, #tpu.memory_space<vmem>>, vector<1x384xf32>
    %439 = vector.broadcast %438 : vector<1x384xf32> to vector<8x384xf32>
    %440 = arith.addf %437, %439 : vector<8x384xf32>
    %441 = vector.extract_strided_slice %427 {offsets = [0, 0], sizes = [8, 128], strides = [1, 1]} : vector<8x384xf32> to vector<8x128xf32>
    %442 = vector.extract_strided_slice %435 {offsets = [0, 0], sizes = [8, 128], strides = [1, 1]} : vector<8x384xf32> to vector<8x128xf32>
    %443 = arith.addf %441, %442 : vector<8x128xf32>
    %444 = arith.negf %443 : vector<8x128xf32>
    %445 = math.exp %444 : vector<8x128xf32>
    %cst_174 = arith.constant 1.000000e+00 : f32
    %446 = vector.broadcast %cst_174 : f32 to vector<8x128xf32>
    %447 = arith.addf %446, %445 : vector<8x128xf32>
    %448 = arith.divf %446, %447 : vector<8x128xf32>
    %449 = vector.extract_strided_slice %427 {offsets = [0, 128], sizes = [8, 128], strides = [1, 1]} : vector<8x384xf32> to vector<8x128xf32>
    %450 = vector.extract_strided_slice %435 {offsets = [0, 128], sizes = [8, 128], strides = [1, 1]} : vector<8x384xf32> to vector<8x128xf32>
    %451 = arith.addf %449, %450 : vector<8x128xf32>
    %452 = arith.negf %451 : vector<8x128xf32>
    %453 = math.exp %452 : vector<8x128xf32>
    %cst_175 = arith.constant 1.000000e+00 : f32
    %454 = vector.broadcast %cst_175 : f32 to vector<8x128xf32>
    %455 = arith.addf %454, %453 : vector<8x128xf32>
    %456 = arith.divf %454, %455 : vector<8x128xf32>
    %457 = vector.extract_strided_slice %427 {offsets = [0, 256], sizes = [8, 128], strides = [1, 1]} : vector<8x384xf32> to vector<8x128xf32>
    %458 = vector.extract_strided_slice %435 {offsets = [0, 256], sizes = [8, 128], strides = [1, 1]} : vector<8x384xf32> to vector<8x128xf32>
    %459 = arith.mulf %448, %458 : vector<8x128xf32>
    %460 = arith.addf %457, %459 : vector<8x128xf32>
    %461 = math.tanh %460 : vector<8x128xf32>
    %cst_176 = arith.constant 1.000000e+00 : f32
    %462 = vector.broadcast %cst_176 : f32 to vector<8x128xf32>
    %463 = arith.subf %462, %456 : vector<8x128xf32>
    %464 = arith.mulf %463, %461 : vector<8x128xf32>
    %465 = arith.mulf %456, %417 : vector<8x128xf32>
    %466 = arith.addf %464, %465 : vector<8x128xf32>
    %467 = vector.extract_strided_slice %428 {offsets = [0, 0], sizes = [8, 128], strides = [1, 1]} : vector<8x384xf32> to vector<8x128xf32>
    %468 = vector.extract_strided_slice %440 {offsets = [0, 0], sizes = [8, 128], strides = [1, 1]} : vector<8x384xf32> to vector<8x128xf32>
    %469 = arith.addf %467, %468 : vector<8x128xf32>
    %470 = arith.negf %469 : vector<8x128xf32>
    %471 = math.exp %470 : vector<8x128xf32>
    %cst_177 = arith.constant 1.000000e+00 : f32
    %472 = vector.broadcast %cst_177 : f32 to vector<8x128xf32>
    %473 = arith.addf %472, %471 : vector<8x128xf32>
    %474 = arith.divf %472, %473 : vector<8x128xf32>
    %475 = vector.extract_strided_slice %428 {offsets = [0, 128], sizes = [8, 128], strides = [1, 1]} : vector<8x384xf32> to vector<8x128xf32>
    %476 = vector.extract_strided_slice %440 {offsets = [0, 128], sizes = [8, 128], strides = [1, 1]} : vector<8x384xf32> to vector<8x128xf32>
    %477 = arith.addf %475, %476 : vector<8x128xf32>
    %478 = arith.negf %477 : vector<8x128xf32>
    %479 = math.exp %478 : vector<8x128xf32>
    %cst_178 = arith.constant 1.000000e+00 : f32
    %480 = vector.broadcast %cst_178 : f32 to vector<8x128xf32>
    %481 = arith.addf %480, %479 : vector<8x128xf32>
    %482 = arith.divf %480, %481 : vector<8x128xf32>
    %483 = vector.extract_strided_slice %428 {offsets = [0, 256], sizes = [8, 128], strides = [1, 1]} : vector<8x384xf32> to vector<8x128xf32>
    %484 = vector.extract_strided_slice %440 {offsets = [0, 256], sizes = [8, 128], strides = [1, 1]} : vector<8x384xf32> to vector<8x128xf32>
    %485 = arith.mulf %474, %484 : vector<8x128xf32>
    %486 = arith.addf %483, %485 : vector<8x128xf32>
    %487 = math.tanh %486 : vector<8x128xf32>
    %cst_179 = arith.constant 1.000000e+00 : f32
    %488 = vector.broadcast %cst_179 : f32 to vector<8x128xf32>
    %489 = arith.subf %488, %482 : vector<8x128xf32>
    %490 = arith.mulf %489, %487 : vector<8x128xf32>
    %491 = arith.mulf %482, %422 : vector<8x128xf32>
    %492 = arith.addf %490, %491 : vector<8x128xf32>
    %493 = arith.mulf %429, %466 : vector<8x128xf32>
    %cst_180 = arith.constant 1.000000e+00 : f32
    %494 = vector.broadcast %cst_180 : f32 to vector<8x128xf32>
    %495 = arith.subf %494, %429 : vector<8x128xf32>
    %496 = arith.mulf %495, %417 : vector<8x128xf32>
    %497 = arith.addf %493, %496 : vector<8x128xf32>
    %498 = arith.mulf %430, %492 : vector<8x128xf32>
    %cst_181 = arith.constant 1.000000e+00 : f32
    %499 = vector.broadcast %cst_181 : f32 to vector<8x128xf32>
    %500 = arith.subf %499, %430 : vector<8x128xf32>
    %501 = arith.mulf %500, %422 : vector<8x128xf32>
    %502 = arith.addf %498, %501 : vector<8x128xf32>
    %503 = arith.mulf %429, %466 : vector<8x128xf32>
    %c40_182 = arith.constant 40 : index
    %c0_183 = arith.constant 0 : index
    %504 = vector.load %arg20[%c40_182, %c0_183] : memref<64x256xf32, #tpu.memory_space<vmem>>, vector<8x128xf32>
    tpu.vector_store %arg20[%c40_182, %c0_183], %503 {strides = array<i32>} : memref<64x256xf32, #tpu.memory_space<vmem>>, vector<8x128xf32>,
    %505 = arith.mulf %430, %492 : vector<8x128xf32>
    %c16_184 = arith.constant 16 : index
    %c128_185 = arith.constant 128 : index
    %506 = vector.load %arg20[%c16_184, %c128_185] : memref<64x256xf32, #tpu.memory_space<vmem>>, vector<8x128xf32>
    tpu.vector_store %arg20[%c16_184, %c128_185], %505 {strides = array<i32>} : memref<64x256xf32, #tpu.memory_space<vmem>>, vector<8x128xf32>,
    %c48_186 = arith.constant 48 : index
    %c0_187 = arith.constant 0 : index
    %507 = vector.load %arg19[%c48_186, %c0_187] : memref<64x768xf32, #tpu.memory_space<vmem>>, vector<8x384xf32>
    %c8_188 = arith.constant 8 : index
    %c384_189 = arith.constant 384 : index
    %508 = vector.load %arg19[%c8_188, %c384_189] : memref<64x768xf32, #tpu.memory_space<vmem>>, vector<8x384xf32>
    %c48_190 = arith.constant 48 : index
    %c0_191 = arith.constant 0 : index
    %509 = vector.load %arg2[%c48_190, %c0_191] : memref<64x128xf32, #tpu.memory_space<vmem>>, vector<8x128xf32>
    %c8_192 = arith.constant 8 : index
    %c0_193 = arith.constant 0 : index
    %510 = vector.load %arg2[%c8_192, %c0_193] : memref<64x128xf32, #tpu.memory_space<vmem>>, vector<8x128xf32>
    %c0_194 = arith.constant 0 : index
    %c0_195 = arith.constant 0 : index
    %511 = vector.load %arg8[%c0_194, %c0_195] : memref<128x384xf32, #tpu.memory_space<vmem>>, vector<128x384xf32>
    %cst_196 = arith.constant dense<0.000000e+00> : vector<8x384xf32>
    %512 = tpu.matmul %497, %511, %cst_196 {dimension_numbers = #tpu.dot_dimension_numbers<[1], [0], [0], [1], [0, 0, 1, 1], [], []>} : vector<8x128xf32>, vector<128x384xf32>, vector<8x384xf32> -> vector<8x384xf32>
    %c0_197 = arith.constant 0 : index
    %c0_198 = arith.constant 0 : index
    %513 = vector.load %arg9[%c0_197, %c0_198] : memref<1x384xf32, #tpu.memory_space<vmem>>, vector<1x384xf32>
    %514 = vector.broadcast %513 : vector<1x384xf32> to vector<8x384xf32>
    %515 = arith.addf %512, %514 : vector<8x384xf32>
    %c0_199 = arith.constant 0 : index
    %c0_200 = arith.constant 0 : index
    %516 = vector.load %arg10[%c0_199, %c0_200] : memref<128x384xf32, #tpu.memory_space<vmem>>, vector<128x384xf32>
    %cst_201 = arith.constant dense<0.000000e+00> : vector<8x384xf32>
    %517 = tpu.matmul %502, %516, %cst_201 {dimension_numbers = #tpu.dot_dimension_numbers<[1], [0], [0], [1], [0, 0, 1, 1], [], []>} : vector<8x128xf32>, vector<128x384xf32>, vector<8x384xf32> -> vector<8x384xf32>
    %c0_202 = arith.constant 0 : index
    %c0_203 = arith.constant 0 : index
    %518 = vector.load %arg11[%c0_202, %c0_203] : memref<1x384xf32, #tpu.memory_space<vmem>>, vector<1x384xf32>
    %519 = vector.broadcast %518 : vector<1x384xf32> to vector<8x384xf32>
    %520 = arith.addf %517, %519 : vector<8x384xf32>
    %521 = vector.extract_strided_slice %507 {offsets = [0, 0], sizes = [8, 128], strides = [1, 1]} : vector<8x384xf32> to vector<8x128xf32>
    %522 = vector.extract_strided_slice %515 {offsets = [0, 0], sizes = [8, 128], strides = [1, 1]} : vector<8x384xf32> to vector<8x128xf32>
    %523 = arith.addf %521, %522 : vector<8x128xf32>
    %524 = arith.negf %523 : vector<8x128xf32>
    %525 = math.exp %524 : vector<8x128xf32>
    %cst_204 = arith.constant 1.000000e+00 : f32
    %526 = vector.broadcast %cst_204 : f32 to vector<8x128xf32>
    %527 = arith.addf %526, %525 : vector<8x128xf32>
    %528 = arith.divf %526, %527 : vector<8x128xf32>
    %529 = vector.extract_strided_slice %507 {offsets = [0, 128], sizes = [8, 128], strides = [1, 1]} : vector<8x384xf32> to vector<8x128xf32>
    %530 = vector.extract_strided_slice %515 {offsets = [0, 128], sizes = [8, 128], strides = [1, 1]} : vector<8x384xf32> to vector<8x128xf32>
    %531 = arith.addf %529, %530 : vector<8x128xf32>
    %532 = arith.negf %531 : vector<8x128xf32>
    %533 = math.exp %532 : vector<8x128xf32>
    %cst_205 = arith.constant 1.000000e+00 : f32
    %534 = vector.broadcast %cst_205 : f32 to vector<8x128xf32>
    %535 = arith.addf %534, %533 : vector<8x128xf32>
    %536 = arith.divf %534, %535 : vector<8x128xf32>
    %537 = vector.extract_strided_slice %507 {offsets = [0, 256], sizes = [8, 128], strides = [1, 1]} : vector<8x384xf32> to vector<8x128xf32>
    %538 = vector.extract_strided_slice %515 {offsets = [0, 256], sizes = [8, 128], strides = [1, 1]} : vector<8x384xf32> to vector<8x128xf32>
    %539 = arith.mulf %528, %538 : vector<8x128xf32>
    %540 = arith.addf %537, %539 : vector<8x128xf32>
    %541 = math.tanh %540 : vector<8x128xf32>
    %cst_206 = arith.constant 1.000000e+00 : f32
    %542 = vector.broadcast %cst_206 : f32 to vector<8x128xf32>
    %543 = arith.subf %542, %536 : vector<8x128xf32>
    %544 = arith.mulf %543, %541 : vector<8x128xf32>
    %545 = arith.mulf %536, %497 : vector<8x128xf32>
    %546 = arith.addf %544, %545 : vector<8x128xf32>
    %547 = vector.extract_strided_slice %508 {offsets = [0, 0], sizes = [8, 128], strides = [1, 1]} : vector<8x384xf32> to vector<8x128xf32>
    %548 = vector.extract_strided_slice %520 {offsets = [0, 0], sizes = [8, 128], strides = [1, 1]} : vector<8x384xf32> to vector<8x128xf32>
    %549 = arith.addf %547, %548 : vector<8x128xf32>
    %550 = arith.negf %549 : vector<8x128xf32>
    %551 = math.exp %550 : vector<8x128xf32>
    %cst_207 = arith.constant 1.000000e+00 : f32
    %552 = vector.broadcast %cst_207 : f32 to vector<8x128xf32>
    %553 = arith.addf %552, %551 : vector<8x128xf32>
    %554 = arith.divf %552, %553 : vector<8x128xf32>
    %555 = vector.extract_strided_slice %508 {offsets = [0, 128], sizes = [8, 128], strides = [1, 1]} : vector<8x384xf32> to vector<8x128xf32>
    %556 = vector.extract_strided_slice %520 {offsets = [0, 128], sizes = [8, 128], strides = [1, 1]} : vector<8x384xf32> to vector<8x128xf32>
    %557 = arith.addf %555, %556 : vector<8x128xf32>
    %558 = arith.negf %557 : vector<8x128xf32>
    %559 = math.exp %558 : vector<8x128xf32>
    %cst_208 = arith.constant 1.000000e+00 : f32
    %560 = vector.broadcast %cst_208 : f32 to vector<8x128xf32>
    %561 = arith.addf %560, %559 : vector<8x128xf32>
    %562 = arith.divf %560, %561 : vector<8x128xf32>
    %563 = vector.extract_strided_slice %508 {offsets = [0, 256], sizes = [8, 128], strides = [1, 1]} : vector<8x384xf32> to vector<8x128xf32>
    %564 = vector.extract_strided_slice %520 {offsets = [0, 256], sizes = [8, 128], strides = [1, 1]} : vector<8x384xf32> to vector<8x128xf32>
    %565 = arith.mulf %554, %564 : vector<8x128xf32>
    %566 = arith.addf %563, %565 : vector<8x128xf32>
    %567 = math.tanh %566 : vector<8x128xf32>
    %cst_209 = arith.constant 1.000000e+00 : f32
    %568 = vector.broadcast %cst_209 : f32 to vector<8x128xf32>
    %569 = arith.subf %568, %562 : vector<8x128xf32>
    %570 = arith.mulf %569, %567 : vector<8x128xf32>
    %571 = arith.mulf %562, %502 : vector<8x128xf32>
    %572 = arith.addf %570, %571 : vector<8x128xf32>
    %573 = arith.mulf %509, %546 : vector<8x128xf32>
    %cst_210 = arith.constant 1.000000e+00 : f32
    %574 = vector.broadcast %cst_210 : f32 to vector<8x128xf32>
    %575 = arith.subf %574, %509 : vector<8x128xf32>
    %576 = arith.mulf %575, %497 : vector<8x128xf32>
    %577 = arith.addf %573, %576 : vector<8x128xf32>
    %578 = arith.mulf %510, %572 : vector<8x128xf32>
    %cst_211 = arith.constant 1.000000e+00 : f32
    %579 = vector.broadcast %cst_211 : f32 to vector<8x128xf32>
    %580 = arith.subf %579, %510 : vector<8x128xf32>
    %581 = arith.mulf %580, %502 : vector<8x128xf32>
    %582 = arith.addf %578, %581 : vector<8x128xf32>
    %583 = arith.mulf %509, %546 : vector<8x128xf32>
    %c48_212 = arith.constant 48 : index
    %c0_213 = arith.constant 0 : index
    %584 = vector.load %arg20[%c48_212, %c0_213] : memref<64x256xf32, #tpu.memory_space<vmem>>, vector<8x128xf32>
    tpu.vector_store %arg20[%c48_212, %c0_213], %583 {strides = array<i32>} : memref<64x256xf32, #tpu.memory_space<vmem>>, vector<8x128xf32>,
    %585 = arith.mulf %510, %572 : vector<8x128xf32>
    %c8_214 = arith.constant 8 : index
    %c128_215 = arith.constant 128 : index
    %586 = vector.load %arg20[%c8_214, %c128_215] : memref<64x256xf32, #tpu.memory_space<vmem>>, vector<8x128xf32>
    tpu.vector_store %arg20[%c8_214, %c128_215], %585 {strides = array<i32>} : memref<64x256xf32, #tpu.memory_space<vmem>>, vector<8x128xf32>,
    %c56_216 = arith.constant 56 : index
    %c0_217 = arith.constant 0 : index
    %587 = vector.load %arg19[%c56_216, %c0_217] : memref<64x768xf32, #tpu.memory_space<vmem>>, vector<8x384xf32>
    %c0_218 = arith.constant 0 : index
    %c384_219 = arith.constant 384 : index
    %588 = vector.load %arg19[%c0_218, %c384_219] : memref<64x768xf32, #tpu.memory_space<vmem>>, vector<8x384xf32>
    %c56_220 = arith.constant 56 : index
    %c0_221 = arith.constant 0 : index
    %589 = vector.load %arg2[%c56_220, %c0_221] : memref<64x128xf32, #tpu.memory_space<vmem>>, vector<8x128xf32>
    %c0_222 = arith.constant 0 : index
    %c0_223 = arith.constant 0 : index
    %590 = vector.load %arg2[%c0_222, %c0_223] : memref<64x128xf32, #tpu.memory_space<vmem>>, vector<8x128xf32>
    %c0_224 = arith.constant 0 : index
    %c0_225 = arith.constant 0 : index
    %591 = vector.load %arg8[%c0_224, %c0_225] : memref<128x384xf32, #tpu.memory_space<vmem>>, vector<128x384xf32>
    %cst_226 = arith.constant dense<0.000000e+00> : vector<8x384xf32>
    %592 = tpu.matmul %577, %591, %cst_226 {dimension_numbers = #tpu.dot_dimension_numbers<[1], [0], [0], [1], [0, 0, 1, 1], [], []>} : vector<8x128xf32>, vector<128x384xf32>, vector<8x384xf32> -> vector<8x384xf32>
    %c0_227 = arith.constant 0 : index
    %c0_228 = arith.constant 0 : index
    %593 = vector.load %arg9[%c0_227, %c0_228] : memref<1x384xf32, #tpu.memory_space<vmem>>, vector<1x384xf32>
    %594 = vector.broadcast %593 : vector<1x384xf32> to vector<8x384xf32>
    %595 = arith.addf %592, %594 : vector<8x384xf32>
    %c0_229 = arith.constant 0 : index
    %c0_230 = arith.constant 0 : index
    %596 = vector.load %arg10[%c0_229, %c0_230] : memref<128x384xf32, #tpu.memory_space<vmem>>, vector<128x384xf32>
    %cst_231 = arith.constant dense<0.000000e+00> : vector<8x384xf32>
    %597 = tpu.matmul %582, %596, %cst_231 {dimension_numbers = #tpu.dot_dimension_numbers<[1], [0], [0], [1], [0, 0, 1, 1], [], []>} : vector<8x128xf32>, vector<128x384xf32>, vector<8x384xf32> -> vector<8x384xf32>
    %c0_232 = arith.constant 0 : index
    %c0_233 = arith.constant 0 : index
    %598 = vector.load %arg11[%c0_232, %c0_233] : memref<1x384xf32, #tpu.memory_space<vmem>>, vector<1x384xf32>
    %599 = vector.broadcast %598 : vector<1x384xf32> to vector<8x384xf32>
    %600 = arith.addf %597, %599 : vector<8x384xf32>
    %601 = vector.extract_strided_slice %587 {offsets = [0, 0], sizes = [8, 128], strides = [1, 1]} : vector<8x384xf32> to vector<8x128xf32>
    %602 = vector.extract_strided_slice %595 {offsets = [0, 0], sizes = [8, 128], strides = [1, 1]} : vector<8x384xf32> to vector<8x128xf32>
    %603 = arith.addf %601, %602 : vector<8x128xf32>
    %604 = arith.negf %603 : vector<8x128xf32>
    %605 = math.exp %604 : vector<8x128xf32>
    %cst_234 = arith.constant 1.000000e+00 : f32
    %606 = vector.broadcast %cst_234 : f32 to vector<8x128xf32>
    %607 = arith.addf %606, %605 : vector<8x128xf32>
    %608 = arith.divf %606, %607 : vector<8x128xf32>
    %609 = vector.extract_strided_slice %587 {offsets = [0, 128], sizes = [8, 128], strides = [1, 1]} : vector<8x384xf32> to vector<8x128xf32>
    %610 = vector.extract_strided_slice %595 {offsets = [0, 128], sizes = [8, 128], strides = [1, 1]} : vector<8x384xf32> to vector<8x128xf32>
    %611 = arith.addf %609, %610 : vector<8x128xf32>
    %612 = arith.negf %611 : vector<8x128xf32>
    %613 = math.exp %612 : vector<8x128xf32>
    %cst_235 = arith.constant 1.000000e+00 : f32
    %614 = vector.broadcast %cst_235 : f32 to vector<8x128xf32>
    %615 = arith.addf %614, %613 : vector<8x128xf32>
    %616 = arith.divf %614, %615 : vector<8x128xf32>
    %617 = vector.extract_strided_slice %587 {offsets = [0, 256], sizes = [8, 128], strides = [1, 1]} : vector<8x384xf32> to vector<8x128xf32>
    %618 = vector.extract_strided_slice %595 {offsets = [0, 256], sizes = [8, 128], strides = [1, 1]} : vector<8x384xf32> to vector<8x128xf32>
    %619 = arith.mulf %608, %618 : vector<8x128xf32>
    %620 = arith.addf %617, %619 : vector<8x128xf32>
    %621 = math.tanh %620 : vector<8x128xf32>
    %cst_236 = arith.constant 1.000000e+00 : f32
    %622 = vector.broadcast %cst_236 : f32 to vector<8x128xf32>
    %623 = arith.subf %622, %616 : vector<8x128xf32>
    %624 = arith.mulf %623, %621 : vector<8x128xf32>
    %625 = arith.mulf %616, %577 : vector<8x128xf32>
    %626 = arith.addf %624, %625 : vector<8x128xf32>
    %627 = vector.extract_strided_slice %588 {offsets = [0, 0], sizes = [8, 128], strides = [1, 1]} : vector<8x384xf32> to vector<8x128xf32>
    %628 = vector.extract_strided_slice %600 {offsets = [0, 0], sizes = [8, 128], strides = [1, 1]} : vector<8x384xf32> to vector<8x128xf32>
    %629 = arith.addf %627, %628 : vector<8x128xf32>
    %630 = arith.negf %629 : vector<8x128xf32>
    %631 = math.exp %630 : vector<8x128xf32>
    %cst_237 = arith.constant 1.000000e+00 : f32
    %632 = vector.broadcast %cst_237 : f32 to vector<8x128xf32>
    %633 = arith.addf %632, %631 : vector<8x128xf32>
    %634 = arith.divf %632, %633 : vector<8x128xf32>
    %635 = vector.extract_strided_slice %588 {offsets = [0, 128], sizes = [8, 128], strides = [1, 1]} : vector<8x384xf32> to vector<8x128xf32>
    %636 = vector.extract_strided_slice %600 {offsets = [0, 128], sizes = [8, 128], strides = [1, 1]} : vector<8x384xf32> to vector<8x128xf32>
    %637 = arith.addf %635, %636 : vector<8x128xf32>
    %638 = arith.negf %637 : vector<8x128xf32>
    %639 = math.exp %638 : vector<8x128xf32>
    %cst_238 = arith.constant 1.000000e+00 : f32
    %640 = vector.broadcast %cst_238 : f32 to vector<8x128xf32>
    %641 = arith.addf %640, %639 : vector<8x128xf32>
    %642 = arith.divf %640, %641 : vector<8x128xf32>
    %643 = vector.extract_strided_slice %588 {offsets = [0, 256], sizes = [8, 128], strides = [1, 1]} : vector<8x384xf32> to vector<8x128xf32>
    %644 = vector.extract_strided_slice %600 {offsets = [0, 256], sizes = [8, 128], strides = [1, 1]} : vector<8x384xf32> to vector<8x128xf32>
    %645 = arith.mulf %634, %644 : vector<8x128xf32>
    %646 = arith.addf %643, %645 : vector<8x128xf32>
    %647 = math.tanh %646 : vector<8x128xf32>
    %cst_239 = arith.constant 1.000000e+00 : f32
    %648 = vector.broadcast %cst_239 : f32 to vector<8x128xf32>
    %649 = arith.subf %648, %642 : vector<8x128xf32>
    %650 = arith.mulf %649, %647 : vector<8x128xf32>
    %651 = arith.mulf %642, %582 : vector<8x128xf32>
    %652 = arith.addf %650, %651 : vector<8x128xf32>
    %653 = arith.mulf %589, %626 : vector<8x128xf32>
    %c56_240 = arith.constant 56 : index
    %c0_241 = arith.constant 0 : index
    %654 = vector.load %arg20[%c56_240, %c0_241] : memref<64x256xf32, #tpu.memory_space<vmem>>, vector<8x128xf32>
    tpu.vector_store %arg20[%c56_240, %c0_241], %653 {strides = array<i32>} : memref<64x256xf32, #tpu.memory_space<vmem>>, vector<8x128xf32>,
    %655 = arith.mulf %590, %652 : vector<8x128xf32>
    %c0_242 = arith.constant 0 : index
    %c128_243 = arith.constant 128 : index
    %656 = vector.load %arg20[%c0_242, %c128_243] : memref<64x256xf32, #tpu.memory_space<vmem>>, vector<8x128xf32>
    tpu.vector_store %arg20[%c0_242, %c128_243], %655 {strides = array<i32>} : memref<64x256xf32, #tpu.memory_space<vmem>>, vector<8x128xf32>,
    %c0_244 = arith.constant 0 : index
    %c0_245 = arith.constant 0 : index
    %657 = vector.load %arg20[%c0_244, %c0_245] : memref<64x256xf32, #tpu.memory_space<vmem>>, vector<64x256xf32>
    %658 = arith.truncf %657 : vector<64x256xf32> to vector<64x256xbf16>
    %c0_246 = arith.constant 0 : index
    %c0_247 = arith.constant 0 : index
    %659 = vector.load %arg12[%c0_246, %c0_247] : memref<256x384xbf16, #tpu.memory_space<vmem>>, vector<256x384xbf16>
    %cst_248 = arith.constant dense<0.000000e+00> : vector<64x384xf32>
    %660 = tpu.matmul %658, %659, %cst_248 {dimension_numbers = #tpu.dot_dimension_numbers<[1], [0], [0], [1], [0, 0, 1, 1], [], []>} : vector<64x256xbf16>, vector<256x384xbf16>, vector<64x384xf32> -> vector<64x384xf32>
    %c0_249 = arith.constant 0 : index
    %c0_250 = arith.constant 0 : index
    %661 = vector.load %arg13[%c0_249, %c0_250] : memref<1x384xf32, #tpu.memory_space<vmem>>, vector<1x384xf32>
    %662 = vector.broadcast %661 : vector<1x384xf32> to vector<64x384xf32>
    %663 = arith.addf %660, %662 : vector<64x384xf32>
    %664 = vector.extract_strided_slice %663 {offsets = [0, 0], sizes = [64, 128], strides = [1, 1]} : vector<64x384xf32> to vector<64x128xf32>
    %cst_251 = arith.constant 1.000000e-01 : f32
    %665 = vector.broadcast %cst_251 : f32 to vector<64x128xf32>
    %666 = arith.mulf %664, %665 : vector<64x128xf32>
    %667 = vector.extract_strided_slice %663 {offsets = [0, 128], sizes = [64, 128], strides = [1, 1]} : vector<64x384xf32> to vector<64x128xf32>
    %668 = vector.extract_strided_slice %663 {offsets = [0, 256], sizes = [64, 128], strides = [1, 1]} : vector<64x384xf32> to vector<64x128xf32>
    %cst_252 = arith.constant dense<0.000000e+00> : vector<64x64xf32>
    %669 = tpu.matmul %666, %667, %cst_252 {dimension_numbers = #tpu.dot_dimension_numbers<[1], [1], [0], [0], [0, 0, 1, 0], [], []>} : vector<64x128xf32>, vector<64x128xf32>, vector<64x64xf32> -> vector<64x64xf32>
    %c0_253 = arith.constant 0 : index
    %c0_254 = arith.constant 0 : index
    %670 = vector.load %arg3[%c0_253, %c0_254] : memref<64x64xf32, #tpu.memory_space<vmem>>, vector<64x64xf32>
    %671 = arith.addf %669, %670 : vector<64x64xf32>
    %cst_255 = arith.constant dense<0xFF800000> : vector<64xf32>
    %672 = vector.multi_reduction <maximumf>, %671, %cst_255 [1] : vector<64x64xf32> to vector<64xf32>
    %673 = vector.shape_cast %672 : vector<64xf32> to vector<64x1xf32>
    %674 = vector.broadcast %673 : vector<64x1xf32> to vector<64x64xf32>
    %675 = arith.subf %671, %674 : vector<64x64xf32>
    %676 = math.exp %675 : vector<64x64xf32>
    %cst_256 = arith.constant dense<0.000000e+00> : vector<64xf32>
    %677 = vector.multi_reduction <add>, %676, %cst_256 [1] : vector<64x64xf32> to vector<64xf32>
    %678 = vector.shape_cast %677 : vector<64xf32> to vector<64x1xf32>
    %679 = vector.broadcast %678 : vector<64x1xf32> to vector<64x64xf32>
    %680 = arith.divf %676, %679 : vector<64x64xf32>
    %cst_257 = arith.constant dense<0.000000e+00> : vector<64x128xf32>
    %681 = tpu.matmul %680, %668, %cst_257 {dimension_numbers = #tpu.dot_dimension_numbers<[1], [0], [0], [1], [0, 0, 1, 1], [], []>} : vector<64x64xf32>, vector<64x128xf32>, vector<64x128xf32> -> vector<64x128xf32>
    %682 = arith.truncf %681 : vector<64x128xf32> to vector<64x128xbf16>
    %c0_258 = arith.constant 0 : index
    %c0_259 = arith.constant 0 : index
    %683 = vector.load %arg14[%c0_258, %c0_259] : memref<128x100xbf16, #tpu.memory_space<vmem>>, vector<128x100xbf16>
    %cst_260 = arith.constant dense<0.000000e+00> : vector<64x100xf32>
    %684 = tpu.matmul %682, %683, %cst_260 {dimension_numbers = #tpu.dot_dimension_numbers<[1], [0], [0], [1], [0, 0, 1, 1], [], []>} : vector<64x128xbf16>, vector<128x100xbf16>, vector<64x100xf32> -> vector<64x100xf32>
    %c0_261 = arith.constant 0 : index
    %c0_262 = arith.constant 0 : index
    %685 = vector.load %arg15[%c0_261, %c0_262] : memref<1x100xf32, #tpu.memory_space<vmem>>, vector<1x100xf32>
    %686 = vector.broadcast %685 : vector<1x100xf32> to vector<64x100xf32>
    %687 = arith.addf %684, %686 : vector<64x100xf32>
    %688 = arith.truncf %687 : vector<64x100xf32> to vector<64x100xbf16>
    %c0_263 = arith.constant 0 : index
    %c0_264 = arith.constant 0 : index
    %689 = vector.load %arg16[%c0_263, %c0_264] : memref<100x128xbf16, #tpu.memory_space<vmem>>, vector<100x128xbf16>
    %cst_265 = arith.constant dense<0.000000e+00> : vector<64x128xf32>
    %690 = tpu.matmul %688, %689, %cst_265 {dimension_numbers = #tpu.dot_dimension_numbers<[1], [0], [0], [1], [0, 0, 1, 1], [], []>} : vector<64x100xbf16>, vector<100x128xbf16>, vector<64x128xf32> -> vector<64x128xf32>
    %c0_266 = arith.constant 0 : index
    %c0_267 = arith.constant 0 : index
    %691 = vector.load %arg17[%c0_266, %c0_267] : memref<1x128xf32, #tpu.memory_space<vmem>>, vector<1x128xf32>
    %692 = vector.broadcast %691 : vector<1x128xf32> to vector<64x128xf32>
    %693 = arith.addf %690, %692 : vector<64x128xf32>
    %cst_268 = arith.constant dense<0xFF800000> : vector<64xf32>
    %694 = vector.multi_reduction <maximumf>, %693, %cst_268 [1] : vector<64x128xf32> to vector<64xf32>
    %695 = vector.shape_cast %694 : vector<64xf32> to vector<64x1xf32>
    %696 = vector.broadcast %695 : vector<64x1xf32> to vector<64x128xf32>
    %697 = arith.subf %693, %696 : vector<64x128xf32>
    %698 = math.exp %697 : vector<64x128xf32>
    %cst_269 = arith.constant dense<0.000000e+00> : vector<64xf32>
    %699 = vector.multi_reduction <add>, %698, %cst_269 [1] : vector<64x128xf32> to vector<64xf32>
    %700 = vector.shape_cast %699 : vector<64xf32> to vector<64x1xf32>
    %701 = vector.broadcast %700 : vector<64x1xf32> to vector<64x128xf32>
    %702 = arith.divf %698, %701 : vector<64x128xf32>
    %c0_270 = arith.constant 0 : index
    %c0_271 = arith.constant 0 : index
    %703 = vector.load %arg18[%c0_270, %c0_271] : memref<64x128xf32, #tpu.memory_space<vmem>>, vector<64x128xf32>
    tpu.vector_store %arg18[%c0_270, %c0_271], %702 {strides = array<i32>} : memref<64x128xf32, #tpu.memory_space<vmem>>, vector<64x128xf32>,
    return
  }
  func.func @transform_0(%arg0: i32) -> (i32, i32) {
    %c0_i32 = arith.constant 0 : i32
    %c0_i32_0 = arith.constant 0 : i32
    %c0_i32_1 = arith.constant 0 : i32
    return %c0_i32, %c0_i32_0 : i32, i32
  }
  func.func @transform_1(%arg0: i32) -> (i32, i32) {
    %c0_i32 = arith.constant 0 : i32
    %c0_i32_0 = arith.constant 0 : i32
    %c0_i32_1 = arith.constant 0 : i32
    return %c0_i32, %c0_i32_0 : i32, i32
  }
  func.func @transform_2(%arg0: i32) -> (i32, i32) {
    %c0_i32 = arith.constant 0 : i32
    %c0_i32_0 = arith.constant 0 : i32
    %c0_i32_1 = arith.constant 0 : i32
    return %c0_i32, %c0_i32_0 : i32, i32
  }
  func.func @transform_3(%arg0: i32) -> (i32, i32) {
    %c0_i32 = arith.constant 0 : i32
    %c0_i32_0 = arith.constant 0 : i32
    %c0_i32_1 = arith.constant 0 : i32
    return %c0_i32, %c0_i32_0 : i32, i32
  }
  func.func @transform_4(%arg0: i32) -> (i32, i32) {
    %c0_i32 = arith.constant 0 : i32
    %c0_i32_0 = arith.constant 0 : i32
    %c0_i32_1 = arith.constant 0 : i32
    return %c0_i32, %c0_i32_0 : i32, i32
  }
  func.func @transform_5(%arg0: i32) -> (i32, i32) {
    %c0_i32 = arith.constant 0 : i32
    %c0_i32_0 = arith.constant 0 : i32
    %c0_i32_1 = arith.constant 0 : i32
    return %c0_i32, %c0_i32_0 : i32, i32
  }
  func.func @transform_6(%arg0: i32) -> (i32, i32) {
    %c0_i32 = arith.constant 0 : i32
    %c0_i32_0 = arith.constant 0 : i32
    %c0_i32_1 = arith.constant 0 : i32
    return %c0_i32, %c0_i32_0 : i32, i32
  }
  func.func @transform_7(%arg0: i32) -> (i32, i32) {
    %c0_i32 = arith.constant 0 : i32
    %c0_i32_0 = arith.constant 0 : i32
    %c0_i32_1 = arith.constant 0 : i32
    return %c0_i32, %c0_i32_0 : i32, i32
  }
  func.func @transform_8(%arg0: i32) -> (i32, i32) {
    %c0_i32 = arith.constant 0 : i32
    %c0_i32_0 = arith.constant 0 : i32
    %c0_i32_1 = arith.constant 0 : i32
    return %c0_i32, %c0_i32_0 : i32, i32
  }
  func.func @transform_9(%arg0: i32) -> (i32, i32) {
    %c0_i32 = arith.constant 0 : i32
    %c0_i32_0 = arith.constant 0 : i32
    %c0_i32_1 = arith.constant 0 : i32
    return %c0_i32, %c0_i32_0 : i32, i32
  }
  func.func @transform_10(%arg0: i32) -> (i32, i32) {
    %c0_i32 = arith.constant 0 : i32
    %c0_i32_0 = arith.constant 0 : i32
    %c0_i32_1 = arith.constant 0 : i32
    return %c0_i32, %c0_i32_0 : i32, i32
  }
  func.func @transform_11(%arg0: i32) -> (i32, i32) {
    %c0_i32 = arith.constant 0 : i32
    %c0_i32_0 = arith.constant 0 : i32
    %c0_i32_1 = arith.constant 0 : i32
    return %c0_i32, %c0_i32_0 : i32, i32
  }
  func.func @transform_12(%arg0: i32) -> (i32, i32) {
    %c0_i32 = arith.constant 0 : i32
    %c0_i32_0 = arith.constant 0 : i32
    %c0_i32_1 = arith.constant 0 : i32
    return %c0_i32, %c0_i32_0 : i32, i32
  }
  func.func @transform_13(%arg0: i32) -> (i32, i32) {
    %c0_i32 = arith.constant 0 : i32
    %c0_i32_0 = arith.constant 0 : i32
    %c0_i32_1 = arith.constant 0 : i32
    return %c0_i32, %c0_i32_0 : i32, i32
  }
  func.func @transform_14(%arg0: i32) -> (i32, i32) {
    %c0_i32 = arith.constant 0 : i32
    %c0_i32_0 = arith.constant 0 : i32
    %c0_i32_1 = arith.constant 0 : i32
    return %c0_i32, %c0_i32_0 : i32, i32
  }
  func.func @transform_15(%arg0: i32) -> (i32, i32) {
    %c0_i32 = arith.constant 0 : i32
    %c0_i32_0 = arith.constant 0 : i32
    %c0_i32_1 = arith.constant 0 : i32
    return %c0_i32, %c0_i32_0 : i32, i32
  }
  func.func @transform_16(%arg0: i32) -> (i32, i32) {
    %c0_i32 = arith.constant 0 : i32
    %c0_i32_0 = arith.constant 0 : i32
    %c0_i32_1 = arith.constant 0 : i32
    return %c0_i32, %c0_i32_0 : i32, i32
  }
  func.func @transform_17(%arg0: i32) -> (i32, i32) {
    %c0_i32 = arith.constant 0 : i32
    %c0_i32_0 = arith.constant 0 : i32
    %c0_i32_1 = arith.constant 0 : i32
    return %c0_i32, %c0_i32_0 : i32, i32
  }
}

</mosaic_0001>

<bundles_post_ra>
// kernel: dialogue_modal_forward.1
= control target key start
LH: loop header
LB: loop body
LE: loop exit
PB: predicated region body
PF: predicated region fallthrough
CT: control target
= control target key end

     0   :  { %vm190_vm0 = vcmask 1041408   ;;  %vm165_vm1 = vcmask 818176   ;;  %s10115_s3 = inlined_call_operand.vmem [shape: bf16[100,100], index: 3, kind: input, shape index: {}]   ;;  %s10116_s0 = inlined_call_operand.vmem [shape: bf16[128,100], index: 0, kind: input, shape index: {}]   ;;  %s10117_s4 = inlined_call_operand.vmem [shape: f32[1,100], index: 4, kind: input, shape index: {}]   ;;  %s10118_s5 = inlined_call_operand.vmem [shape: bf16[100,768], index: 5, kind: input, shape index: {}]   ;;  %s10119_s7 = inlined_call_operand.vmem [shape: f32[128,384], index: 7, kind: input, shape index: {}]   ;;  %s10120_s9 = inlined_call_operand.vmem [shape: f32[128,384], index: 9, kind: input, shape index: {}]   ;;  %s10121_s6 = inlined_call_operand.vmem [shape: f32[1,768], index: 6, kind: input, shape index: {}]   ;;  %s10122_s8 = inlined_call_operand.vmem [shape: f32[1,384], index: 8, kind: input, shape index: {}]   ;;  %s10123_s10 = inlined_call_operand.vmem [shape: f32[1,384], index: 10, kind: input, shape index: {}]   ;;  %s10124_s1 = inlined_call_operand.vmem [shape: f32[64,128], index: 1, kind: input, shape index: {}]   ;;  %s10125_s11 = inlined_call_operand.vmem [shape: bf16[256,384], index: 11, kind: input, shape index: {}]   ;;  %s10126_s12 = inlined_call_operand.vmem [shape: f32[1,384], index: 12, kind: input, shape index: {}]   ;;  %s10127_s2 = inlined_call_operand.vmem [shape: f32[64,64], index: 2, kind: input, shape index: {}]   ;;  %s10128_s13 = inlined_call_operand.vmem [shape: bf16[128,100], index: 13, kind: input, shape index: {}]   ;;  %s10129_s14 = inlined_call_operand.vmem [shape: f32[1,100], index: 14, kind: input, shape index: {}]   ;;  %s10130_s15 = inlined_call_operand.vmem [shape: bf16[100,128], index: 15, kind: input, shape index: {}]   ;;  %s10131_s16 = inlined_call_operand.vmem [shape: f32[1,128], index: 16, kind: input, shape index: {}]   ;;  %s10132_s17 = inlined_call_operand.vmem [shape: f32[64,128], index: 17, kind: output, shape index: {}]  }
   0x1   :  { %10268 = sst [smem:[#allocation85_spill]] %s10115_s3  ;;  %v5900_v21 = vld [vmem:[%s10117_s4] ss:$0 sm:$0xff] }
   0x2   :  { %10269 = sst [smem:[#allocation86_spill]] %s10116_s0 }
   0x3   :  { %s10270_s26 = sld [smem:[#allocation85_spill]] }
   0x4   :  { %s10271_s27 = sld [smem:[#allocation86_spill]] }
   0x9   :  { %v85_v0 = vld [vmem:[%s10270_s26 + $0x30] sm:$0x3]  ;;  %v5372_v4 = vld [vmem:[%s10270_s26 + $0x28] sm:$0xff]  ;;  %v5371_v5 = vld [vmem:[%s10270_s26 + $0x20] sm:$0xff] }
   0xa   :  { %v151_v1 = vunpack.c.l.b16 %v85_v0  ;;  %v5370_v6 = vld [vmem:[%s10270_s26 + $0x18] sm:$0xff]  ;;  %v5369_v7 = vld [vmem:[%s10270_s26 + $0x10] sm:$0xff]  ;;  %v5368_v8 = vld [vmem:[%s10270_s26 + $0x8] sm:$0xff] }
   0xb   :  { %v5367_v9 = vld [vmem:[%s10270_s26] sm:$0xff]  ;;  %v5365_v11 = vld [vmem:[%s10271_s27 + $0x30] sm:$0xff]  ;;  %v5360_v12 = vld [vmem:[%s10271_s27 + $0x8] sm:$0xff] }
   0xc   :  { %v158_v2 = vpack.c.b16 %v151_v1, %v151_v1  ;;  %v5359_v10 = vld [vmem:[%s10271_s27] sm:$0xff]  ;;  %v5366_v13 = vld [vmem:[%s10271_s27 + $0x38] sm:$0xff]  ;;  %v5361_v14 = vld [vmem:[%s10271_s27 + $0x10] sm:$0xff] }
   0xd   :  { %v5362_v15 = vld [vmem:[%s10271_s27 + $0x18] sm:$0xff]  ;;  %v5363_v16 = vld [vmem:[%s10271_s27 + $0x20] sm:$0xff]  ;;  %v5364_v17 = vld [vmem:[%s10271_s27 + $0x28] sm:$0xff] }
   0xe   :  { %v192_v3 = vsel %vm190_vm0, %v158_v2, 0 }
   0xf   :  { %195 = vmatpush.bf16.msra.mxu0 %v192_v3  ;;  %5471 = vmatpush.bf16.msra.mxu2 %v192_v3 }
  0x13   :  { %196 = vmatpush.bf16.msra.mxu0 %v5372_v4  ;;  %5472 = vmatpush.bf16.msra.mxu2 %v5372_v4 }
  0x17   :  { %197 = vmatpush.bf16.msra.mxu0 %v5371_v5  ;;  %5473 = vmatpush.bf16.msra.mxu2 %v5371_v5 }
  0x1b   :  { %198 = vmatpush.bf16.msra.mxu0 %v5370_v6  ;;  %5474 = vmatpush.bf16.msra.mxu2 %v5370_v6 }
  0x1f   :  { %199 = vmatpush.bf16.msra.mxu0 %v5369_v7  ;;  %5475 = vmatpush.bf16.msra.mxu2 %v5369_v7 }
  0x23   :  { %200 = vmatpush.bf16.msra.mxu0 %v5368_v8  ;;  %5476 = vmatpush.bf16.msra.mxu2 %v5368_v8 }
  0x27   :  { %201 = vmatpush.bf16.msra.mxu0 %v5367_v9  ;;  %5477 = vmatpush.bf16.msra.mxu2 %v5367_v9 }
  0x2a   :  { %4891 = vmatmul.msk.bf16.vlgmr.msra.gmra.mxu0 %vm165_vm1, %v5359_v10  ;;  %4897 = vmatmul.msk.bf16.vlgmr.msra.gmra.mxu2 %vm165_vm1, %v5365_v11 }
  0x3a   :  { %4892 = vmatmul.msk.bf16.gmra.mxu0 %vm165_vm1, %v5360_v12  ;;  %4898 = vmatmul.msk.bf16.gmra.mxu2 %vm165_vm1, %v5366_v13 }
  0x4a   :  { %4893 = vmatmul.msk.bf16.gmra.mxu0 %vm165_vm1, %v5361_v14 }
  0x5a   :  { %4894 = vmatmul.msk.bf16.gmra.mxu0 %vm165_vm1, %v5362_v15 }
  0x6a   :  { %4895 = vmatmul.msk.bf16.gmra.mxu0 %vm165_vm1, %v5363_v16 }
  0x7a   :  { %4896 = vmatmul.msk.bf16.gmra.mxu0 %vm165_vm1, %v5364_v17 }
  0xa7   :  { %v5890_v18 = vpop.f32.mrf.mxu0 }
  0xad   :  { %v5892_v19 = vpop.f32.mrf.mxu2 }
  0xae   :  { %5489 = vtanh.f32 %v5892_v19 }
  0xaf   :  { %v5895_v20 = vpop.f32.mrf.mxu0 }
  0xb4   :  { %v5490_v22 = vpop.eup %5489 }
  0xb5   :  { %v5902_v23 = vpop.f32.mrf.mxu2  ;;  %v275_v24 = vmul.f32 %v5490_v22, %v5900_v21 }
  0xb6   :  { %5491 = vtanh.f32 %v5902_v23 }
  0xb7   :  { %v5906_v25 = vpop.f32.mrf.mxu0  ;;  %v315_v26 = vsel %vm165_vm1, %v275_v24, 0.0  ;;  %v391_v24 = vld [vmem:[%s10118_s5 + $0x120] sm:$0x33] }
  0xb8   :  { %316 = vadd.xlane.f32.xlu1 %v315_v26  ;;  %v519_v26 = vunpack.c.l.b16 %v391_v24 }
  0xbc   :  { %v5492_v27 = vpop.eup %5491 }
  0xbd   :  { %v5909_v28 = vpop.f32.mrf.mxu2  ;;  %v276_v29 = vmul.f32 %v5492_v27, %v5900_v21  ;;  %v561_v27 = vpack.c.b16 %v519_v26, %v519_v26  ;;  %v887_v26 = vld [vmem:[%s10119_s7 + $0xc0] sm:$0xff] }
  0xbf   :  { %v5912_v30 = vpop.f32.mrf.mxu0  ;;  %v318_v31 = vsel %vm165_vm1, %v276_v29, 0.0  ;;  %v5021_v29 = vld [vmem:[%s10118_s5 + $0xf0] sm:$0xf] }
  0xc0   :  { %319 = vadd.xlane.f32.xlu1 %v318_v31  ;;  %v5406_v31 = vld [vmem:[%s10118_s5 + $0x104] sm:$0xf0] }
  0xc5   :  { %v5915_v32 = vpop.f32.mrf.mxu2 }
  0xc6   :  { %5493 = vtanh.f32 %v5915_v32 }
  0xc7   :  { %v5918_v33 = vpop.f32.mrf.mxu0 }
  0xc8   :  { %5495 = vtanh.f32 %v5918_v33 }
  0xcc   :  { %v5494_v34 = vpop.eup %5493 }
  0xcd   :  { %v278_v35 = vmul.f32 %v5494_v34, %v5900_v21  ;;  %v616_v34 = vsel %vm190_vm0, %v561_v27, 0  ;;  %v5391_v27 = vld [vmem:[%s10118_s5 + $0x94] sm:$0xf] }
  0xce   :  { %v5496_v36 = vpop.eup %5495  ;;  %5478 = vmatpush.bf16.msra.mxu3 %v616_v34  ;;  %634 = vmatpush.bf16.msra.mxu1 %v616_v34 }
  0xcf   :  { %v5922_v37 = vpop.f32.mrf.mxu0  ;;  %v324_v38 = vsel %vm165_vm1, %v278_v35, 0.0  ;;  %v267_v39 = vmul.f32 %v5496_v36, %v5900_v21  ;;  %v4997_v35 = vld [vmem:[%s10118_s5 + $0xc0] sm:$0xf]  ;;  %v5400_v36 = vld [vmem:[%s10118_s5 + $0xd4] sm:$0xf0] }
  0xd0   :  { %5497 = vtanh.f32 %v5922_v37  ;;  %325 = vadd.xlane.f32.xlu1 %v324_v38  ;;  %v4998_v38 = vor.u32 %v5400_v36, %v4997_v35  ;;  %v884_v35 = vld [vmem:[%s10119_s7 + $0xa8] sm:$0xff] }
  0xd1   :  { %v291_v40 = vsel %vm165_vm1, %v267_v39, 0.0  ;;  %5499 = vtanh.f32 %v5909_v28  ;;  %v4973_v39 = vld [vmem:[%s10118_s5 + $0x90] sm:$0xf] }
  0xd2   :  { %292 = vadd.xlane.f32.xlu0 %v291_v40  ;;  %v5394_v40 = vld [vmem:[%s10118_s5 + $0xa4] sm:$0xf0] }
  0xd6   :  { %v5498_v41 = vpop.eup %5497 }
  0xd7   :  { %v5929_v42 = vpop.f32.mrf.mxu0  ;;  %v268_v43 = vmul.f32 %v5498_v41, %v5900_v21  ;;  %v5500_v44 = vpop.eup %5499  ;;  %v4974_v41 = vor.u32 %v5394_v40, %v4973_v39  ;;  %v881_v39 = vld [vmem:[%s10119_s7 + $0x90] sm:$0xff]  ;;  %v5385_v40 = vld [vmem:[%s10118_s5 + $0x64] sm:$0xf] }
  0xd8   :  { %5501 = vtanh.f32 %v5929_v42  ;;  %v277_v46 = vmul.f32 %v5500_v44, %v5900_v21  ;;  %v5388_v44 = vld [vmem:[%s10118_s5 + $0x74] sm:$0xf0] }
  0xd9   :  { %v294_v45 = vsel %vm165_vm1, %v268_v43, 0.0  ;;  %5503 = vtanh.f32 %v5895_v20  ;;  %v4949_v43 = vld [vmem:[%s10118_s5 + $0x60] sm:$0xf] }
  0xda   :  { %295 = vadd.xlane.f32.xlu0 %v294_v45  ;;  %v321_v49 = vsel %vm165_vm1, %v277_v46, 0.0  ;;  %v4950_v45 = vor.u32 %v5388_v44, %v4949_v43  ;;  %v4925_v46 = vld [vmem:[%s10118_s5 + $0x30] sm:$0xf]  ;;  %v4957_v44 = vld [vmem:[%s10118_s5 + $0x68] sm:$0xf] }
  0xde   :  { %v5502_v47 = vpop.eup %5501 }
  0xdf   :  { %v5936_v48 = vpop.f32.mrf.mxu0  ;;  %v269_v50 = vmul.f32 %v5502_v47, %v5900_v21  ;;  %v5504_v52 = vpop.eup %5503  ;;  %v5382_v47 = vld [vmem:[%s10118_s5 + $0x44] sm:$0xf0] }
  0xe0   :  { %5505 = vtanh.f32 %v5936_v48  ;;  %v264_v53 = vmul.f32 %v5504_v52, %v5900_v21 }
  0xe1   :  { %v297_v51 = vsel %vm165_vm1, %v269_v50, 0.0  ;;  %5507 = vtanh.f32 %v5890_v18  ;;  %v4901_v50 = vld [vmem:[%s10118_s5] sm:$0xf] }
  0xe2   :  { %322 = vadd.xlane.f32.xlu0 %v321_v49  ;;  %298 = vadd.xlane.f32.xlu2 %v297_v51  ;;  %5509 = vtanh.f32 %v5906_v25  ;;  %v282_v58 = vsel %vm165_vm1, %v264_v53, 0.0  ;;  %v4926_v49 = vor.u32 %v5382_v47, %v4925_v46  ;;  %v5376_v51 = vld [vmem:[%s10118_s5 + $0x14] sm:$0xf0]  ;;  %v908_v53 = vld [vmem:[%s10119_s7 + $0x168] sm:$0xff] }
  0xe3   :  { %v4902_v52 = vor.u32 %v5376_v51, %v4901_v50  ;;  %919 = vmatpush.msrb.mxu0 %v908_v53  ;;  %v878_v47 = vld [vmem:[%s10119_s7 + $0x78] sm:$0xff]  ;;  %v5379_v50 = vld [vmem:[%s10118_s5 + $0x34] sm:$0xf]  ;;  %v4927_v51 = vld [vmem:[%s10118_s5 + $0x48] sm:$0xf0] }
  0xe4   :  { %v5383_v53 = vld [vmem:[%s10118_s5 + $0x4c] sm:$0xf0] }
  0xe6   :  { %v5506_v54 = vpop.eup %5505 }
  0xe7   :  { %v5945_v55 = vpop.f32.mrf.mxu0  ;;  %v270_v56 = vmul.f32 %v5506_v54, %v5900_v21  ;;  %v5508_v57 = vpop.eup %5507  ;;  %v6021_v54 = vld [vmem:[%s10118_s5 + $0x128] sm:$0x33] }
  0xe8   :  { %5511 = vtanh.f32 %v5945_v55  ;;  %v5510_v60 = vpop.eup %5509  ;;  %v263_v62 = vmul.f32 %v5508_v57, %v5900_v21  ;;  %v521_v57 = vunpack.c.l.b16 %v6021_v54 }
  0xe9   :  { %v300_v59 = vsel %vm165_vm1, %v270_v56, 0.0  ;;  %5513 = vtanh.f32 %v5912_v30  ;;  %v265_v61 = vmul.f32 %v5510_v60, %v5900_v21  ;;  %v520_v56 = vunpack.c.h.b16 %v391_v24  ;;  %v890_v24 = vld [vmem:[%s10119_s7 + $0xd8] sm:$0xff] }
  0xea   :  { %283 = vadd.xlane.f32.xlu0 %v282_v58  ;;  %301 = vadd.xlane.f32.xlu2 %v300_v59  ;;  %v279_v3 = vsel %vm165_vm1, %v263_v62, 0.0  ;;  %v905_v58 = vld [vmem:[%s10119_s7 + $0x150] sm:$0xff]  ;;  %v563_v60 = vpack.c.b16 %v521_v57, %v521_v57  ;;  %v4930_v57 = vor.u32 %v5379_v50, %v4927_v51 }
  0xeb   :  { %v285_v2 = vsel %vm165_vm1, %v265_v61, 0.0  ;;  %v562_v59 = vpack.c.b16 %v520_v56, %v520_v56  ;;  %920 = vmatpush.msrb.mxu0 %v905_v58  ;;  %v902_v61 = vld [vmem:[%s10119_s7 + $0x138] sm:$0xff]  ;;  %v5403_v62 = vld [vmem:[%s10118_s5 + $0xf4] sm:$0xf] }
  0xed   :  { %921 = vmatpush.msrb.mxu0 %v902_v61 }
  0xee   :  { %v5512_v63 = vpop.eup %5511 }
  0xef   :  { %v5954_v0 = vpop.f32.mrf.mxu0  ;;  %v271_v1 = vmul.f32 %v5512_v63, %v5900_v21  ;;  %v5514_v5 = vpop.eup %5513  ;;  %v619_v63 = vsel %vm190_vm0, %v562_v59, 0 }
  0xf0   :  { %5515 = vtanh.f32 %v5954_v0  ;;  %v266_v7 = vmul.f32 %v5514_v5, %v5900_v21  ;;  %663 = vmatpush.bf16.msrb.mxu2 %v619_v63 }
  0xf1   :  { %v303_v4 = vsel %vm165_vm1, %v271_v1, 0.0  ;;  %v622_v1 = vsel %vm190_vm0, %v563_v60, 0  ;;  %v872_v60 = vld [vmem:[%s10119_s7 + $0x48] sm:$0xff] }
  0xf2   :  { %286 = vadd.xlane.f32.xlu0 %v285_v2  ;;  %280 = vadd.xlane.f32.xlu2 %v279_v3  ;;  %v288_v11 = vsel %vm165_vm1, %v266_v7, 0.0  ;;  %v5023_v2 = vld [vmem:[%s10118_s5 + $0x108] sm:$0xf0]  ;;  %v5029_v3 = vld [vmem:[%s10118_s5 + $0xf8] sm:$0xf] }
  0xf3   :  { %304 = vadd.xlane.f32.xlu1 %v303_v4  ;;  %v899_v4 = vld [vmem:[%s10119_s7 + $0x120] sm:$0xff]  ;;  %v5026_v5 = vor.u32 %v5403_v62, %v5023_v2  ;;  %v869_v2 = vld [vmem:[%s10119_s7 + $0x30] sm:$0xff] }
  0xf4   :  { %922 = vmatpush.msrb.mxu0 %v899_v4 }
  0xf5   :  { %664 = vmatpush.bf16.msrb.mxu2 %v5026_v5  ;;  %v5377_v5 = vld [vmem:[%s10118_s5 + $0x1c] sm:$0xf0] }
  0xf6   :  { %v5516_v6 = vpop.eup %5515 }
  0xf7   :  { %v5962_v8 = vpop.f32.mrf.mxu0  ;;  %v272_v9 = vmul.f32 %v5516_v6, %v5900_v21  ;;  %v5407_v6 = vld [vmem:[%s10118_s5 + $0x10c] sm:$0xf0] }
  0xf8   :  { %5517 = vtanh.f32 %v5962_v8  ;;  %v5030_v7 = vor.u32 %v5407_v6, %v5029_v3  ;;  %v4903_v3 = vld [vmem:[%s10118_s5 + $0x18] sm:$0xf0] }
  0xf9   :  { %v306_v10 = vsel %vm165_vm1, %v272_v9, 0.0  ;;  %v896_v9 = vld [vmem:[%s10119_s7 + $0x108] sm:$0xff] }
  0xfa   :  { %307 = vadd.xlane.f32.xlu2 %v306_v10  ;;  %923 = vmatpush.msrb.mxu0 %v896_v9  ;;  %v893_v10 = vld [vmem:[%s10119_s7 + $0xf0] sm:$0xff] }
  0xfb   :  { %289 = vadd.xlane.f32.xlu1 %v288_v11  ;;  %v5397_v11 = vld [vmem:[%s10118_s5 + $0xc4] sm:$0xf] }
  0xfc   :  { %924 = vmatpush.msrb.mxu0 %v893_v10  ;;  %v863_v10 = vld [vmem:[%s10119_s7] sm:$0xff] }
  0xfe   :  { %v5518_v12 = vpop.eup %5517  ;;  %925 = vmatpush.msrb.mxu0 %v890_v24 }
  0xff   :  { %v5968_v13 = vpop.f32.mrf.mxu0  ;;  %v273_v14 = vmul.f32 %v5518_v12, %v5900_v21  ;;  %v4999_v12 = vld [vmem:[%s10118_s5 + $0xd8] sm:$0xf0] }
 0x100   :  { %5519 = vtanh.f32 %v5968_v13  ;;  %926 = vmatpush.msrb.mxu0 %v887_v26 }
 0x101   :  { %v309_v15 = vsel %vm165_vm1, %v273_v14, 0.0  ;;  %v5002_v14 = vor.u32 %v5397_v11, %v4999_v12  ;;  %v522_v12 = vunpack.c.h.b16 %v6021_v54 }
 0x102   :  { %310 = vadd.xlane.f32.xlu2 %v309_v15  ;;  %v5005_v15 = vld [vmem:[%s10118_s5 + $0xc8] sm:$0xf]  ;;  %927 = vmatpush.msrb.mxu0 %v884_v35  ;;  %v5398_v35 = vld [vmem:[%s10118_s5 + $0xcc] sm:$0xf] }
 0x103   :  { %665 = vmatpush.bf16.msrb.mxu2 %v5002_v14  ;;  %v10135_v14 = vmov 0.0  }
 0x104   :  { %928 = vmatpush.msrb.mxu0 %v881_v39 }
 0x106   :  { %v5520_v16 = vpop.eup %5519  ;;  %929 = vmatpush.msrb.mxu0 %v878_v47  ;;  %v4935_v47 = vld [vmem:[%s10118_s5 + $0x50] sm:$0xf0] }
 0x107   :  { %v274_v17 = vmul.f32 %v5520_v16, %v5900_v21  ;;  %v5022_v21 = vor.u32 %v5406_v31, %v5021_v29  ;;  %v5401_v16 = vld [vmem:[%s10118_s5 + $0xdc] sm:$0xf0]  ;;  %v4975_v29 = vld [vmem:[%s10118_s5 + $0xa8] sm:$0xf0]  ;;  %v4981_v31 = vld [vmem:[%s10118_s5 + $0x98] sm:$0xf] }
 0x108   :  { %v4978_v34 = vor.u32 %v5391_v27, %v4975_v29 }
 0x109   :  { %v312_v22 = vsel %vm165_vm1, %v274_v17, 0.0  ;;  %5479 = vmatpush.bf16.msra.mxu3 %v5022_v21  ;;  %635 = vmatpush.bf16.msra.mxu1 %v5022_v21  ;;  %v5395_v21 = vld [vmem:[%s10118_s5 + $0xac] sm:$0xf0] }
 0x10a   :  { %313 = vadd.xlane.f32.xlu0 %v312_v22  ;;  %v5006_v22 = vor.u32 %v5401_v16, %v5005_v15  ;;  %666 = vmatpush.bf16.msrb.mxu2 %v4978_v34  ;;  %v564_v15 = vpack.c.b16 %v522_v12, %v522_v12  ;;  %v5404_v16 = vld [vmem:[%s10118_s5 + $0xfc] sm:$0xf]  ;;  %v5013_v12 = vld [vmem:[%s10118_s5 + $0xd0] sm:$0xf] }
 0x10c   :  { %v625_v24 = vsel %vm190_vm0, %v564_v15, 0  ;;  %v5402_v15 = vld [vmem:[%s10118_s5 + $0xe4] sm:$0xf0] }
 0x10d   :  { %5480 = vmatpush.bf16.msra.mxu3 %v4998_v38  ;;  %636 = vmatpush.bf16.msra.mxu1 %v4998_v38  ;;  %v4982_v38 = vor.u32 %v5395_v21, %v4981_v31 }
 0x111   :  { %5481 = vmatpush.bf16.msra.mxu3 %v4974_v41  ;;  %637 = vmatpush.bf16.msra.mxu1 %v4974_v41  ;;  %v4951_v41 = vld [vmem:[%s10118_s5 + $0x78] sm:$0xf0] }
 0x112   :  { %v4954_v43 = vor.u32 %v5385_v40, %v4951_v41 }
 0x114   :  { %667 = vmatpush.bf16.msrb.mxu2 %v4954_v43  ;;  %v5386_v43 = vld [vmem:[%s10118_s5 + $0x6c] sm:$0xf] }
 0x115   :  { %5482 = vmatpush.bf16.msra.mxu3 %v4950_v45  ;;  %638 = vmatpush.bf16.msra.mxu1 %v4950_v45  ;;  %v5389_v45 = vld [vmem:[%s10118_s5 + $0x7c] sm:$0xf0] }
 0x116   :  { %v4958_v46 = vor.u32 %v5389_v45, %v4957_v44  ;;  %v4959_v44 = vld [vmem:[%s10118_s5 + $0x80] sm:$0xf0] }
 0x117   :  { %v4962_v45 = vor.u32 %v5386_v43, %v4959_v44  ;;  %v4941_v43 = vld [vmem:[%s10118_s5 + $0x40] sm:$0xf]  ;;  %v5384_v44 = vld [vmem:[%s10118_s5 + $0x54] sm:$0xf0] }
 0x118   :  { %668 = vmatpush.bf16.msrb.mxu2 %v4930_v57 }
 0x119   :  { %5483 = vmatpush.bf16.msra.mxu3 %v4926_v49  ;;  %639 = vmatpush.bf16.msra.mxu1 %v4926_v49  ;;  %v875_v49 = vld [vmem:[%s10119_s7 + $0x60] sm:$0xff] }
 0x11a   :  { %930 = vmatpush.msrb.mxu0 %v875_v49 }
 0x11c   :  { %931 = vmatpush.msrb.mxu0 %v872_v60 }
 0x11d   :  { %5484 = vmatpush.bf16.msra.mxu3 %v4902_v52  ;;  %640 = vmatpush.bf16.msra.mxu1 %v4902_v52  ;;  %v4933_v52 = vld [vmem:[%s10118_s5 + $0x38] sm:$0xf] }
 0x11e   :  { %v4934_v58 = vor.u32 %v5383_v53, %v4933_v52  ;;  %932 = vmatpush.msrb.mxu0 %v869_v2  ;;  %v5374_v52 = vld [vmem:[%s10118_s5 + $0xc] sm:$0xf]  ;;  %v4911_v53 = vld [vmem:[%s10118_s5 + $0x20] sm:$0xf0]  ;;  %v5037_v2 = vld [vmem:[%s10118_s5 + $0x100] sm:$0xf] }
 0x121   :  { %692 = vmatpush.bf16.msrb.mxu3 %v622_v1  ;;  %721 = vmatpush.bf16.msrb.mxu1 %v625_v24 }
 0x125   :  { %693 = vmatpush.bf16.msrb.mxu3 %v5030_v7  ;;  %v866_v7 = vld [vmem:[%s10119_s7 + $0x18] sm:$0xff] }
 0x126   :  { %933 = vmatpush.msrb.mxu0 %v866_v7 }
 0x128   :  { %934 = vmatpush.msrb.mxu0 %v863_v10 }
 0x129   :  { %694 = vmatpush.bf16.msrb.mxu3 %v5006_v22  ;;  %935 = vmatmul.f32.vlgmr.msrb.gmra.mxu0 %v10135_v14  ;;  %v6691_v14 = vld [vmem:[%s10120_s9 + $0x18] sm:$0xff] }
 0x12b   :  { %v317_v17 = vpop.xlane.xlu1 %316 }
 0x12c   :  { %v339_v62 = vmul.f32 %v317_v17, %v5892_v19  ;;  %v5031_v17 = vld [vmem:[%s10118_s5 + $0x110] sm:$0xf0] }
 0x12d   :  { %695 = vmatpush.bf16.msrb.mxu3 %v4982_v38  ;;  %v5034_v26 = vor.u32 %v5404_v16, %v5031_v17  ;;  %v5399_v16 = vld [vmem:[%s10118_s5 + $0xd4] sm:$0xf]  ;;  %v5015_v17 = vld [vmem:[%s10118_s5 + $0xe8] sm:$0xf0] }
 0x12f   :  { %722 = vmatpush.bf16.msrb.mxu1 %v5034_v26 }
 0x131   :  { %696 = vmatpush.bf16.msrb.mxu3 %v4958_v46  ;;  %v5380_v46 = vld [vmem:[%s10118_s5 + $0x3c] sm:$0xf] }
 0x132   :  { %v4938_v50 = vor.u32 %v5380_v46, %v4935_v47  ;;  %v4943_v46 = vld [vmem:[%s10118_s5 + $0x58] sm:$0xf0]  ;;  %v4942_v47 = vor.u32 %v5384_v44, %v4941_v43  ;;  %v6616_v43 = vld [vmem:[%s10120_s9 + $0x68] sm:$0xff]  ;;  %v6623_v44 = vld [vmem:[%s10119_s7 + $0x70] sm:$0xff] }
 0x133   :  { %v320_v56 = vpop.xlane.xlu1 %319  ;;  %10272 = vst [vmem:[#allocation4_spill] sm:$0xff] %v6616_v43 }
 0x134   :  { %v340_v63 = vmul.f32 %v320_v56, %v5902_v23 }
 0x135   :  { %697 = vmatpush.bf16.msrb.mxu3 %v4934_v58 }
 0x143   :  { %v326_v27 = vpop.xlane.xlu1 %325 }
 0x144   :  { %v342_v34 = vmul.f32 %v326_v27, %v5915_v32  ;;  %v5392_v32 = vld [vmem:[%s10118_s5 + $0x9c] sm:$0xf] }
 0x145   :  { %v293_v36 = vpop.xlane.xlu0 %292 }
 0x146   :  { %v331_v59 = vmul.f32 %v293_v36, %v5918_v33  ;;  %v5373_v33 = vld [vmem:[%s10118_s5 + $0x4] sm:$0xf] }
 0x147   :  { %v4906_v23 = vor.u32 %v5373_v33, %v4903_v3  ;;  %v5007_v36 = vld [vmem:[%s10118_s5 + $0xe0] sm:$0xf0] }
 0x148   :  { %v347_v19 = vadd.f32 %v339_v62, %v331_v59  ;;  %v5010_v40 = vor.u32 %v5398_v35, %v5007_v36  ;;  %v4991_v36 = vld [vmem:[%s10118_s5 + $0xb8] sm:$0xf0] }
 0x149   :  { %669 = vmatpush.bf16.msrb.mxu2 %v4906_v23  ;;  %v5039_v23 = vld [vmem:[%s10118_s5 + $0x118] sm:$0xf0] }
 0x14a   :  { %723 = vmatpush.bf16.msrb.mxu1 %v5010_v40  ;;  %v5390_v40 = vld [vmem:[%s10118_s5 + $0x84] sm:$0xf0] }
 0x14d   :  { %v296_v61 = vpop.xlane.xlu0 %295 }
 0x14e   :  { %v332_v1 = vmul.f32 %v296_v61, %v5922_v37  ;;  %v4909_v37 = vld [vmem:[%s10118_s5 + $0x8] sm:$0xf]  ;;  %v4914_v61 = vor.u32 %v5374_v52, %v4911_v53  ;;  %v5375_v52 = vld [vmem:[%s10118_s5 + $0x14] sm:$0xf]  ;;  %v4919_v53 = vld [vmem:[%s10118_s5 + $0x28] sm:$0xf0] }
 0x14f   :  { %v4910_v6 = vor.u32 %v5377_v5, %v4909_v37 }
 0x150   :  { %v348_v4 = vadd.f32 %v340_v63, %v332_v1 }
 0x151   :  { %698 = vmatpush.bf16.msrb.mxu3 %v4910_v6 }
 0x152   :  { %v6144_v9 = vpack.c.bf16 %v348_v4, %v347_v19  ;;  %v5408_v19 = vld [vmem:[%s10118_s5 + $0x114] sm:$0xf0]  ;;  %v5405_v4 = vld [vmem:[%s10118_s5 + $0x104] sm:$0xf] }
 0x153   :  { %v5038_v10 = vor.u32 %v5408_v19, %v5037_v2  ;;  %v6373_v2 = vld [vmem:[%s10120_s9 + $0x170] sm:$0xff] }
 0x154   :  { %5045 = vmatmul.msk.bf16.vlgmr.msra.gmra.mxu3 %vm165_vm1, %v6144_v9  ;;  %1055 = vmatpush.msra.mxu0 %v6373_v2  ;;  %v6391_v19 = vld [vmem:[%s10119_s7 + $0x50] sm:$0xff] }
 0x155   :  { %v299_v11 = vpop.xlane.xlu2 %298  ;;  %v323_v22 = vpop.xlane.xlu0 %322 }
 0x156   :  { %v341_v54 = vmul.f32 %v323_v22, %v5909_v28  ;;  %v333_v29 = vmul.f32 %v299_v11, %v5929_v42  ;;  %v4983_v42 = vld [vmem:[%s10118_s5 + $0xb0] sm:$0xf0]  ;;  %v5042_v11 = vor.u32 %v5405_v4, %v5039_v23  ;;  %v6397_v4 = vld [vmem:[%s10119_s7 + $0x38] sm:$0xff]  ;;  %v6403_v23 = vld [vmem:[%s10119_s7 + $0x20] sm:$0xff] }
 0x158   :  { %v349_v38 = vadd.f32 %v341_v54, %v333_v29  ;;  %v5014_v29 = vor.u32 %v5402_v15, %v5013_v12  ;;  %v6457_v12 = vld [vmem:[%s10119_s7 + $0x148] sm:$0xff]  ;;  %v6462_v15 = vld [vmem:[%s10120_s9 + $0x138] sm:$0xff] }
 0x15d   :  { %v302_v31 = vpop.xlane.xlu2 %301  ;;  %v284_v51 = vpop.xlane.xlu0 %283 }
 0x15e   :  { %v334_v21 = vmul.f32 %v302_v31, %v5936_v48  ;;  %v4986_v48 = vor.u32 %v5392_v32, %v4983_v42  ;;  %v328_v59 = vmul.f32 %v284_v51, %v5895_v20  ;;  %v5018_v31 = vor.u32 %v5399_v16, %v5015_v17  ;;  %v5387_v32 = vld [vmem:[%s10118_s5 + $0x74] sm:$0xf]  ;;  %v5378_v51 = vld [vmem:[%s10118_s5 + $0x24] sm:$0xf0] }
 0x15f   :  { %v6467_v16 = vld [vmem:[%s10120_s9 + $0x128] sm:$0xff]  ;;  %v6473_v17 = vld [vmem:[%s10119_s7 + $0x130] sm:$0xff] }
 0x160   :  { %v350_v39 = vadd.f32 %v342_v34, %v334_v21  ;;  %724 = vmatpush.bf16.msrb.mxu1 %v4986_v48  ;;  %v4967_v48 = vld [vmem:[%s10118_s5 + $0x88] sm:$0xf0] }
 0x162   :  { %v6170_v28 = vpack.c.bf16 %v350_v39, %v349_v38  ;;  %v4965_v39 = vld [vmem:[%s10118_s5 + $0x70] sm:$0xf] }
 0x163   :  { %v4966_v42 = vor.u32 %v5390_v40, %v4965_v39  ;;  %v6575_v39 = vld [vmem:[%s10120_s9 + $0xa8] sm:$0xff]  ;;  %v6580_v40 = vld [vmem:[%s10120_s9 + $0x98] sm:$0xff] }
 0x164   :  { %5046 = vmatmul.msk.bf16.gmra.mxu3 %vm165_vm1, %v6170_v28  ;;  %725 = vmatpush.bf16.msrb.mxu1 %v4962_v45  ;;  %v5381_v45 = vld [vmem:[%s10118_s5 + $0x44] sm:$0xf] }
 0x165   :  { %v281_v41 = vpop.xlane.xlu2 %280  ;;  %v287_v20 = vpop.xlane.xlu0 %286 }
 0x166   :  { %v305_v49 = vpop.xlane.xlu1 %304  ;;  %v327_v56 = vmul.f32 %v281_v41, %v5890_v18  ;;  %v393_v18 = vld [vmem:[%s10118_s5 + $0x130] sm:$0x33]  ;;  %v329_v24 = vmul.f32 %v287_v20, %v5906_v25  ;;  %v5396_v25 = vld [vmem:[%s10118_s5 + $0xb4] sm:$0xf0]  ;;  %v4970_v41 = vor.u32 %v5387_v32, %v4967_v48  ;;  %v6350_v20 = vld [vmem:[%s10119_s7 + $0xc8] sm:$0xff] }
 0x167   :  { %v335_v57 = vmul.f32 %v305_v49, %v5945_v55  ;;  %v524_v55 = vunpack.c.h.b16 %v393_v18  ;;  %v4946_v49 = vor.u32 %v5381_v45, %v4943_v46  ;;  %v6593_v32 = vld [vmem:[%s10120_s9 + $0x90] sm:$0xff]  ;;  %v6605_v48 = vld [vmem:[%s10119_s7 + $0x88] sm:$0xff]  ;;  %v6629_v45 = vld [vmem:[%s10120_s9 + $0x60] sm:$0xff] }
 0x168   :  { %726 = vmatpush.bf16.msrb.mxu1 %v4938_v50  ;;  %v4917_v50 = vld [vmem:[%s10118_s5 + $0x10] sm:$0xf] }
 0x169   :  { %v343_v62 = vadd.f32 %v335_v57, %v327_v56  ;;  %v566_v33 = vpack.c.b16 %v524_v55, %v524_v55  ;;  %v4918_v56 = vor.u32 %v5378_v51, %v4917_v50  ;;  %v4922_v57 = vor.u32 %v5375_v52, %v4919_v53  ;;  %v6362_v55 = vld [vmem:[%s10119_s7 + $0xb0] sm:$0xff]  ;;  %v6652_v50 = vld [vmem:[%s10120_s9 + $0x38] sm:$0xff]  ;;  %v6660_v51 = vld [vmem:[%s10119_s7 + $0x40] sm:$0xff] }
 0x16a   :  { %v6634_v46 = vld [vmem:[%s10120_s9 + $0x50] sm:$0xff]  ;;  %10274 = vst [vmem:[#allocation6_spill] sm:$0xff] %v6652_v50  ;;  %v6670_v53 = vld [vmem:[%s10120_s9 + $0x20] sm:$0xff] }
 0x16b   :  { %v631_v5 = vsel %vm190_vm0, %v566_v33, 0  ;;  %v6378_v33 = vld [vmem:[%s10119_s7 + $0x80] sm:$0xff]  ;;  %10273 = vst [vmem:[#allocation5_spill] sm:$0xff] %v6634_v46  ;;  %v6665_v52 = vld [vmem:[%s10120_s9 + $0x30] sm:$0xff] }
 0x16c   :  { %727 = vmatpush.bf16.msrb.mxu1 %v4914_v61  ;;  %779 = vmatpush.bf16.msra.mxu3 %v631_v5  ;;  %v6325_v61 = vld [vmem:[%s10119_s7 + $0x128] sm:$0xff]  ;;  %v6422_v5 = vld [vmem:[%s10119_s7 + $0x178] sm:$0xff]  ;;  %10275 = vst [vmem:[#allocation7_spill] sm:$0xff] %v6670_v53 }
 0x16d   :  { %v308_v58 = vpop.xlane.xlu2 %307 }
 0x16e   :  { %v336_v60 = vmul.f32 %v308_v58, %v5954_v0  ;;  %v523_v0 = vunpack.c.l.b16 %v393_v18  ;;  %v290_v7 = vpop.xlane.xlu1 %289  ;;  %v6308_v58 = vld [vmem:[%s10119_s7 + $0x170] sm:$0xff]  ;;  %v6343_v18 = vld [vmem:[%s10119_s7 + $0xe0] sm:$0xff] }
 0x16f   :  { %v330_v26 = vmul.f32 %v290_v7, %v5912_v30  ;;  %v5393_v30 = vld [vmem:[%s10118_s5 + $0xa4] sm:$0xf]  ;;  %v6432_v7 = vld [vmem:[%s10120_s9 + $0x158] sm:$0xff] }
 0x170   :  { %v344_v63 = vadd.f32 %v336_v60, %v328_v59  ;;  %v565_v3 = vpack.c.b16 %v523_v0, %v523_v0  ;;  %780 = vmatpush.bf16.msra.mxu3 %v5042_v11  ;;  %v4994_v38 = vor.u32 %v5393_v30, %v4991_v36  ;;  %v6313_v59 = vld [vmem:[%s10119_s7 + $0x158] sm:$0xff]  ;;  %v6319_v60 = vld [vmem:[%s10119_s7 + $0x140] sm:$0xff]  ;;  %1056 = vmatpush.msra.mxu0 %v6432_v7  ;;  %v6547_v30 = vld [vmem:[%s10119_s7 + $0xd0] sm:$0xff] }
 0x171   :  { %v6367_v0 = vld [vmem:[%s10119_s7 + $0x98] sm:$0xff]  ;;  %v6450_v11 = vld [vmem:[%s10120_s9 + $0x140] sm:$0xff]  ;;  %v6558_v36 = vld [vmem:[%s10120_s9 + $0xb0] sm:$0xff] }
 0x172   :  { %v6202_v1 = vpack.c.bf16 %v344_v63, %v343_v62  ;;  %v628_v6 = vsel %vm190_vm0, %v565_v3, 0  ;;  %v6331_v62 = vld [vmem:[%s10119_s7 + $0x110] sm:$0xff]  ;;  %v6337_v63 = vld [vmem:[%s10119_s7 + $0xf8] sm:$0xff]  ;;  %v6385_v3 = vld [vmem:[%s10119_s7 + $0x68] sm:$0xff]  ;;  %1057 = vmatpush.msra.mxu0 %v6450_v11 }
 0x173   :  { %750 = vmatpush.bf16.msra.mxu2 %v628_v6  ;;  %v6427_v6 = vld [vmem:[%s10120_s9 + $0x168] sm:$0xff] }
 0x174   :  { %5043 = vmatmul.msk.bf16.vlgmr.msra.gmra.mxu1 %vm165_vm1, %v6202_v1  ;;  %5047 = vmatmul.msk.bf16.vlgmr.msrb.gmra.mxu2 %vm165_vm1, %v6202_v1 }
 0x175   :  { %5051 = vmatmul.msk.bf16.vlgmr.msrb.gmra.mxu3 %vm165_vm1, %v6202_v1  ;;  %v311_v37 = vpop.xlane.xlu2 %310  ;;  %939 = vmatpush.msra.mxu1 %v6308_v58 }
 0x176   :  { %v337_v22 = vmul.f32 %v311_v37, %v5962_v8  ;;  %781 = vmatpush.bf16.msra.mxu3 %v5018_v31  ;;  %v4989_v8 = vld [vmem:[%s10118_s5 + $0xa0] sm:$0xf]  ;;  %v6409_v37 = vld [vmem:[%s10119_s7 + $0x8] sm:$0xff]  ;;  %1058 = vmatpush.msra.mxu0 %v6467_v16  ;;  %v6517_v31 = vld [vmem:[%s10120_s9 + $0xf0] sm:$0xff] }
 0x177   :  { %751 = vmatpush.bf16.msra.mxu2 %v5038_v10  ;;  %940 = vmatpush.msra.mxu1 %v6313_v59  ;;  %v6445_v10 = vld [vmem:[%s10120_s9 + $0x150] sm:$0xff] }
 0x178   :  { %v345_v34 = vadd.f32 %v337_v22, %v329_v24  ;;  %v6478_v22 = vld [vmem:[%s10120_s9 + $0x120] sm:$0xff]  ;;  %v6485_v24 = vld [vmem:[%s10120_s9 + $0x110] sm:$0xff] }
 0x179   :  { %941 = vmatpush.msra.mxu1 %v6319_v60  ;;  %1059 = vmatpush.msra.mxu0 %v6485_v24 }
 0x17a   :  { %782 = vmatpush.bf16.msra.mxu3 %v4994_v38  ;;  %v6570_v38 = vld [vmem:[%s10119_s7 + $0xb8] sm:$0xff] }
 0x17b   :  { %752 = vmatpush.bf16.msra.mxu2 %v5014_v29  ;;  %942 = vmatpush.msra.mxu1 %v6325_v61  ;;  %v6512_v29 = vld [vmem:[%s10119_s7 + $0x100] sm:$0xff] }
 0x17d   :  { %v314_v27 = vpop.xlane.xlu0 %313  ;;  %943 = vmatpush.msra.mxu1 %v6331_v62 }
 0x17e   :  { %v338_v54 = vmul.f32 %v314_v27, %v5968_v13  ;;  %v4990_v13 = vor.u32 %v5396_v25, %v4989_v8  ;;  %783 = vmatpush.bf16.msra.mxu3 %v4970_v41  ;;  %v6496_v27 = vld [vmem:[%s10120_s9 + $0x108] sm:$0xff]  ;;  %v6534_v8 = vld [vmem:[%s10120_s9 + $0xd8] sm:$0xff] }
 0x17f   :  { %944 = vmatpush.msra.mxu1 %v6337_v63  ;;  %v6539_v25 = vld [vmem:[%s10120_s9 + $0xc8] sm:$0xff]  ;;  %v6611_v41 = vld [vmem:[%s10120_s9 + $0x78] sm:$0xff] }
 0x180   :  { %v346_v21 = vadd.f32 %v338_v54, %v330_v26  ;;  %753 = vmatpush.bf16.msra.mxu2 %v4990_v13  ;;  %v6491_v26 = vld [vmem:[%s10119_s7 + $0x118] sm:$0xff]  ;;  %v6553_v13 = vld [vmem:[%s10120_s9 + $0xc0] sm:$0xff] }
 0x181   :  { %945 = vmatpush.msra.mxu1 %v6343_v18  ;;  %v6503_v54 = vld [vmem:[%s10120_s9 + $0xf8] sm:$0xff] }
 0x182   :  { %v6243_v35 = vpack.c.bf16 %v346_v21, %v345_v34  ;;  %784 = vmatpush.bf16.msra.mxu3 %v4946_v49  ;;  %1060 = vmatpush.msra.mxu0 %v6503_v54  ;;  %v6522_v34 = vld [vmem:[%s10120_s9 + $0xe0] sm:$0xff]  ;;  %v6529_v21 = vld [vmem:[%s10119_s7 + $0xe8] sm:$0xff] }
 0x183   :  { %946 = vmatpush.msra.mxu1 %v6350_v20  ;;  %v6647_v49 = vld [vmem:[%s10120_s9 + $0x48] sm:$0xff] }
 0x184   :  { %5044 = vmatmul.msk.bf16.gmra.mxu1 %vm165_vm1, %v6243_v35  ;;  %5048 = vmatmul.msk.bf16.gmra.mxu2 %vm165_vm1, %v6243_v35 }
 0x185   :  { %5052 = vmatmul.msk.bf16.gmra.mxu3 %vm165_vm1, %v6243_v35  ;;  %754 = vmatpush.bf16.msra.mxu2 %v4966_v42  ;;  %v6598_v42 = vld [vmem:[%s10120_s9 + $0x80] sm:$0xff] }
 0x186   :  { %785 = vmatpush.bf16.msra.mxu3 %v4922_v57  ;;  %947 = vmatpush.msra.mxu1 %v6362_v55  ;;  %v6685_v57 = vld [vmem:[%s10120_s9 + $0x8] sm:$0xff] }
 0x187   :  { %1061 = vmatpush.msra.mxu0 %v6522_v34 }
 0x188   :  { %948 = vmatpush.msra.mxu1 %v6367_v0 }
 0x189   :  { %755 = vmatpush.bf16.msra.mxu2 %v4942_v47  ;;  %1062 = vmatpush.msra.mxu0 %v6539_v25  ;;  %v6641_v47 = vld [vmem:[%s10119_s7 + $0x58] sm:$0xff] }
 0x18a   :  { %949 = vmatpush.msra.mxu1 %v6378_v33  ;;  %1035 = vmatpush.msrb.mxu3 %v6427_v6 }
 0x18b   :  { %1063 = vmatpush.msra.mxu0 %v6558_v36 }
 0x18c   :  { %950 = vmatpush.msra.mxu1 %v6385_v3  ;;  %1036 = vmatpush.msrb.mxu3 %v6445_v10 }
 0x18d   :  { %756 = vmatpush.bf16.msra.mxu2 %v4918_v56  ;;  %1064 = vmatpush.msra.mxu0 %v6580_v40  ;;  %v6678_v56 = vld [vmem:[%s10119_s7 + $0x28] sm:$0xff] }
 0x18e   :  { %951 = vmatpush.msra.mxu1 %v6391_v19  ;;  %1037 = vmatpush.msrb.mxu3 %v6462_v15 }
 0x18f   :  { %1065 = vmatpush.msra.mxu0 %v6598_v42 }
 0x190   :  { %952 = vmatpush.msra.mxu1 %v6397_v4  ;;  %1038 = vmatpush.msrb.mxu3 %v6478_v22 }
 0x191   :  { %959 = vmatpush.msrb.mxu2 %v6422_v5  ;;  %1066 = vmatpush.msra.mxu0 %v6616_v43 }
 0x192   :  { %953 = vmatpush.msra.mxu1 %v6403_v23  ;;  %1039 = vmatpush.msrb.mxu3 %v6496_v27 }
 0x193   :  { %1067 = vmatpush.msra.mxu0 %v6634_v46  ;;  %v6707_v46 = vld [vmem:[%s10120_s9] sm:$0xff] }
 0x194   :  { %5049 = vmatmul.msk.bf16.gmra.mxu2 %vm165_vm1, %v6144_v9  ;;  %5055 = vmatmul.msk.bf16.vlgmr.msrb.gmra.mxu1 %vm165_vm1, %v6202_v1 }
 0x195   :  { %5053 = vmatmul.msk.bf16.gmra.mxu3 %vm165_vm1, %v6144_v9  ;;  %954 = vmatpush.msra.mxu1 %v6409_v37 }
 0x196   :  { %1040 = vmatpush.msrb.mxu3 %v6517_v31  ;;  %1068 = vmatpush.msra.mxu0 %v6652_v50  ;;  %v10276_v50 = vmov 0.0  }
 0x198   :  { %1041 = vmatpush.msrb.mxu3 %v6534_v8  ;;  %1069 = vmatpush.msra.mxu0 %v6670_v53  ;;  %v6699_v53 = vld [vmem:[%s10119_s7 + $0x10] sm:$0xff] }
 0x19a   :  { %1042 = vmatpush.msrb.mxu3 %v6553_v13  ;;  %1070 = vmatpush.msra.mxu0 %v6685_v57 }
 0x19b   :  { %1071 = vmatmul.f32.vlgmr.msra.gmra.mxu0 %v10276_v50 }
 0x19c   :  { %1043 = vmatpush.msrb.mxu3 %v6575_v39  ;;  %1303 = vmatpush.msrb.mxu0 %v6422_v5  ;;  %v6735_v5 = vld [vmem:[%s10120_s9 + $0x148] sm:$0xff] }
 0x19e   :  { %1044 = vmatpush.msrb.mxu3 %v6593_v32 }
 0x1a0   :  { %1045 = vmatpush.msrb.mxu3 %v6611_v41 }
 0x1a2   :  { %1046 = vmatpush.msrb.mxu3 %v6629_v45 }
 0x1a4   :  { %5050 = vmatmul.msk.bf16.gmra.mxu2 %vm165_vm1, %v6170_v28  ;;  %5056 = vmatmul.msk.bf16.gmra.mxu1 %vm165_vm1, %v6243_v35 }
 0x1a5   :  { %5054 = vmatmul.msk.bf16.gmra.mxu3 %vm165_vm1, %v6170_v28 }
 0x1a6   :  { %1047 = vmatpush.msrb.mxu3 %v6647_v49 }
 0x1a8   :  { %1048 = vmatpush.msrb.mxu3 %v6665_v52 }
 0x1aa   :  { %1049 = vmatpush.msrb.mxu3 %v6691_v14 }
 0x1ac   :  { %1050 = vmatpush.msrb.mxu3 %v6707_v46 }
 0x1b4   :  { %5057 = vmatmul.msk.bf16.gmra.mxu1 %vm165_vm1, %v6144_v9  ;;  %5059 = vmatmul.msk.bf16.vlgmr.msra.gmra.mxu2 %vm165_vm1, %v6202_v1 }
 0x1b5   :  { %5063 = vmatmul.msk.bf16.vlgmr.msra.gmra.mxu3 %vm165_vm1, %v6202_v1  ;;  %v6440_v1 = vld [vmem:[%s10119_s7 + $0x160] sm:$0xff] }
 0x1b6   :  { %960 = vmatpush.msrb.mxu2 %v6440_v1  ;;  %1283 = vmatpush.msra.mxu3 %v6308_v58 }
 0x1b7   :  { %1304 = vmatpush.msrb.mxu0 %v6440_v1  ;;  %v6761_v1 = vld [vmem:[%s10120_s9 + $0x100] sm:$0xff] }
 0x1b8   :  { %961 = vmatpush.msrb.mxu2 %v6457_v12  ;;  %1284 = vmatpush.msra.mxu3 %v6313_v59  ;;  %v6745_v59 = vld [vmem:[%s10120_s9 + $0x130] sm:$0xff] }
 0x1b9   :  { %1305 = vmatpush.msrb.mxu0 %v6457_v12 }
 0x1ba   :  { %962 = vmatpush.msrb.mxu2 %v6473_v17  ;;  %1285 = vmatpush.msra.mxu3 %v6319_v60  ;;  %v6753_v60 = vld [vmem:[%s10120_s9 + $0x118] sm:$0xff] }
 0x1bb   :  { %1306 = vmatpush.msrb.mxu0 %v6473_v17 }
 0x1bc   :  { %963 = vmatpush.msrb.mxu2 %v6491_v26  ;;  %1286 = vmatpush.msra.mxu3 %v6325_v61  ;;  %v6766_v61 = vld [vmem:[%s10120_s9 + $0xe8] sm:$0xff] }
 0x1bd   :  { %1307 = vmatpush.msrb.mxu0 %v6491_v26  ;;  %v984_v26 = vld [vmem:[%s10120_s9 + $0x28] sm:$0xff] }
 0x1be   :  { %964 = vmatpush.msrb.mxu2 %v6512_v29  ;;  %1287 = vmatpush.msra.mxu3 %v6331_v62 }
 0x1bf   :  { %1308 = vmatpush.msrb.mxu0 %v6512_v29 }
 0x1c0   :  { %965 = vmatpush.msrb.mxu2 %v6529_v21  ;;  %1288 = vmatpush.msra.mxu3 %v6337_v63  ;;  %v6783_v63 = vld [vmem:[%s10120_s9 + $0xd0] sm:$0xff] }
 0x1c1   :  { %1309 = vmatpush.msrb.mxu0 %v6529_v21 }
 0x1c2   :  { %966 = vmatpush.msrb.mxu2 %v6547_v30  ;;  %1289 = vmatpush.msra.mxu3 %v6343_v18  ;;  %v6798_v18 = vld [vmem:[%s10120_s9 + $0xa0] sm:$0xff] }
 0x1c3   :  { %1310 = vmatpush.msrb.mxu0 %v6547_v30 }
 0x1c4   :  { %5058 = vmatmul.msk.bf16.gmra.mxu1 %vm165_vm1, %v6170_v28  ;;  %5060 = vmatmul.msk.bf16.gmra.mxu2 %vm165_vm1, %v6243_v35 }
 0x1c5   :  { %5064 = vmatmul.msk.bf16.gmra.mxu3 %vm165_vm1, %v6243_v35  ;;  %967 = vmatpush.msrb.mxu2 %v6570_v38  ;;  %v6588_v35 = vld [vmem:[%s10119_s7 + $0xa0] sm:$0xff] }
 0x1c6   :  { %1311 = vmatpush.msrb.mxu0 %v6570_v38  ;;  %1290 = vmatpush.msra.mxu3 %v6350_v20  ;;  %v6804_v20 = vld [vmem:[%s10120_s9 + $0x88] sm:$0xff] }
 0x1c7   :  { %968 = vmatpush.msrb.mxu2 %v6588_v35 }
 0x1c8   :  { %1312 = vmatpush.msrb.mxu0 %v6588_v35  ;;  %1291 = vmatpush.msra.mxu3 %v6362_v55  ;;  %v993_v55 = vld [vmem:[%s10120_s9 + $0x70] sm:$0xff] }
 0x1c9   :  { %969 = vmatpush.msrb.mxu2 %v6605_v48 }
 0x1ca   :  { %1313 = vmatpush.msrb.mxu0 %v6605_v48  ;;  %1292 = vmatpush.msra.mxu3 %v6367_v0  ;;  %v990_v0 = vld [vmem:[%s10120_s9 + $0x58] sm:$0xff] }
 0x1cb   :  { %970 = vmatpush.msrb.mxu2 %v6623_v44 }
 0x1cc   :  { %1314 = vmatpush.msrb.mxu0 %v6623_v44  ;;  %1293 = vmatpush.msra.mxu3 %v6378_v33  ;;  %v987_v33 = vld [vmem:[%s10120_s9 + $0x40] sm:$0xff] }
 0x1cd   :  { %971 = vmatpush.msrb.mxu2 %v6641_v47 }
 0x1ce   :  { %1315 = vmatpush.msrb.mxu0 %v6641_v47  ;;  %1294 = vmatpush.msra.mxu3 %v6385_v3 }
 0x1cf   :  { %972 = vmatpush.msrb.mxu2 %v6660_v51 }
 0x1d0   :  { %1316 = vmatpush.msrb.mxu0 %v6660_v51  ;;  %1295 = vmatpush.msra.mxu3 %v6391_v19  ;;  %v981_v19 = vld [vmem:[%s10120_s9 + $0x10] sm:$0xff] }
 0x1d1   :  { %973 = vmatpush.msrb.mxu2 %v6678_v56 }
 0x1d2   :  { %1317 = vmatpush.msrb.mxu0 %v6678_v56  ;;  %1296 = vmatpush.msra.mxu3 %v6397_v4  ;;  %v6855_v4 = vld [vmem:[%s10121_s6] sm:$0x3f] }
 0x1d3   :  { %974 = vmatpush.msrb.mxu2 %v6699_v53  ;;  %v6906_v35 = vperm.slane %v6855_v4, 1 }
 0x1d4   :  { %5061 = vmatmul.msk.bf16.gmra.mxu2 %vm165_vm1, %v6144_v9  ;;  %955 = vmatmul.f32.vlgmr.msra.gmra.mxu1 %v10276_v50 }
 0x1d5   :  { %5065 = vmatmul.msk.bf16.gmra.mxu3 %vm165_vm1, %v6144_v9  ;;  %v6719_v9 = vld [vmem:[%s10120_s9 + $0x178] sm:$0xff]  ;;  %1318 = vmatpush.msrb.mxu0 %v6699_v53  ;;  %10290 = vst [vmem:[#allocation21_spill] sm:$0xff] %v6906_v35 }
 0x1d6   :  { %1075 = vmatpush.msrb.mxu1 %v6719_v9  ;;  %1297 = vmatpush.msra.mxu3 %v6403_v23 }
 0x1d7   :  { %v6711_v43 = vpop.f32.mrf.mxu3 }
 0x1d8   :  { %10277 = vst [vmem:[#allocation8_spill] sm:$0xff] %v6711_v43  ;;  %v6727_v43 = vld [vmem:[%s10120_s9 + $0x160] sm:$0xff]  ;;  %1298 = vmatpush.msra.mxu3 %v6409_v37  ;;  %v6863_v37 = vperm.slane %v6855_v4, 0 }
 0x1d9   :  { %1076 = vmatpush.msrb.mxu1 %v6727_v43 }
 0x1da   :  { %10281 = vst [vmem:[#allocation12_spill] sm:$0xff] %v6863_v37 }
 0x1db   :  { %1077 = vmatpush.msrb.mxu1 %v6735_v5 }
 0x1dd   :  { %1078 = vmatpush.msrb.mxu1 %v6745_v59 }
 0x1df   :  { %v6740_v58 = vpop.f32.mrf.mxu3  ;;  %1079 = vmatpush.msrb.mxu1 %v6753_v60 }
 0x1e0   :  { %10278 = vst [vmem:[#allocation9_spill] sm:$0xff] %v6740_v58  ;;  %v7320_v58 = vld [vmem:[%s10120_s9 + $0x170] sm:$0xff] }
 0x1e1   :  { %1080 = vmatpush.msrb.mxu1 %v6761_v1 }
 0x1e3   :  { %1081 = vmatpush.msrb.mxu1 %v6766_v61 }
 0x1e4   :  { %5062 = vmatmul.msk.bf16.gmra.mxu2 %vm165_vm1, %v6170_v28 }
 0x1e5   :  { %5066 = vmatmul.msk.bf16.gmra.mxu3 %vm165_vm1, %v6170_v28  ;;  %1082 = vmatpush.msrb.mxu1 %v6783_v63  ;;  %v6791_v28 = vld [vmem:[%s10120_s9 + $0xb8] sm:$0xff] }
 0x1e7   :  { %v6778_v62 = vpop.f32.mrf.mxu3  ;;  %1083 = vmatpush.msrb.mxu1 %v6791_v28 }
 0x1e8   :  { %10279 = vst [vmem:[#allocation10_spill] sm:$0xff] %v6778_v62 }
 0x1e9   :  { %1084 = vmatpush.msrb.mxu1 %v6798_v18 }
 0x1eb   :  { %1085 = vmatpush.msrb.mxu1 %v6804_v20 }
 0x1ed   :  { %1086 = vmatpush.msrb.mxu1 %v993_v55 }
 0x1ef   :  { %v6812_v12 = vpop.f32.mrf.mxu3  ;;  %1087 = vmatpush.msrb.mxu1 %v990_v0 }
 0x1f0   :  { %10280 = vst [vmem:[#allocation11_spill] sm:$0xff] %v6812_v12  ;;  %v1213_v12 = vld [vmem:[%s10119_s7 + $0x30] sm:$0xff] }
 0x1f1   :  { %v6819_v17 = vpop.f32.mrf.mxu1  ;;  %1088 = vmatpush.msrb.mxu1 %v987_v33 }
 0x1f3   :  { %1089 = vmatpush.msrb.mxu1 %v984_v26 }
 0x1f4   :  { %975 = vmatmul.f32.vlgmr.msrb.gmra.mxu2 %v10276_v50 }
 0x1f5   :  { %1051 = vmatmul.f32.vlgmr.msrb.gmra.mxu3 %v10276_v50  ;;  %1090 = vmatpush.msrb.mxu1 %v981_v19 }
 0x1f6   :  { %1091 = vmatmul.f32.vlgmr.msrb.gmra.mxu1 %v10276_v50  ;;  %1419 = vmatpush.msrb.mxu3 %v6719_v9 }
 0x1f7   :  { %v6837_v3 = vpop.f32.mrf.mxu2  ;;  %1379 = vmatpush.msra.mxu1 %v6427_v6 }
 0x1f8   :  { %v6842_v29 = vpop.f32.mrf.mxu3  ;;  %1420 = vmatpush.msrb.mxu3 %v6727_v43 }
 0x1f9   :  { %v6845_v21 = vpop.f32.mrf.mxu1  ;;  %1380 = vmatpush.msra.mxu1 %v6445_v10 }
 0x1fa   :  { %1421 = vmatpush.msrb.mxu3 %v6735_v5 }
 0x1fb   :  { %1381 = vmatpush.msra.mxu1 %v6462_v15 }
 0x1fc   :  { %1422 = vmatpush.msrb.mxu3 %v6745_v59 }
 0x1fd   :  { %1382 = vmatpush.msra.mxu1 %v6478_v22 }
 0x1fe   :  { %1423 = vmatpush.msrb.mxu3 %v6753_v60 }
 0x1ff   :  { %v6859_v23 = vpop.f32.mrf.mxu2  ;;  %1383 = vmatpush.msra.mxu1 %v6496_v27  ;;  %v6891_v27 = vperm.slane %v6855_v4, 3 }
 0x200   :  { %v6865_v6 = vpop.f32.mrf.mxu3  ;;  %1424 = vmatpush.msrb.mxu3 %v6761_v1  ;;  %v6944_v1 = vperm.slane %v6855_v4, 4 }
 0x201   :  { %v647_v10 = vpop.f32.mrf.mxu1  ;;  %1384 = vmatpush.msra.mxu1 %v6517_v31  ;;  %10286 = vst [vmem:[#allocation17_spill] sm:$0xff] %v6891_v27 }
 0x202   :  { %v6870_v30 = vadd.f32 %v647_v10, %v6863_v37  ;;  %1425 = vmatpush.msrb.mxu3 %v6766_v61  ;;  %10304 = vst [vmem:[#allocation35_spill] sm:$0xff] %v6944_v1  ;;  %v6947_v61 = vperm.slane %v6855_v4, 5 }
 0x203   :  { %1385 = vmatpush.msra.mxu1 %v6534_v8 }
 0x204   :  { %10282 = vst [vmem:[#allocation13_spill] sm:$0xff] %v6870_v30  ;;  %1426 = vmatpush.msrb.mxu3 %v6783_v63 }
 0x205   :  { %1386 = vmatpush.msra.mxu1 %v6553_v13  ;;  %10305 = vst [vmem:[#allocation36_spill] sm:$0xff] %v6947_v61 }
 0x206   :  { %1427 = vmatpush.msrb.mxu3 %v6791_v28 }
 0x207   :  { %v6877_v15 = vpop.f32.mrf.mxu2  ;;  %1387 = vmatpush.msra.mxu1 %v6575_v39 }
 0x208   :  { %10283 = vst [vmem:[#allocation14_spill] sm:$0xff] %v6877_v15  ;;  %v6880_v22 = vpop.f32.mrf.mxu3  ;;  %1428 = vmatpush.msrb.mxu3 %v6798_v18  ;;  %v7440_v15 = vld [vmem:[%s10120_s9 + $0xf0] sm:$0xff] }
 0x209   :  { %10284 = vst [vmem:[#allocation15_spill] sm:$0xff] %v6880_v22  ;;  %v6883_v38 = vpop.f32.mrf.mxu1  ;;  %1388 = vmatpush.msra.mxu1 %v6593_v32  ;;  %v6910_v32 = vperm.slane %v6855_v4, 2  ;;  %v7408_v22 = vld [vmem:[%s10120_s9 + $0x130] sm:$0xff] }
 0x20a   :  { %10285 = vst [vmem:[#allocation16_spill] sm:$0xff] %v6883_v38  ;;  %1429 = vmatpush.msrb.mxu3 %v6804_v20  ;;  %v7394_v38 = vld [vmem:[%s10120_s9 + $0x120] sm:$0xff] }
 0x20b   :  { %1389 = vmatpush.msra.mxu1 %v6611_v41  ;;  %10291 = vst [vmem:[#allocation22_spill] sm:$0xff] %v6910_v32 }
 0x20c   :  { %1430 = vmatpush.msrb.mxu3 %v993_v55  ;;  %10335 = vst [vmem:[#allocation58_spill] sm:$0xff] %v7408_v22 }
 0x20d   :  { %1390 = vmatpush.msra.mxu1 %v6629_v45 }
 0x20e   :  { %1431 = vmatpush.msrb.mxu3 %v990_v0  ;;  %v6960_v0 = vld [vmem:[%s10122_s8] sm:$0x7] }
 0x20f   :  { %v6894_v31 = vpop.f32.mrf.mxu2  ;;  %1391 = vmatpush.msra.mxu1 %v6647_v49 }
 0x210   :  { %10287 = vst [vmem:[#allocation18_spill] sm:$0xff] %v6894_v31  ;;  %v6897_v8 = vpop.f32.mrf.mxu3  ;;  %1432 = vmatpush.msrb.mxu3 %v987_v33  ;;  %v913_v33 = vperm.slane %v6960_v0, 0  ;;  %v7389_v31 = vld [vmem:[%s10119_s7 + $0x10] sm:$0xff] }
 0x211   :  { %10288 = vst [vmem:[#allocation19_spill] sm:$0xff] %v6897_v8  ;;  %v729_v13 = vpop.f32.mrf.mxu1  ;;  %1392 = vmatpush.msra.mxu1 %v6665_v52  ;;  %v7370_v8 = vld [vmem:[%s10120_s9 + $0x140] sm:$0xff] }
 0x212   :  { %v6901_v39 = vadd.f32 %v729_v13, %v6891_v27  ;;  %1433 = vmatpush.msrb.mxu3 %v984_v26  ;;  %10331 = vst [vmem:[#allocation54_spill] sm:$0xff] %v7370_v8 }
 0x213   :  { %1393 = vmatpush.msra.mxu1 %v6691_v14  ;;  %10333 = vst [vmem:[#allocation56_spill] sm:$0xff] %v7389_v31 }
 0x214   :  { %10289 = vst [vmem:[#allocation20_spill] sm:$0xff] %v6901_v39  ;;  %1434 = vmatpush.msrb.mxu3 %v981_v19  ;;  %v936_v19 = vpop.f32.mrf.mxu0 }
 0x215   :  { %1394 = vmatpush.msra.mxu1 %v6707_v46 }
 0x217   :  { %v681_v48 = vpop.f32.mrf.mxu2 }
 0x218   :  { %v6913_v41 = vadd.f32 %v681_v48, %v6906_v35  ;;  %v710_v43 = vpop.f32.mrf.mxu3  ;;  %v643_v48 = vadd.f32 %v6819_v17, %v6863_v37 }
 0x219   :  { %v6917_v44 = vadd.f32 %v710_v43, %v6910_v32  ;;  %v6919_v45 = vpop.f32.mrf.mxu1  ;;  %v937_v43 = vadd.f32 %v936_v19, %v913_v33  ;;  %v1249_v19 = vld [vmem:[%s10119_s7 + $0x150] sm:$0xff] }
 0x21a   :  { %10292 = vst [vmem:[#allocation23_spill] sm:$0xff] %v6913_v41  ;;  %v7360_v41 = vld [vmem:[%s10119_s7 + $0x28] sm:$0xff] }
 0x21b   :  { %10293 = vst [vmem:[#allocation24_spill] sm:$0xff] %v6917_v44  ;;  %v7341_v44 = vld [vmem:[%s10120_s9 + $0x150] sm:$0xff] }
 0x21c   :  { %10294 = vst [vmem:[#allocation25_spill] sm:$0xff] %v6919_v45  ;;  %v1210_v45 = vld [vmem:[%s10119_s7 + $0x18] sm:$0xff] }
 0x21d   :  { %10330 = vst [vmem:[#allocation53_spill] sm:$0xff] %v7360_v41 }
 0x21f   :  { %v6921_v47 = vpop.f32.mrf.mxu2 }
 0x220   :  { %10295 = vst [vmem:[#allocation26_spill] sm:$0xff] %v6921_v47  ;;  %v6923_v14 = vpop.f32.mrf.mxu3 }
 0x221   :  { %10296 = vst [vmem:[#allocation27_spill] sm:$0xff] %v6923_v14  ;;  %v734_v49 = vpop.f32.mrf.mxu1 }
 0x222   :  { %v6926_v50 = vadd.f32 %v734_v49, %v6891_v27  ;;  %v1095_v49 = vadd.f32 %v937_v43, %v643_v48  ;;  %v672_v43 = vadd.f32 %v6837_v3, %v6906_v35  ;;  %v1240_v3 = vld [vmem:[%s10119_s7 + $0x108] sm:$0xff] }
 0x224   :  { %10297 = vst [vmem:[#allocation28_spill] sm:$0xff] %v6926_v50 }
 0x227   :  { %v686_v51 = vpop.f32.mrf.mxu2 }
 0x228   :  { %v6929_v52 = vadd.f32 %v686_v51, %v6906_v35  ;;  %v715_v53 = vpop.f32.mrf.mxu3 }
 0x229   :  { %v6932_v46 = vadd.f32 %v715_v53, %v6910_v32  ;;  %v6934_v56 = vpop.f32.mrf.mxu1 }
 0x22a   :  { %10298 = vst [vmem:[#allocation29_spill] sm:$0xff] %v6929_v52 }
 0x22b   :  { %10299 = vst [vmem:[#allocation30_spill] sm:$0xff] %v6932_v46 }
 0x22c   :  { %10300 = vst [vmem:[#allocation31_spill] sm:$0xff] %v6934_v56  ;;  %v7346_v56 = vld [vmem:[%s10120_s9 + $0x158] sm:$0xff] }
 0x22d   :  { %10328 = vst [vmem:[#allocation51_spill] sm:$0xff] %v7346_v56 }
 0x22f   :  { %v6936_v9 = vpop.f32.mrf.mxu2 }
 0x230   :  { %10301 = vst [vmem:[#allocation32_spill] sm:$0xff] %v6936_v9  ;;  %v6938_v5 = vpop.f32.mrf.mxu3 }
 0x231   :  { %10302 = vst [vmem:[#allocation33_spill] sm:$0xff] %v6938_v5  ;;  %v739_v59 = vpop.f32.mrf.mxu1 }
 0x232   :  { %v6941_v60 = vadd.f32 %v739_v59, %v6891_v27 }
 0x234   :  { %10303 = vst [vmem:[#allocation34_spill] sm:$0xff] %v6941_v60  ;;  %v7382_v60 = vld [vmem:[%s10120_s9 + $0x148] sm:$0xff] }
 0x235   :  { %10332 = vst [vmem:[#allocation55_spill] sm:$0xff] %v7382_v60 }
 0x237   :  { %v758_v63 = vpop.f32.mrf.mxu2 }
 0x238   :  { %v6950_v28 = vadd.f32 %v758_v63, %v6944_v1  ;;  %v787_v18 = vpop.f32.mrf.mxu3 }
 0x239   :  { %v6953_v20 = vadd.f32 %v787_v18, %v6947_v61  ;;  %v6955_v55 = vpop.f32.mrf.mxu1 }
 0x23a   :  { %10306 = vst [vmem:[#allocation37_spill] sm:$0xff] %v6950_v28  ;;  %v914_v28 = vperm.slane %v6960_v0, 1 }
 0x23b   :  { %10307 = vst [vmem:[#allocation38_spill] sm:$0xff] %v6953_v20  ;;  %v5067_v20 = vmul.f32 -1.442695, %v1095_v49 }
 0x23c   :  { %10308 = vst [vmem:[#allocation39_spill] sm:$0xff] %v6955_v55 }
 0x23d   :  { %5521 = vpow2.f32 %v5067_v20  ;;  %v1246_v20 = vld [vmem:[%s10119_s7 + $0x138] sm:$0xff] }
 0x23f   :  { %v6963_v26 = vpop.f32.mrf.mxu2 }
 0x240   :  { %10309 = vst [vmem:[#allocation40_spill] sm:$0xff] %v6963_v26  ;;  %v6965_v4 = vpop.f32.mrf.mxu3  ;;  %v1072_v26 = vpop.f32.mrf.mxu0 }
 0x241   :  { %10310 = vst [vmem:[#allocation41_spill] sm:$0xff] %v6965_v4  ;;  %v744_v10 = vpop.f32.mrf.mxu1 }
 0x242   :  { %v6968_v13 = vadd.f32 %v744_v10, %v6891_v27  ;;  %v1252_v10 = vld [vmem:[%s10119_s7 + $0x168] sm:$0xff] }
 0x243   :  { %1263 = vmatpush.msra.mxu2 %v1252_v10  ;;  %1607 = vmatpush.msra.mxu0 %v1252_v10  ;;  %v5522_v10 = vpop.eup %5521 }
 0x245   :  { %1264 = vmatpush.msra.mxu2 %v1249_v19  ;;  %1608 = vmatpush.msra.mxu0 %v1249_v19  ;;  %v7004_v19 = vadd.f32 1.0, %v5522_v10 }
 0x247   :  { %v763_v51 = vpop.f32.mrf.mxu2  ;;  %1265 = vmatpush.msra.mxu2 %v1246_v20  ;;  %1609 = vmatpush.msra.mxu0 %v1246_v20  ;;  %v1111_v47 = vand.u32 2147483648, %v7004_v19  ;;  %vm1105_vm3 = vweird.f32 %v7004_v19 }
 0x248   :  { %v6973_v53 = vadd.f32 %v763_v51, %v6944_v1  ;;  %v792_v59 = vpop.f32.mrf.mxu3 }
 0x249   :  { %v6976_v63 = vadd.f32 %v792_v59, %v6947_v61  ;;  %v6978_v18 = vpop.f32.mrf.mxu1  ;;  %v1243_v59 = vld [vmem:[%s10119_s7 + $0x120] sm:$0xff] }
 0x24a   :  { %10311 = vst [vmem:[#allocation42_spill] sm:$0xff] %v6973_v53  ;;  %1266 = vmatpush.msra.mxu2 %v1243_v59  ;;  %1610 = vmatpush.msra.mxu0 %v1243_v59 }
 0x24b   :  { %10312 = vst [vmem:[#allocation43_spill] sm:$0xff] %v6976_v63 }
 0x24c   :  { %1267 = vmatpush.msra.mxu2 %v1240_v3  ;;  %1611 = vmatpush.msra.mxu0 %v1240_v3 }
 0x24f   :  { %v6984_v17 = vpop.f32.mrf.mxu2 }
 0x250   :  { %10313 = vst [vmem:[#allocation44_spill] sm:$0xff] %v6984_v17  ;;  %v6986_v33 = vpop.f32.mrf.mxu3  ;;  %v7353_v17 = vld [vmem:[%s10120_s9 + $0x160] sm:$0xff] }
 0x251   :  { %10314 = vst [vmem:[#allocation45_spill] sm:$0xff] %v6986_v33  ;;  %v956_v48 = vpop.f32.mrf.mxu1  ;;  %v7336_v33 = vld [vmem:[%s10119_s7 + $0x40] sm:$0xff] }
 0x252   :  { %v957_v49 = vadd.f32 %v956_v48, %v914_v28  ;;  %10327 = vst [vmem:[#allocation50_spill] sm:$0xff] %v7336_v33 }
 0x253   :  { %10329 = vst [vmem:[#allocation52_spill] sm:$0xff] %v7353_v17 }
 0x254   :  { %v1115_v51 = vadd.f32 %v957_v49, %v672_v43  ;;  %v1237_v43 = vld [vmem:[%s10119_s7 + $0xf0] sm:$0xff]  ;;  %v1234_v49 = vld [vmem:[%s10119_s7 + $0xd8] sm:$0xff] }
 0x255   :  { %1268 = vmatpush.msra.mxu2 %v1237_v43  ;;  %1612 = vmatpush.msra.mxu0 %v1237_v43  ;;  %v1225_v43 = vld [vmem:[%s10119_s7 + $0x90] sm:$0xff] }
 0x256   :  { %v5068_v5 = vmul.f32 -1.442695, %v1115_v51  ;;  %v1228_v51 = vld [vmem:[%s10119_s7 + $0xa8] sm:$0xff] }
 0x257   :  { %v7002_v28 = vpop.f32.mrf.mxu2  ;;  %1269 = vmatpush.msra.mxu2 %v1234_v49  ;;  %1613 = vmatpush.msra.mxu0 %v1234_v49 }
 0x258   :  { %10315 = vst [vmem:[#allocation46_spill] sm:$0xff] %v7002_v28  ;;  %5523 = vpow2.f32 %v5068_v5  ;;  %v7006_v48 = vpop.f32.mrf.mxu3  ;;  %v1231_v5 = vld [vmem:[%s10119_s7 + $0xc0] sm:$0xff] }
 0x259   :  { %10316 = vst [vmem:[#allocation47_spill] sm:$0xff] %v7006_v48  ;;  %5525 = vrcp.f32 %v7004_v19  ;;  %1270 = vmatpush.msra.mxu2 %v1231_v5  ;;  %1614 = vmatpush.msra.mxu0 %v1231_v5  ;;  %v1222_v5 = vld [vmem:[%s10119_s7 + $0x78] sm:$0xff]  ;;  %v7375_v28 = vld [vmem:[%s10123_s10] sm:$0x7] }
 0x25a   :  { %v7365_v48 = vld [vmem:[%s10120_s9 + $0x138] sm:$0xff] }
 0x25b   :  { %1271 = vmatpush.msra.mxu2 %v1228_v51  ;;  %1615 = vmatpush.msra.mxu0 %v1228_v51 }
 0x25d   :  { %1272 = vmatpush.msra.mxu2 %v1225_v43  ;;  %1616 = vmatpush.msra.mxu0 %v1225_v43  ;;  %v1216_v43 = vld [vmem:[%s10119_s7 + $0x48] sm:$0xff] }
 0x25e   :  { %v5524_v20 = vpop.eup %5523 }
 0x25f   :  { %v7021_v59 = vpop.f32.mrf.mxu2  ;;  %v7023_v10 = vadd.f32 1.0, %v5524_v20  ;;  %v5526_v49 = vpop.eup %5525  ;;  %1273 = vmatpush.msra.mxu2 %v1222_v5  ;;  %1617 = vmatpush.msra.mxu0 %v1222_v5  ;;  %v1219_v20 = vld [vmem:[%s10119_s7 + $0x60] sm:$0xff] }
 0x260   :  { %10317 = vst [vmem:[#allocation48_spill] sm:$0xff] %v7021_v59  ;;  %v7025_v3 = vpop.f32.mrf.mxu3  ;;  %v1101_v51 = vmul.f32 %v5526_v49, %v7004_v19  ;;  %v7046_v5 = vld [vmem:[%s10123_s10] sm:$0x7]  ;;  %vm1106_vm2 = vweird.f32 %v5526_v49  ;;  %v1373_v59 = vperm.slane %v7375_v28, 0 }
 0x261   :  { %10318 = vst [vmem:[#allocation49_spill] sm:$0xff] %v7025_v3  ;;  %5527 = vrcp.f32 %v7023_v10  ;;  %1274 = vmatpush.msra.mxu2 %v1219_v20  ;;  %1618 = vmatpush.msra.mxu0 %v1219_v20  ;;  %v1030_v46 = vperm.slane %v7046_v5, 1  ;;  %vm1107_vm4 = vmor %vm1105_vm3, %vm1106_vm2  ;;  %vm1125_vm7 = vweird.f32 %v7023_v10 }
 0x262   :  { %v1102_v20 = vsub.f32 1.0, %v1101_v51 }
 0x263   :  { %1275 = vmatpush.msra.mxu2 %v1216_v43  ;;  %1619 = vmatpush.msra.mxu0 %v1216_v43  ;;  %v1207_v43 = vld [vmem:[%s10119_s7] sm:$0xff] }
 0x264   :  { %v1103_v52 = vmul.f32 %v5526_v49, %v1102_v20 }
 0x265   :  { %1276 = vmatpush.msra.mxu2 %v1213_v12  ;;  %1620 = vmatpush.msra.mxu0 %v1213_v12  ;;  %v1073_v12 = vadd.f32 %v1072_v26, %v1030_v46  ;;  %v1109_v46 = vand.u32 2147483647, %v7004_v19  ;;  %v915_v26 = vperm.slane %v6960_v0, 2  ;;  %v747_v0 = vadd.f32 %v6978_v18, %v6891_v27 }
 0x266   :  { %v1104_v50 = vadd.f32 %v5526_v49, %v1103_v52  ;;  %v1029_v52 = vperm.slane %v7046_v5, 0 }
 0x267   :  { %v7041_v39 = vpop.f32.mrf.mxu2  ;;  %v7053_v4 = vpop.eup %5527  ;;  %1277 = vmatpush.msra.mxu2 %v1210_v45  ;;  %1621 = vmatpush.msra.mxu0 %v1210_v45  ;;  %vm1110_vm5 = vcmp.eq.f32.partialorder %v1109_v46, 8.507059e+37 }
 0x268   :  { %v7048_v9 = vpop.f32.mrf.mxu3  ;;  %v1121_v51 = vmul.f32 %v7053_v4, %v7023_v10  ;;  %vm1126_vm6 = vweird.f32 %v7053_v4 }
 0x269   :  { %1278 = vmatpush.msra.mxu2 %v1207_v43  ;;  %1622 = vmatpush.msra.mxu0 %v1207_v43  ;;  %vm1127_vm8 = vmor %vm1125_vm7, %vm1126_vm6 }
 0x26a   :  { %v1122_v14 = vsub.f32 1.0, %v1121_v51 }
 0x26b   :  { %1399 = vmatpush.msrb.mxu2 %v6373_v2 }
 0x26d   :  { %1400 = vmatpush.msrb.mxu2 %v6432_v7  ;;  %v1123_v7 = vmul.f32 %v7053_v4, %v1122_v14 }
 0x26f   :  { %v775_v62 = vpop.f32.mrf.mxu2  ;;  %1401 = vmatpush.msrb.mxu2 %v6450_v11 }
 0x270   :  { %v776_v63 = vadd.f32 %v775_v62, %v6944_v1  ;;  %v7066_v53 = vpop.f32.mrf.mxu3  ;;  %v1108_v62 = vsel %vm1107_vm4, %v5526_v49, %v1104_v50 }
 0x271   :  { %1402 = vmatpush.msrb.mxu2 %v6467_v16  ;;  %v1124_v16 = vadd.f32 %v7053_v4, %v1123_v7 }
 0x272   :  { %v1162_v45 = vadd.f32 %v1073_v12, %v776_v63  ;;  %v1112_v63 = vor.u32 1.1754944e-38, %v1111_v47  ;;  %v701_v47 = vadd.f32 %v6842_v29, %v6910_v32 }
 0x273   :  { %1403 = vmatpush.msrb.mxu2 %v6485_v24  ;;  %v1131_v24 = vand.u32 2147483648, %v7023_v10  ;;  %v1128_v12 = vsel %vm1127_vm8, %v7053_v4, %v1124_v16 }
 0x274   :  { %v5070_v2 = vmul.f32 -1.442695, %v1162_v45  ;;  %v1113_v43 = vsel %vm1110_vm5, %v1112_v63, %v1108_v62 }
 0x275   :  { %1404 = vmatpush.msrb.mxu2 %v6503_v54  ;;  %v1129_v54 = vand.u32 2147483647, %v7023_v10  ;;  %v1132_v46 = vor.u32 1.1754944e-38, %v1131_v24  ;;  %v861_v10 = vld [vmem:[%s10124_s1] sm:$0xff] }
 0x276   :  { %5529 = vpow2.f32 %v5070_v2  ;;  %v1190_v2 = vsub.f32 1.0, %v861_v10 }
 0x277   :  { %v976_v11 = vpop.f32.mrf.mxu2  ;;  %1405 = vmatpush.msrb.mxu2 %v6522_v34  ;;  %vm1130_vm9 = vcmp.eq.f32.partialorder %v1129_v54, 8.507059e+37 }
 0x278   :  { %v977_v20 = vadd.f32 %v976_v11, %v915_v26  ;;  %v1052_v19 = vpop.f32.mrf.mxu3  ;;  %v1133_v34 = vsel %vm1130_vm9, %v1132_v46, %v1128_v12  ;;  %v10319_v26 = vld [vmem:[#allocation4_spill] sm:$0xff] }
 0x279   :  { %v1053_v14 = vadd.f32 %v1052_v19, %v1029_v52  ;;  %1406 = vmatpush.msrb.mxu2 %v6539_v25  ;;  %v1138_v25 = vsub.f32 1.0, %v1133_v34  ;;  %v10320_v52 = vld [vmem:[#allocation5_spill] sm:$0xff]  ;;  %v10323_v19 = vld [vmem:[#allocation7_spill] sm:$0xff] }
 0x27a   :  { %v1135_v50 = vmul.f32 %v1113_v43, %v977_v20  ;;  %v1191_v20 = vmul.f32 0.0, %v1190_v2  ;;  %v10321_v43 = vld [vmem:[#allocation6_spill] sm:$0xff] }
 0x27b   :  { %v1142_v49 = vadd.f32 %v1053_v14, %v747_v0  ;;  %1407 = vmatpush.msrb.mxu2 %v6558_v36  ;;  %v1140_v36 = vmul.f32 0.0, %v1133_v34  ;;  %10325 = vst [vmem:[#allocation6_spill] sm:$0xff] %v7320_v58 }
 0x27c   :  { %v1136_v18 = vadd.f32 %v1135_v50, %v701_v47  ;;  %v5530_v51 = vpop.eup %5529  ;;  %v1031_v50 = vperm.slane %v7046_v5, 2  ;;  %v805_v5 = vadd.f32 %v7066_v53, %v6947_v61 }
 0x27d   :  { %v5069_v45 = vmul.f32 -1.442695, %v1142_v49  ;;  %v1166_v29 = vadd.f32 1.0, %v5530_v51  ;;  %1408 = vmatpush.msrb.mxu2 %v6580_v40  ;;  %v1092_v49 = vpop.f32.mrf.mxu1 }
 0x27e   :  { %5531 = vtanh.f32 %v1136_v18 }
 0x27f   :  { %5533 = vpow2.f32 %v5069_v45  ;;  %1409 = vmatpush.msrb.mxu2 %v6598_v42  ;;  %vm1172_vm15 = vweird.f32 %v1166_v29 }
 0x280   :  { %5535 = vrcp.f32 %v1166_v29 }
 0x281   :  { %1410 = vmatpush.msrb.mxu2 %v10319_v26 }
 0x283   :  { %1411 = vmatpush.msrb.mxu2 %v10320_v52 }
 0x284   :  { %v5532_v4 = vpop.eup %5531 }
 0x285   :  { %v1139_v7 = vmul.f32 %v5532_v4, %v1138_v25  ;;  %v5534_v62 = vpop.eup %5533  ;;  %1412 = vmatpush.msrb.mxu2 %v10321_v43  ;;  %v1178_v4 = vand.u32 2147483648, %v1166_v29 }
 0x286   :  { %v1146_v11 = vadd.f32 1.0, %v5534_v62  ;;  %v5536_v42 = vpop.eup %5535 }
 0x287   :  { %v1141_v63 = vadd.f32 %v1140_v36, %v1139_v7  ;;  %1413 = vmatpush.msrb.mxu2 %v10323_v19  ;;  %v1168_v16 = vmul.f32 %v5536_v42, %v1166_v29  ;;  %vm1173_vm14 = vweird.f32 %v5536_v42  ;;  %v1176_v7 = vand.u32 2147483647, %v1166_v29 }
 0x288   :  { %5537 = vrcp.f32 %v1146_v11  ;;  %v1158_v18 = vand.u32 2147483648, %v1146_v11  ;;  %v1156_v12 = vand.u32 2147483647, %v1146_v11  ;;  %vm1152_vm11 = vweird.f32 %v1146_v11  ;;  %vm1174_vm2 = vmor %vm1172_vm15, %vm1173_vm14 }
 0x289   :  { %v7100_v40 = vmul.f32 %v1141_v63, %v861_v10  ;;  %1414 = vmatpush.msrb.mxu2 %v6685_v57  ;;  %v1169_v24 = vsub.f32 1.0, %v1168_v16  ;;  %v1093_v57 = vadd.f32 %v1092_v49, %v1031_v50  ;;  %v1179_v52 = vor.u32 1.1754944e-38, %v1178_v4  ;;  %v7133_v50 = vld [vmem:[%s10119_s7 + $0x158] sm:$0xff]  ;;  %v7145_v49 = vld [vmem:[%s10119_s7 + $0x128] sm:$0xff] }
 0x28a   :  { %v1159_v34 = vor.u32 1.1754944e-38, %v1158_v18  ;;  %vm1157_vm13 = vcmp.eq.f32.partialorder %v1156_v12, 8.507059e+37  ;;  %vm1177_vm3 = vcmp.eq.f32.partialorder %v1176_v7, 8.507059e+37  ;;  %v7151_v18 = vld [vmem:[%s10119_s7 + $0x178] sm:$0xff]  ;;  %v7163_v12 = vld [vmem:[%s10119_s7 + $0x160] sm:$0xff] }
 0x28b   :  { %10322 = vst [vmem:[#allocation4_spill] sm:$0xff] %v7100_v40  ;;  %v7104_v0 = vadd.f32 %v1191_v20, %v7100_v40  ;;  %v1170_v45 = vmul.f32 %v5536_v42, %v1169_v24  ;;  %v7206_v4 = vld [vmem:[%s10119_s7 + $0x118] sm:$0xff] }
 0x28c   :  { %v7310_v40 = vld [vmem:[%s10119_s7 + $0x58] sm:$0xff] }
 0x28d   :  { %1279 = vmatmul.f32.vlgmr.msra.gmra.mxu2 %v7104_v0  ;;  %1299 = vmatmul.f32.vlgmr.msra.gmra.mxu3 %v7104_v0  ;;  %v1171_v2 = vadd.f32 %v5536_v42, %v1170_v45  ;;  %v7169_v45 = vld [vmem:[%s10119_s7 + $0xf8] sm:$0xff] }
 0x28e   :  { %1319 = vmatmul.f32.vlgmr.msrb.gmra.mxu0 %v7104_v0  ;;  %v5538_v14 = vpop.eup %5537  ;;  %1647 = vmatpush.msra.mxu2 %v7151_v18 }
 0x28f   :  { %v1148_v47 = vmul.f32 %v5538_v14, %v1146_v11  ;;  %vm1153_vm10 = vweird.f32 %v5538_v14  ;;  %v1175_v62 = vsel %vm1174_vm2, %v5536_v42, %v1171_v2  ;;  %v862_v11 = vld [vmem:[%s10124_s1 + $0x38] sm:$0xff]  ;;  %v7127_v42 = vld [vmem:[%s10119_s7 + $0x170] sm:$0xff]  ;;  %1743 = vmatpush.msrb.mxu0 %v7320_v58 }
 0x290   :  { %vm1154_vm12 = vmor %vm1152_vm11, %vm1153_vm10  ;;  %v1180_v63 = vsel %vm1177_vm3, %v1179_v52, %v1175_v62  ;;  %v1194_v43 = vsub.f32 1.0, %v862_v11  ;;  %1627 = vmatpush.msrb.mxu1 %v7127_v42  ;;  %1648 = vmatpush.msra.mxu2 %v7163_v12  ;;  %v7194_v2 = vld [vmem:[%s10119_s7 + $0x130] sm:$0xff]  ;;  %v645_v62 = vadd.f32 %v6845_v21, %v6863_v37  ;;  %v674_v52 = vadd.f32 %v6859_v23, %v6906_v35  ;;  %v7234_v23 = vld [vmem:[%s10119_s7 + $0xe8] sm:$0xff] }
 0x291   :  { %v1149_v54 = vsub.f32 1.0, %v1148_v47  ;;  %v1185_v20 = vsub.f32 1.0, %v1180_v63  ;;  %v1187_v53 = vmul.f32 0.0, %v1180_v63  ;;  %1744 = vmatpush.msrb.mxu0 %v7346_v56  ;;  %v7399_v37 = vld [vmem:[%s10120_s9 + $0x128] sm:$0xff]  ;;  %v7425_v56 = vld [vmem:[%s10120_s9 + $0x110] sm:$0xff]  ;;  %v7430_v58 = vld [vmem:[%s10120_s9 + $0x118] sm:$0xff] }
 0x292   :  { %v1195_v47 = vmul.f32 0.0, %v1194_v43  ;;  %1628 = vmatpush.msrb.mxu1 %v7133_v50  ;;  %v7228_v43 = vld [vmem:[%s10119_s7 + $0x98] sm:$0xff]  ;;  %10334 = vst [vmem:[#allocation57_spill] sm:$0xff] %v7399_v37 }
 0x293   :  { %v1150_v51 = vmul.f32 %v5538_v14, %v1149_v54  ;;  %v7139_v54 = vld [vmem:[%s10119_s7 + $0x140] sm:$0xff]  ;;  %1745 = vmatpush.msrb.mxu0 %v7370_v8  ;;  %v7420_v8 = vld [vmem:[%s10120_s9 + $0x108] sm:$0xff]  ;;  %10336 = vst [vmem:[#allocation59_spill] sm:$0xff] %v7425_v56  ;;  %v7445_v35 = vld [vmem:[%s10120_s9 + $0xf8] sm:$0xff] }
 0x294   :  { %1629 = vmatpush.msrb.mxu1 %v7139_v54  ;;  %10337 = vst [vmem:[#allocation60_spill] sm:$0xff] %v7430_v58 }
 0x295   :  { %v1151_v46 = vadd.f32 %v5538_v14, %v1150_v51  ;;  %v7157_v51 = vld [vmem:[%s10119_s7 + $0x110] sm:$0xff]  ;;  %1746 = vmatpush.msrb.mxu0 %v7399_v37  ;;  %10338 = vst [vmem:[#allocation61_spill] sm:$0xff] %v7445_v35 }
 0x296   :  { %1630 = vmatpush.msrb.mxu1 %v7145_v49 }
 0x297   :  { %v1155_v10 = vsel %vm1154_vm12, %v5538_v14, %v1151_v46  ;;  %v7180_v46 = vld [vmem:[%s10122_s8] sm:$0x7]  ;;  %1747 = vmatpush.msrb.mxu0 %v7425_v56 }
 0x298   :  { %v1160_v25 = vsel %vm1157_vm13, %v1159_v34, %v1155_v10  ;;  %1631 = vmatpush.msrb.mxu1 %v7157_v51  ;;  %v7186_v34 = vld [vmem:[%s10119_s7 + $0xe0] sm:$0xff]  ;;  %v1257_v10 = vperm.slane %v7180_v46, 0 }
 0x299   :  { %v1182_v26 = vmul.f32 %v1160_v25, %v1093_v57  ;;  %v7175_v57 = vld [vmem:[%s10119_s7 + $0x148] sm:$0xff]  ;;  %v1258_v25 = vperm.slane %v7180_v46, 1  ;;  %v7453_v56 = vld [vmem:[%s10120_s9 + $0x100] sm:$0xff]  ;;  %1748 = vmatpush.msrb.mxu0 %v7445_v35 }
 0x29a   :  { %1632 = vmatpush.msrb.mxu1 %v7169_v45  ;;  %1649 = vmatpush.msra.mxu2 %v7175_v57  ;;  %10339 = vst [vmem:[#allocation62_spill] sm:$0xff] %v7453_v56 }
 0x29b   :  { %v1183_v36 = vadd.f32 %v1182_v26, %v805_v5  ;;  %v7200_v5 = vld [vmem:[%s10119_s7 + $0xc8] sm:$0xff] }
 0x29c   :  { %1633 = vmatpush.msrb.mxu1 %v7186_v34  ;;  %1650 = vmatpush.msra.mxu2 %v7194_v2 }
 0x29d   :  { %5539 = vtanh.f32 %v1183_v36  ;;  %v7212_v36 = vld [vmem:[%s10119_s7 + $0xb0] sm:$0xff] }
 0x29e   :  { %1634 = vmatpush.msrb.mxu1 %v7200_v5  ;;  %1651 = vmatpush.msra.mxu2 %v7206_v4 }
 0x2a0   :  { %1635 = vmatpush.msrb.mxu1 %v7212_v36 }
 0x2a2   :  { %1636 = vmatpush.msrb.mxu1 %v7228_v43 }
 0x2a3   :  { %v5540_v19 = vpop.eup %5539 }
 0x2a4   :  { %v1186_v16 = vmul.f32 %v5540_v19, %v1185_v20  ;;  %v7222_v20 = vld [vmem:[%s10119_s7 + $0x100] sm:$0xff] }
 0x2a5   :  { %1652 = vmatpush.msra.mxu2 %v7222_v20 }
 0x2a6   :  { %v1188_v14 = vadd.f32 %v1187_v53, %v1186_v16  ;;  %v7240_v16 = vld [vmem:[%s10119_s7 + $0x80] sm:$0xff] }
 0x2a7   :  { %1653 = vmatpush.msra.mxu2 %v7234_v23  ;;  %1637 = vmatpush.msrb.mxu1 %v7240_v16 }
 0x2a8   :  { %v7116_v24 = vmul.f32 %v1188_v14, %v862_v11 }
 0x2aa   :  { %10324 = vst [vmem:[#allocation5_spill] sm:$0xff] %v7116_v24  ;;  %v7119_v29 = vadd.f32 %v1195_v47, %v7116_v24  ;;  %v7246_v47 = vld [vmem:[%s10119_s7 + $0xd0] sm:$0xff] }
 0x2ab   :  { %1654 = vmatpush.msra.mxu2 %v7246_v47 }
 0x2ac   :  { %1395 = vmatmul.f32.vlgmr.msra.gmra.mxu1 %v7119_v29  ;;  %1415 = vmatmul.f32.vlgmr.msrb.gmra.mxu2 %v7119_v29 }
 0x2ad   :  { %1435 = vmatmul.f32.vlgmr.msrb.gmra.mxu3 %v7119_v29 }
 0x310   :  { %v1280_v26 = vpop.f32.mrf.mxu2  ;;  %v1300_v7 = vpop.f32.mrf.mxu3 }
 0x311   :  { %v1281_v63 = vadd.f32 %v1280_v26, %v1257_v10  ;;  %v1301_v11 = vadd.f32 %v1300_v7, %v1258_v25  ;;  %v7252_v10 = vld [vmem:[%s10119_s7 + $0x68] sm:$0xff]  ;;  %v7258_v25 = vld [vmem:[%s10119_s7 + $0xb8] sm:$0xff]  ;;  %v7264_v26 = vld [vmem:[%s10119_s7 + $0x50] sm:$0xff] }
 0x312   :  { %1638 = vmatpush.msrb.mxu1 %v7252_v10  ;;  %1655 = vmatpush.msra.mxu2 %v7258_v25  ;;  %v7270_v7 = vld [vmem:[%s10119_s7 + $0xa0] sm:$0xff] }
 0x313   :  { %v1439_v21 = vadd.f32 %v1281_v63, %v645_v62  ;;  %v1459_v19 = vadd.f32 %v1301_v11, %v674_v52  ;;  %v7276_v62 = vld [vmem:[%s10119_s7 + $0x38] sm:$0xff]  ;;  %v7282_v52 = vld [vmem:[%s10119_s7 + $0x88] sm:$0xff]  ;;  %v7288_v63 = vld [vmem:[%s10119_s7 + $0x20] sm:$0xff] }
 0x314   :  { %1639 = vmatpush.msrb.mxu1 %v7264_v26  ;;  %1656 = vmatpush.msra.mxu2 %v7270_v7 }
 0x315   :  { %v5071_v53 = vmul.f32 -1.442695, %v1439_v21  ;;  %v5072_v14 = vmul.f32 -1.442695, %v1459_v19  ;;  %v7294_v21 = vld [vmem:[%s10119_s7 + $0x70] sm:$0xff] }
 0x316   :  { %1640 = vmatpush.msrb.mxu1 %v7276_v62  ;;  %1657 = vmatpush.msra.mxu2 %v7282_v52 }
 0x317   :  { %5541 = vpow2.f32 %v5071_v53 }
 0x318   :  { %5543 = vpow2.f32 %v5072_v14  ;;  %1641 = vmatpush.msrb.mxu1 %v7288_v63  ;;  %1658 = vmatpush.msra.mxu2 %v7294_v21  ;;  %v7302_v14 = vld [vmem:[%s10119_s7 + $0x8] sm:$0xff] }
 0x31a   :  { %1642 = vmatpush.msrb.mxu1 %v7302_v14  ;;  %1659 = vmatpush.msra.mxu2 %v7310_v40 }
 0x31c   :  { %1660 = vmatpush.msra.mxu2 %v7336_v33  ;;  %v7486_v33 = vld [vmem:[%s10120_s9 + $0xc0] sm:$0xff] }
 0x31d   :  { %v5542_v11 = vpop.eup %5541 }
 0x31e   :  { %v5544_v19 = vpop.eup %5543  ;;  %v7296_v53 = vadd.f32 1.0, %v5542_v11  ;;  %v7315_v11 = vld [vmem:[%s10120_s9 + $0x168] sm:$0xff]  ;;  %1661 = vmatpush.msra.mxu2 %v7360_v41 }
 0x31f   :  { %v7304_v24 = vadd.f32 1.0, %v5544_v19  ;;  %1723 = vmatpush.msra.mxu3 %v7315_v11  ;;  %v7328_v19 = vld [vmem:[%s10120_s9 + $0x178] sm:$0xff] }
 0x320   :  { %5545 = vrcp.f32 %v7296_v53  ;;  %10326 = vst [vmem:[#allocation7_spill] sm:$0xff] %v7328_v19  ;;  %1763 = vmatpush.msra.mxu1 %v7328_v19  ;;  %1662 = vmatpush.msra.mxu2 %v7389_v31  ;;  %v1453_v41 = vand.u32 2147483647, %v7296_v53  ;;  %vm1449_vm5 = vweird.f32 %v7296_v53 }
 0x321   :  { %5547 = vrcp.f32 %v7304_v24  ;;  %1724 = vmatpush.msra.mxu3 %v7341_v44  ;;  %vm1469_vm9 = vweird.f32 %v7304_v24 }
 0x322   :  { %1764 = vmatpush.msra.mxu1 %v7353_v17  ;;  %vm1454_vm7 = vcmp.eq.f32.partialorder %v1453_v41, 8.507059e+37 }
 0x323   :  { %1725 = vmatpush.msra.mxu3 %v7365_v48 }
 0x324   :  { %1765 = vmatpush.msra.mxu1 %v7382_v60  ;;  %v1455_v60 = vand.u32 2147483648, %v7296_v53 }
 0x325   :  { %1726 = vmatpush.msra.mxu3 %v7394_v38 }
 0x326   :  { %v7401_v3 = vpop.eup %5545  ;;  %1766 = vmatpush.msra.mxu1 %v7408_v22  ;;  %v1259_v22 = vperm.slane %v7180_v46, 2  ;;  %v7468_v46 = vld [vmem:[%s10120_s9 + $0xe0] sm:$0xff] }
 0x327   :  { %v7410_v55 = vpop.eup %5547  ;;  %v1445_v27 = vmul.f32 %v7401_v3, %v7296_v53  ;;  %1727 = vmatpush.msra.mxu3 %v7420_v8  ;;  %vm1450_vm4 = vweird.f32 %v7401_v3  ;;  %10340 = vst [vmem:[#allocation63_spill] sm:$0xff] %v7468_v46  ;;  %1749 = vmatpush.msrb.mxu0 %v7468_v46 }
 0x328   :  { %v1465_v37 = vmul.f32 %v7410_v55, %v7304_v24  ;;  %1767 = vmatpush.msra.mxu1 %v7430_v58  ;;  %v1320_v58 = vpop.f32.mrf.mxu0  ;;  %vm1451_vm6 = vmor %vm1449_vm5, %vm1450_vm4  ;;  %vm1470_vm8 = vweird.f32 %v7410_v55 }
 0x329   :  { %v1446_v30 = vsub.f32 1.0, %v1445_v27  ;;  %v1396_v27 = vpop.f32.mrf.mxu1  ;;  %1728 = vmatpush.msra.mxu3 %v7440_v15  ;;  %v1321_v53 = vadd.f32 %v1320_v58, %v1259_v22  ;;  %v7510_v58 = vld [vmem:[%s10120_s9 + $0xa8] sm:$0xff]  ;;  %v7520_v22 = vld [vmem:[%s10120_s9 + $0xb8] sm:$0xff]  ;;  %vm7547_vm10 = vmor %vm1469_vm9, %vm1470_vm8 }
 0x32a   :  { %v1466_v31 = vsub.f32 1.0, %v1465_v37  ;;  %v1397_v19 = vadd.f32 %v1396_v27, %v1373_v59  ;;  %1768 = vmatpush.msra.mxu1 %v7453_v56  ;;  %v7463_v37 = vld [vmem:[%s10120_s9 + $0xd8] sm:$0xff]  ;;  %v1374_v56 = vperm.slane %v7375_v28, 1  ;;  %10345 = vst [vmem:[#allocation68_spill] sm:$0xff] %v7520_v22 }
 0x32b   :  { %v1447_v17 = vmul.f32 %v7401_v3, %v1446_v30  ;;  %v7473_v30 = vld [vmem:[%s10120_s9 + $0xe8] sm:$0xff]  ;;  %1729 = vmatpush.msra.mxu3 %v7463_v37 }
 0x32c   :  { %10341 = vst [vmem:[#allocation64_spill] sm:$0xff] %v7473_v30  ;;  %v1467_v59 = vmul.f32 %v7410_v55, %v1466_v31  ;;  %v1486_v35 = vadd.f32 %v1397_v19, %v6968_v13  ;;  %1769 = vmatpush.msra.mxu1 %v7473_v30  ;;  %v7491_v31 = vld [vmem:[%s10120_s9 + $0xc8] sm:$0xff]  ;;  %v7496_v13 = vld [vmem:[%s10120_s9 + $0xd0] sm:$0xff]  ;;  %v1456_v19 = vor.u32 1.1754944e-38, %v1455_v60 }
 0x32d   :  { %v1448_v27 = vadd.f32 %v7401_v3, %v1447_v17  ;;  %10342 = vst [vmem:[#allocation65_spill] sm:$0xff] %v7491_v31  ;;  %v703_v17 = vadd.f32 %v6865_v6, %v6910_v32  ;;  %1730 = vmatpush.msra.mxu3 %v7486_v33  ;;  %1750 = vmatpush.msrb.mxu0 %v7491_v31  ;;  %v7515_v6 = vld [vmem:[%s10120_s9 + $0xb0] sm:$0xff]  ;;  %v1475_v31 = vand.u32 2147483648, %v7304_v24 }
 0x32e   :  { %10343 = vst [vmem:[#allocation66_spill] sm:$0xff] %v7496_v13  ;;  %v5073_v30 = vmul.f32 -1.442695, %v1486_v35  ;;  %1770 = vmatpush.msra.mxu1 %v7496_v13  ;;  %v774_v35 = vadd.f32 %v7041_v39, %v6944_v1  ;;  %v1468_v60 = vadd.f32 %v7410_v55, %v1467_v59  ;;  %v7533_v39 = vld [vmem:[%s10120_s9 + $0x90] sm:$0xff]  ;;  %v7543_v59 = vld [vmem:[%s10120_s9 + $0xa0] sm:$0xff] }
 0x32f   :  { %v1452_v46 = vsel %vm1451_vm6, %v7401_v3, %v1448_v27  ;;  %10344 = vst [vmem:[#allocation67_spill] sm:$0xff] %v7515_v6  ;;  %v1416_v3 = vpop.f32.mrf.mxu2  ;;  %1731 = vmatpush.msra.mxu3 %v7510_v58  ;;  %1751 = vmatpush.msrb.mxu0 %v7515_v6  ;;  %v7647_v6 = vld [vmem:[%s10120_s9 + $0x28] sm:$0xff] }
 0x330   :  { %v1457_v41 = vsel %vm1454_vm7, %v1456_v19, %v1452_v46  ;;  %5549 = vpow2.f32 %v5073_v30  ;;  %v1417_v32 = vadd.f32 %v1416_v3, %v1374_v56  ;;  %1771 = vmatpush.msra.mxu1 %v7520_v22  ;;  %v7538_v46 = vld [vmem:[%s10120_s9 + $0x98] sm:$0xff]  ;;  %10347 = vst [vmem:[#allocation70_spill] sm:$0xff] %v7543_v59  ;;  %v1473_v30 = vand.u32 2147483647, %v7304_v24  ;;  %v7563_v3 = vld [vmem:[%s10120_s9 + $0x80] sm:$0xff]  ;;  %v7568_v24 = vld [vmem:[%s10120_s9 + $0x88] sm:$0xff] }
 0x331   :  { %v1479_v27 = vmul.f32 %v1457_v41, %v1321_v53  ;;  %10346 = vst [vmem:[#allocation69_spill] sm:$0xff] %v7538_v46  ;;  %1732 = vmatpush.msra.mxu3 %v7533_v39  ;;  %1752 = vmatpush.msrb.mxu0 %v7538_v46  ;;  %v7558_v41 = vld [vmem:[%s10120_s9 + $0x78] sm:$0xff]  ;;  %v7584_v46 = vld [vmem:[%s10120_s9 + $0x68] sm:$0xff] }
 0x332   :  { %v1506_v19 = vadd.f32 %v1417_v32, %v774_v35  ;;  %1772 = vmatpush.msra.mxu1 %v7543_v59  ;;  %10350 = vst [vmem:[#allocation71_spill] sm:$0xff] %v7563_v3  ;;  %v1472_v32 = vsel %vm7547_vm10, %v7410_v55, %v1468_v60  ;;  %v7589_v55 = vld [vmem:[%s10120_s9 + $0x70] sm:$0xff]  ;;  %vm1474_vm11 = vcmp.eq.f32.partialorder %v1473_v30, 8.507059e+37  ;;  %v7597_v56 = vld [vmem:[%s10120_s9 + $0x48] sm:$0xff]  ;;  %v7607_v30 = vld [vmem:[%s10120_s9 + $0x58] sm:$0xff] }
 0x333   :  { %v1480_v53 = vadd.f32 %v1479_v27, %v703_v17  ;;  %10351 = vst [vmem:[#allocation72_spill] sm:$0xff] %v7568_v24  ;;  %1733 = vmatpush.msra.mxu3 %v7558_v41  ;;  %v1476_v17 = vor.u32 1.1754944e-38, %v1475_v31  ;;  %1753 = vmatpush.msrb.mxu0 %v7563_v3  ;;  %v7579_v27 = vld [vmem:[%s10120_s9 + $0x60] sm:$0xff]  ;;  %v7661_v59 = vld [vmem:[%s10120_s9 + $0x8] sm:$0xff] }
 0x334   :  { %v5074_v35 = vmul.f32 -1.442695, %v1506_v19  ;;  %1773 = vmatpush.msra.mxu1 %v7568_v24  ;;  %10352 = vst [vmem:[#allocation73_spill] sm:$0xff] %v7584_v46 }
 0x335   :  { %5551 = vtanh.f32 %v1480_v53  ;;  %10353 = vst [vmem:[#allocation74_spill] sm:$0xff] %v7589_v55  ;;  %1734 = vmatpush.msra.mxu3 %v7579_v27  ;;  %v1477_v60 = vsel %vm1474_vm11, %v1476_v17, %v1472_v32  ;;  %1754 = vmatpush.msrb.mxu0 %v7584_v46  ;;  %v7602_v53 = vld [vmem:[%s10120_s9 + $0x50] sm:$0xff]  ;;  %v7620_v17 = vld [vmem:[%s10120_s9 + $0x38] sm:$0xff]  ;;  %v1205_v46 = vld [vmem:[%s10124_s1 + $0x8] sm:$0xff] }
 0x336   :  { %v5550_v31 = vpop.eup %5549  ;;  %5553 = vpow2.f32 %v5074_v35  ;;  %1774 = vmatpush.msra.mxu1 %v7589_v55  ;;  %10354 = vst [vmem:[#allocation75_spill] sm:$0xff] %v7602_v53  ;;  %v7615_v32 = vld [vmem:[%s10120_s9 + $0x30] sm:$0xff]  ;;  %v7625_v35 = vld [vmem:[%s10120_s9 + $0x40] sm:$0xff]  ;;  %v1482_v3 = vsub.f32 1.0, %v1477_v60  ;;  %v1484_v24 = vmul.f32 %v1477_v60, %v7104_v0  ;;  %v1534_v22 = vsub.f32 1.0, %v1205_v46 }
 0x337   :  { %10355 = vst [vmem:[#allocation76_spill] sm:$0xff] %v7607_v30  ;;  %v7609_v19 = vadd.f32 1.0, %v5550_v31  ;;  %1735 = vmatpush.msra.mxu3 %v7597_v56  ;;  %1755 = vmatpush.msrb.mxu0 %v7602_v53  ;;  %v7632_v31 = vld [vmem:[%s10120_s9 + $0x18] sm:$0xff]  ;;  %v7642_v53 = vld [vmem:[%s10120_s9 + $0x20] sm:$0xff] }
 0x338   :  { %10356 = vst [vmem:[#allocation77_spill] sm:$0xff] %v7620_v17  ;;  %1775 = vmatpush.msra.mxu1 %v7607_v30  ;;  %v7654_v30 = vld [vmem:[%s10120_s9] sm:$0xff] }
 0x339   :  { %10357 = vst [vmem:[#allocation78_spill] sm:$0xff] %v7625_v35  ;;  %5555 = vrcp.f32 %v7609_v19  ;;  %1736 = vmatpush.msra.mxu3 %v7615_v32  ;;  %1756 = vmatpush.msrb.mxu0 %v7620_v17  ;;  %v7666_v17 = vld [vmem:[%s10120_s9 + $0x10] sm:$0xff]  ;;  %vm1496_vm13 = vweird.f32 %v7609_v19 }
 0x33a   :  { %10358 = vst [vmem:[#allocation79_spill] sm:$0xff] %v7632_v31  ;;  %1776 = vmatpush.msra.mxu1 %v7625_v35 }
 0x33b   :  { %10359 = vst [vmem:[#allocation80_spill] sm:$0xff] %v7642_v53  ;;  %v5552_v1 = vpop.eup %5551  ;;  %1737 = vmatpush.msra.mxu3 %v7632_v31  ;;  %1757 = vmatpush.msrb.mxu0 %v7642_v53  ;;  %v1535_v53 = vmul.f32 %v1534_v22, %v7104_v0 }
 0x33c   :  { %v1483_v55 = vmul.f32 %v5552_v1, %v1482_v3  ;;  %10360 = vst [vmem:[#allocation81_spill] sm:$0xff] %v7661_v59  ;;  %v5554_v35 = vpop.eup %5553  ;;  %1777 = vmatpush.msra.mxu1 %v7647_v6 }
 0x33d   :  { %10361 = vst [vmem:[#allocation82_spill] sm:$0xff] %v7666_v17  ;;  %v7670_v1 = vadd.f32 1.0, %v5554_v35  ;;  %1738 = vmatpush.msra.mxu3 %v7654_v30  ;;  %1758 = vmatpush.msrb.mxu0 %v7661_v59  ;;  %v1502_v35 = vand.u32 2147483648, %v7609_v19  ;;  %v1375_v59 = vperm.slane %v7375_v28, 2 }
 0x33e   :  { %v1485_v3 = vadd.f32 %v1484_v24, %v1483_v55  ;;  %1778 = vmatpush.msra.mxu1 %v7666_v17 }
 0x33f   :  { %v5556_v60 = vpop.eup %5555  ;;  %5557 = vrcp.f32 %v7670_v1  ;;  %1971 = vmatpush.msrb.mxu3 %v7127_v42  ;;  %v1500_v42 = vand.u32 2147483647, %v7609_v19  ;;  %v1503_v28 = vor.u32 1.1754944e-38, %v1502_v35  ;;  %vm1516_vm3 = vweird.f32 %v7670_v1  ;;  %v10383_v35 = vld [vmem:[#allocation21_spill] sm:$0xff] }
 0x340   :  { %v1492_v13 = vmul.f32 %v5556_v60, %v7609_v19  ;;  %v7678_v31 = vmul.f32 %v1485_v3, %v1205_v46  ;;  %vm1497_vm12 = vweird.f32 %v5556_v60  ;;  %v1925_v3 = vld [vmem:[%s10119_s7 + $0xf0] sm:$0xff] }
 0x341   :  { %1972 = vmatpush.msrb.mxu3 %v7133_v50  ;;  %v1436_v50 = vpop.f32.mrf.mxu3  ;;  %vm1498_vm14 = vmor %vm1496_vm13, %vm1497_vm12  ;;  %vm1501_vm15 = vcmp.eq.f32.partialorder %v1500_v42, 8.507059e+37  ;;  %v10384_v42 = vld [vmem:[#allocation14_spill] sm:$0xff] }
 0x342   :  { %10362 = vst [vmem:[#allocation83_spill] sm:$0xff] %v7678_v31  ;;  %v1493_v24 = vsub.f32 1.0, %v1492_v13  ;;  %v7683_v55 = vadd.f32 %v1535_v53, %v7678_v31  ;;  %v1437_v46 = vadd.f32 %v1436_v50, %v1375_v59  ;;  %v1940_v59 = vld [vmem:[%s10119_s7 + $0x168] sm:$0xff] }
 0x343   :  { %1973 = vmatpush.msrb.mxu3 %v7139_v54  ;;  %1951 = vmatpush.msrb.mxu2 %v1940_v59 }
 0x344   :  { %v1494_v17 = vmul.f32 %v5556_v60, %v1493_v24  ;;  %1623 = vmatmul.f32.vlgmr.msra.gmra.mxu0 %v7683_v55  ;;  %1643 = vmatmul.f32.vlgmr.msrb.gmra.mxu1 %v7683_v55 }
 0x345   :  { %v5558_v0 = vpop.eup %5557  ;;  %1663 = vmatmul.f32.vlgmr.msra.gmra.mxu2 %v7683_v55  ;;  %1991 = vmatpush.msra.mxu0 %v7151_v18  ;;  %v803_v18 = vadd.f32 %v7048_v9, %v6947_v61 }
 0x346   :  { %v1512_v13 = vmul.f32 %v5558_v0, %v7670_v1  ;;  %v1495_v22 = vadd.f32 %v5556_v60, %v1494_v17  ;;  %1974 = vmatpush.msrb.mxu3 %v7145_v49  ;;  %2067 = vmatpush.msrb.mxu1 %v7315_v11  ;;  %vm1517_vm2 = vweird.f32 %v5558_v0  ;;  %v1522_v11 = vand.u32 2147483648, %v7670_v1 }
 0x347   :  { %1992 = vmatpush.msra.mxu0 %v7163_v12  ;;  %v1520_v12 = vand.u32 2147483647, %v7670_v1  ;;  %vm1518_vm4 = vmor %vm1516_vm3, %vm1517_vm2  ;;  %v1928_v1 = vld [vmem:[%s10119_s7 + $0x108] sm:$0xff] }
 0x348   :  { %v1513_v54 = vsub.f32 1.0, %v1512_v13  ;;  %v1499_v53 = vsel %vm1498_vm14, %v5556_v60, %v1495_v22  ;;  %1975 = vmatpush.msrb.mxu3 %v7157_v51  ;;  %2068 = vmatpush.msrb.mxu1 %v7341_v44  ;;  %v1523_v51 = vor.u32 1.1754944e-38, %v1522_v11  ;;  %v1922_v22 = vld [vmem:[%s10119_s7 + $0xd8] sm:$0xff]  ;;  %v1913_v11 = vld [vmem:[%s10119_s7 + $0x90] sm:$0xff] }
 0x349   :  { %v1504_v19 = vsel %vm1501_vm15, %v1503_v28, %v1499_v53  ;;  %1993 = vmatpush.msra.mxu0 %v7175_v57  ;;  %vm1521_vm5 = vcmp.eq.f32.partialorder %v1520_v12, 8.507059e+37  ;;  %v10385_v28 = vld [vmem:[#allocation13_spill] sm:$0xff]  ;;  %v1919_v53 = vld [vmem:[%s10119_s7 + $0xc0] sm:$0xff] }
 0x34a   :  { %v1514_v49 = vmul.f32 %v5558_v0, %v1513_v54  ;;  %v1526_v17 = vmul.f32 %v1504_v19, %v1437_v46  ;;  %1976 = vmatpush.msrb.mxu3 %v7169_v45  ;;  %2069 = vmatpush.msrb.mxu1 %v7365_v48  ;;  %v1907_v12 = vld [vmem:[%s10119_s7 + $0x60] sm:$0xff] }
 0x34b   :  { %1994 = vmatpush.msra.mxu0 %v7194_v2 }
 0x34c   :  { %v1515_v44 = vadd.f32 %v5558_v0, %v1514_v49  ;;  %v1527_v9 = vadd.f32 %v1526_v17, %v803_v18  ;;  %1977 = vmatpush.msrb.mxu3 %v7186_v34  ;;  %2070 = vmatpush.msrb.mxu1 %v7394_v38  ;;  %v1206_v38 = vld [vmem:[%s10124_s1 + $0x30] sm:$0xff]  ;;  %v1916_v49 = vld [vmem:[%s10119_s7 + $0xa8] sm:$0xff]  ;;  %v1910_v17 = vld [vmem:[%s10119_s7 + $0x78] sm:$0xff] }
 0x34d   :  { %1995 = vmatpush.msra.mxu0 %v7206_v4  ;;  %v1538_v2 = vsub.f32 1.0, %v1206_v38 }
 0x34e   :  { %v1519_v57 = vsel %vm1518_vm4, %v5558_v0, %v1515_v44  ;;  %5559 = vtanh.f32 %v1527_v9  ;;  %1978 = vmatpush.msrb.mxu3 %v7200_v5  ;;  %2071 = vmatpush.msrb.mxu1 %v7420_v8  ;;  %v677_v0 = vadd.f32 %v10384_v42, %v10383_v35  ;;  %v1904_v9 = vld [vmem:[%s10119_s7 + $0x48] sm:$0xff] }
 0x34f   :  { %1996 = vmatpush.msra.mxu0 %v7222_v20  ;;  %v1524_v48 = vsel %vm1521_vm5, %v1523_v51, %v1519_v57  ;;  %v10365_v20 = vld [vmem:[#allocation7_spill] sm:$0xff]  ;;  %v10395_v42 = vld [vmem:[#allocation61_spill] sm:$0xff] }
 0x350   :  { %1979 = vmatpush.msrb.mxu3 %v7212_v36  ;;  %2072 = vmatpush.msrb.mxu1 %v7440_v15  ;;  %v1529_v45 = vsub.f32 1.0, %v1524_v48  ;;  %v1531_v15 = vmul.f32 %v1524_v48, %v7119_v29 }
 0x351   :  { %1997 = vmatpush.msra.mxu0 %v7234_v23  ;;  %v10367_v23 = vld [vmem:[#allocation52_spill] sm:$0xff] }
 0x352   :  { %1980 = vmatpush.msrb.mxu3 %v7228_v43  ;;  %2073 = vmatpush.msrb.mxu1 %v7463_v37  ;;  %v10366_v43 = vld [vmem:[#allocation53_spill] sm:$0xff]  ;;  %v10380_v37 = vld [vmem:[#allocation76_spill] sm:$0xff] }
 0x353   :  { %1998 = vmatpush.msra.mxu0 %v7246_v47  ;;  %v10369_v47 = vld [vmem:[#allocation56_spill] sm:$0xff] }
 0x354   :  { %v5560_v8 = vpop.eup %5559  ;;  %1981 = vmatpush.msrb.mxu3 %v7240_v16  ;;  %2074 = vmatpush.msrb.mxu1 %v7486_v33  ;;  %v1539_v33 = vmul.f32 %v1538_v2, %v7119_v29  ;;  %v10364_v29 = vld [vmem:[#allocation50_spill] sm:$0xff]  ;;  %v10368_v16 = vld [vmem:[#allocation79_spill] sm:$0xff] }
 0x355   :  { %v1530_v34 = vmul.f32 %v5560_v8, %v1529_v45  ;;  %1999 = vmatpush.msra.mxu0 %v7258_v25  ;;  %v10372_v25 = vld [vmem:[#allocation60_spill] sm:$0xff]  ;;  %v1898_v45 = vld [vmem:[%s10119_s7 + $0x18] sm:$0xff] }
 0x356   :  { %1982 = vmatpush.msrb.mxu3 %v7252_v10  ;;  %2075 = vmatpush.msrb.mxu1 %v7510_v58  ;;  %v10370_v10 = vld [vmem:[#allocation55_spill] sm:$0xff]  ;;  %v10381_v58 = vld [vmem:[#allocation78_spill] sm:$0xff]  ;;  %v7834_v8 = vld [vmem:[%s10123_s10] sm:$0x7] }
 0x357   :  { %v1532_v5 = vadd.f32 %v1531_v15, %v1530_v34  ;;  %2000 = vmatpush.msra.mxu0 %v7270_v7  ;;  %v10374_v7 = vld [vmem:[#allocation64_spill] sm:$0xff]  ;;  %v10386_v15 = vld [vmem:[#allocation6_spill] sm:$0xff] }
 0x358   :  { %1983 = vmatpush.msrb.mxu3 %v7264_v26  ;;  %2076 = vmatpush.msrb.mxu1 %v7533_v39  ;;  %v10373_v26 = vld [vmem:[#allocation62_spill] sm:$0xff]  ;;  %v1895_v34 = vld [vmem:[%s10119_s7] sm:$0xff] }
 0x359   :  { %v7733_v4 = vmul.f32 %v1532_v5, %v1206_v38  ;;  %2001 = vmatpush.msra.mxu0 %v7282_v52  ;;  %v10376_v52 = vld [vmem:[#allocation68_spill] sm:$0xff]  ;;  %v10382_v39 = vld [vmem:[#allocation82_spill] sm:$0xff]  ;;  %v1718_v5 = vperm.slane %v7834_v8, 1 }
 0x35a   :  { %1984 = vmatpush.msrb.mxu3 %v7276_v62  ;;  %2077 = vmatpush.msrb.mxu1 %v7558_v41  ;;  %v10375_v62 = vld [vmem:[#allocation66_spill] sm:$0xff] }
 0x35b   :  { %10363 = vst [vmem:[#allocation84_spill] sm:$0xff] %v7733_v4  ;;  %v7740_v36 = vadd.f32 %v1539_v33, %v7733_v4  ;;  %2002 = vmatpush.msra.mxu0 %v7294_v21  ;;  %v10378_v21 = vld [vmem:[#allocation72_spill] sm:$0xff]  ;;  %v1937_v41 = vld [vmem:[%s10119_s7 + $0x150] sm:$0xff]  ;;  %v8198_v4 = vld [vmem:[%s10120_s9 + $0x118] sm:$0xff] }
 0x35c   :  { %1985 = vmatpush.msrb.mxu3 %v7288_v63  ;;  %2078 = vmatpush.msrb.mxu1 %v7579_v27  ;;  %v10377_v63 = vld [vmem:[#allocation70_spill] sm:$0xff]  ;;  %v1934_v27 = vld [vmem:[%s10119_s7 + $0x138] sm:$0xff]  ;;  %10426 = vst [vmem:[#allocation72_spill] sm:$0xff] %v8198_v4 }
 0x35d   :  { %1739 = vmatmul.f32.vlgmr.msra.gmra.mxu3 %v7740_v36  ;;  %1759 = vmatmul.f32.vlgmr.msrb.gmra.mxu0 %v7740_v36  ;;  %v1901_v38 = vld [vmem:[%s10119_s7 + $0x30] sm:$0xff] }
 0x35e   :  { %1779 = vmatmul.f32.vlgmr.msra.gmra.mxu1 %v7740_v36  ;;  %2003 = vmatpush.msra.mxu0 %v7310_v40  ;;  %v10371_v40 = vld [vmem:[#allocation58_spill] sm:$0xff] }
 0x35f   :  { %1986 = vmatpush.msrb.mxu3 %v7302_v14  ;;  %2079 = vmatpush.msrb.mxu1 %v7597_v56  ;;  %v10379_v14 = vld [vmem:[#allocation74_spill] sm:$0xff]  ;;  %v1931_v56 = vld [vmem:[%s10119_s7 + $0x120] sm:$0xff] }
 0x360   :  { %2004 = vmatpush.msra.mxu0 %v10364_v29  ;;  %1952 = vmatpush.msrb.mxu2 %v1937_v41 }
 0x361   :  { %2107 = vmatpush.msra.mxu3 %v10365_v20  ;;  %2080 = vmatpush.msrb.mxu1 %v7615_v32  ;;  %v10387_v20 = vld [vmem:[#allocation51_spill] sm:$0xff] }
 0x362   :  { %2005 = vmatpush.msra.mxu0 %v10366_v43  ;;  %1953 = vmatpush.msrb.mxu2 %v1934_v27 }
 0x363   :  { %2108 = vmatpush.msra.mxu3 %v10367_v23  ;;  %2081 = vmatpush.msrb.mxu1 %v10368_v16 }
 0x364   :  { %2006 = vmatpush.msra.mxu0 %v10369_v47  ;;  %1954 = vmatpush.msrb.mxu2 %v1931_v56  ;;  %v10388_v47 = vld [vmem:[#allocation54_spill] sm:$0xff] }
 0x365   :  { %2109 = vmatpush.msra.mxu3 %v10370_v10  ;;  %2082 = vmatpush.msrb.mxu1 %v7654_v30  ;;  %v10389_v10 = vld [vmem:[#allocation35_spill] sm:$0xff] }
 0x366   :  { %2295 = vmatpush.msrb.mxu0 %v1940_v59  ;;  %1955 = vmatpush.msrb.mxu2 %v1928_v1  ;;  %v1717_v59 = vperm.slane %v7834_v8, 0 }
 0x367   :  { %2110 = vmatpush.msra.mxu3 %v10371_v40  ;;  %v10390_v40 = vld [vmem:[#allocation48_spill] sm:$0xff] }
 0x368   :  { %2296 = vmatpush.msrb.mxu0 %v1937_v41  ;;  %1956 = vmatpush.msrb.mxu2 %v1925_v3 }
 0x369   :  { %2111 = vmatpush.msra.mxu3 %v10372_v25  ;;  %v771_v25 = vadd.f32 %v10390_v40, %v10389_v10 }
 0x36a   :  { %2297 = vmatpush.msrb.mxu0 %v1934_v27  ;;  %1957 = vmatpush.msrb.mxu2 %v1922_v22  ;;  %v10392_v27 = vld [vmem:[#allocation59_spill] sm:$0xff] }
 0x36b   :  { %2112 = vmatpush.msra.mxu3 %v10373_v26 }
 0x36c   :  { %2298 = vmatpush.msrb.mxu0 %v1931_v56  ;;  %1958 = vmatpush.msrb.mxu2 %v1919_v53  ;;  %v10393_v56 = vld [vmem:[#allocation17_spill] sm:$0xff] }
 0x36d   :  { %2113 = vmatpush.msra.mxu3 %v10374_v7 }
 0x36e   :  { %2299 = vmatpush.msrb.mxu0 %v1928_v1  ;;  %1959 = vmatpush.msrb.mxu2 %v1916_v49 }
 0x36f   :  { %2114 = vmatpush.msra.mxu3 %v10375_v62 }
 0x370   :  { %2300 = vmatpush.msrb.mxu0 %v1925_v3  ;;  %1960 = vmatpush.msrb.mxu2 %v1913_v11 }
 0x371   :  { %2115 = vmatpush.msra.mxu3 %v10376_v52 }
 0x372   :  { %2301 = vmatpush.msrb.mxu0 %v1922_v22  ;;  %1961 = vmatpush.msrb.mxu2 %v1910_v17  ;;  %v10396_v22 = vld [vmem:[#allocation22_spill] sm:$0xff] }
 0x373   :  { %2116 = vmatpush.msra.mxu3 %v10377_v63 }
 0x374   :  { %2302 = vmatpush.msrb.mxu0 %v1919_v53  ;;  %1962 = vmatpush.msrb.mxu2 %v1907_v12 }
 0x375   :  { %2117 = vmatpush.msra.mxu3 %v10378_v21 }
 0x376   :  { %2303 = vmatpush.msrb.mxu0 %v1916_v49  ;;  %1963 = vmatpush.msrb.mxu2 %v1904_v9 }
 0x377   :  { %2118 = vmatpush.msra.mxu3 %v10379_v14  ;;  %v10391_v14 = vld [vmem:[#allocation57_spill] sm:$0xff] }
 0x378   :  { %2304 = vmatpush.msrb.mxu0 %v1913_v11  ;;  %1964 = vmatpush.msrb.mxu2 %v1901_v38 }
 0x379   :  { %2119 = vmatpush.msra.mxu3 %v10380_v37 }
 0x37a   :  { %2305 = vmatpush.msrb.mxu0 %v1910_v17  ;;  %1965 = vmatpush.msrb.mxu2 %v1898_v45  ;;  %v10399_v17 = vld [vmem:[#allocation65_spill] sm:$0xff] }
 0x37b   :  { %2120 = vmatpush.msra.mxu3 %v10381_v58 }
 0x37c   :  { %2306 = vmatpush.msrb.mxu0 %v1907_v12  ;;  %1966 = vmatpush.msrb.mxu2 %v1895_v34 }
 0x37d   :  { %2121 = vmatpush.msra.mxu3 %v7647_v6  ;;  %v7785_v6 = vld [vmem:[%s10122_s8] sm:$0x7] }
 0x37e   :  { %v1601_v30 = vperm.slane %v7785_v6, 0  ;;  %v1602_v32 = vperm.slane %v7785_v6, 1  ;;  %2307 = vmatpush.msrb.mxu0 %v1904_v9  ;;  %2087 = vmatpush.msra.mxu2 %v10386_v15  ;;  %v1603_v52 = vperm.slane %v7785_v6, 2  ;;  %v10402_v15 = vld [vmem:[#allocation71_spill] sm:$0xff] }
 0x37f   :  { %2122 = vmatpush.msra.mxu3 %v10382_v39 }
 0x380   :  { %2308 = vmatpush.msrb.mxu0 %v1901_v38  ;;  %2088 = vmatpush.msra.mxu2 %v10387_v20 }
 0x382   :  { %2309 = vmatpush.msrb.mxu0 %v1898_v45  ;;  %2089 = vmatpush.msra.mxu2 %v10388_v47  ;;  %v10404_v47 = vld [vmem:[#allocation75_spill] sm:$0xff] }
 0x384   :  { %2310 = vmatpush.msrb.mxu0 %v1895_v34  ;;  %2090 = vmatpush.msra.mxu2 %v10391_v14  ;;  %v10401_v34 = vld [vmem:[#allocation69_spill] sm:$0xff] }
 0x385   :  { %v10408_v14 = vld [vmem:[#allocation81_spill] sm:$0xff] }
 0x386   :  { %2091 = vmatpush.msra.mxu2 %v10392_v27 }
 0x388   :  { %2092 = vmatpush.msra.mxu2 %v10395_v42 }
 0x3c1   :  { %v1624_v60 = vpop.f32.mrf.mxu0  ;;  %v1644_v24 = vpop.f32.mrf.mxu1 }
 0x3c2   :  { %v1625_v50 = vadd.f32 %v1624_v60, %v1601_v30  ;;  %v1645_v13 = vadd.f32 %v1644_v24, %v1602_v32  ;;  %v10394_v30 = vld [vmem:[#allocation39_spill] sm:$0xff] }
 0x3c3   :  { %v742_v32 = vadd.f32 %v10394_v30, %v10393_v56  ;;  %v8216_v56 = vld [vmem:[%s10120_s9 + $0xf8] sm:$0xff] }
 0x3c4   :  { %v1783_v54 = vadd.f32 %v1625_v50, %v10385_v28  ;;  %v1803_v46 = vadd.f32 %v1645_v13, %v677_v0  ;;  %v10397_v28 = vld [vmem:[#allocation15_spill] sm:$0xff]  ;;  %10427 = vst [vmem:[#allocation74_spill] sm:$0xff] %v8216_v56 }
 0x3c6   :  { %v5075_v18 = vmul.f32 -1.442695, %v1783_v54  ;;  %v5076_v19 = vmul.f32 -1.442695, %v1803_v46  ;;  %v706_v54 = vadd.f32 %v10397_v28, %v10396_v22 }
 0x3c8   :  { %5561 = vpow2.f32 %v5075_v18  ;;  %v1664_v58 = vpop.f32.mrf.mxu2  ;;  %v10398_v18 = vld [vmem:[#allocation63_spill] sm:$0xff] }
 0x3c9   :  { %5563 = vpow2.f32 %v5076_v19  ;;  %v1665_v3 = vadd.f32 %v1664_v58, %v1603_v52  ;;  %2093 = vmatpush.msra.mxu2 %v10398_v18  ;;  %v10407_v52 = vld [vmem:[#allocation80_spill] sm:$0xff] }
 0x3cb   :  { %2094 = vmatpush.msra.mxu2 %v10399_v17 }
 0x3ce   :  { %v5562_v44 = vpop.eup %5561 }
 0x3cf   :  { %v5564_v51 = vpop.eup %5563  ;;  %v1787_v57 = vadd.f32 1.0, %v5562_v44 }
 0x3d0   :  { %v7822_v48 = vadd.f32 1.0, %v5564_v51  ;;  %v10400_v51 = vld [vmem:[#allocation67_spill] sm:$0xff] }
 0x3d1   :  { %5565 = vrcp.f32 %v1787_v57  ;;  %v1799_v7 = vand.u32 2147483648, %v1787_v57  ;;  %v1797_v21 = vand.u32 2147483647, %v1787_v57  ;;  %vm1793_vm7 = vweird.f32 %v1787_v57  ;;  %2095 = vmatpush.msra.mxu2 %v10400_v51 }
 0x3d2   :  { %5567 = vrcp.f32 %v7822_v48  ;;  %v1819_v46 = vand.u32 2147483648, %v7822_v48  ;;  %vm1813_vm11 = vweird.f32 %v7822_v48  ;;  %v1817_v19 = vand.u32 2147483647, %v7822_v48 }
 0x3d3   :  { %v1800_v1 = vor.u32 1.1754944e-38, %v1799_v7  ;;  %vm1798_vm10 = vcmp.eq.f32.partialorder %v1797_v21, 8.507059e+37  ;;  %2096 = vmatpush.msra.mxu2 %v10401_v34  ;;  %v7901_v34 = vld [vmem:[%s10119_s7 + $0x170] sm:$0xff] }
 0x3d4   :  { %v1820_v9 = vor.u32 1.1754944e-38, %v1819_v46  ;;  %vm1818_vm13 = vcmp.eq.f32.partialorder %v1817_v19, 8.507059e+37  ;;  %2315 = vmatpush.msra.mxu1 %v7901_v34 }
 0x3d5   :  { %2097 = vmatpush.msra.mxu2 %v10402_v15  ;;  %v7919_v15 = vld [vmem:[%s10119_s7 + $0x128] sm:$0xff] }
 0x3d7   :  { %v5566_v2 = vpop.eup %5565 }
 0x3d8   :  { %v5568_v33 = vpop.eup %5567  ;;  %v1789_v29 = vmul.f32 %v5566_v2, %v1787_v57  ;;  %vm1794_vm6 = vweird.f32 %v5566_v2 }
 0x3d9   :  { %v1809_v43 = vmul.f32 %v5568_v33, %v7822_v48  ;;  %vm1795_vm8 = vmor %vm1793_vm7, %vm1794_vm6  ;;  %vm1814_vm9 = vweird.f32 %v5568_v33  ;;  %v1549_v48 = vld [vmem:[%s10124_s1 + $0x10] sm:$0xff] }
 0x3da   :  { %v1790_v23 = vsub.f32 1.0, %v1789_v29  ;;  %v1760_v16 = vpop.f32.mrf.mxu0  ;;  %vm1815_vm12 = vmor %vm1813_vm11, %vm1814_vm9 }
 0x3db   :  { %v1810_v26 = vsub.f32 1.0, %v1809_v43  ;;  %v1761_v62 = vadd.f32 %v1760_v16, %v1718_v5 }
 0x3dc   :  { %v1791_v63 = vmul.f32 %v5566_v2, %v1790_v23  ;;  %v1878_v23 = vsub.f32 1.0, %v1549_v48 }
 0x3dd   :  { %v1811_v37 = vmul.f32 %v5568_v33, %v1810_v26  ;;  %v1850_v39 = vadd.f32 %v1761_v62, %v771_v25  ;;  %v10405_v25 = vld [vmem:[#allocation77_spill] sm:$0xff] }
 0x3de   :  { %v1792_v41 = vadd.f32 %v5566_v2, %v1791_v63  ;;  %v1879_v62 = vmul.f32 %v1878_v23, %v7683_v55  ;;  %v7960_v23 = vld [vmem:[%s10122_s8] sm:$0x7] }
 0x3df   :  { %v5078_v6 = vmul.f32 -1.442695, %v1850_v39  ;;  %v1812_v50 = vadd.f32 %v5568_v33, %v1811_v37 }
 0x3e0   :  { %v1796_v60 = vsel %vm1795_vm8, %v5566_v2, %v1792_v41  ;;  %v1740_v24 = vpop.f32.mrf.mxu3 }
 0x3e1   :  { %v1801_v0 = vsel %vm1798_vm10, %v1800_v1, %v1796_v60  ;;  %5569 = vpow2.f32 %v5078_v6  ;;  %v1741_v13 = vadd.f32 %v1740_v24, %v1717_v59  ;;  %v1816_v12 = vsel %vm1815_vm12, %v5568_v33, %v1812_v50  ;;  %v10403_v33 = vld [vmem:[#allocation73_spill] sm:$0xff]  ;;  %v1780_v1 = vpop.f32.mrf.mxu1 }
 0x3e2   :  { %v1823_v53 = vmul.f32 %v1801_v0, %v1665_v3  ;;  %v1821_v38 = vsel %vm1818_vm13, %v1820_v9, %v1816_v12  ;;  %2098 = vmatpush.msra.mxu2 %v10403_v33  ;;  %v10409_v50 = vld [vmem:[#allocation49_spill] sm:$0xff]  ;;  %v7937_v33 = vld [vmem:[%s10119_s7 + $0x160] sm:$0xff] }
 0x3e3   :  { %v1830_v49 = vadd.f32 %v1741_v13, %v742_v32  ;;  %v1826_v2 = vsub.f32 1.0, %v1821_v38  ;;  %v1828_v43 = vmul.f32 %v1821_v38, %v7683_v55  ;;  %v1719_v55 = vperm.slane %v7834_v8, 2 }
 0x3e4   :  { %v1824_v11 = vadd.f32 %v1823_v53, %v706_v54  ;;  %2099 = vmatpush.msra.mxu2 %v10404_v47  ;;  %v800_v13 = vadd.f32 %v10409_v50, %v6947_v61  ;;  %v1945_v47 = vperm.slane %v7960_v23, 0  ;;  %v8032_v50 = vld [vmem:[%s10119_s7 + $0xb8] sm:$0xff] }
 0x3e5   :  { %v5077_v44 = vmul.f32 -1.442695, %v1830_v49  ;;  %v1781_v60 = vadd.f32 %v1780_v1, %v1719_v55  ;;  %v1550_v49 = vld [vmem:[%s10124_s1 + $0x28] sm:$0xff] }
 0x3e6   :  { %5571 = vtanh.f32 %v1824_v11  ;;  %2100 = vmatpush.msra.mxu2 %v10405_v25  ;;  %v1882_v9 = vsub.f32 1.0, %v1550_v49  ;;  %v7974_v25 = vld [vmem:[%s10119_s7 + $0xc8] sm:$0xff] }
 0x3e7   :  { %v5570_v57 = vpop.eup %5569  ;;  %5573 = vpow2.f32 %v5077_v44 }
 0x3e8   :  { %v1854_v45 = vadd.f32 1.0, %v5570_v57  ;;  %2101 = vmatpush.msra.mxu2 %v10407_v52  ;;  %v1883_v38 = vmul.f32 %v1882_v9, %v7740_v36 }
 0x3ea   :  { %5575 = vrcp.f32 %v1854_v45  ;;  %2102 = vmatpush.msra.mxu2 %v10408_v14  ;;  %v1866_v28 = vand.u32 2147483648, %v1854_v45  ;;  %vm1860_vm5 = vweird.f32 %v1854_v45  ;;  %v1864_v54 = vand.u32 2147483647, %v1854_v45  ;;  %v7992_v14 = vld [vmem:[%s10119_s7 + $0x100] sm:$0xff] }
 0x3ec   :  { %v5572_v5 = vpop.eup %5571  ;;  %v1867_v18 = vor.u32 1.1754944e-38, %v1866_v28  ;;  %vm1865_vm7 = vcmp.eq.f32.partialorder %v1864_v54, 8.507059e+37  ;;  %v8044_v28 = vld [vmem:[%s10119_s7 + $0xa0] sm:$0xff]  ;;  %v8056_v54 = vld [vmem:[%s10119_s7 + $0x88] sm:$0xff] }
 0x3ed   :  { %v5574_v29 = vpop.eup %5573  ;;  %v1827_v20 = vmul.f32 %v5572_v5, %v1826_v2  ;;  %v7925_v2 = vld [vmem:[%s10119_s7 + $0x178] sm:$0xff]  ;;  %v7931_v5 = vld [vmem:[%s10119_s7 + $0x110] sm:$0xff] }
 0x3ee   :  { %v1834_v16 = vadd.f32 1.0, %v5574_v29  ;;  %v7943_v29 = vld [vmem:[%s10119_s7 + $0xf8] sm:$0xff] }
 0x3ef   :  { %v1829_v40 = vadd.f32 %v1828_v43, %v1827_v20  ;;  %v7949_v20 = vld [vmem:[%s10119_s7 + $0x148] sm:$0xff]  ;;  %v7955_v43 = vld [vmem:[%s10119_s7 + $0xe0] sm:$0xff] }
 0x3f0   :  { %5577 = vrcp.f32 %v1834_v16  ;;  %v5576_v26 = vpop.eup %5575  ;;  %v1846_v41 = vand.u32 2147483648, %v1834_v16  ;;  %v1844_v30 = vand.u32 2147483647, %v1834_v16  ;;  %vm1840_vm15 = vweird.f32 %v1834_v16 }
 0x3f1   :  { %v7871_v7 = vmul.f32 %v1829_v40, %v1549_v48  ;;  %v1856_v21 = vmul.f32 %v5576_v26, %v1854_v45  ;;  %vm1861_vm4 = vweird.f32 %v5576_v26  ;;  %v7913_v48 = vld [vmem:[%s10119_s7 + $0x140] sm:$0xff]  ;;  %v1946_v40 = vperm.slane %v7960_v23, 1 }
 0x3f2   :  { %v1847_v3 = vor.u32 1.1754944e-38, %v1846_v41  ;;  %vm1845_vm3 = vcmp.eq.f32.partialorder %v1844_v30, 8.507059e+37  ;;  %vm1862_vm6 = vmor %vm1860_vm5, %vm1861_vm4  ;;  %v8002_v30 = vld [vmem:[%s10119_s7 + $0x98] sm:$0xff] }
 0x3f3   :  { %10406 = vst [vmem:[#allocation50_spill] sm:$0xff] %v7871_v7  ;;  %v7876_v63 = vadd.f32 %v1879_v62, %v7871_v7  ;;  %v1857_v39 = vsub.f32 1.0, %v1856_v21  ;;  %v7986_v62 = vld [vmem:[%s10119_s7 + $0xb0] sm:$0xff] }
 0x3f5   :  { %1967 = vmatmul.f32.vlgmr.msrb.gmra.mxu2 %v7876_v63  ;;  %1987 = vmatmul.f32.vlgmr.msrb.gmra.mxu3 %v7876_v63  ;;  %v1858_v32 = vmul.f32 %v5576_v26, %v1857_v39 }
 0x3f6   :  { %v5578_v37 = vpop.eup %5577  ;;  %2007 = vmatmul.f32.vlgmr.msra.gmra.mxu0 %v7876_v63  ;;  %2335 = vmatpush.msrb.mxu2 %v7925_v2 }
 0x3f7   :  { %v1836_v58 = vmul.f32 %v5578_v37, %v1834_v16  ;;  %vm1841_vm14 = vweird.f32 %v5578_v37  ;;  %v1859_v42 = vadd.f32 %v5576_v26, %v1858_v32  ;;  %v7966_v16 = vld [vmem:[%s10119_s7 + $0x130] sm:$0xff]  ;;  %v8008_v32 = vld [vmem:[%s10119_s7 + $0xe8] sm:$0xff] }
 0x3f8   :  { %vm1842_vm2 = vmor %vm1840_vm15, %vm1841_vm14  ;;  %2336 = vmatpush.msrb.mxu2 %v7937_v33 }
 0x3f9   :  { %v1837_v59 = vsub.f32 1.0, %v1836_v58  ;;  %v1863_v53 = vsel %vm1862_vm6, %v5576_v26, %v1859_v42  ;;  %v7980_v26 = vld [vmem:[%s10119_s7 + $0x118] sm:$0xff]  ;;  %v10412_v58 = vld [vmem:[#allocation16_spill] sm:$0xff] }
 0x3fa   :  { %v1868_v19 = vsel %vm1865_vm7, %v1867_v18, %v1863_v53  ;;  %2337 = vmatpush.msrb.mxu2 %v7949_v20  ;;  %v8068_v53 = vld [vmem:[%s10119_s7 + $0x70] sm:$0xff] }
 0x3fb   :  { %v1838_v27 = vmul.f32 %v5578_v37, %v1837_v59  ;;  %v1873_v11 = vsub.f32 1.0, %v1868_v19  ;;  %v1875_v44 = vmul.f32 %v1868_v19, %v7740_v36  ;;  %v7907_v36 = vld [vmem:[%s10119_s7 + $0x158] sm:$0xff]  ;;  %v10413_v59 = vld [vmem:[#allocation18_spill] sm:$0xff]  ;;  %v8074_v19 = vld [vmem:[%s10119_s7 + $0x8] sm:$0xff] }
 0x3fc   :  { %2316 = vmatpush.msra.mxu1 %v7907_v36  ;;  %2338 = vmatpush.msrb.mxu2 %v7966_v16  ;;  %v679_v41 = vadd.f32 %v10413_v59, %v10383_v35  ;;  %v8149_v59 = vld [vmem:[%s10123_s10] sm:$0x7]  ;;  %v8211_v35 = vld [vmem:[%s10120_s9 + $0xf0] sm:$0xff] }
 0x3fd   :  { %v1839_v6 = vadd.f32 %v5578_v37, %v1838_v27 }
 0x3fe   :  { %2317 = vmatpush.msra.mxu1 %v7913_v48  ;;  %2339 = vmatpush.msrb.mxu2 %v7980_v26 }
 0x3ff   :  { %v1843_v24 = vsel %vm1842_vm2, %v5578_v37, %v1839_v6  ;;  %v10411_v37 = vld [vmem:[#allocation12_spill] sm:$0xff] }
 0x400   :  { %v1848_v0 = vsel %vm1845_vm3, %v1847_v3, %v1843_v24  ;;  %2318 = vmatpush.msra.mxu1 %v7919_v15  ;;  %v650_v39 = vadd.f32 %v10412_v58, %v10411_v37  ;;  %2340 = vmatpush.msrb.mxu2 %v7992_v14  ;;  %v8014_v3 = vld [vmem:[%s10119_s7 + $0x80] sm:$0xff]  ;;  %v8139_v58 = vld [vmem:[%s10120_s9 + $0x138] sm:$0xff] }
 0x401   :  { %v1870_v8 = vmul.f32 %v1848_v0, %v1781_v60  ;;  %v8020_v60 = vld [vmem:[%s10119_s7 + $0xd0] sm:$0xff]  ;;  %v8026_v0 = vld [vmem:[%s10119_s7 + $0x68] sm:$0xff] }
 0x402   :  { %2319 = vmatpush.msra.mxu1 %v7931_v5  ;;  %2341 = vmatpush.msrb.mxu2 %v8008_v32 }
 0x403   :  { %v1871_v46 = vadd.f32 %v1870_v8, %v800_v13  ;;  %v8038_v13 = vld [vmem:[%s10119_s7 + $0x50] sm:$0xff]  ;;  %v8050_v8 = vld [vmem:[%s10119_s7 + $0x38] sm:$0xff] }
 0x404   :  { %2320 = vmatpush.msra.mxu1 %v7943_v29  ;;  %2342 = vmatpush.msrb.mxu2 %v8020_v60 }
 0x405   :  { %5579 = vtanh.f32 %v1871_v46  ;;  %v8062_v46 = vld [vmem:[%s10119_s7 + $0x20] sm:$0xff] }
 0x406   :  { %2321 = vmatpush.msra.mxu1 %v7955_v43  ;;  %2343 = vmatpush.msrb.mxu2 %v8032_v50 }
 0x408   :  { %2322 = vmatpush.msra.mxu1 %v7974_v25  ;;  %2344 = vmatpush.msrb.mxu2 %v8044_v28 }
 0x40a   :  { %2323 = vmatpush.msra.mxu1 %v7986_v62  ;;  %2345 = vmatpush.msrb.mxu2 %v8056_v54 }
 0x40b   :  { %v5580_v17 = vpop.eup %5579 }
 0x40c   :  { %v1874_v12 = vmul.f32 %v5580_v17, %v1873_v11  ;;  %2324 = vmatpush.msra.mxu1 %v8002_v30  ;;  %2346 = vmatpush.msrb.mxu2 %v8068_v53  ;;  %v8082_v17 = vld [vmem:[%s10119_s7 + $0x58] sm:$0xff] }
 0x40e   :  { %v1876_v51 = vadd.f32 %v1875_v44, %v1874_v12  ;;  %2325 = vmatpush.msra.mxu1 %v8014_v3  ;;  %v8087_v12 = vld [vmem:[%s10120_s9 + $0x168] sm:$0xff]  ;;  %v8092_v44 = vld [vmem:[%s10120_s9 + $0x170] sm:$0xff]  ;;  %2347 = vmatpush.msrb.mxu2 %v8082_v17 }
 0x40f   :  { %10414 = vst [vmem:[#allocation53_spill] sm:$0xff] %v8092_v44  ;;  %2411 = vmatpush.msrb.mxu3 %v8087_v12  ;;  %2431 = vmatpush.msra.mxu0 %v8092_v44 }
 0x410   :  { %v7889_v57 = vmul.f32 %v1876_v51, %v1550_v49  ;;  %2326 = vmatpush.msra.mxu1 %v8026_v0  ;;  %v8101_v51 = vld [vmem:[%s10120_s9 + $0x178] sm:$0xff] }
 0x411   :  { %10415 = vst [vmem:[#allocation52_spill] sm:$0xff] %v8101_v51 }
 0x412   :  { %10410 = vst [vmem:[#allocation7_spill] sm:$0xff] %v7889_v57  ;;  %v7893_v45 = vadd.f32 %v1883_v38, %v7889_v57  ;;  %2327 = vmatpush.msra.mxu1 %v8038_v13  ;;  %v8109_v38 = vld [vmem:[%s10119_s7 + $0x40] sm:$0xff] }
 0x413   :  { %10416 = vst [vmem:[#allocation79_spill] sm:$0xff] %v8109_v38  ;;  %2348 = vmatpush.msrb.mxu2 %v8109_v38 }
 0x414   :  { %2083 = vmatmul.f32.vlgmr.msrb.gmra.mxu1 %v7893_v45  ;;  %2103 = vmatmul.f32.vlgmr.msra.gmra.mxu2 %v7893_v45 }
 0x415   :  { %2123 = vmatmul.f32.vlgmr.msra.gmra.mxu3 %v7893_v45  ;;  %2328 = vmatpush.msra.mxu1 %v8050_v8 }
 0x417   :  { %2329 = vmatpush.msra.mxu1 %v8062_v46 }
 0x419   :  { %2330 = vmatpush.msra.mxu1 %v8074_v19 }
 0x41b   :  { %2451 = vmatpush.msrb.mxu1 %v8101_v51  ;;  %v8284_v51 = vld [vmem:[%s10120_s9 + $0xb0] sm:$0xff] }
 0x41c   :  { %10437 = vst [vmem:[#allocation6_spill] sm:$0xff] %v8284_v51 }
 0x478   :  { %v1968_v52 = vpop.f32.mrf.mxu2  ;;  %v1988_v21 = vpop.f32.mrf.mxu3 }
 0x479   :  { %v1969_v55 = vadd.f32 %v1968_v52, %v1945_v47  ;;  %v1989_v27 = vadd.f32 %v1988_v21, %v1946_v40  ;;  %v8114_v47 = vld [vmem:[%s10120_s9 + $0x150] sm:$0xff]  ;;  %v8119_v40 = vld [vmem:[%s10120_s9 + $0x158] sm:$0xff]  ;;  %v8127_v52 = vld [vmem:[%s10120_s9 + $0x160] sm:$0xff] }
 0x47a   :  { %10417 = vst [vmem:[#allocation56_spill] sm:$0xff] %v8119_v40  ;;  %2412 = vmatpush.msrb.mxu3 %v8114_v47  ;;  %2432 = vmatpush.msra.mxu0 %v8119_v40  ;;  %v8134_v21 = vld [vmem:[%s10119_s7 + $0x28] sm:$0xff] }
 0x47b   :  { %v2127_v1 = vadd.f32 %v1969_v55, %v650_v39  ;;  %v2147_v6 = vadd.f32 %v1989_v27, %v679_v41  ;;  %10418 = vst [vmem:[#allocation55_spill] sm:$0xff] %v8127_v52  ;;  %2452 = vmatpush.msrb.mxu1 %v8127_v52  ;;  %v8144_v39 = vld [vmem:[%s10120_s9 + $0x140] sm:$0xff]  ;;  %2349 = vmatpush.msrb.mxu2 %v8134_v21  ;;  %v8156_v41 = vld [vmem:[%s10120_s9 + $0x148] sm:$0xff]  ;;  %v8163_v55 = vld [vmem:[%s10119_s7 + $0x10] sm:$0xff]  ;;  %v2062_v52 = vperm.slane %v8149_v59, 1 }
 0x47c   :  { %10419 = vst [vmem:[#allocation58_spill] sm:$0xff] %v8134_v21  ;;  %2413 = vmatpush.msrb.mxu3 %v8139_v58  ;;  %2433 = vmatpush.msra.mxu0 %v8144_v39  ;;  %v8168_v27 = vld [vmem:[%s10120_s9 + $0x120] sm:$0xff] }
 0x47d   :  { %v5079_v24 = vmul.f32 -1.442695, %v2127_v1  ;;  %v5080_v42 = vmul.f32 -1.442695, %v2147_v6  ;;  %10420 = vst [vmem:[#allocation60_spill] sm:$0xff] %v8144_v39  ;;  %2453 = vmatpush.msrb.mxu1 %v8156_v41  ;;  %v8173_v1 = vld [vmem:[%s10120_s9 + $0x128] sm:$0xff]  ;;  %2350 = vmatpush.msrb.mxu2 %v8163_v55 }
 0x47e   :  { %10421 = vst [vmem:[#allocation62_spill] sm:$0xff] %v8156_v41  ;;  %2414 = vmatpush.msrb.mxu3 %v8168_v27  ;;  %v8180_v6 = vld [vmem:[%s10120_s9 + $0x130] sm:$0xff]  ;;  %2434 = vmatpush.msra.mxu0 %v8173_v1 }
 0x47f   :  { %5581 = vpow2.f32 %v5079_v24  ;;  %10422 = vst [vmem:[#allocation64_spill] sm:$0xff] %v8163_v55  ;;  %2454 = vmatpush.msrb.mxu1 %v8180_v6  ;;  %v10431_v41 = vld [vmem:[#allocation34_spill] sm:$0xff] }
 0x480   :  { %5583 = vpow2.f32 %v5080_v42  ;;  %10423 = vst [vmem:[#allocation66_spill] sm:$0xff] %v8173_v1  ;;  %v2061_v42 = vperm.slane %v8149_v59, 0 }
 0x481   :  { %10424 = vst [vmem:[#allocation68_spill] sm:$0xff] %v8180_v6  ;;  %2455 = vmatpush.msrb.mxu1 %v8198_v4  ;;  %v8235_v4 = vld [vmem:[%s10120_s9 + $0xe0] sm:$0xff]  ;;  %v8240_v6 = vld [vmem:[%s10120_s9 + $0xe8] sm:$0xff] }
 0x482   :  { %10429 = vst [vmem:[#allocation78_spill] sm:$0xff] %v8235_v4 }
 0x483   :  { %10430 = vst [vmem:[#allocation82_spill] sm:$0xff] %v8240_v6 }
 0x485   :  { %v5582_v18 = vpop.eup %5581 }
 0x486   :  { %v5584_v49 = vpop.eup %5583  ;;  %v8076_v11 = vadd.f32 1.0, %v5582_v18  ;;  %v8188_v18 = vld [vmem:[%s10120_s9 + $0x108] sm:$0xff] }
 0x487   :  { %v8094_v9 = vadd.f32 1.0, %v5584_v49  ;;  %v8193_v49 = vld [vmem:[%s10120_s9 + $0x110] sm:$0xff]  ;;  %2415 = vmatpush.msrb.mxu3 %v8188_v18 }
 0x488   :  { %5585 = vrcp.f32 %v8076_v11  ;;  %10425 = vst [vmem:[#allocation70_spill] sm:$0xff] %v8193_v49  ;;  %2435 = vmatpush.msra.mxu0 %v8193_v49  ;;  %v8222_v49 = vld [vmem:[%s10120_s9 + $0x100] sm:$0xff]  ;;  %v2143_v40 = vand.u32 2147483648, %v8076_v11  ;;  %vm2137_vm9 = vweird.f32 %v8076_v11 }
 0x489   :  { %5587 = vrcp.f32 %v8094_v9  ;;  %2416 = vmatpush.msrb.mxu3 %v8211_v35  ;;  %10428 = vst [vmem:[#allocation76_spill] sm:$0xff] %v8222_v49  ;;  %2456 = vmatpush.msrb.mxu1 %v8222_v49  ;;  %vm2157_vm13 = vweird.f32 %v8094_v9 }
 0x48a   :  { %2436 = vmatpush.msra.mxu0 %v8216_v56  ;;  %v2008_v56 = vpop.f32.mrf.mxu0 }
 0x48b   :  { %2457 = vmatpush.msrb.mxu1 %v8240_v6  ;;  %v2144_v6 = vor.u32 1.1754944e-38, %v2143_v40 }
 0x48c   :  { %2437 = vmatpush.msra.mxu0 %v8235_v4 }
 0x48e   :  { %v5586_v24 = vpop.eup %5585 }
 0x48f   :  { %v8200_v57 = vpop.eup %5587  ;;  %v2133_v7 = vmul.f32 %v5586_v24, %v8076_v11  ;;  %vm2138_vm8 = vweird.f32 %v5586_v24 }
 0x490   :  { %v2153_v31 = vmul.f32 %v8200_v57, %v8094_v9  ;;  %vm8267_vm10 = vmor %vm2137_vm9, %vm2138_vm8  ;;  %vm2158_vm12 = vweird.f32 %v8200_v57 }
 0x491   :  { %v2134_v1 = vsub.f32 1.0, %v2133_v7  ;;  %v2084_v39 = vpop.f32.mrf.mxu1  ;;  %v8230_v7 = vld [vmem:[%s10120_s9 + $0xd8] sm:$0xff]  ;;  %vm8338_vm14 = vmor %vm2157_vm13, %vm2158_vm12 }
 0x492   :  { %v2154_v44 = vsub.f32 1.0, %v2153_v31  ;;  %v2085_v37 = vadd.f32 %v2084_v39, %v2061_v42  ;;  %v1947_v31 = vperm.slane %v7960_v23, 2  ;;  %v2141_v42 = vand.u32 2147483647, %v8076_v11  ;;  %2417 = vmatpush.msrb.mxu3 %v8230_v7  ;;  %v8254_v23 = vld [vmem:[%s10120_s9 + $0xc0] sm:$0xff] }
 0x493   :  { %v2135_v39 = vmul.f32 %v5586_v24, %v2134_v1  ;;  %v8259_v1 = vld [vmem:[%s10120_s9 + $0xc8] sm:$0xff] }
 0x494   :  { %v2155_v49 = vmul.f32 %v8200_v57, %v2154_v44  ;;  %v2174_v55 = vadd.f32 %v2085_v37, %v10431_v41  ;;  %10432 = vst [vmem:[#allocation14_spill] sm:$0xff] %v8259_v1  ;;  %v8264_v37 = vld [vmem:[%s10120_s9 + $0xd0] sm:$0xff]  ;;  %2418 = vmatpush.msrb.mxu3 %v8254_v23  ;;  %2438 = vmatpush.msra.mxu0 %v8259_v1  ;;  %vm2142_vm11 = vcmp.eq.f32.partialorder %v2141_v42, 8.507059e+37  ;;  %v2161_v42 = vand.u32 2147483647, %v8094_v9  ;;  %v8334_v44 = vld [vmem:[%s10120_s9 + $0x88] sm:$0xff] }
 0x495   :  { %10433 = vst [vmem:[#allocation13_spill] sm:$0xff] %v8264_v37  ;;  %v2136_v11 = vadd.f32 %v5586_v24, %v2135_v39  ;;  %v10436_v41 = vld [vmem:[#allocation46_spill] sm:$0xff]  ;;  %2458 = vmatpush.msrb.mxu1 %v8264_v37  ;;  %v8279_v39 = vld [vmem:[%s10120_s9 + $0xa8] sm:$0xff]  ;;  %v2009_v40 = vadd.f32 %v2008_v56, %v1947_v31  ;;  %v2163_v31 = vand.u32 2147483648, %v8094_v9 }
 0x496   :  { %v769_v4 = vadd.f32 %v10436_v41, %v10389_v10  ;;  %v5081_v21 = vmul.f32 -1.442695, %v2174_v55  ;;  %v8289_v41 = vld [vmem:[%s10120_s9 + $0xb8] sm:$0xff]  ;;  %2419 = vmatpush.msrb.mxu3 %v8279_v39  ;;  %v2156_v37 = vadd.f32 %v8200_v57, %v2155_v49  ;;  %2439 = vmatpush.msra.mxu0 %v8284_v51  ;;  %v8301_v56 = vld [vmem:[%s10120_s9 + $0x90] sm:$0xff]  ;;  %10443 = vst [vmem:[#allocation59_spill] sm:$0xff] %v8334_v44  ;;  %vm2162_vm15 = vcmp.eq.f32.partialorder %v2161_v42, 8.507059e+37 }
 0x497   :  { %10438 = vst [vmem:[#allocation51_spill] sm:$0xff] %v8289_v41  ;;  %v2140_v55 = vsel %vm8267_vm10, %v5586_v24, %v2136_v11  ;;  %v2104_v1 = vpop.f32.mrf.mxu2  ;;  %2459 = vmatpush.msrb.mxu1 %v8289_v41  ;;  %v8306_v24 = vld [vmem:[%s10120_s9 + $0x98] sm:$0xff]  ;;  %v8387_v9 = vld [vmem:[%s10120_s9 + $0x30] sm:$0xff]  ;;  %v8434_v51 = vld [vmem:[%s10120_s9 + $0x8] sm:$0xff] }
 0x498   :  { %v2145_v10 = vsel %vm2142_vm11, %v2144_v6, %v2140_v55  ;;  %5589 = vpow2.f32 %v5081_v21  ;;  %v2105_v38 = vadd.f32 %v2104_v1, %v2062_v52  ;;  %10439 = vst [vmem:[#allocation54_spill] sm:$0xff] %v8306_v24  ;;  %v8311_v6 = vld [vmem:[%s10120_s9 + $0xa0] sm:$0xff]  ;;  %v10441_v52 = vld [vmem:[#allocation19_spill] sm:$0xff]  ;;  %2420 = vmatpush.msrb.mxu3 %v8301_v56  ;;  %2440 = vmatpush.msra.mxu0 %v8306_v24 }
 0x499   :  { %10440 = vst [vmem:[#allocation48_spill] sm:$0xff] %v8311_v6  ;;  %v708_v21 = vadd.f32 %v10441_v52, %v10396_v22  ;;  %v2167_v49 = vmul.f32 %v2145_v10, %v2009_v40  ;;  %2460 = vmatpush.msrb.mxu1 %v8311_v6  ;;  %v8324_v11 = vld [vmem:[%s10120_s9 + $0x78] sm:$0xff]  ;;  %v8329_v10 = vld [vmem:[%s10120_s9 + $0x80] sm:$0xff]  ;;  %v8356_v52 = vld [vmem:[%s10120_s9 + $0x68] sm:$0xff] }
 0x49a   :  { %v2194_v1 = vadd.f32 %v2105_v38, %v769_v4  ;;  %10442 = vst [vmem:[#allocation57_spill] sm:$0xff] %v8329_v10  ;;  %2421 = vmatpush.msrb.mxu3 %v8324_v11  ;;  %v2160_v38 = vsel %vm8338_vm14, %v8200_v57, %v2156_v37  ;;  %2441 = vmatpush.msra.mxu0 %v8329_v10  ;;  %v8351_v55 = vld [vmem:[%s10120_s9 + $0x60] sm:$0xff]  ;;  %v2164_v57 = vor.u32 1.1754944e-38, %v2163_v31  ;;  %v8379_v31 = vld [vmem:[%s10120_s9 + $0x58] sm:$0xff] }
 0x49b   :  { %v2168_v4 = vadd.f32 %v2167_v49, %v708_v21  ;;  %2461 = vmatpush.msrb.mxu1 %v8334_v44  ;;  %10446 = vst [vmem:[#allocation39_spill] sm:$0xff] %v8356_v52  ;;  %v8361_v21 = vld [vmem:[%s10120_s9 + $0x70] sm:$0xff]  ;;  %v8369_v49 = vld [vmem:[%s10120_s9 + $0x48] sm:$0xff]  ;;  %v8397_v22 = vld [vmem:[%s10120_s9 + $0x40] sm:$0xff] }
 0x49c   :  { %v5082_v40 = vmul.f32 -1.442695, %v2194_v1  ;;  %10447 = vst [vmem:[#allocation61_spill] sm:$0xff] %v8361_v21  ;;  %2422 = vmatpush.msrb.mxu3 %v8351_v55  ;;  %2442 = vmatpush.msra.mxu0 %v8356_v52  ;;  %v8374_v1 = vld [vmem:[%s10120_s9 + $0x50] sm:$0xff]  ;;  %v8428_v10 = vld [vmem:[%s10120_s9] sm:$0xff] }
 0x49d   :  { %5591 = vtanh.f32 %v2168_v4  ;;  %2462 = vmatpush.msrb.mxu1 %v8361_v21  ;;  %10448 = vst [vmem:[#allocation15_spill] sm:$0xff] %v8374_v1  ;;  %v2165_v4 = vsel %vm2162_vm15, %v2164_v57, %v2160_v38  ;;  %v8404_v38 = vld [vmem:[%s10120_s9 + $0x18] sm:$0xff] }
 0x49e   :  { %v5590_v37 = vpop.eup %5589  ;;  %5593 = vpow2.f32 %v5082_v40  ;;  %10449 = vst [vmem:[#allocation63_spill] sm:$0xff] %v8379_v31  ;;  %2423 = vmatpush.msrb.mxu3 %v8369_v49  ;;  %v8392_v40 = vld [vmem:[%s10120_s9 + $0x38] sm:$0xff]  ;;  %2443 = vmatpush.msra.mxu0 %v8374_v1  ;;  %v8421_v1 = vld [vmem:[%s10120_s9 + $0x28] sm:$0xff]  ;;  %v2170_v52 = vsub.f32 1.0, %v2165_v4  ;;  %v2172_v21 = vmul.f32 %v2165_v4, %v7876_v63 }
 0x49f   :  { %v8381_v42 = vadd.f32 1.0, %v5590_v37  ;;  %10450 = vst [vmem:[#allocation65_spill] sm:$0xff] %v8392_v40  ;;  %2463 = vmatpush.msrb.mxu1 %v8379_v31  ;;  %v8410_v57 = vld [vmem:[%s10124_s1 + $0x18] sm:$0xff]  ;;  %v8416_v37 = vld [vmem:[%s10120_s9 + $0x20] sm:$0xff]  ;;  %v8439_v31 = vld [vmem:[%s10120_s9 + $0x10] sm:$0xff] }
 0x4a0   :  { %10451 = vst [vmem:[#allocation67_spill] sm:$0xff] %v8397_v22  ;;  %2424 = vmatpush.msrb.mxu3 %v8387_v9  ;;  %2444 = vmatpush.msra.mxu0 %v8392_v40  ;;  %v10228_v44 = vsub.f32 1.0, %v8410_v57 }
 0x4a1   :  { %10452 = vst [vmem:[#allocation69_spill] sm:$0xff] %v8404_v38  ;;  %5595 = vrcp.f32 %v8381_v42  ;;  %2464 = vmatpush.msrb.mxu1 %v8397_v22  ;;  %vm2184_vm3 = vweird.f32 %v8381_v42 }
 0x4a2   :  { %2425 = vmatpush.msrb.mxu3 %v8404_v38  ;;  %10453 = vst [vmem:[#allocation71_spill] sm:$0xff] %v8434_v51  ;;  %2445 = vmatpush.msra.mxu0 %v8416_v37  ;;  %v2223_v4 = vmul.f32 %v10228_v44, %v7876_v63 }
 0x4a3   :  { %v5592_v24 = vpop.eup %5591  ;;  %2465 = vmatpush.msrb.mxu1 %v8421_v1 }
 0x4a4   :  { %v5594_v40 = vpop.eup %5593  ;;  %v2171_v22 = vmul.f32 %v5592_v24, %v2170_v52  ;;  %2426 = vmatpush.msrb.mxu3 %v8428_v10  ;;  %2446 = vmatpush.msra.mxu0 %v8434_v51 }
 0x4a5   :  { %v8445_v6 = vadd.f32 1.0, %v5594_v40  ;;  %2466 = vmatpush.msrb.mxu1 %v8439_v31  ;;  %v2190_v40 = vand.u32 2147483648, %v8381_v42 }
 0x4a6   :  { %v2173_v41 = vadd.f32 %v2172_v21, %v2171_v22  ;;  %2659 = vmatpush.msra.mxu3 %v7901_v34  ;;  %v2063_v34 = vperm.slane %v8149_v59, 2 }
 0x4a7   :  { %v5596_v38 = vpop.eup %5595  ;;  %5597 = vrcp.f32 %v8445_v6  ;;  %vm2204_vm7 = vweird.f32 %v8445_v6 }
 0x4a8   :  { %v2180_v24 = vmul.f32 %v5596_v38, %v8381_v42  ;;  %v8454_v52 = vmul.f32 %v2173_v41, %v8410_v57  ;;  %2660 = vmatpush.msra.mxu3 %v7907_v36  ;;  %vm2185_vm2 = vweird.f32 %v5596_v38  ;;  %v2188_v41 = vand.u32 2147483647, %v8381_v42  ;;  %v2124_v36 = vpop.f32.mrf.mxu3 }
 0x4a9   :  { %vm2186_vm4 = vmor %vm2184_vm3, %vm2185_vm2 }
 0x4aa   :  { %10454 = vst [vmem:[#allocation73_spill] sm:$0xff] %v8454_v52  ;;  %v2181_v22 = vsub.f32 1.0, %v2180_v24  ;;  %v8461_v21 = vadd.f32 %v2223_v4, %v8454_v52  ;;  %2661 = vmatpush.msra.mxu3 %v7913_v48  ;;  %v2191_v48 = vor.u32 1.1754944e-38, %v2190_v40  ;;  %vm2189_vm5 = vcmp.eq.f32.partialorder %v2188_v41, 8.507059e+37  ;;  %v10475_v41 = vld [vmem:[#allocation12_spill] sm:$0xff]  ;;  %v8999_v52 = vld [vmem:[%s10120_s9 + $0xf8] sm:$0xff] }
 0x4ac   :  { %v2182_v51 = vmul.f32 %v5596_v38, %v2181_v22  ;;  %2311 = vmatmul.f32.vlgmr.msrb.gmra.mxu0 %v8461_v21  ;;  %2331 = vmatmul.f32.vlgmr.msra.gmra.mxu1 %v8461_v21  ;;  %v2125_v22 = vadd.f32 %v2124_v36, %v2063_v34 }
 0x4ad   :  { %v5598_v63 = vpop.eup %5597  ;;  %2351 = vmatmul.f32.vlgmr.msrb.gmra.mxu2 %v8461_v21  ;;  %2679 = vmatpush.msrb.mxu0 %v7925_v2  ;;  %v10455_v2 = vld [vmem:[#allocation47_spill] sm:$0xff] }
 0x4ae   :  { %v2200_v24 = vmul.f32 %v5598_v63, %v8445_v6  ;;  %v2183_v4 = vadd.f32 %v5596_v38, %v2182_v51  ;;  %2662 = vmatpush.msra.mxu3 %v7919_v15  ;;  %2755 = vmatpush.msra.mxu1 %v8087_v12  ;;  %v798_v51 = vadd.f32 %v10455_v2, %v6947_v61  ;;  %vm2205_vm6 = vweird.f32 %v5598_v63 }
 0x4af   :  { %2680 = vmatpush.msrb.mxu0 %v7937_v33  ;;  %v2210_v12 = vand.u32 2147483648, %v8445_v6  ;;  %v2208_v33 = vand.u32 2147483647, %v8445_v6  ;;  %vm2206_vm8 = vmor %vm2204_vm7, %vm2205_vm6  ;;  %v2625_v6 = vld [vmem:[%s10119_s7 + $0x150] sm:$0xff] }
 0x4b0   :  { %v2201_v59 = vsub.f32 1.0, %v2200_v24  ;;  %v2187_v44 = vsel %vm2186_vm4, %v5596_v38, %v2183_v4  ;;  %2663 = vmatpush.msra.mxu3 %v7931_v5  ;;  %2756 = vmatpush.msra.mxu1 %v8114_v47 }
 0x4b1   :  { %v2192_v42 = vsel %vm2189_vm5, %v2191_v48, %v2187_v44  ;;  %2681 = vmatpush.msrb.mxu0 %v7949_v20  ;;  %v2211_v20 = vor.u32 1.1754944e-38, %v2210_v12  ;;  %vm2209_vm9 = vcmp.eq.f32.partialorder %v2208_v33, 8.507059e+37  ;;  %v2610_v48 = vld [vmem:[%s10119_s7 + $0xd8] sm:$0xff]  ;;  %v2604_v12 = vld [vmem:[%s10119_s7 + $0xa8] sm:$0xff] }
 0x4b2   :  { %v2202_v15 = vmul.f32 %v5598_v63, %v2201_v59  ;;  %v2214_v40 = vmul.f32 %v2192_v42, %v2125_v22  ;;  %2664 = vmatpush.msra.mxu3 %v7943_v29  ;;  %2757 = vmatpush.msra.mxu1 %v8139_v58  ;;  %v10469_v58 = vld [vmem:[#allocation51_spill] sm:$0xff] }
 0x4b3   :  { %2682 = vmatpush.msrb.mxu0 %v7966_v16  ;;  %v10477_v22 = vld [vmem:[#allocation23_spill] sm:$0xff] }
 0x4b4   :  { %v2203_v5 = vadd.f32 %v5598_v63, %v2202_v15  ;;  %v2215_v47 = vadd.f32 %v2214_v40, %v798_v51  ;;  %2665 = vmatpush.msra.mxu3 %v7955_v43  ;;  %2758 = vmatpush.msra.mxu1 %v8168_v27  ;;  %v8499_v43 = vld [vmem:[%s10124_s1 + $0x20] sm:$0xff]  ;;  %v2601_v40 = vld [vmem:[%s10119_s7 + $0x90] sm:$0xff]  ;;  %v2598_v33 = vld [vmem:[%s10119_s7 + $0x78] sm:$0xff] }
 0x4b5   :  { %2683 = vmatpush.msrb.mxu0 %v7980_v26  ;;  %v10470_v27 = vld [vmem:[#allocation48_spill] sm:$0xff] }
 0x4b6   :  { %v2207_v44 = vsel %vm2206_vm8, %v5598_v63, %v2203_v5  ;;  %5599 = vtanh.f32 %v2215_v47  ;;  %2666 = vmatpush.msra.mxu3 %v7974_v25  ;;  %2759 = vmatpush.msra.mxu1 %v8188_v18  ;;  %v10471_v18 = vld [vmem:[#allocation59_spill] sm:$0xff]  ;;  %v10476_v63 = vld [vmem:[#allocation8_spill] sm:$0xff] }
 0x4b7   :  { %2684 = vmatpush.msrb.mxu0 %v7992_v14  ;;  %v2212_v29 = vsel %vm2209_vm9, %v2211_v20, %v2207_v44  ;;  %v653_v36 = vadd.f32 %v10476_v63, %v10475_v41  ;;  %v2607_v51 = vld [vmem:[%s10119_s7 + $0xc0] sm:$0xff]  ;;  %v2592_v20 = vld [vmem:[%s10119_s7 + $0x48] sm:$0xff] }
 0x4b8   :  { %2667 = vmatpush.msra.mxu3 %v7986_v62  ;;  %2760 = vmatpush.msra.mxu1 %v8211_v35  ;;  %v2217_v16 = vsub.f32 1.0, %v2212_v29  ;;  %v2219_v26 = vmul.f32 %v2212_v29, %v7893_v45  ;;  %v2226_v62 = vsub.f32 1.0, %v8499_v43  ;;  %v2595_v5 = vld [vmem:[%s10119_s7 + $0x60] sm:$0xff] }
 0x4b9   :  { %2685 = vmatpush.msrb.mxu0 %v8008_v32 }
 0x4ba   :  { %2668 = vmatpush.msra.mxu3 %v8002_v30  ;;  %2761 = vmatpush.msra.mxu1 %v8230_v7  ;;  %v2227_v32 = vmul.f32 %v2226_v62, %v7893_v45  ;;  %v10457_v45 = vld [vmem:[#allocation79_spill] sm:$0xff]  ;;  %v10472_v7 = vld [vmem:[#allocation61_spill] sm:$0xff] }
 0x4bb   :  { %2686 = vmatpush.msrb.mxu0 %v8020_v60  ;;  %v10458_v60 = vld [vmem:[#allocation52_spill] sm:$0xff] }
 0x4bc   :  { %v5600_v25 = vpop.eup %5599  ;;  %2669 = vmatpush.msra.mxu3 %v8014_v3  ;;  %2762 = vmatpush.msra.mxu1 %v8254_v23  ;;  %v10473_v23 = vld [vmem:[#allocation63_spill] sm:$0xff] }
 0x4bd   :  { %v2218_v35 = vmul.f32 %v5600_v25, %v2217_v16  ;;  %2687 = vmatpush.msrb.mxu0 %v8032_v50  ;;  %v10460_v50 = vld [vmem:[#allocation55_spill] sm:$0xff]  ;;  %v2589_v25 = vld [vmem:[%s10119_s7 + $0x30] sm:$0xff] }
 0x4be   :  { %2670 = vmatpush.msra.mxu3 %v8026_v0  ;;  %2763 = vmatpush.msra.mxu1 %v8279_v39  ;;  %v10459_v0 = vld [vmem:[#allocation58_spill] sm:$0xff]  ;;  %v10474_v39 = vld [vmem:[#allocation67_spill] sm:$0xff]  ;;  %10516 = vst [vmem:[#allocation55_spill] sm:$0xff] %v8999_v52 }
 0x4bf   :  { %v2220_v14 = vadd.f32 %v2219_v26, %v2218_v35  ;;  %2688 = vmatpush.msrb.mxu0 %v8044_v28  ;;  %v10462_v28 = vld [vmem:[#allocation64_spill] sm:$0xff]  ;;  %v2586_v35 = vld [vmem:[%s10119_s7 + $0x18] sm:$0xff] }
 0x4c0   :  { %2671 = vmatpush.msra.mxu3 %v8038_v13  ;;  %2764 = vmatpush.msra.mxu1 %v8301_v56  ;;  %v10461_v13 = vld [vmem:[#allocation69_spill] sm:$0xff]  ;;  %v8618_v26 = vld [vmem:[%s10123_s10] sm:$0x7] }
 0x4c1   :  { %v8515_v30 = vmul.f32 %v2220_v14, %v8499_v43  ;;  %2689 = vmatpush.msrb.mxu0 %v8056_v54  ;;  %v10464_v54 = vld [vmem:[#allocation68_spill] sm:$0xff]  ;;  %v2628_v56 = vld [vmem:[%s10119_s7 + $0x168] sm:$0xff] }
 0x4c2   :  { %2672 = vmatpush.msra.mxu3 %v8050_v8  ;;  %2765 = vmatpush.msra.mxu1 %v8324_v11  ;;  %v10463_v8 = vld [vmem:[#allocation62_spill] sm:$0xff]  ;;  %v2622_v11 = vld [vmem:[%s10119_s7 + $0x138] sm:$0xff]  ;;  %v2583_v14 = vld [vmem:[%s10119_s7] sm:$0xff] }
 0x4c3   :  { %10456 = vst [vmem:[#allocation75_spill] sm:$0xff] %v8515_v30  ;;  %v8524_v3 = vadd.f32 %v2227_v32, %v8515_v30  ;;  %2690 = vmatpush.msrb.mxu0 %v8068_v53  ;;  %v10466_v53 = vld [vmem:[#allocation76_spill] sm:$0xff]  ;;  %2639 = vmatpush.msra.mxu2 %v2628_v56  ;;  %v10478_v32 = vld [vmem:[#allocation53_spill] sm:$0xff] }
 0x4c4   :  { %2673 = vmatpush.msra.mxu3 %v8062_v46  ;;  %2766 = vmatpush.msra.mxu1 %v8351_v55  ;;  %v10465_v46 = vld [vmem:[#allocation72_spill] sm:$0xff] }
 0x4c5   :  { %2427 = vmatmul.f32.vlgmr.msrb.gmra.mxu3 %v8524_v3  ;;  %2447 = vmatmul.f32.vlgmr.msra.gmra.mxu0 %v8524_v3  ;;  %v2619_v55 = vld [vmem:[%s10119_s7 + $0x120] sm:$0xff] }
 0x4c6   :  { %2467 = vmatmul.f32.vlgmr.msrb.gmra.mxu1 %v8524_v3  ;;  %2691 = vmatpush.msrb.mxu0 %v8082_v17  ;;  %v10468_v17 = vld [vmem:[#allocation13_spill] sm:$0xff] }
 0x4c7   :  { %2674 = vmatpush.msra.mxu3 %v8074_v19  ;;  %2767 = vmatpush.msra.mxu1 %v8369_v49  ;;  %v10467_v19 = vld [vmem:[#allocation82_spill] sm:$0xff] }
 0x4c8   :  { %2692 = vmatpush.msrb.mxu0 %v10457_v45  ;;  %2640 = vmatpush.msra.mxu2 %v2625_v6 }
 0x4c9   :  { %2795 = vmatpush.msrb.mxu3 %v10458_v60  ;;  %2768 = vmatpush.msra.mxu1 %v8387_v9  ;;  %v2613_v9 = vld [vmem:[%s10119_s7 + $0xf0] sm:$0xff]  ;;  %v2406_v60 = vperm.slane %v8618_v26, 1 }
 0x4ca   :  { %2693 = vmatpush.msrb.mxu0 %v10459_v0  ;;  %2641 = vmatpush.msra.mxu2 %v2622_v11 }
 0x4cb   :  { %2796 = vmatpush.msrb.mxu3 %v10460_v50  ;;  %2769 = vmatpush.msra.mxu1 %v10461_v13  ;;  %v10479_v13 = vld [vmem:[#allocation56_spill] sm:$0xff] }
 0x4cc   :  { %2694 = vmatpush.msrb.mxu0 %v10462_v28  ;;  %2642 = vmatpush.msra.mxu2 %v2619_v55 }
 0x4cd   :  { %2797 = vmatpush.msrb.mxu3 %v10463_v8  ;;  %2770 = vmatpush.msra.mxu1 %v8428_v10  ;;  %v8569_v10 = vld [vmem:[%s10122_s8] sm:$0x7] }
 0x4ce   :  { %2983 = vmatpush.msra.mxu0 %v2628_v56  ;;  %v2289_v49 = vperm.slane %v8569_v10, 0  ;;  %v10483_v56 = vld [vmem:[#allocation66_spill] sm:$0xff] }
 0x4cf   :  { %2798 = vmatpush.msrb.mxu3 %v10464_v54 }
 0x4d0   :  { %2984 = vmatpush.msra.mxu0 %v2625_v6 }
 0x4d1   :  { %2799 = vmatpush.msrb.mxu3 %v10465_v46  ;;  %v10480_v46 = vld [vmem:[#allocation60_spill] sm:$0xff] }
 0x4d2   :  { %2985 = vmatpush.msra.mxu0 %v2622_v11 }
 0x4d3   :  { %2800 = vmatpush.msrb.mxu3 %v10466_v53  ;;  %v10481_v53 = vld [vmem:[#allocation35_spill] sm:$0xff] }
 0x4d4   :  { %2986 = vmatpush.msra.mxu0 %v2619_v55 }
 0x4d5   :  { %2801 = vmatpush.msrb.mxu3 %v10467_v19  ;;  %v10482_v19 = vld [vmem:[#allocation44_spill] sm:$0xff] }
 0x4d7   :  { %2802 = vmatpush.msrb.mxu3 %v10468_v17  ;;  %v766_v17 = vadd.f32 %v10482_v19, %v10481_v53  ;;  %v9005_v53 = vld [vmem:[%s10120_s9 + $0x100] sm:$0xff] }
 0x4d8   :  { %10517 = vst [vmem:[#allocation69_spill] sm:$0xff] %v9005_v53 }
 0x4d9   :  { %2803 = vmatpush.msrb.mxu3 %v10469_v58 }
 0x4db   :  { %2804 = vmatpush.msrb.mxu3 %v10470_v27 }
 0x4dd   :  { %2805 = vmatpush.msrb.mxu3 %v10471_v18 }
 0x4df   :  { %2806 = vmatpush.msrb.mxu3 %v10472_v7  ;;  %v2291_v7 = vperm.slane %v8569_v10, 2 }
 0x4e1   :  { %2807 = vmatpush.msrb.mxu3 %v10473_v23 }
 0x4e3   :  { %2808 = vmatpush.msrb.mxu3 %v10474_v39 }
 0x4e5   :  { %2809 = vmatpush.msrb.mxu3 %v8421_v1  ;;  %v2290_v1 = vperm.slane %v8569_v10, 1 }
 0x4e7   :  { %2810 = vmatpush.msrb.mxu3 %v8439_v31  ;;  %v2616_v31 = vld [vmem:[%s10119_s7 + $0x108] sm:$0xff] }
 0x4e8   :  { %2643 = vmatpush.msra.mxu2 %v2616_v31  ;;  %2987 = vmatpush.msra.mxu0 %v2616_v31  ;;  %v10484_v31 = vld [vmem:[#allocation70_spill] sm:$0xff] }
 0x4ea   :  { %2644 = vmatpush.msra.mxu2 %v2613_v9  ;;  %2988 = vmatpush.msra.mxu0 %v2613_v9  ;;  %v10485_v9 = vld [vmem:[#allocation17_spill] sm:$0xff] }
 0x4ec   :  { %2645 = vmatpush.msra.mxu2 %v2610_v48  ;;  %2989 = vmatpush.msra.mxu0 %v2610_v48  ;;  %v10487_v48 = vld [vmem:[#allocation74_spill] sm:$0xff] }
 0x4ee   :  { %2646 = vmatpush.msra.mxu2 %v2607_v51  ;;  %2990 = vmatpush.msra.mxu0 %v2607_v51 }
 0x4f0   :  { %2647 = vmatpush.msra.mxu2 %v2604_v12  ;;  %2991 = vmatpush.msra.mxu0 %v2604_v12 }
 0x4f2   :  { %2648 = vmatpush.msra.mxu2 %v2601_v40  ;;  %2992 = vmatpush.msra.mxu0 %v2601_v40 }
 0x4f4   :  { %2649 = vmatpush.msra.mxu2 %v2598_v33  ;;  %2993 = vmatpush.msra.mxu0 %v2598_v33  ;;  %v10489_v33 = vld [vmem:[#allocation24_spill] sm:$0xff] }
 0x4f6   :  { %2650 = vmatpush.msra.mxu2 %v2595_v5  ;;  %2994 = vmatpush.msra.mxu0 %v2595_v5 }
 0x4f8   :  { %2651 = vmatpush.msra.mxu2 %v2592_v20  ;;  %2995 = vmatpush.msra.mxu0 %v2592_v20 }
 0x4fa   :  { %2652 = vmatpush.msra.mxu2 %v2589_v25  ;;  %2996 = vmatpush.msra.mxu0 %v2589_v25  ;;  %v10491_v25 = vld [vmem:[#allocation6_spill] sm:$0xff] }
 0x4fc   :  { %2653 = vmatpush.msra.mxu2 %v2586_v35  ;;  %2997 = vmatpush.msra.mxu0 %v2586_v35 }
 0x4fe   :  { %2654 = vmatpush.msra.mxu2 %v2583_v14  ;;  %2998 = vmatpush.msra.mxu0 %v2583_v14 }
 0x500   :  { %2775 = vmatpush.msrb.mxu2 %v10478_v32 }
 0x502   :  { %2776 = vmatpush.msrb.mxu2 %v10479_v13  ;;  %v10494_v13 = vld [vmem:[#allocation39_spill] sm:$0xff] }
 0x504   :  { %2777 = vmatpush.msrb.mxu2 %v10480_v46  ;;  %v10495_v46 = vld [vmem:[#allocation15_spill] sm:$0xff] }
 0x506   :  { %2778 = vmatpush.msrb.mxu2 %v10483_v56 }
 0x508   :  { %2779 = vmatpush.msrb.mxu2 %v10484_v31 }
 0x50a   :  { %2780 = vmatpush.msrb.mxu2 %v10487_v48 }
 0x529   :  { %v2312_v38 = vpop.f32.mrf.mxu0  ;;  %v2332_v34 = vpop.f32.mrf.mxu1 }
 0x52a   :  { %v2313_v24 = vadd.f32 %v2312_v38, %v2289_v49  ;;  %v2333_v4 = vadd.f32 %v2332_v34, %v2290_v1  ;;  %v2405_v49 = vperm.slane %v8618_v26, 0  ;;  %v10486_v38 = vld [vmem:[#allocation31_spill] sm:$0xff] }
 0x52b   :  { %v737_v34 = vadd.f32 %v10486_v38, %v10485_v9 }
 0x52c   :  { %v2471_v59 = vadd.f32 %v2313_v24, %v653_v36  ;;  %v2491_v2 = vadd.f32 %v2333_v4, %v10477_v22 }
 0x52e   :  { %v5083_v42 = vmul.f32 -1.442695, %v2471_v59  ;;  %v5084_v15 = vmul.f32 -1.442695, %v2491_v2 }
 0x530   :  { %5601 = vpow2.f32 %v5083_v42  ;;  %v2352_v11 = vpop.f32.mrf.mxu2 }
 0x531   :  { %5603 = vpow2.f32 %v5084_v15  ;;  %v2353_v36 = vadd.f32 %v2352_v11, %v2291_v7  ;;  %v10488_v15 = vld [vmem:[#allocation78_spill] sm:$0xff] }
 0x532   :  { %2781 = vmatpush.msrb.mxu2 %v10488_v15 }
 0x536   :  { %v5602_v47 = vpop.eup %5601 }
 0x537   :  { %v5604_v44 = vpop.eup %5603  ;;  %v2475_v29 = vadd.f32 1.0, %v5602_v47  ;;  %v10490_v47 = vld [vmem:[#allocation14_spill] sm:$0xff] }
 0x538   :  { %v8606_v16 = vadd.f32 1.0, %v5604_v44  ;;  %2782 = vmatpush.msrb.mxu2 %v10490_v47 }
 0x539   :  { %5605 = vrcp.f32 %v2475_v29  ;;  %v2487_v27 = vand.u32 2147483648, %v2475_v29  ;;  %v2485_v39 = vand.u32 2147483647, %v2475_v29  ;;  %vm2481_vm11 = vweird.f32 %v2475_v29 }
 0x53a   :  { %5607 = vrcp.f32 %v8606_v16  ;;  %v2507_v51 = vand.u32 2147483648, %v8606_v16  ;;  %vm2501_vm15 = vweird.f32 %v8606_v16  ;;  %v2505_v12 = vand.u32 2147483647, %v8606_v16  ;;  %2783 = vmatpush.msrb.mxu2 %v10491_v25  ;;  %v8684_v25 = vld [vmem:[%s10119_s7 + $0x170] sm:$0xff] }
 0x53b   :  { %v2488_v63 = vor.u32 1.1754944e-38, %v2487_v27  ;;  %vm2486_vm14 = vcmp.eq.f32.partialorder %v2485_v39, 8.507059e+37  ;;  %v10498_v39 = vld [vmem:[#allocation71_spill] sm:$0xff]  ;;  %3003 = vmatpush.msrb.mxu1 %v8684_v25 }
 0x53c   :  { %vm2506_vm3 = vcmp.eq.f32.partialorder %v2505_v12, 8.507059e+37 }
 0x53f   :  { %v5606_v45 = vpop.eup %5605 }
 0x540   :  { %v5608_v0 = vpop.eup %5607  ;;  %v2477_v50 = vmul.f32 %v5606_v45, %v2475_v29  ;;  %vm2482_vm10 = vweird.f32 %v5606_v45  ;;  %v2508_v29 = vor.u32 1.1754944e-38, %v2507_v51 }
 0x541   :  { %v2497_v28 = vmul.f32 %v5608_v0, %v8606_v16  ;;  %vm2483_vm12 = vmor %vm2481_vm11, %vm2482_vm10  ;;  %vm2502_vm13 = vweird.f32 %v5608_v0  ;;  %v10493_v16 = vld [vmem:[#allocation57_spill] sm:$0xff] }
 0x542   :  { %v2478_v8 = vsub.f32 1.0, %v2477_v50  ;;  %v2448_v54 = vpop.f32.mrf.mxu0  ;;  %vm2503_vm2 = vmor %vm2501_vm15, %vm2502_vm13 }
 0x543   :  { %v2498_v58 = vsub.f32 1.0, %v2497_v28  ;;  %v2449_v18 = vadd.f32 %v2448_v54, %v2406_v60 }
 0x544   :  { %v2479_v23 = vmul.f32 %v5606_v45, %v2478_v8 }
 0x545   :  { %v2499_v6 = vmul.f32 %v5608_v0, %v2498_v58  ;;  %v2538_v55 = vadd.f32 %v2449_v18, %v766_v17  ;;  %v10496_v17 = vld [vmem:[#allocation65_spill] sm:$0xff]  ;;  %v2567_v18 = vmul.f32 %v2226_v62, %v8461_v21 }
 0x546   :  { %v2480_v1 = vadd.f32 %v5606_v45, %v2479_v23 }
 0x547   :  { %v5086_v10 = vmul.f32 -1.442695, %v2538_v55  ;;  %v2500_v22 = vadd.f32 %v5608_v0, %v2499_v6 }
 0x548   :  { %v2484_v24 = vsel %vm2483_vm12, %v5606_v45, %v2480_v1  ;;  %v2428_v4 = vpop.f32.mrf.mxu3  ;;  %v10492_v45 = vld [vmem:[#allocation54_spill] sm:$0xff]  ;;  %v2468_v1 = vpop.f32.mrf.mxu1 }
 0x549   :  { %v2489_v59 = vsel %vm2486_vm14, %v2488_v63, %v2484_v24  ;;  %5609 = vpow2.f32 %v5086_v10  ;;  %v2429_v2 = vadd.f32 %v2428_v4, %v2405_v49  ;;  %v2504_v20 = vsel %vm2503_vm2, %v5608_v0, %v2500_v22  ;;  %2784 = vmatpush.msrb.mxu2 %v10492_v45  ;;  %v10499_v24 = vld [vmem:[#allocation45_spill] sm:$0xff]  ;;  %v8720_v45 = vld [vmem:[%s10119_s7 + $0x160] sm:$0xff] }
 0x54a   :  { %v2511_v42 = vmul.f32 %v2489_v59, %v2353_v36  ;;  %v2509_v14 = vsel %vm2506_vm3, %v2508_v29, %v2504_v20  ;;  %v795_v4 = vadd.f32 %v10499_v24, %v6947_v61  ;;  %v10501_v20 = vsub.f32 1.0, %v8410_v57  ;;  %v8827_v24 = vld [vmem:[%s10119_s7 + $0xa0] sm:$0xff] }
 0x54b   :  { %v2518_v40 = vadd.f32 %v2429_v2, %v737_v34  ;;  %2785 = vmatpush.msrb.mxu2 %v10493_v16  ;;  %v2514_v60 = vsub.f32 1.0, %v2509_v14  ;;  %v2516_v8 = vmul.f32 %v2509_v14, %v8461_v21  ;;  %v2407_v21 = vperm.slane %v8618_v26, 2  ;;  %v8708_v14 = vld [vmem:[%s10119_s7 + $0x178] sm:$0xff] }
 0x54c   :  { %v2512_v5 = vadd.f32 %v2511_v42, %v10489_v33  ;;  %v8726_v16 = vld [vmem:[%s10119_s7 + $0xf8] sm:$0xff] }
 0x54d   :  { %v5085_v44 = vmul.f32 -1.442695, %v2518_v40  ;;  %2786 = vmatpush.msrb.mxu2 %v10494_v13  ;;  %v2469_v34 = vadd.f32 %v2468_v1, %v2407_v21  ;;  %v8743_v13 = vld [vmem:[%s10122_s8] sm:$0x7]  ;;  %v8785_v21 = vld [vmem:[%s10119_s7 + $0x98] sm:$0xff] }
 0x54e   :  { %5611 = vtanh.f32 %v2512_v5  ;;  %v8797_v1 = vld [vmem:[%s10119_s7 + $0x80] sm:$0xff] }
 0x54f   :  { %v5610_v35 = vpop.eup %5609  ;;  %5613 = vpow2.f32 %v5085_v44  ;;  %2787 = vmatpush.msrb.mxu2 %v10495_v46  ;;  %v2571_v44 = vmul.f32 %v8524_v3, %v10501_v20  ;;  %v8763_v46 = vld [vmem:[%s10119_s7 + $0x118] sm:$0xff]  ;;  %v8892_v20 = vld [vmem:[%s10119_s7 + $0x40] sm:$0xff] }
 0x550   :  { %v2542_v32 = vadd.f32 1.0, %v5610_v35  ;;  %v8702_v35 = vld [vmem:[%s10119_s7 + $0x128] sm:$0xff] }
 0x551   :  { %2788 = vmatpush.msrb.mxu2 %v10496_v17 }
 0x552   :  { %5615 = vrcp.f32 %v2542_v32  ;;  %v2554_v48 = vand.u32 2147483648, %v2542_v32  ;;  %vm2548_vm9 = vweird.f32 %v2542_v32  ;;  %v2552_v59 = vand.u32 2147483647, %v2542_v32 }
 0x553   :  { %2789 = vmatpush.msrb.mxu2 %v8416_v37 }
 0x554   :  { %v5612_v50 = vpop.eup %5611  ;;  %v2555_v51 = vor.u32 1.1754944e-38, %v2554_v48  ;;  %vm2553_vm11 = vcmp.eq.f32.partialorder %v2552_v59, 8.507059e+37  ;;  %v8839_v48 = vld [vmem:[%s10119_s7 + $0x88] sm:$0xff]  ;;  %v8851_v59 = vld [vmem:[%s10119_s7 + $0x70] sm:$0xff] }
 0x555   :  { %v5614_v0 = vpop.eup %5613  ;;  %v2515_v28 = vmul.f32 %v5612_v50, %v2514_v60  ;;  %2790 = vmatpush.msrb.mxu2 %v10498_v39  ;;  %v8732_v60 = vld [vmem:[%s10119_s7 + $0x148] sm:$0xff]  ;;  %v8738_v50 = vld [vmem:[%s10119_s7 + $0xe0] sm:$0xff] }
 0x556   :  { %v2522_v54 = vadd.f32 1.0, %v5614_v0  ;;  %v8749_v0 = vld [vmem:[%s10119_s7 + $0x130] sm:$0xff] }
 0x557   :  { %v2517_v19 = vadd.f32 %v2516_v8, %v2515_v28  ;;  %v2633_v28 = vperm.slane %v8743_v13, 0  ;;  %v2634_v8 = vperm.slane %v8743_v13, 1 }
 0x558   :  { %5617 = vrcp.f32 %v2522_v54  ;;  %v5616_v58 = vpop.eup %5615  ;;  %v2532_v62 = vand.u32 2147483647, %v2522_v54  ;;  %vm2528_vm5 = vweird.f32 %v2522_v54 }
 0x559   :  { %v8652_v27 = vmul.f32 %v2517_v19, %v8499_v43  ;;  %v2544_v23 = vmul.f32 %v5616_v58, %v2542_v32  ;;  %v2534_v43 = vand.u32 2147483648, %v2522_v54  ;;  %vm2549_vm8 = vweird.f32 %v5616_v58  ;;  %v8714_v32 = vld [vmem:[%s10119_s7 + $0x110] sm:$0xff] }
 0x55a   :  { %vm2533_vm7 = vcmp.eq.f32.partialorder %v2532_v62, 8.507059e+37  ;;  %vm2550_vm10 = vmor %vm2548_vm9, %vm2549_vm8  ;;  %v8769_v19 = vld [vmem:[%s10119_s7 + $0xb0] sm:$0xff] }
 0x55b   :  { %10497 = vst [vmem:[#allocation77_spill] sm:$0xff] %v8652_v27  ;;  %v8659_v7 = vadd.f32 %v2567_v18, %v8652_v27  ;;  %v2545_v11 = vsub.f32 1.0, %v2544_v23  ;;  %v2535_v38 = vor.u32 1.1754944e-38, %v2534_v43  ;;  %v8775_v18 = vld [vmem:[%s10119_s7 + $0x100] sm:$0xff]  ;;  %v10502_v23 = vld [vmem:[#allocation9_spill] sm:$0xff]  ;;  %v8994_v27 = vld [vmem:[%s10120_s9 + $0xf0] sm:$0xff] }
 0x55c   :  { %v655_v39 = vadd.f32 %v10502_v23, %v10475_v41  ;;  %v8927_v23 = vld [vmem:[%s10120_s9 + $0x140] sm:$0xff] }
 0x55d   :  { %2655 = vmatmul.f32.vlgmr.msra.gmra.mxu2 %v8659_v7  ;;  %2675 = vmatmul.f32.vlgmr.msra.gmra.mxu3 %v8659_v7  ;;  %v2546_v49 = vmul.f32 %v5616_v58, %v2545_v11  ;;  %10509 = vst [vmem:[#allocation34_spill] sm:$0xff] %v8927_v23  ;;  %v9018_v41 = vld [vmem:[%s10120_s9 + $0xe0] sm:$0xff] }
 0x55e   :  { %v5618_v56 = vpop.eup %5617  ;;  %2695 = vmatmul.f32.vlgmr.msrb.gmra.mxu0 %v8659_v7  ;;  %3023 = vmatpush.msra.mxu2 %v8708_v14  ;;  %10518 = vst [vmem:[#allocation64_spill] sm:$0xff] %v9018_v41 }
 0x55f   :  { %v2524_v6 = vmul.f32 %v5618_v56, %v2522_v54  ;;  %vm2529_vm4 = vweird.f32 %v5618_v56  ;;  %v2547_v10 = vadd.f32 %v5616_v58, %v2546_v49  ;;  %v8757_v54 = vld [vmem:[%s10119_s7 + $0xc8] sm:$0xff] }
 0x560   :  { %vm2530_vm6 = vmor %vm2528_vm5, %vm2529_vm4  ;;  %3024 = vmatpush.msra.mxu2 %v8720_v45 }
 0x561   :  { %v2525_v55 = vsub.f32 1.0, %v2524_v6  ;;  %v2551_v2 = vsel %vm2550_vm10, %v5616_v58, %v2547_v10  ;;  %v10504_v6 = vld [vmem:[#allocation26_spill] sm:$0xff]  ;;  %v8815_v10 = vld [vmem:[%s10119_s7 + $0xb8] sm:$0xff] }
 0x562   :  { %v2556_v42 = vsel %vm2553_vm11, %v2555_v51, %v2551_v2  ;;  %3025 = vmatpush.msra.mxu2 %v8732_v60  ;;  %v8857_v2 = vld [vmem:[%s10119_s7 + $0x8] sm:$0xff] }
 0x563   :  { %v2526_v37 = vmul.f32 %v5618_v56, %v2525_v55  ;;  %v2561_v15 = vsub.f32 1.0, %v2556_v42  ;;  %v2563_v33 = vmul.f32 %v2556_v42, %v8524_v3  ;;  %v8696_v3 = vld [vmem:[%s10119_s7 + $0x140] sm:$0xff] }
 0x564   :  { %3026 = vmatpush.msra.mxu2 %v8749_v0 }
 0x565   :  { %v2527_v31 = vadd.f32 %v5618_v56, %v2526_v37  ;;  %v8791_v37 = vld [vmem:[%s10119_s7 + $0xe8] sm:$0xff] }
 0x566   :  { %3027 = vmatpush.msra.mxu2 %v8763_v46 }
 0x567   :  { %v2531_v63 = vsel %vm2530_vm6, %v5618_v56, %v2527_v31  ;;  %v10503_v56 = vld [vmem:[#allocation21_spill] sm:$0xff]  ;;  %v8803_v31 = vld [vmem:[%s10119_s7 + $0xd0] sm:$0xff] }
 0x568   :  { %v2536_v36 = vsel %vm2533_vm7, %v2535_v38, %v2531_v63  ;;  %v684_v11 = vadd.f32 %v10504_v6, %v10503_v56  ;;  %3028 = vmatpush.msra.mxu2 %v8775_v18  ;;  %v8809_v63 = vld [vmem:[%s10119_s7 + $0x68] sm:$0xff] }
 0x569   :  { %v2558_v26 = vmul.f32 %v2536_v36, %v2469_v34  ;;  %v8821_v36 = vld [vmem:[%s10119_s7 + $0x50] sm:$0xff]  ;;  %v8939_v6 = vld [vmem:[%s10120_s9 + $0x148] sm:$0xff] }
 0x56a   :  { %3029 = vmatpush.msra.mxu2 %v8791_v37  ;;  %10510 = vst [vmem:[#allocation46_spill] sm:$0xff] %v8939_v6 }
 0x56b   :  { %v2559_v22 = vadd.f32 %v2558_v26, %v795_v4  ;;  %v8833_v4 = vld [vmem:[%s10119_s7 + $0x38] sm:$0xff]  ;;  %v8845_v26 = vld [vmem:[%s10119_s7 + $0x20] sm:$0xff] }
 0x56c   :  { %3030 = vmatpush.msra.mxu2 %v8803_v31 }
 0x56d   :  { %5619 = vtanh.f32 %v2559_v22 }
 0x56e   :  { %3031 = vmatpush.msra.mxu2 %v8815_v10 }
 0x570   :  { %3032 = vmatpush.msra.mxu2 %v8827_v24 }
 0x572   :  { %3033 = vmatpush.msra.mxu2 %v8839_v48 }
 0x573   :  { %v5620_v12 = vpop.eup %5619 }
 0x574   :  { %v2562_v40 = vmul.f32 %v5620_v12, %v2561_v15  ;;  %3034 = vmatpush.msra.mxu2 %v8851_v59  ;;  %v8865_v15 = vld [vmem:[%s10119_s7 + $0x58] sm:$0xff]  ;;  %v8870_v12 = vld [vmem:[%s10120_s9 + $0x168] sm:$0xff] }
 0x575   :  { %3099 = vmatpush.msra.mxu3 %v8870_v12 }
 0x576   :  { %v2564_v5 = vadd.f32 %v2563_v33, %v2562_v40  ;;  %v8875_v40 = vld [vmem:[%s10120_s9 + $0x170] sm:$0xff]  ;;  %3035 = vmatpush.msra.mxu2 %v8865_v15 }
 0x577   :  { %10505 = vst [vmem:[#allocation81_spill] sm:$0xff] %v8875_v40  ;;  %3119 = vmatpush.msrb.mxu0 %v8875_v40 }
 0x578   :  { %v8670_v47 = vmul.f32 %v2564_v5, %v8410_v57  ;;  %v8690_v57 = vld [vmem:[%s10119_s7 + $0x158] sm:$0xff]  ;;  %3036 = vmatpush.msra.mxu2 %v8892_v20 }
 0x579   :  { %3004 = vmatpush.msrb.mxu1 %v8690_v57  ;;  %v8884_v5 = vld [vmem:[%s10120_s9 + $0x178] sm:$0xff] }
 0x57a   :  { %10500 = vst [vmem:[#allocation80_spill] sm:$0xff] %v8670_v47  ;;  %v8676_v29 = vadd.f32 %v2571_v44, %v8670_v47  ;;  %v8897_v44 = vld [vmem:[%s10120_s9 + $0x150] sm:$0xff] }
 0x57b   :  { %3005 = vmatpush.msrb.mxu1 %v8696_v3  ;;  %3100 = vmatpush.msra.mxu3 %v8897_v44 }
 0x57c   :  { %2771 = vmatmul.f32.vlgmr.msra.gmra.mxu1 %v8676_v29  ;;  %2791 = vmatmul.f32.vlgmr.msrb.gmra.mxu2 %v8676_v29 }
 0x57d   :  { %2811 = vmatmul.f32.vlgmr.msrb.gmra.mxu3 %v8676_v29  ;;  %3006 = vmatpush.msrb.mxu1 %v8702_v35 }
 0x57f   :  { %3007 = vmatpush.msrb.mxu1 %v8714_v32 }
 0x581   :  { %3008 = vmatpush.msrb.mxu1 %v8726_v16 }
 0x583   :  { %3009 = vmatpush.msrb.mxu1 %v8738_v50 }
 0x585   :  { %3010 = vmatpush.msrb.mxu1 %v8757_v54 }
 0x587   :  { %3011 = vmatpush.msrb.mxu1 %v8769_v19 }
 0x589   :  { %3012 = vmatpush.msrb.mxu1 %v8785_v21 }
 0x58b   :  { %3013 = vmatpush.msrb.mxu1 %v8797_v1 }
 0x58d   :  { %3014 = vmatpush.msrb.mxu1 %v8809_v63 }
 0x58f   :  { %3015 = vmatpush.msrb.mxu1 %v8821_v36 }
 0x591   :  { %3016 = vmatpush.msrb.mxu1 %v8833_v4 }
 0x593   :  { %3017 = vmatpush.msrb.mxu1 %v8845_v26 }
 0x595   :  { %3018 = vmatpush.msrb.mxu1 %v8857_v2 }
 0x597   :  { %3139 = vmatpush.msra.mxu1 %v8884_v5 }
 0x5e0   :  { %v2656_v17 = vpop.f32.mrf.mxu2  ;;  %v2676_v58 = vpop.f32.mrf.mxu3 }
 0x5e1   :  { %v2657_v55 = vadd.f32 %v2656_v17, %v2633_v28  ;;  %v2677_v43 = vadd.f32 %v2676_v58, %v2634_v8  ;;  %v8902_v28 = vld [vmem:[%s10120_s9 + $0x158] sm:$0xff]  ;;  %v8910_v8 = vld [vmem:[%s10120_s9 + $0x160] sm:$0xff]  ;;  %v8917_v17 = vld [vmem:[%s10119_s7 + $0x28] sm:$0xff] }
 0x5e2   :  { %10506 = vst [vmem:[#allocation49_spill] sm:$0xff] %v8902_v28  ;;  %3120 = vmatpush.msrb.mxu0 %v8902_v28  ;;  %3140 = vmatpush.msra.mxu1 %v8910_v8  ;;  %v8922_v58 = vld [vmem:[%s10120_s9 + $0x138] sm:$0xff]  ;;  %v9023_v28 = vld [vmem:[%s10120_s9 + $0xe8] sm:$0xff] }
 0x5e3   :  { %v2815_v62 = vadd.f32 %v2657_v55, %v655_v39  ;;  %v2835_v49 = vadd.f32 %v2677_v43, %v684_v11  ;;  %10507 = vst [vmem:[#allocation16_spill] sm:$0xff] %v8910_v8  ;;  %v8932_v39 = vld [vmem:[%s10123_s10] sm:$0x7]  ;;  %3037 = vmatpush.msra.mxu2 %v8917_v17  ;;  %3101 = vmatpush.msra.mxu3 %v8922_v58  ;;  %v8946_v11 = vld [vmem:[%s10119_s7 + $0x10] sm:$0xff]  ;;  %v8956_v43 = vld [vmem:[%s10120_s9 + $0x128] sm:$0xff] }
 0x5e4   :  { %10508 = vst [vmem:[#allocation18_spill] sm:$0xff] %v8917_v17  ;;  %3121 = vmatpush.msrb.mxu0 %v8927_v23  ;;  %3141 = vmatpush.msra.mxu1 %v8939_v6  ;;  %v8951_v55 = vld [vmem:[%s10120_s9 + $0x120] sm:$0xff]  ;;  %v9070_v6 = vld [vmem:[%s10120_s9 + $0xb8] sm:$0xff] }
 0x5e5   :  { %v5087_v38 = vmul.f32 -1.442695, %v2815_v62  ;;  %v5088_v34 = vmul.f32 -1.442695, %v2835_v49  ;;  %10511 = vst [vmem:[#allocation19_spill] sm:$0xff] %v8946_v11  ;;  %3038 = vmatpush.msra.mxu2 %v8946_v11  ;;  %3102 = vmatpush.msra.mxu3 %v8951_v55  ;;  %v8963_v62 = vld [vmem:[%s10120_s9 + $0x130] sm:$0xff] }
 0x5e6   :  { %10512 = vst [vmem:[#allocation47_spill] sm:$0xff] %v8956_v43  ;;  %3122 = vmatpush.msrb.mxu0 %v8956_v43  ;;  %3142 = vmatpush.msra.mxu1 %v8963_v62 }
 0x5e7   :  { %5621 = vpow2.f32 %v5087_v38  ;;  %10513 = vst [vmem:[#allocation79_spill] sm:$0xff] %v8963_v62  ;;  %v2749_v38 = vperm.slane %v8932_v39, 0  ;;  %v2750_v62 = vperm.slane %v8932_v39, 1 }
 0x5e8   :  { %5623 = vpow2.f32 %v5088_v34  ;;  %v8971_v34 = vld [vmem:[%s10120_s9 + $0x108] sm:$0xff]  ;;  %10519 = vst [vmem:[#allocation62_spill] sm:$0xff] %v9023_v28 }
 0x5e9   :  { %3103 = vmatpush.msra.mxu3 %v8971_v34  ;;  %10526 = vst [vmem:[#allocation82_spill] sm:$0xff] %v9070_v6 }
 0x5eb   :  { %3104 = vmatpush.msra.mxu3 %v8994_v27 }
 0x5ed   :  { %v5622_v22 = vpop.eup %5621 }
 0x5ee   :  { %v5624_v51 = vpop.eup %5623  ;;  %v8859_v42 = vadd.f32 1.0, %v5622_v22  ;;  %v8976_v22 = vld [vmem:[%s10120_s9 + $0x110] sm:$0xff] }
 0x5ef   :  { %v8877_v33 = vadd.f32 1.0, %v5624_v51  ;;  %10514 = vst [vmem:[#allocation52_spill] sm:$0xff] %v8976_v22  ;;  %v8981_v51 = vld [vmem:[%s10120_s9 + $0x118] sm:$0xff]  ;;  %3123 = vmatpush.msrb.mxu0 %v8976_v22 }
 0x5f0   :  { %5625 = vrcp.f32 %v8859_v42  ;;  %10515 = vst [vmem:[#allocation58_spill] sm:$0xff] %v8981_v51  ;;  %3143 = vmatpush.msra.mxu1 %v8981_v51  ;;  %v2831_v22 = vand.u32 2147483648, %v8859_v42  ;;  %vm2825_vm13 = vweird.f32 %v8859_v42 }
 0x5f1   :  { %5627 = vrcp.f32 %v8877_v33  ;;  %3124 = vmatpush.msrb.mxu0 %v8999_v52  ;;  %v2696_v52 = vpop.f32.mrf.mxu0  ;;  %vm2845_vm3 = vweird.f32 %v8877_v33 }
 0x5f2   :  { %3144 = vmatpush.msra.mxu1 %v9005_v53  ;;  %v10520_v53 = vld [vmem:[#allocation28_spill] sm:$0xff] }
 0x5f3   :  { %3125 = vmatpush.msrb.mxu0 %v9018_v41 }
 0x5f4   :  { %3145 = vmatpush.msra.mxu1 %v9023_v28  ;;  %v9060_v28 = vld [vmem:[%s10120_s9 + $0xa8] sm:$0xff] }
 0x5f6   :  { %v5626_v49 = vpop.eup %5625 }
 0x5f7   :  { %v8983_v30 = vpop.eup %5627  ;;  %v2821_v47 = vmul.f32 %v5626_v49, %v8859_v42  ;;  %vm2826_vm12 = vweird.f32 %v5626_v49 }
 0x5f8   :  { %v2841_v56 = vmul.f32 %v8983_v30, %v8877_v33  ;;  %vm9050_vm14 = vmor %vm2825_vm13, %vm2826_vm12  ;;  %vm2846_vm2 = vweird.f32 %v8983_v30 }
 0x5f9   :  { %v2822_v61 = vsub.f32 1.0, %v2821_v47  ;;  %v2772_v9 = vpop.f32.mrf.mxu1  ;;  %v9013_v47 = vld [vmem:[%s10120_s9 + $0xd8] sm:$0xff]  ;;  %vm9120_vm4 = vmor %vm2845_vm3, %vm2846_vm2 }
 0x5fa   :  { %v2842_v43 = vsub.f32 1.0, %v2841_v56  ;;  %v2773_v23 = vadd.f32 %v2772_v9, %v2749_v38  ;;  %v2635_v9 = vperm.slane %v8743_v13, 2  ;;  %v2829_v38 = vand.u32 2147483647, %v8859_v42  ;;  %3105 = vmatpush.msra.mxu3 %v9013_v47  ;;  %v9042_v13 = vld [vmem:[%s10120_s9 + $0xc8] sm:$0xff] }
 0x5fb   :  { %v2823_v56 = vmul.f32 %v5626_v49, %v2822_v61  ;;  %v9037_v61 = vld [vmem:[%s10120_s9 + $0xc0] sm:$0xff]  ;;  %10521 = vst [vmem:[#allocation68_spill] sm:$0xff] %v9042_v13  ;;  %3126 = vmatpush.msrb.mxu0 %v9042_v13 }
 0x5fc   :  { %v2843_v40 = vmul.f32 %v8983_v30, %v2842_v43  ;;  %v2862_v51 = vadd.f32 %v2773_v23, %v10520_v53  ;;  %v9047_v53 = vld [vmem:[%s10120_s9 + $0xd0] sm:$0xff]  ;;  %3106 = vmatpush.msra.mxu3 %v9037_v61  ;;  %v2832_v43 = vor.u32 1.1754944e-38, %v2831_v22  ;;  %v2697_v22 = vadd.f32 %v2696_v52, %v2635_v9 }
 0x5fd   :  { %10522 = vst [vmem:[#allocation72_spill] sm:$0xff] %v9047_v53  ;;  %v2824_v42 = vadd.f32 %v5626_v49, %v2823_v56  ;;  %3146 = vmatpush.msra.mxu1 %v9047_v53  ;;  %v9065_v56 = vld [vmem:[%s10120_s9 + $0xb0] sm:$0xff]  ;;  %vm2830_vm15 = vcmp.eq.f32.partialorder %v2829_v38, 8.507059e+37 }
 0x5fe   :  { %v5089_v41 = vmul.f32 -1.442695, %v2862_v51  ;;  %10525 = vst [vmem:[#allocation76_spill] sm:$0xff] %v9065_v56  ;;  %3107 = vmatpush.msra.mxu3 %v9060_v28  ;;  %v2844_v11 = vadd.f32 %v8983_v30, %v2843_v40  ;;  %3127 = vmatpush.msrb.mxu0 %v9065_v56  ;;  %v9082_v52 = vld [vmem:[%s10120_s9 + $0x90] sm:$0xff]  ;;  %v9092_v40 = vld [vmem:[%s10120_s9 + $0xa0] sm:$0xff] }
 0x5ff   :  { %v2828_v51 = vsel %vm9050_vm14, %v5626_v49, %v2824_v42  ;;  %v2792_v13 = vpop.f32.mrf.mxu2  ;;  %3147 = vmatpush.msra.mxu1 %v9070_v6  ;;  %v9087_v49 = vld [vmem:[%s10120_s9 + $0x98] sm:$0xff]  ;;  %10528 = vst [vmem:[#allocation51_spill] sm:$0xff] %v9092_v40  ;;  %v2849_v42 = vand.u32 2147483647, %v8877_v33  ;;  %v10531_v23 = vld [vmem:[#allocation42_spill] sm:$0xff]  ;;  %v9208_v56 = vld [vmem:[%s10120_s9] sm:$0xff] }
 0x600   :  { %v2833_v53 = vsel %vm2830_vm15, %v2832_v43, %v2828_v51  ;;  %5629 = vpow2.f32 %v5089_v41  ;;  %v2793_v8 = vadd.f32 %v2792_v13, %v2750_v62  ;;  %10527 = vst [vmem:[#allocation13_spill] sm:$0xff] %v9087_v49  ;;  %v10529_v41 = vld [vmem:[#allocation22_spill] sm:$0xff]  ;;  %v10530_v62 = vld [vmem:[#allocation27_spill] sm:$0xff]  ;;  %v2851_v13 = vand.u32 2147483648, %v8877_v33  ;;  %3108 = vmatpush.msra.mxu3 %v9082_v52  ;;  %3128 = vmatpush.msrb.mxu0 %v9087_v49  ;;  %v9116_v33 = vld [vmem:[%s10120_s9 + $0x88] sm:$0xff] }
 0x601   :  { %v713_v9 = vadd.f32 %v10530_v62, %v10529_v41  ;;  %v2855_v38 = vmul.f32 %v2833_v53, %v2697_v22  ;;  %3148 = vmatpush.msra.mxu1 %v9092_v40  ;;  %v9106_v51 = vld [vmem:[%s10120_s9 + $0x78] sm:$0xff]  ;;  %v9111_v53 = vld [vmem:[%s10120_s9 + $0x80] sm:$0xff]  ;;  %10533 = vst [vmem:[#allocation59_spill] sm:$0xff] %v9116_v33  ;;  %v2848_v62 = vsel %vm9120_vm4, %v8983_v30, %v2844_v11  ;;  %v9143_v22 = vld [vmem:[%s10120_s9 + $0x70] sm:$0xff]  ;;  %vm2850_vm5 = vcmp.eq.f32.partialorder %v2849_v42, 8.507059e+37 }
 0x602   :  { %v2882_v43 = vadd.f32 %v2793_v8, %v10531_v23  ;;  %10532 = vst [vmem:[#allocation48_spill] sm:$0xff] %v9111_v53  ;;  %3109 = vmatpush.msra.mxu3 %v9106_v51  ;;  %3129 = vmatpush.msrb.mxu0 %v9111_v53  ;;  %v2852_v30 = vor.u32 1.1754944e-38, %v2851_v13  ;;  %v9156_v41 = vld [vmem:[%s10120_s9 + $0x50] sm:$0xff]  ;;  %v9161_v13 = vld [vmem:[%s10120_s9 + $0x58] sm:$0xff]  ;;  %v9179_v53 = vld [vmem:[%s10120_s9 + $0x40] sm:$0xff] }
 0x603   :  { %v2856_v8 = vadd.f32 %v2855_v38, %v713_v9  ;;  %3149 = vmatpush.msra.mxu1 %v9116_v33  ;;  %v9133_v9 = vld [vmem:[%s10120_s9 + $0x60] sm:$0xff]  ;;  %v9138_v38 = vld [vmem:[%s10120_s9 + $0x68] sm:$0xff]  ;;  %10537 = vst [vmem:[#allocation63_spill] sm:$0xff] %v9143_v22  ;;  %v9219_v33 = vld [vmem:[%s10120_s9 + $0x10] sm:$0xff] }
 0x604   :  { %v5090_v23 = vmul.f32 -1.442695, %v2882_v43  ;;  %10536 = vst [vmem:[#allocation61_spill] sm:$0xff] %v9138_v38  ;;  %3110 = vmatpush.msra.mxu3 %v9133_v9  ;;  %3130 = vmatpush.msrb.mxu0 %v9138_v38  ;;  %v9151_v43 = vld [vmem:[%s10120_s9 + $0x48] sm:$0xff]  ;;  %v9174_v38 = vld [vmem:[%s10120_s9 + $0x38] sm:$0xff] }
 0x605   :  { %5631 = vtanh.f32 %v2856_v8  ;;  %3150 = vmatpush.msra.mxu1 %v9143_v22  ;;  %10538 = vst [vmem:[#allocation67_spill] sm:$0xff] %v9156_v41  ;;  %v2853_v8 = vsel %vm2850_vm5, %v2852_v30, %v2848_v62  ;;  %v9186_v62 = vld [vmem:[%s10120_s9 + $0x18] sm:$0xff]  ;;  %v2581_v30 = vld [vmem:[%s10124_s1 + $0x28] sm:$0xff] }
 0x606   :  { %v5630_v11 = vpop.eup %5629  ;;  %5633 = vpow2.f32 %v5090_v23  ;;  %10539 = vst [vmem:[#allocation8_spill] sm:$0xff] %v9161_v13  ;;  %3111 = vmatpush.msra.mxu3 %v9151_v43  ;;  %v9169_v23 = vld [vmem:[%s10120_s9 + $0x30] sm:$0xff]  ;;  %3131 = vmatpush.msrb.mxu0 %v9156_v41  ;;  %v9201_v41 = vld [vmem:[%s10120_s9 + $0x28] sm:$0xff]  ;;  %v2858_v49 = vsub.f32 1.0, %v2853_v8  ;;  %v2860_v40 = vmul.f32 %v2853_v8, %v8659_v7  ;;  %v2910_v6 = vsub.f32 1.0, %v2581_v30 }
 0x607   :  { %v9163_v42 = vadd.f32 1.0, %v5630_v11  ;;  %10540 = vst [vmem:[#allocation23_spill] sm:$0xff] %v9174_v38  ;;  %3151 = vmatpush.msra.mxu1 %v9161_v13  ;;  %v9196_v11 = vld [vmem:[%s10120_s9 + $0x20] sm:$0xff]  ;;  %v9214_v22 = vld [vmem:[%s10120_s9 + $0x8] sm:$0xff] }
 0x608   :  { %10541 = vst [vmem:[#allocation53_spill] sm:$0xff] %v9179_v53  ;;  %3112 = vmatpush.msra.mxu3 %v9169_v23  ;;  %3132 = vmatpush.msrb.mxu0 %v9174_v38 }
 0x609   :  { %10542 = vst [vmem:[#allocation56_spill] sm:$0xff] %v9186_v62  ;;  %5635 = vrcp.f32 %v9163_v42  ;;  %3152 = vmatpush.msra.mxu1 %v9179_v53  ;;  %vm2872_vm7 = vweird.f32 %v9163_v42 }
 0x60a   :  { %10543 = vst [vmem:[#allocation60_spill] sm:$0xff] %v9196_v11  ;;  %3113 = vmatpush.msra.mxu3 %v9186_v62  ;;  %3133 = vmatpush.msrb.mxu0 %v9196_v11 }
 0x60b   :  { %v5632_v13 = vpop.eup %5631  ;;  %10544 = vst [vmem:[#allocation44_spill] sm:$0xff] %v9214_v22  ;;  %3153 = vmatpush.msra.mxu1 %v9201_v41 }
 0x60c   :  { %10545 = vst [vmem:[#allocation66_spill] sm:$0xff] %v9219_v33  ;;  %v5634_v38 = vpop.eup %5633  ;;  %v2859_v53 = vmul.f32 %v5632_v13, %v2858_v49  ;;  %3114 = vmatpush.msra.mxu3 %v9208_v56  ;;  %3134 = vmatpush.msrb.mxu0 %v9214_v22  ;;  %v3316_v49 = vld [vmem:[%s10119_s7 + $0x168] sm:$0xff]  ;;  %v3313_v13 = vld [vmem:[%s10119_s7 + $0x150] sm:$0xff] }
 0x60d   :  { %v9224_v62 = vadd.f32 1.0, %v5634_v38  ;;  %3154 = vmatpush.msra.mxu1 %v9219_v33  ;;  %3327 = vmatpush.msrb.mxu2 %v3316_v49  ;;  %v2911_v38 = vmul.f32 %v2910_v6, %v8659_v7  ;;  %v2878_v33 = vand.u32 2147483648, %v9163_v42  ;;  %v2751_v49 = vperm.slane %v8932_v39, 2 }
 0x60e   :  { %v2861_v17 = vadd.f32 %v2860_v40, %v2859_v53  ;;  %3347 = vmatpush.msrb.mxu3 %v8684_v25 }
 0x60f   :  { %v5636_v8 = vpop.eup %5635  ;;  %5637 = vrcp.f32 %v9224_v62  ;;  %3328 = vmatpush.msrb.mxu2 %v3313_v13  ;;  %vm2892_vm11 = vweird.f32 %v9224_v62 }
 0x610   :  { %v2868_v40 = vmul.f32 %v5636_v8, %v9163_v42  ;;  %v9238_v53 = vmul.f32 %v2861_v17, %v2581_v30  ;;  %3348 = vmatpush.msrb.mxu3 %v8690_v57  ;;  %vm2873_vm6 = vweird.f32 %v5636_v8  ;;  %v2876_v17 = vand.u32 2147483647, %v9163_v42  ;;  %v2812_v57 = vpop.f32.mrf.mxu3 }
 0x611   :  { %vm2874_vm8 = vmor %vm2872_vm7, %vm2873_vm6 }
 0x612   :  { %v2869_v22 = vsub.f32 1.0, %v2868_v40  ;;  %v9243_v11 = vadd.f32 %v2911_v38, %v9238_v53  ;;  %3349 = vmatpush.msrb.mxu3 %v8696_v3  ;;  %v2879_v3 = vor.u32 1.1754944e-38, %v2878_v33  ;;  %vm2877_vm9 = vcmp.eq.f32.partialorder %v2876_v17, 8.507059e+37  ;;  %v3277_v40 = vld [vmem:[%s10119_s7 + $0x30] sm:$0xff]  ;;  %v9371_v38 = vld [vmem:[%s10122_s8] sm:$0x7] }
 0x613   :  { %v5185_v17 = vld [vmem:[%s10125_s11 + $0xa8] sm:$0xf] }
 0x614   :  { %v2870_v25 = vmul.f32 %v5636_v8, %v2869_v22  ;;  %2999 = vmatmul.f32.vlgmr.msra.gmra.mxu0 %v9243_v11  ;;  %3019 = vmatmul.f32.vlgmr.msrb.gmra.mxu1 %v9243_v11  ;;  %v2813_v22 = vadd.f32 %v2812_v57, %v2751_v49  ;;  %v3274_v49 = vld [vmem:[%s10119_s7 + $0x18] sm:$0xff]  ;;  %v2977_v57 = vperm.slane %v9371_v38, 0 }
 0x615   :  { %v5638_v7 = vpop.eup %5637  ;;  %3039 = vmatmul.f32.vlgmr.msra.gmra.mxu2 %v9243_v11  ;;  %3367 = vmatpush.msra.mxu0 %v8708_v14 }
 0x616   :  { %v2888_v6 = vmul.f32 %v5638_v7, %v9224_v62  ;;  %v2871_v30 = vadd.f32 %v5636_v8, %v2870_v25  ;;  %3350 = vmatpush.msrb.mxu3 %v8702_v35  ;;  %3443 = vmatpush.msrb.mxu1 %v8870_v12  ;;  %vm2893_vm10 = vweird.f32 %v5638_v7  ;;  %v2898_v35 = vand.u32 2147483648, %v9224_v62  ;;  %v3271_v25 = vld [vmem:[%s10119_s7] sm:$0xff] }
 0x617   :  { %3368 = vmatpush.msra.mxu0 %v8720_v45  ;;  %v2896_v45 = vand.u32 2147483647, %v9224_v62  ;;  %vm2894_vm12 = vmor %vm2892_vm11, %vm2893_vm10  ;;  %v3283_v62 = vld [vmem:[%s10119_s7 + $0x60] sm:$0xff] }
 0x618   :  { %v2889_v39 = vsub.f32 1.0, %v2888_v6  ;;  %v2875_v13 = vsel %vm2874_vm8, %v5636_v8, %v2871_v30  ;;  %3351 = vmatpush.msrb.mxu3 %v8714_v32  ;;  %3444 = vmatpush.msrb.mxu1 %v8897_v44  ;;  %v10546_v44 = vld [vmem:[#allocation43_spill] sm:$0xff]  ;;  %v3280_v8 = vld [vmem:[%s10119_s7 + $0x48] sm:$0xff]  ;;  %v2978_v6 = vperm.slane %v9371_v38, 1 }
 0x619   :  { %v2880_v14 = vsel %vm2877_vm9, %v2879_v3, %v2875_v13  ;;  %3369 = vmatpush.msra.mxu0 %v8732_v60  ;;  %v2899_v60 = vor.u32 1.1754944e-38, %v2898_v35  ;;  %vm2897_vm13 = vcmp.eq.f32.partialorder %v2896_v45, 8.507059e+37  ;;  %v10564_v3 = vld [vmem:[#allocation81_spill] sm:$0xff]  ;;  %v10566_v35 = vld [vmem:[#allocation12_spill] sm:$0xff] }
 0x61a   :  { %v2890_v42 = vmul.f32 %v5638_v7, %v2889_v39  ;;  %v2902_v12 = vmul.f32 %v2880_v14, %v2813_v22  ;;  %3352 = vmatpush.msrb.mxu3 %v8726_v16  ;;  %3445 = vmatpush.msrb.mxu1 %v8922_v58  ;;  %v10561_v58 = vld [vmem:[#allocation8_spill] sm:$0xff]  ;;  %v10565_v13 = vld [vmem:[#allocation49_spill] sm:$0xff]  ;;  %v5173_v14 = vld [vmem:[%s10125_s11 + $0x90] sm:$0xf] }
 0x61b   :  { %3370 = vmatpush.msra.mxu0 %v8749_v0 }
 0x61c   :  { %v2891_v32 = vadd.f32 %v5638_v7, %v2890_v42  ;;  %v2903_v33 = vadd.f32 %v2902_v12, %v10546_v44  ;;  %3353 = vmatpush.msrb.mxu3 %v8738_v50  ;;  %3446 = vmatpush.msrb.mxu1 %v8951_v55  ;;  %v2582_v50 = vld [vmem:[%s10124_s1 + $0x10] sm:$0xff]  ;;  %v10562_v55 = vld [vmem:[#allocation53_spill] sm:$0xff]  ;;  %v5428_v42 = vld [vmem:[%s10125_s11 + $0x98] sm:$0xf0] }
 0x61d   :  { %3371 = vmatpush.msra.mxu0 %v8763_v46  ;;  %v10567_v12 = vld [vmem:[#allocation10_spill] sm:$0xff] }
 0x61e   :  { %v2895_v16 = vsel %vm2894_vm12, %v5638_v7, %v2891_v32  ;;  %5639 = vtanh.f32 %v2903_v33  ;;  %3354 = vmatpush.msrb.mxu3 %v8757_v54  ;;  %3447 = vmatpush.msrb.mxu1 %v8971_v34  ;;  %v10563_v34 = vld [vmem:[#allocation66_spill] sm:$0xff]  ;;  %v658_v45 = vadd.f32 %v10567_v12, %v10566_v35  ;;  %v5174_v33 = vor.u32 %v5428_v42, %v5173_v14  ;;  %v10583_v12 = vld [vmem:[#allocation60_spill] sm:$0xff] }
 0x61f   :  { %3372 = vmatpush.msra.mxu0 %v8775_v18  ;;  %v2900_v0 = vsel %vm2897_vm13, %v2899_v60, %v2895_v16  ;;  %v2914_v18 = vsub.f32 1.0, %v2582_v50  ;;  %v5431_v7 = vld [vmem:[%s10125_s11 + $0xb0] sm:$0xf0] }
 0x620   :  { %3355 = vmatpush.msrb.mxu3 %v8769_v19  ;;  %3448 = vmatpush.msrb.mxu1 %v8994_v27  ;;  %v2905_v54 = vsub.f32 1.0, %v2900_v0  ;;  %v2907_v27 = vmul.f32 %v2900_v0, %v8676_v29  ;;  %v5186_v30 = vor.u32 %v5431_v7, %v5185_v17  ;;  %v10568_v60 = vld [vmem:[#allocation34_spill] sm:$0xff]  ;;  %v10569_v0 = vld [vmem:[#allocation29_spill] sm:$0xff]  ;;  %v5101_v17 = vld [vmem:[%s10125_s11] sm:$0xf] }
 0x621   :  { %3373 = vmatpush.msra.mxu0 %v8791_v37  ;;  %v5410_v7 = vld [vmem:[%s10125_s11 + $0x8] sm:$0xf0] }
 0x622   :  { %3356 = vmatpush.msrb.mxu3 %v8785_v21  ;;  %3449 = vmatpush.msrb.mxu1 %v9013_v47  ;;  %v3310_v47 = vld [vmem:[%s10119_s7 + $0x138] sm:$0xff] }
 0x623   :  { %3374 = vmatpush.msra.mxu0 %v8803_v31  ;;  %3329 = vmatpush.msrb.mxu2 %v3310_v47  ;;  %v10577_v47 = vld [vmem:[#allocation48_spill] sm:$0xff] }
 0x624   :  { %v5640_v46 = vpop.eup %5639  ;;  %3357 = vmatpush.msrb.mxu3 %v8797_v1  ;;  %3450 = vmatpush.msrb.mxu1 %v9037_v61  ;;  %v2915_v1 = vmul.f32 %v2914_v18, %v8676_v29  ;;  %v10547_v29 = vld [vmem:[#allocation18_spill] sm:$0xff]  ;;  %v3307_v61 = vld [vmem:[%s10119_s7 + $0x120] sm:$0xff] }
 0x625   :  { %v2906_v19 = vmul.f32 %v5640_v46, %v2905_v54  ;;  %3375 = vmatpush.msra.mxu0 %v8815_v10  ;;  %v10549_v10 = vld [vmem:[#allocation56_spill] sm:$0xff]  ;;  %3330 = vmatpush.msrb.mxu2 %v3307_v61  ;;  %v10570_v54 = vld [vmem:[#allocation47_spill] sm:$0xff] }
 0x626   :  { %3358 = vmatpush.msrb.mxu3 %v8809_v63  ;;  %3451 = vmatpush.msrb.mxu1 %v9060_v28  ;;  %v10548_v63 = vld [vmem:[#allocation16_spill] sm:$0xff]  ;;  %v10560_v28 = vld [vmem:[#allocation63_spill] sm:$0xff] }
 0x627   :  { %v2908_v21 = vadd.f32 %v2907_v27, %v2906_v19  ;;  %3376 = vmatpush.msra.mxu0 %v8827_v24  ;;  %v10551_v24 = vld [vmem:[#allocation46_spill] sm:$0xff]  ;;  %v5161_v46 = vld [vmem:[%s10125_s11 + $0x78] sm:$0xf]  ;;  %v5425_v19 = vld [vmem:[%s10125_s11 + $0x80] sm:$0xf0] }
 0x628   :  { %3359 = vmatpush.msrb.mxu3 %v8821_v36  ;;  %3452 = vmatpush.msrb.mxu1 %v9082_v52  ;;  %v10550_v36 = vld [vmem:[#allocation19_spill] sm:$0xff]  ;;  %v3301_v52 = vld [vmem:[%s10119_s7 + $0xf0] sm:$0xff] }
 0x629   :  { %v9292_v37 = vmul.f32 %v2908_v21, %v2582_v50  ;;  %3377 = vmatpush.msra.mxu0 %v8839_v48  ;;  %v10553_v48 = vld [vmem:[#allocation58_spill] sm:$0xff]  ;;  %v5162_v21 = vor.u32 %v5425_v19, %v5161_v46  ;;  %v10585_v46 = vld [vmem:[#allocation17_spill] sm:$0xff] }
 0x62a   :  { %3360 = vmatpush.msrb.mxu3 %v8833_v4  ;;  %3453 = vmatpush.msrb.mxu1 %v9106_v51  ;;  %v10552_v4 = vld [vmem:[#allocation79_spill] sm:$0xff]  ;;  %v3295_v51 = vld [vmem:[%s10119_s7 + $0xc0] sm:$0xff]  ;;  %v10586_v19 = vld [vmem:[#allocation25_spill] sm:$0xff] }
 0x62b   :  { %v9299_v31 = vadd.f32 %v2915_v1, %v9292_v37  ;;  %3378 = vmatpush.msra.mxu0 %v8851_v59  ;;  %v10555_v59 = vld [vmem:[#allocation62_spill] sm:$0xff]  ;;  %v10571_v1 = vld [vmem:[#allocation52_spill] sm:$0xff] }
 0x62c   :  { %3361 = vmatpush.msrb.mxu3 %v8845_v26  ;;  %3454 = vmatpush.msrb.mxu1 %v9133_v9  ;;  %v10554_v26 = vld [vmem:[#allocation69_spill] sm:$0xff] }
 0x62d   :  { %3115 = vmatmul.f32.vlgmr.msra.gmra.mxu3 %v9299_v31  ;;  %3135 = vmatmul.f32.vlgmr.msrb.gmra.mxu0 %v9299_v31  ;;  %v3292_v9 = vld [vmem:[%s10119_s7 + $0xa8] sm:$0xff] }
 0x62e   :  { %3155 = vmatmul.f32.vlgmr.msra.gmra.mxu1 %v9299_v31  ;;  %3379 = vmatpush.msra.mxu0 %v8865_v15  ;;  %v10557_v15 = vld [vmem:[#allocation82_spill] sm:$0xff] }
 0x62f   :  { %3362 = vmatpush.msrb.mxu3 %v8857_v2  ;;  %3455 = vmatpush.msrb.mxu1 %v9151_v43  ;;  %v10556_v2 = vld [vmem:[#allocation72_spill] sm:$0xff]  ;;  %v3289_v43 = vld [vmem:[%s10119_s7 + $0x90] sm:$0xff] }
 0x630   :  { %3380 = vmatpush.msra.mxu0 %v8892_v20  ;;  %v10559_v20 = vld [vmem:[#allocation59_spill] sm:$0xff] }
 0x631   :  { %3483 = vmatpush.msra.mxu3 %v8884_v5  ;;  %3456 = vmatpush.msrb.mxu1 %v9169_v23  ;;  %v10558_v5 = vld [vmem:[#allocation51_spill] sm:$0xff] }
 0x632   :  { %3381 = vmatpush.msra.mxu0 %v10547_v29  ;;  %v3286_v23 = vld [vmem:[%s10119_s7 + $0x78] sm:$0xff] }
 0x633   :  { %3484 = vmatpush.msra.mxu3 %v10548_v63  ;;  %3457 = vmatpush.msrb.mxu1 %v10549_v10  ;;  %v10572_v29 = vld [vmem:[#allocation55_spill] sm:$0xff]  ;;  %v5149_v63 = vld [vmem:[%s10125_s11 + $0x60] sm:$0xf]  ;;  %v5422_v10 = vld [vmem:[%s10125_s11 + $0x68] sm:$0xf0] }
 0x634   :  { %3382 = vmatpush.msra.mxu0 %v10550_v36  ;;  %v5150_v36 = vor.u32 %v5422_v10, %v5149_v63 }
 0x635   :  { %3485 = vmatpush.msra.mxu3 %v10551_v24  ;;  %3458 = vmatpush.msrb.mxu1 %v9208_v56  ;;  %v3304_v56 = vld [vmem:[%s10119_s7 + $0x108] sm:$0xff]  ;;  %v10573_v24 = vld [vmem:[#allocation64_spill] sm:$0xff] }
 0x636   :  { %3331 = vmatpush.msrb.mxu2 %v3304_v56  ;;  %3953 = vmatpush.bf16.msrb.mxu0 %v5186_v30  ;;  %v9437_v56 = vld [vmem:[%s10123_s10] sm:$0x7]  ;;  %v5102_v30 = vor.u32 %v5410_v7, %v5101_v17 }
 0x637   :  { %3486 = vmatpush.msra.mxu3 %v10552_v4  ;;  %v10574_v4 = vld [vmem:[#allocation68_spill] sm:$0xff] }
 0x638   :  { %3332 = vmatpush.msrb.mxu2 %v3301_v52  ;;  %v10578_v52 = vld [vmem:[#allocation61_spill] sm:$0xff] }
 0x639   :  { %3487 = vmatpush.msra.mxu3 %v10553_v48  ;;  %v5137_v48 = vld [vmem:[%s10125_s11 + $0x48] sm:$0xf] }
 0x63a   :  { %3954 = vmatpush.bf16.msrb.mxu0 %v5174_v33 }
 0x63b   :  { %3488 = vmatpush.msra.mxu3 %v10554_v26  ;;  %v5419_v26 = vld [vmem:[%s10125_s11 + $0x50] sm:$0xf0] }
 0x63d   :  { %3489 = vmatpush.msra.mxu3 %v10555_v59 }
 0x63e   :  { %3955 = vmatpush.bf16.msrb.mxu0 %v5162_v21 }
 0x63f   :  { %3490 = vmatpush.msra.mxu3 %v10556_v2  ;;  %v5138_v2 = vor.u32 %v5419_v26, %v5137_v48 }
 0x641   :  { %3491 = vmatpush.msra.mxu3 %v10557_v15 }
 0x642   :  { %3956 = vmatpush.bf16.msrb.mxu0 %v5150_v36 }
 0x643   :  { %3492 = vmatpush.msra.mxu3 %v10558_v5 }
 0x645   :  { %3493 = vmatpush.msra.mxu3 %v10559_v20  ;;  %v10575_v20 = vld [vmem:[#allocation76_spill] sm:$0xff] }
 0x646   :  { %3957 = vmatpush.bf16.msrb.mxu0 %v5138_v2 }
 0x647   :  { %3494 = vmatpush.msra.mxu3 %v10560_v28 }
 0x649   :  { %3495 = vmatpush.msra.mxu3 %v10561_v58  ;;  %v10576_v58 = vld [vmem:[#allocation13_spill] sm:$0xff] }
 0x64b   :  { %3496 = vmatpush.msra.mxu3 %v10562_v55  ;;  %v5125_v55 = vld [vmem:[%s10125_s11 + $0x30] sm:$0xf] }
 0x64d   :  { %3497 = vmatpush.msra.mxu3 %v9201_v41  ;;  %v3298_v41 = vld [vmem:[%s10119_s7 + $0xd8] sm:$0xff] }
 0x64e   :  { %3333 = vmatpush.msrb.mxu2 %v3298_v41  ;;  %v5113_v41 = vld [vmem:[%s10125_s11 + $0x18] sm:$0xf] }
 0x64f   :  { %3498 = vmatpush.msra.mxu3 %v10563_v34  ;;  %v5416_v34 = vld [vmem:[%s10125_s11 + $0x38] sm:$0xf0] }
 0x650   :  { %3334 = vmatpush.msrb.mxu2 %v3295_v51  ;;  %v5126_v61 = vor.u32 %v5416_v34, %v5125_v55  ;;  %v5413_v51 = vld [vmem:[%s10125_s11 + $0x20] sm:$0xf0] }
 0x652   :  { %3335 = vmatpush.msrb.mxu2 %v3292_v9  ;;  %3958 = vmatpush.bf16.msrb.mxu0 %v5126_v61  ;;  %v5114_v9 = vor.u32 %v5413_v51, %v5113_v41 }
 0x654   :  { %3336 = vmatpush.msrb.mxu2 %v3289_v43 }
 0x656   :  { %3337 = vmatpush.msrb.mxu2 %v3286_v23  ;;  %v3094_v23 = vperm.slane %v9437_v56, 1  ;;  %3959 = vmatpush.bf16.msrb.mxu0 %v5114_v9 }
 0x658   :  { %3338 = vmatpush.msrb.mxu2 %v3283_v62  ;;  %v10579_v62 = vld [vmem:[#allocation67_spill] sm:$0xff] }
 0x65a   :  { %3339 = vmatpush.msrb.mxu2 %v3280_v8  ;;  %3960 = vmatpush.bf16.msrb.mxu0 %v5102_v30 }
 0x65c   :  { %3340 = vmatpush.msrb.mxu2 %v3277_v40 }
 0x65e   :  { %3341 = vmatpush.msrb.mxu2 %v3274_v49 }
 0x660   :  { %3342 = vmatpush.msrb.mxu2 %v3271_v25  ;;  %v10580_v25 = vld [vmem:[#allocation23_spill] sm:$0xff] }
 0x662   :  { %3463 = vmatpush.msra.mxu2 %v10564_v3  ;;  %v10581_v3 = vld [vmem:[#allocation35_spill] sm:$0xff] }
 0x664   :  { %3464 = vmatpush.msra.mxu2 %v10565_v13 }
 0x666   :  { %3465 = vmatpush.msra.mxu2 %v10568_v60 }
 0x668   :  { %3466 = vmatpush.msra.mxu2 %v10570_v54 }
 0x66a   :  { %3467 = vmatpush.msra.mxu2 %v10571_v1 }
 0x66c   :  { %3468 = vmatpush.msra.mxu2 %v10572_v29 }
 0x66e   :  { %3469 = vmatpush.msra.mxu2 %v10573_v24 }
 0x670   :  { %3470 = vmatpush.msra.mxu2 %v10574_v4 }
 0x672   :  { %3471 = vmatpush.msra.mxu2 %v10575_v20 }
 0x674   :  { %3472 = vmatpush.msra.mxu2 %v10576_v58 }
 0x676   :  { %3473 = vmatpush.msra.mxu2 %v10577_v47  ;;  %v2925_v47 = vld [vmem:[%s10124_s1 + $0x30] sm:$0xff] }
 0x677   :  { %v3254_v9 = vsub.f32 1.0, %v2925_v47 }
 0x678   :  { %3474 = vmatpush.msra.mxu2 %v10578_v52 }
 0x67a   :  { %3475 = vmatpush.msra.mxu2 %v10579_v62  ;;  %v5430_v62 = vld [vmem:[%s10125_s11 + $0xac] sm:$0xf] }
 0x67c   :  { %3476 = vmatpush.msra.mxu2 %v10580_v25  ;;  %v3255_v25 = vmul.f32 %v3254_v9, %v9243_v11 }
 0x67e   :  { %3477 = vmatpush.msra.mxu2 %v10583_v12  ;;  %v3095_v12 = vperm.slane %v9437_v56, 2 }
 0x691   :  { %v3000_v39 = vpop.f32.mrf.mxu0  ;;  %v3020_v22 = vpop.f32.mrf.mxu1 }
 0x692   :  { %v3001_v32 = vadd.f32 %v3000_v39, %v2977_v57  ;;  %v3021_v44 = vadd.f32 %v3020_v22, %v2978_v6  ;;  %v10582_v39 = vld [vmem:[#allocation40_spill] sm:$0xff] }
 0x693   :  { %v761_v22 = vadd.f32 %v10582_v39, %v10581_v3 }
 0x694   :  { %v3159_v16 = vadd.f32 %v3001_v32, %v658_v45  ;;  %v3179_v50 = vadd.f32 %v3021_v44, %v10569_v0  ;;  %v2979_v45 = vperm.slane %v9371_v38, 2  ;;  %v3093_v0 = vperm.slane %v9437_v56, 0 }
 0x696   :  { %v5091_v27 = vmul.f32 -1.442695, %v3159_v16  ;;  %v5092_v18 = vmul.f32 -1.442695, %v3179_v50  ;;  %v10584_v50 = vld [vmem:[#allocation44_spill] sm:$0xff] }
 0x697   :  { %3478 = vmatpush.msra.mxu2 %v10584_v50 }
 0x698   :  { %5641 = vpow2.f32 %v5091_v27  ;;  %v3040_v60 = vpop.f32.mrf.mxu2  ;;  %v732_v27 = vadd.f32 %v10586_v19, %v10585_v46  ;;  %v10589_v46 = vld [vmem:[#allocation83_spill] sm:$0xff] }
 0x699   :  { %5643 = vpow2.f32 %v5092_v18  ;;  %v3041_v38 = vadd.f32 %v3040_v60, %v2979_v45  ;;  %v5421_v60 = vld [vmem:[%s10125_s11 + $0x64] sm:$0xf] }
 0x69e   :  { %v5642_v59 = vpop.eup %5641 }
 0x69f   :  { %v5644_v15 = vpop.eup %5643  ;;  %v3163_v5 = vadd.f32 1.0, %v5642_v59  ;;  %v10587_v59 = vld [vmem:[#allocation30_spill] sm:$0xff] }
 0x6a0   :  { %v9423_v28 = vadd.f32 1.0, %v5644_v15 }
 0x6a1   :  { %5645 = vrcp.f32 %v3163_v5  ;;  %v3175_v14 = vand.u32 2147483648, %v3163_v5  ;;  %v3173_v44 = vand.u32 2147483647, %v3163_v5  ;;  %vm3169_vm15 = vweird.f32 %v3163_v5 }
 0x6a2   :  { %5647 = vrcp.f32 %v9423_v28  ;;  %v3195_v24 = vand.u32 2147483648, %v9423_v28  ;;  %vm3189_vm5 = vweird.f32 %v9423_v28  ;;  %v3193_v48 = vand.u32 2147483647, %v9423_v28 }
 0x6a3   :  { %v3176_v18 = vor.u32 1.1754944e-38, %v3175_v14  ;;  %vm3174_vm3 = vcmp.eq.f32.partialorder %v3173_v44, 8.507059e+37 }
 0x6a4   :  { %v3196_v20 = vor.u32 1.1754944e-38, %v3195_v24  ;;  %vm3194_vm7 = vcmp.eq.f32.partialorder %v3193_v48, 8.507059e+37  ;;  %v10591_v24 = vld [vmem:[#allocation41_spill] sm:$0xff] }
 0x6a7   :  { %v5646_v43 = vpop.eup %5645 }
 0x6a8   :  { %v5648_v8 = vpop.eup %5647  ;;  %v3165_v40 = vmul.f32 %v5646_v43, %v3163_v5  ;;  %vm3170_vm14 = vweird.f32 %v5646_v43 }
 0x6a9   :  { %v3185_v49 = vmul.f32 %v5648_v8, %v9423_v28  ;;  %vm3171_vm2 = vmor %vm3169_vm15, %vm3170_vm14  ;;  %vm3190_vm4 = vweird.f32 %v5648_v8 }
 0x6aa   :  { %v3166_v57 = vsub.f32 1.0, %v3165_v40  ;;  %v3136_v6 = vpop.f32.mrf.mxu0  ;;  %vm3191_vm6 = vmor %vm3189_vm5, %vm3190_vm4 }
 0x6ab   :  { %v3186_v13 = vsub.f32 1.0, %v3185_v49  ;;  %v3137_v42 = vadd.f32 %v3136_v6, %v3094_v23  ;;  %v5175_v6 = vld [vmem:[%s10125_s11 + $0x9c] sm:$0xf0]  ;;  %v3156_v50 = vpop.f32.mrf.mxu1 }
 0x6ac   :  { %v3167_v32 = vmul.f32 %v5646_v43, %v3166_v57  ;;  %v5427_v57 = vld [vmem:[%s10125_s11 + $0x94] sm:$0xf] }
 0x6ad   :  { %v3187_v33 = vmul.f32 %v5648_v8, %v3186_v13  ;;  %v3226_v16 = vadd.f32 %v3137_v42, %v761_v22  ;;  %v5178_v3 = vor.u32 %v5427_v57, %v5175_v6  ;;  %v5424_v22 = vld [vmem:[%s10125_s11 + $0x7c] sm:$0xf]  ;;  %v5163_v13 = vld [vmem:[%s10125_s11 + $0x84] sm:$0xf0] }
 0x6ae   :  { %v3168_v54 = vadd.f32 %v5646_v43, %v3167_v32  ;;  %v5166_v32 = vor.u32 %v5424_v22, %v5163_v13  ;;  %v10594_v22 = vld [vmem:[#allocation77_spill] sm:$0xff] }
 0x6af   :  { %v5094_v21 = vmul.f32 -1.442695, %v3226_v16  ;;  %v3188_v10 = vadd.f32 %v5648_v8, %v3187_v33  ;;  %v5151_v16 = vld [vmem:[%s10125_s11 + $0x6c] sm:$0xf0]  ;;  %v9572_v13 = vpack.c.bf16 %v9238_v53, %v10594_v22  ;;  %v10595_v53 = vld [vmem:[#allocation11_spill] sm:$0xff] }
 0x6b0   :  { %v3172_v1 = vsel %vm3171_vm2, %v5646_v43, %v3168_v54  ;;  %v3116_v29 = vpop.f32.mrf.mxu3  ;;  %v10588_v54 = vld [vmem:[#allocation4_spill] sm:$0xff] }
 0x6b1   :  { %v3177_v63 = vsel %vm3174_vm3, %v3176_v18, %v3172_v1  ;;  %5649 = vpow2.f32 %v5094_v21  ;;  %v3117_v36 = vadd.f32 %v3116_v29, %v3093_v0  ;;  %v3192_v15 = vsel %vm3191_vm6, %v5648_v8, %v3188_v10  ;;  %v5187_v8 = vld [vmem:[%s10125_s11 + $0xb4] sm:$0xf0]  ;;  %v5418_v1 = vld [vmem:[%s10125_s11 + $0x4c] sm:$0xf] }
 0x6b2   :  { %v3199_v4 = vmul.f32 %v3177_v63, %v3041_v38  ;;  %v3197_v55 = vsel %vm3194_vm7, %v3196_v20, %v3192_v15  ;;  %v5190_v17 = vor.u32 %v5430_v62, %v5187_v8  ;;  %v9516_v56 = vpack.c.bf16 %v10589_v46, %v10588_v54  ;;  %v5139_v29 = vld [vmem:[%s10125_s11 + $0x54] sm:$0xf0]  ;;  %v5415_v15 = vld [vmem:[%s10125_s11 + $0x34] sm:$0xf]  ;;  %v10593_v8 = vld [vmem:[#allocation73_spill] sm:$0xff] }
 0x6b3   :  { %v3206_v26 = vadd.f32 %v3117_v36, %v732_v27  ;;  %v3202_v61 = vsub.f32 1.0, %v3197_v55  ;;  %v3204_v51 = vmul.f32 %v3197_v55, %v9243_v11  ;;  %v5154_v18 = vor.u32 %v5421_v60, %v5151_v16  ;;  %v10590_v36 = vld [vmem:[#allocation36_spill] sm:$0xff]  ;;  %v10592_v62 = vld [vmem:[#allocation50_spill] sm:$0xff] }
 0x6b4   :  { %v3200_v2 = vadd.f32 %v3199_v4, %v10587_v59  ;;  %v3157_v21 = vadd.f32 %v3156_v50, %v3095_v12  ;;  %v790_v4 = vadd.f32 %v10591_v24, %v10590_v36  ;;  %v5142_v59 = vor.u32 %v5418_v1, %v5139_v29  ;;  %v5193_v46 = vld [vmem:[%s10125_s11 + $0xb0] sm:$0xf]  ;;  %v5281_v29 = vld [vmem:[%s10125_s11 + $0x168] sm:$0xf] }
 0x6b5   :  { %v5093_v5 = vmul.f32 -1.442695, %v3206_v26 }
 0x6b6   :  { %5651 = vtanh.f32 %v3200_v2 }
 0x6b7   :  { %v5650_v58 = vpop.eup %5649  ;;  %5653 = vpow2.f32 %v5093_v5  ;;  %v5127_v5 = vld [vmem:[%s10125_s11 + $0x3c] sm:$0xf0] }
 0x6b8   :  { %v9468_v34 = vadd.f32 1.0, %v5650_v58 }
 0x6ba   :  { %5655 = vrcp.f32 %v9468_v34  ;;  %v3242_v48 = vand.u32 2147483648, %v9468_v34  ;;  %vm3236_vm13 = vweird.f32 %v9468_v34  ;;  %v3240_v2 = vand.u32 2147483647, %v9468_v34 }
 0x6bc   :  { %v5652_v28 = vpop.eup %5651  ;;  %v3243_v55 = vor.u32 1.1754944e-38, %v3242_v48  ;;  %vm3241_vm15 = vcmp.eq.f32.partialorder %v3240_v2, 8.507059e+37  ;;  %v5169_v48 = vld [vmem:[%s10125_s11 + $0x80] sm:$0xf] }
 0x6bd   :  { %v5654_v52 = vpop.eup %5653  ;;  %v3203_v41 = vmul.f32 %v5652_v28, %v3202_v61  ;;  %v5115_v28 = vld [vmem:[%s10125_s11 + $0x24] sm:$0xf0] }
 0x6be   :  { %v3210_v43 = vadd.f32 1.0, %v5654_v52  ;;  %v2926_v52 = vld [vmem:[%s10124_s1 + $0x8] sm:$0xff] }
 0x6bf   :  { %v3205_v23 = vadd.f32 %v3204_v51, %v3203_v41  ;;  %v3258_v57 = vsub.f32 1.0, %v2926_v52 }
 0x6c0   :  { %5657 = vrcp.f32 %v3210_v43  ;;  %v9481_v40 = vpop.eup %5655  ;;  %v3222_v45 = vand.u32 2147483648, %v3210_v43  ;;  %v3220_v33 = vand.u32 2147483647, %v3210_v43  ;;  %vm3216_vm9 = vweird.f32 %v3210_v43 }
 0x6c1   :  { %v9483_v49 = vmul.f32 %v3205_v23, %v2925_v47  ;;  %v3232_v30 = vmul.f32 %v9481_v40, %v9468_v34  ;;  %vm3237_vm12 = vweird.f32 %v9481_v40  ;;  %v5130_v47 = vor.u32 %v5415_v15, %v5127_v5  ;;  %v5412_v34 = vld [vmem:[%s10125_s11 + $0x1c] sm:$0xf]  ;;  %v5103_v23 = vld [vmem:[%s10125_s11 + $0xc] sm:$0xf0] }
 0x6c2   :  { %v3223_v27 = vor.u32 1.1754944e-38, %v3222_v45  ;;  %vm3221_vm11 = vcmp.eq.f32.partialorder %v3220_v33, 8.507059e+37  ;;  %vm3238_vm14 = vmor %vm3236_vm13, %vm3237_vm12  ;;  %v5118_v51 = vor.u32 %v5412_v34, %v5115_v28  ;;  %v10597_v33 = vld [vmem:[#allocation32_spill] sm:$0xff] }
 0x6c3   :  { %v9487_v7 = vadd.f32 %v3255_v25, %v9483_v49  ;;  %v3233_v14 = vsub.f32 1.0, %v3232_v30  ;;  %v9639_v34 = vld [vmem:[%s10123_s10] sm:$0x7] }
 0x6c5   :  { %3343 = vmatmul.f32.vlgmr.msrb.gmra.mxu2 %v9487_v7  ;;  %3363 = vmatmul.f32.vlgmr.msrb.gmra.mxu3 %v9487_v7  ;;  %v3234_v0 = vmul.f32 %v9481_v40, %v3233_v14 }
 0x6c6   :  { %v5658_v11 = vpop.eup %5657  ;;  %3383 = vmatmul.f32.vlgmr.msra.gmra.mxu0 %v9487_v7  ;;  %4011 = vmatpush.bf16.msrb.mxu2 %v5190_v17 }
 0x6c7   :  { %v3212_v39 = vmul.f32 %v5658_v11, %v3210_v43  ;;  %vm3217_vm8 = vweird.f32 %v5658_v11  ;;  %v3235_v10 = vadd.f32 %v9481_v40, %v3234_v0  ;;  %v5409_v43 = vld [vmem:[%s10125_s11 + $0x4] sm:$0xf] }
 0x6c8   :  { %vm3218_vm10 = vmor %vm3216_vm9, %vm3217_vm8  ;;  %v5106_v30 = vor.u32 %v5409_v43, %v5103_v23  ;;  %v3437_v43 = vperm.slane %v9639_v34, 0  ;;  %v5257_v23 = vld [vmem:[%s10125_s11 + $0x138] sm:$0xf] }
 0x6c9   :  { %v3213_v42 = vsub.f32 1.0, %v3212_v39  ;;  %v3239_v58 = vsel %vm3238_vm14, %v9481_v40, %v3235_v10  ;;  %v9556_v40 = vpack.c.bf16 %v10593_v8, %v10592_v62  ;;  %v5454_v10 = vld [vmem:[%s10125_s11 + $0x16c] sm:$0xf]  ;;  %v5449_v62 = vld [vmem:[%s10125_s11 + $0x140] sm:$0xf0] }
 0x6ca   :  { %4012 = vmatpush.bf16.msrb.mxu2 %v5178_v3  ;;  %v3244_v61 = vsel %vm3241_vm15, %v3243_v55, %v3239_v58  ;;  %v3259_v3 = vmul.f32 %v3258_v57, %v9299_v31  ;;  %v5269_v58 = vld [vmem:[%s10125_s11 + $0x150] sm:$0xf]  ;;  %v5452_v55 = vld [vmem:[%s10125_s11 + $0x158] sm:$0xf0]  ;;  %v5259_v57 = vld [vmem:[%s10125_s11 + $0x144] sm:$0xf0] }
 0x6cb   :  { %v3214_v44 = vmul.f32 %v5658_v11, %v3213_v42  ;;  %v3249_v41 = vsub.f32 1.0, %v3244_v61  ;;  %v3251_v17 = vmul.f32 %v3244_v61, %v9299_v31  ;;  %v9580_v31 = vld [vmem:[%s10122_s8] sm:$0x7]  ;;  %v5270_v28 = vor.u32 %v5452_v55, %v5269_v58 }
 0x6cc   :  { %v3321_v14 = vperm.slane %v9580_v31, 0  ;;  %v3322_v42 = vperm.slane %v9580_v31, 1  ;;  %v5271_v61 = vld [vmem:[%s10125_s11 + $0x15c] sm:$0xf0] }
 0x6cd   :  { %v3215_v19 = vadd.f32 %v5658_v11, %v3214_v44  ;;  %v10596_v44 = vld [vmem:[#allocation21_spill] sm:$0xff]  ;;  %v5121_v55 = vld [vmem:[%s10125_s11 + $0x20] sm:$0xf] }
 0x6ce   :  { %3961 = vmatmul.bf16.vlgmr.msrb.gmra.mxu0 %v9516_v56  ;;  %4013 = vmatpush.bf16.msrb.mxu2 %v5166_v32  ;;  %v660_v32 = vadd.f32 %v10595_v53, %v10566_v35  ;;  %v689_v60 = vadd.f32 %v10597_v33, %v10596_v44  ;;  %v5181_v35 = vld [vmem:[%s10125_s11 + $0x98] sm:$0xf] }
 0x6cf   :  { %v3219_v38 = vsel %vm3218_vm10, %v5658_v11, %v3215_v19  ;;  %v5432_v19 = vld [vmem:[%s10125_s11 + $0xb8] sm:$0xf0] }
 0x6d0   :  { %v3224_v63 = vsel %vm3221_vm11, %v3223_v27, %v3219_v38  ;;  %v5429_v38 = vld [vmem:[%s10125_s11 + $0xa0] sm:$0xf0] }
 0x6d1   :  { %v3246_v26 = vmul.f32 %v3224_v63, %v3157_v21  ;;  %v5194_v21 = vor.u32 %v5432_v19, %v5193_v46  ;;  %v5182_v1 = vor.u32 %v5429_v38, %v5181_v35  ;;  %v5455_v63 = vld [vmem:[%s10125_s11 + $0x170] sm:$0xf0]  ;;  %v5247_v19 = vld [vmem:[%s10125_s11 + $0x12c] sm:$0xf0]  ;;  %v5133_v38 = vld [vmem:[%s10125_s11 + $0x38] sm:$0xf] }
 0x6d2   :  { %4014 = vmatpush.bf16.msrb.mxu2 %v5154_v18  ;;  %v5282_v24 = vor.u32 %v5455_v63, %v5281_v29  ;;  %v10600_v63 = vld [vmem:[#allocation20_spill] sm:$0xff] }
 0x6d3   :  { %v3247_v20 = vadd.f32 %v3246_v26, %v790_v4  ;;  %4069 = vmatpush.bf16.msra.mxu0 %v5194_v21  ;;  %v5283_v4 = vld [vmem:[%s10125_s11 + $0x174] sm:$0xf0]  ;;  %v5426_v26 = vld [vmem:[%s10125_s11 + $0x88] sm:$0xf0] }
 0x6d4   :  { %v5286_v15 = vor.u32 %v5454_v10, %v5283_v4  ;;  %v5170_v5 = vor.u32 %v5426_v26, %v5169_v48  ;;  %3982 = vmatpush.bf16.msra.mxu1 %v5282_v24  ;;  %v5233_v48 = vld [vmem:[%s10125_s11 + $0x108] sm:$0xf]  ;;  %v5443_v26 = vld [vmem:[%s10125_s11 + $0x110] sm:$0xf0] }
 0x6d5   :  { %5659 = vtanh.f32 %v3247_v20  ;;  %v5234_v58 = vor.u32 %v5443_v26, %v5233_v48 }
 0x6d6   :  { %4015 = vmatpush.bf16.msrb.mxu2 %v5142_v59  ;;  %4040 = vmatpush.bf16.msrb.mxu3 %v5286_v15 }
 0x6d7   :  { %4070 = vmatpush.bf16.msra.mxu0 %v5182_v1  ;;  %v5417_v1 = vld [vmem:[%s10125_s11 + $0x40] sm:$0xf0] }
 0x6d8   :  { %3983 = vmatpush.bf16.msra.mxu1 %v5270_v28  ;;  %v5134_v24 = vor.u32 %v5417_v1, %v5133_v38  ;;  %v5197_v38 = vld [vmem:[%s10125_s11 + $0xc0] sm:$0xf]  ;;  %v5434_v1 = vld [vmem:[%s10125_s11 + $0xc8] sm:$0xf0] }
 0x6da   :  { %4016 = vmatpush.bf16.msrb.mxu2 %v5130_v47  ;;  %v5451_v47 = vld [vmem:[%s10125_s11 + $0x154] sm:$0xf] }
 0x6db   :  { %v5660_v9 = vpop.eup %5659  ;;  %4071 = vmatpush.bf16.msra.mxu0 %v5170_v5 }
 0x6dc   :  { %v3250_v25 = vmul.f32 %v5660_v9, %v3249_v41  ;;  %v5157_v41 = vld [vmem:[%s10125_s11 + $0x68] sm:$0xf] }
 0x6de   :  { %3966 = vmatmul.bf16.gmra.mxu0 %v9556_v40  ;;  %v3252_v6 = vadd.f32 %v3251_v17, %v3250_v25  ;;  %4017 = vmatpush.bf16.msrb.mxu2 %v5118_v51  ;;  %v5423_v51 = vld [vmem:[%s10125_s11 + $0x70] sm:$0xf0]  ;;  %v5258_v25 = vor.u32 %v5449_v62, %v5257_v23  ;;  %v5448_v17 = vld [vmem:[%s10125_s11 + $0x13c] sm:$0xf]  ;;  %v10602_v62 = vld [vmem:[#allocation33_spill] sm:$0xff] }
 0x6df   :  { %v5158_v9 = vor.u32 %v5423_v51, %v5157_v41  ;;  %v5414_v41 = vld [vmem:[%s10125_s11 + $0x28] sm:$0xf0]  ;;  %v10601_v23 = vld [vmem:[#allocation22_spill] sm:$0xff] }
 0x6e0   :  { %v9560_v11 = vmul.f32 %v3252_v6, %v2926_v52  ;;  %v5274_v52 = vor.u32 %v5451_v47, %v5271_v61  ;;  %v5145_v6 = vld [vmem:[%s10125_s11 + $0x50] sm:$0xf]  ;;  %3984 = vmatpush.bf16.msra.mxu1 %v5258_v25 }
 0x6e1   :  { %4072 = vmatpush.bf16.msra.mxu0 %v5158_v9 }
 0x6e2   :  { %v9564_v39 = vadd.f32 %v3259_v3, %v9560_v11  ;;  %4018 = vmatpush.bf16.msrb.mxu2 %v5106_v30  ;;  %4041 = vmatpush.bf16.msrb.mxu3 %v5274_v52 }
 0x6e4   :  { %3459 = vmatmul.f32.vlgmr.msrb.gmra.mxu1 %v9564_v39  ;;  %3479 = vmatmul.f32.vlgmr.msra.gmra.mxu2 %v9564_v39 }
 0x6e5   :  { %3499 = vmatmul.f32.vlgmr.msra.gmra.mxu3 %v9564_v39 }
 0x6ec   :  { %4019 = vmatmul.bf16.vlgmr.msrb.gmra.mxu2 %v9516_v56 }
 0x6ee   :  { %3971 = vmatmul.bf16.gmra.mxu0 %v9572_v13 }
 0x6fc   :  { %4024 = vmatmul.bf16.gmra.mxu2 %v9556_v40 }
 0x70c   :  { %4029 = vmatmul.bf16.gmra.mxu2 %v9572_v13 }
 0x748   :  { %v3344_v12 = vpop.f32.mrf.mxu2  ;;  %v3364_v45 = vpop.f32.mrf.mxu3 }
 0x749   :  { %v3345_v16 = vadd.f32 %v3344_v12, %v3321_v14  ;;  %v3365_v0 = vadd.f32 %v3364_v45, %v3322_v42  ;;  %v5262_v14 = vor.u32 %v5448_v17, %v5259_v57  ;;  %v5420_v42 = vld [vmem:[%s10125_s11 + $0x58] sm:$0xf0]  ;;  %v5122_v17 = vor.u32 %v5414_v41, %v5121_v55  ;;  %v5221_v57 = vld [vmem:[%s10125_s11 + $0xf0] sm:$0xf] }
 0x74a   :  { %v5146_v53 = vor.u32 %v5420_v42, %v5145_v6  ;;  %v5440_v6 = vld [vmem:[%s10125_s11 + $0xf8] sm:$0xf0]  ;;  %v3439_v41 = vperm.slane %v9639_v34, 2 }
 0x74b   :  { %v3503_v50 = vadd.f32 %v3345_v16, %v660_v32  ;;  %v3523_v54 = vadd.f32 %v3365_v0, %v689_v60  ;;  %v3323_v32 = vperm.slane %v9580_v31, 2  ;;  %4042 = vmatpush.bf16.msrb.mxu3 %v5262_v14  ;;  %v5245_v60 = vld [vmem:[%s10125_s11 + $0x120] sm:$0xf]  ;;  %v5446_v16 = vld [vmem:[%s10125_s11 + $0x128] sm:$0xf0] }
 0x74c   :  { %4073 = vmatpush.bf16.msra.mxu0 %v5146_v53  ;;  %v5246_v46 = vor.u32 %v5446_v16, %v5245_v60  ;;  %v5445_v31 = vld [vmem:[%s10125_s11 + $0x124] sm:$0xf]  ;;  %v5109_v53 = vld [vmem:[%s10125_s11 + $0x8] sm:$0xf] }
 0x74d   :  { %v5095_v27 = vmul.f32 -1.442695, %v3503_v50  ;;  %v5096_v18 = vmul.f32 -1.442695, %v3523_v54  ;;  %v3438_v54 = vperm.slane %v9639_v34, 1  ;;  %v5250_v35 = vor.u32 %v5445_v31, %v5247_v19 }
 0x74e   :  { %3985 = vmatpush.bf16.msra.mxu1 %v5246_v46  ;;  %v5437_v46 = vld [vmem:[%s10125_s11 + $0xe0] sm:$0xf0]  ;;  %v5436_v31 = vld [vmem:[%s10125_s11 + $0xdc] sm:$0xf] }
 0x74f   :  { %5661 = vpow2.f32 %v5095_v27  ;;  %v3384_v27 = vpop.f32.mrf.mxu0  ;;  %4043 = vmatpush.bf16.msrb.mxu3 %v5250_v35 }
 0x750   :  { %5663 = vpow2.f32 %v5096_v18  ;;  %v3385_v15 = vadd.f32 %v3384_v27, %v3323_v32  ;;  %4074 = vmatpush.bf16.msra.mxu0 %v5134_v24  ;;  %v5211_v27 = vld [vmem:[%s10125_s11 + $0xe4] sm:$0xf0] }
 0x751   :  { %v5214_v35 = vor.u32 %v5436_v31, %v5211_v27  ;;  %v5450_v27 = vld [vmem:[%s10125_s11 + $0x148] sm:$0xf0] }
 0x752   :  { %3986 = vmatpush.bf16.msra.mxu1 %v5234_v58 }
 0x754   :  { %4075 = vmatpush.bf16.msra.mxu0 %v5122_v17 }
 0x755   :  { %v5662_v36 = vpop.eup %5661 }
 0x756   :  { %v5664_v59 = vpop.eup %5663  ;;  %v9618_v2 = vadd.f32 1.0, %v5662_v36 }
 0x757   :  { %v9620_v20 = vadd.f32 1.0, %v5664_v59  ;;  %v5442_v59 = vld [vmem:[%s10125_s11 + $0x10c] sm:$0xf] }
 0x758   :  { %5665 = vrcp.f32 %v9618_v2  ;;  %v3517_v22 = vand.u32 2147483647, %v9618_v2  ;;  %v3519_v12 = vand.u32 2147483648, %v9618_v2  ;;  %vm3513_vm4 = vweird.f32 %v9618_v2 }
 0x759   :  { %5667 = vrcp.f32 %v9620_v20  ;;  %v3539_v28 = vand.u32 2147483648, %v9620_v20  ;;  %vm3533_vm7 = vweird.f32 %v9620_v20  ;;  %v3537_v42 = vand.u32 2147483647, %v9620_v20 }
 0x75a   :  { %vm9687_vm3 = vcmp.eq.f32.partialorder %v3517_v22, 8.507059e+37  ;;  %v3520_v29 = vor.u32 1.1754944e-38, %v3519_v12  ;;  %v10603_v22 = vld [vmem:[#allocation37_spill] sm:$0xff]  ;;  %v5222_v12 = vor.u32 %v5440_v6, %v5221_v57 }
 0x75b   :  { %vm3538_vm9 = vcmp.eq.f32.partialorder %v3537_v42, 8.507059e+37  ;;  %v10606_v42 = vld [vmem:[#allocation38_spill] sm:$0xff] }
 0x75c   :  { %3987 = vmatpush.bf16.msra.mxu1 %v5222_v12 }
 0x75e   :  { %v5666_v8 = vpop.eup %5665 }
 0x75f   :  { %v9663_v30 = vpop.eup %5667  ;;  %v3509_v3 = vmul.f32 %v5666_v8, %v9618_v2  ;;  %vm3514_vm2 = vweird.f32 %v5666_v8  ;;  %v5235_v2 = vld [vmem:[%s10125_s11 + $0x114] sm:$0xf0] }
 0x760   :  { %v3529_v45 = vmul.f32 %v9663_v30, %v9620_v20  ;;  %vm3515_vm5 = vmor %vm3513_vm4, %vm3514_vm2  ;;  %vm3534_vm6 = vweird.f32 %v9663_v30  ;;  %v5238_v52 = vor.u32 %v5442_v59, %v5235_v2  ;;  %v5411_v20 = vld [vmem:[%s10125_s11 + $0x10] sm:$0xf0]  ;;  %vm4184_vm4 = vcmask 523264  }
 0x761   :  { %v3510_v44 = vsub.f32 1.0, %v3509_v3  ;;  %v3460_v33 = vpop.f32.mrf.mxu1  ;;  %v5439_v3 = vld [vmem:[%s10125_s11 + $0xf4] sm:$0xf]  ;;  %vm9746_vm8 = vmor %vm3533_vm7, %vm3534_vm6 }
 0x762   :  { %v3530_v0 = vsub.f32 1.0, %v3529_v45  ;;  %v3461_v50 = vadd.f32 %v3460_v33, %v3437_v43  ;;  %4044 = vmatpush.bf16.msrb.mxu3 %v5238_v52  ;;  %v5223_v45 = vld [vmem:[%s10125_s11 + $0xfc] sm:$0xf0] }
 0x763   :  { %v3511_v18 = vmul.f32 %v5666_v8, %v3510_v44  ;;  %v5226_v33 = vor.u32 %v5439_v3, %v5223_v45 }
 0x764   :  { %v3550_v10 = vadd.f32 %v3461_v50, %v10600_v63  ;;  %v3531_v36 = vmul.f32 %v9663_v30, %v3530_v0  ;;  %v3540_v0 = vor.u32 1.1754944e-38, %v3539_v28  ;;  %v5110_v50 = vor.u32 %v5411_v20, %v5109_v53  ;;  %v5199_v63 = vld [vmem:[%s10125_s11 + $0xcc] sm:$0xf0] }
 0x765   :  { %v3512_v4 = vadd.f32 %v5666_v8, %v3511_v18 }
 0x766   :  { %v5097_v5 = vmul.f32 -1.442695, %v3550_v10  ;;  %v3532_v43 = vadd.f32 %v9663_v30, %v3531_v36  ;;  %4045 = vmatpush.bf16.msrb.mxu3 %v5226_v33  ;;  %4076 = vmatpush.bf16.msra.mxu0 %v5110_v50  ;;  %v5198_v36 = vor.u32 %v5434_v1, %v5197_v38  ;;  %v10607_v38 = vld [vmem:[#allocation80_spill] sm:$0xff] }
 0x767   :  { %v3516_v47 = vsel %vm3515_vm5, %v5666_v8, %v3512_v4  ;;  %v3480_v61 = vpop.f32.mrf.mxu2  ;;  %v718_v8 = vadd.f32 %v10602_v62, %v10601_v23  ;;  %v3620_v1 = vpack.c.bf16 %v10607_v38, %v9292_v37  ;;  %v5441_v37 = vld [vmem:[%s10125_s11 + $0x100] sm:$0xf0] }
 0x768   :  { %5669 = vpow2.f32 %v5097_v5  ;;  %v3481_v51 = vadd.f32 %v3480_v61, %v3438_v54  ;;  %v3521_v9 = vsel %vm9687_vm3, %v3520_v29, %v3516_v47  ;;  %v3536_v16 = vsel %vm9746_vm8, %v9663_v30, %v3532_v43  ;;  %v5209_v54 = vld [vmem:[%s10125_s11 + $0xd8] sm:$0xf]  ;;  %v5433_v29 = vld [vmem:[%s10125_s11 + $0xc4] sm:$0xf]  ;;  %v3500_v43 = vpop.f32.mrf.mxu3 }
 0x769   :  { %v3543_v25 = vmul.f32 %v3521_v9, %v3385_v15  ;;  %v5210_v30 = vor.u32 %v5437_v46, %v5209_v54  ;;  %v3541_v21 = vsel %vm3538_vm9, %v3540_v0, %v3536_v16  ;;  %v5202_v24 = vor.u32 %v5433_v29, %v5199_v63  ;;  %v3269_v5 = vld [vmem:[%s10124_s1 + $0x38] sm:$0xff]  ;;  %v3270_v16 = vld [vmem:[%s10124_s1] sm:$0xff]  ;;  %v5289_v46 = vld [vmem:[%s10125_s11 + $0x170] sm:$0xf] }
 0x76a   :  { %v3570_v14 = vadd.f32 %v3481_v51, %v10603_v22  ;;  %4046 = vmatpush.bf16.msrb.mxu3 %v5214_v35  ;;  %v3546_v10 = vsub.f32 1.0, %v3541_v21  ;;  %v3548_v59 = vmul.f32 %v3541_v21, %v9487_v7  ;;  %v5253_v21 = vld [vmem:[%s10125_s11 + $0x128] sm:$0xf]  ;;  %v5447_v35 = vld [vmem:[%s10125_s11 + $0x130] sm:$0xf0] }
 0x76b   :  { %v3544_v44 = vadd.f32 %v3543_v25, %v718_v8  ;;  %3988 = vmatpush.bf16.msra.mxu1 %v5210_v30  ;;  %v5265_v30 = vld [vmem:[%s10125_s11 + $0x140] sm:$0xf]  ;;  %v5241_v29 = vld [vmem:[%s10125_s11 + $0x110] sm:$0xf]  ;;  %v5444_v63 = vld [vmem:[%s10125_s11 + $0x118] sm:$0xf0] }
 0x76c   :  { %v5098_v60 = vmul.f32 -1.442695, %v3570_v14 }
 0x76d   :  { %5671 = vtanh.f32 %v3544_v44 }
 0x76e   :  { %v5670_v19 = vpop.eup %5669  ;;  %5673 = vpow2.f32 %v5098_v60  ;;  %4047 = vmatpush.bf16.msrb.mxu3 %v5202_v24 }
 0x76f   :  { %v3554_v18 = vadd.f32 1.0, %v5670_v19  ;;  %3989 = vmatpush.bf16.msra.mxu1 %v5198_v36  ;;  %v5453_v19 = vld [vmem:[%s10125_s11 + $0x160] sm:$0xf0]  ;;  %v5242_v36 = vor.u32 %v5444_v63, %v5241_v29 }
 0x771   :  { %5675 = vrcp.f32 %v3554_v18  ;;  %v3566_v52 = vand.u32 2147483648, %v3554_v18  ;;  %v3564_v51 = vand.u32 2147483647, %v3554_v18  ;;  %vm3560_vm11 = vweird.f32 %v3554_v18 }
 0x773   :  { %v5672_v4 = vpop.eup %5671  ;;  %v3567_v8 = vor.u32 1.1754944e-38, %v3566_v52  ;;  %vm3565_vm13 = vcmp.eq.f32.partialorder %v3564_v51, 8.507059e+37  ;;  %v3962_v52 = vpop.f32.mrf.mxu0 }
 0x774   :  { %v5674_v48 = vpop.eup %5673  ;;  %v3547_v26 = vmul.f32 %v5672_v4, %v3546_v10  ;;  %v5229_v10 = vld [vmem:[%s10125_s11 + $0xf8] sm:$0xf]  ;;  %v5217_v4 = vld [vmem:[%s10125_s11 + $0xe0] sm:$0xf]  ;;  %v4020_v51 = vpop.f32.mrf.mxu2 }
 0x775   :  { %v3574_v15 = vadd.f32 1.0, %v5674_v48  ;;  %v5230_v24 = vor.u32 %v5441_v37, %v5229_v10  ;;  %v5438_v48 = vld [vmem:[%s10125_s11 + $0xe8] sm:$0xf0] }
 0x776   :  { %v3549_v58 = vadd.f32 %v3548_v59, %v3547_v26  ;;  %v5218_v26 = vor.u32 %v5438_v48, %v5217_v4  ;;  %v5205_v59 = vld [vmem:[%s10125_s11 + $0xc8] sm:$0xf] }
 0x777   :  { %v5676_v2 = vpop.eup %5675  ;;  %5677 = vrcp.f32 %v3574_v15  ;;  %v3586_v6 = vand.u32 2147483648, %v3574_v15  ;;  %v3584_v22 = vand.u32 2147483647, %v3574_v15  ;;  %vm3580_vm15 = vweird.f32 %v3574_v15 }
 0x778   :  { %v3556_v55 = vmul.f32 %v5676_v2, %v3554_v18  ;;  %v3597_v47 = vmul.f32 %v3549_v58, %v3269_v5  ;;  %vm3561_vm10 = vweird.f32 %v5676_v2  ;;  %v5266_v18 = vor.u32 %v5450_v27, %v5265_v30  ;;  %v10608_v58 = vld [vmem:[#allocation75_spill] sm:$0xff] }
 0x779   :  { %vm3562_vm12 = vmor %vm3560_vm11, %vm3561_vm10  ;;  %v3587_v45 = vor.u32 1.1754944e-38, %v3586_v6  ;;  %vm3585_vm3 = vcmp.eq.f32.partialorder %v3584_v22, 8.507059e+37 }
 0x77a   :  { %v3557_v61 = vsub.f32 1.0, %v3556_v55  ;;  %v9785_v28 = vpack.c.bf16 %v3597_v47, %v9483_v49  ;;  %v3501_v49 = vadd.f32 %v3500_v43, %v3439_v41  ;;  %v10611_v47 = vld [vmem:[#allocation5_spill] sm:$0xff] }
 0x77b   :  { %v3964_v41 = vpop.f32.mrf.mxu0 }
 0x77c   :  { %v3558_v7 = vmul.f32 %v5676_v2, %v3557_v61  ;;  %3976 = vmatmul.bf16.gmra.mxu0 %v9785_v28  ;;  %4034 = vmatmul.bf16.gmra.mxu2 %v9785_v28 }
 0x77d   :  { %v5678_v9 = vpop.eup %5677 }
 0x77e   :  { %v3576_v23 = vmul.f32 %v5678_v9, %v3574_v15  ;;  %v3559_v62 = vadd.f32 %v5676_v2, %v3558_v7  ;;  %vm3581_vm14 = vweird.f32 %v5678_v9  ;;  %v5435_v15 = vld [vmem:[%s10125_s11 + $0xd0] sm:$0xf0] }
 0x77f   :  { %vm3582_vm2 = vmor %vm3580_vm15, %vm3581_vm14  ;;  %v5206_v5 = vor.u32 %v5435_v15, %v5205_v59 }
 0x780   :  { %v3577_v25 = vsub.f32 1.0, %v3576_v23  ;;  %v3563_v17 = vsel %vm3562_vm12, %v5676_v2, %v3559_v62  ;;  %v10609_v2 = vld [vmem:[#allocation7_spill] sm:$0xff]  ;;  %v4022_v62 = vpop.f32.mrf.mxu2 }
 0x781   :  { %v3568_v57 = vsel %vm3565_vm13, %v3567_v8, %v3563_v17  ;;  %v3622_v55 = vpack.c.bf16 %v10609_v2, %v10608_v58 }
 0x782   :  { %v3578_v34 = vmul.f32 %v5678_v9, %v3577_v25  ;;  %v3590_v3 = vmul.f32 %v3568_v57, %v3501_v49 }
 0x783   :  { %v3967_v7 = vpop.f32.mrf.mxu0 }
 0x784   :  { %v3579_v14 = vadd.f32 %v5678_v9, %v3578_v34  ;;  %v3591_v12 = vadd.f32 %v3590_v3, %v10606_v42 }
 0x786   :  { %v3583_v53 = vsel %vm3582_vm2, %v5678_v9, %v3579_v14  ;;  %5679 = vtanh.f32 %v3591_v12  ;;  %v3689_v9 = vld [vmem:[%s10126_s12] sm:$0x7] }
 0x787   :  { %v3588_v32 = vsel %vm3585_vm3, %v3587_v45, %v3583_v53  ;;  %v9857_v43 = vperm.slane %v3689_v9, 0  ;;  %v9860_v25 = vperm.slane %v3689_v9, 1 }
 0x788   :  { %v3593_v44 = vsub.f32 1.0, %v3588_v32  ;;  %v3595_v60 = vmul.f32 %v3588_v32, %v9564_v39  ;;  %v5277_v39 = vld [vmem:[%s10125_s11 + $0x158] sm:$0xf]  ;;  %v4025_v42 = vpop.f32.mrf.mxu2 }
 0x789   :  { %v3963_v23 = vadd.f32 %v3962_v52, %v9857_v43  ;;  %v4021_v17 = vadd.f32 %v4020_v51, %v9860_v25  ;;  %v3965_v34 = vadd.f32 %v3964_v41, %v9857_v43  ;;  %v4023_v12 = vadd.f32 %v4022_v62, %v9860_v25 }
 0x78a   :  { %v3968_v53 = vadd.f32 %v3967_v7, %v9857_v43 }
 0x78c   :  { %v5680_v33 = vpop.eup %5679  ;;  %4077 = vmatmul.bf16.vlgmr.msra.gmra.mxu0 %v9516_v56  ;;  %v5456_v56 = vld [vmem:[%s10125_s11 + $0x178] sm:$0xf0] }
 0x78d   :  { %v3594_v20 = vmul.f32 %v5680_v33, %v3593_v44  ;;  %v5290_v31 = vor.u32 %v5456_v56, %v5289_v46 }
 0x78f   :  { %v3596_v0 = vadd.f32 %v3595_v60, %v3594_v20  ;;  %4098 = vmatpush.bf16.msrb.mxu1 %v5290_v31 }
 0x790   :  { %v4027_v60 = vpop.f32.mrf.mxu2 }
 0x791   :  { %v3599_v50 = vmul.f32 %v3596_v0, %v3270_v16 }
 0x793   :  { %v3618_v54 = vpack.c.bf16 %v9560_v11, %v3599_v50  ;;  %v5278_v11 = vor.u32 %v5453_v19, %v5277_v39 }
 0x795   :  { %3990 = vmatmul.bf16.vlgmr.msra.gmra.mxu1 %v3618_v54  ;;  %4048 = vmatmul.bf16.vlgmr.msrb.gmra.mxu3 %v3618_v54 }
 0x796   :  { %4099 = vmatpush.bf16.msrb.mxu1 %v5278_v11 }
 0x798   :  { %v4030_v56 = vpop.f32.mrf.mxu2 }
 0x799   :  { %v4031_v51 = vadd.f32 %v4030_v56, %v9860_v25 }
 0x79a   :  { %4100 = vmatpush.bf16.msrb.mxu1 %v5266_v18 }
 0x79c   :  { %4082 = vmatmul.bf16.gmra.mxu0 %v9556_v40  ;;  %v5254_v40 = vor.u32 %v5447_v35, %v5253_v21 }
 0x79e   :  { %4101 = vmatpush.bf16.msrb.mxu1 %v5254_v40 }
 0x7a0   :  { %v4032_v18 = vpop.f32.mrf.mxu2 }
 0x7a1   :  { %v4033_v52 = vadd.f32 %v4032_v18, %v9860_v25 }
 0x7a2   :  { %4102 = vmatpush.bf16.msrb.mxu1 %v5242_v36 }
 0x7a5   :  { %3995 = vmatmul.bf16.gmra.mxu1 %v3620_v1  ;;  %4053 = vmatmul.bf16.gmra.mxu3 %v3620_v1 }
 0x7a6   :  { %4103 = vmatpush.bf16.msrb.mxu1 %v5230_v24 }
 0x7aa   :  { %4104 = vmatpush.bf16.msrb.mxu1 %v5218_v26  ;;  %v9892_v26 = vperm.slane %v3689_v9, 2 }
 0x7ac   :  { %4087 = vmatmul.bf16.gmra.mxu0 %v9572_v13  ;;  %v10610_v13 = vld [vmem:[#allocation84_spill] sm:$0xff] }
 0x7ad   :  { %v3624_v61 = vpack.c.bf16 %v10611_v47, %v10610_v13 }
 0x7ae   :  { %4105 = vmatpush.bf16.msrb.mxu1 %v5206_v5 }
 0x7b5   :  { %4000 = vmatmul.bf16.gmra.mxu1 %v3622_v55  ;;  %4058 = vmatmul.bf16.gmra.mxu3 %v3622_v55 }
 0x7bc   :  { %4092 = vmatmul.bf16.gmra.mxu0 %v9785_v28  ;;  %v3969_v28 = vpop.f32.mrf.mxu0 }
 0x7bd   :  { %v3970_v0 = vadd.f32 %v3969_v28, %v9857_v43 }
 0x7c4   :  { %v3972_v3 = vpop.f32.mrf.mxu0 }
 0x7c5   :  { %4005 = vmatmul.bf16.gmra.mxu1 %v3624_v61  ;;  %4063 = vmatmul.bf16.gmra.mxu3 %v3624_v61  ;;  %v3973_v31 = vadd.f32 %v3972_v3, %v9857_v43 }
 0x7cc   :  { %v9874_v20 = vpop.f32.mrf.mxu0 }
 0x7d5   :  { %4106 = vmatmul.bf16.vlgmr.msrb.gmra.mxu1 %v3618_v54 }
 0x7e5   :  { %4111 = vmatmul.bf16.gmra.mxu1 %v3620_v1 }
 0x7f5   :  { %4116 = vmatmul.bf16.gmra.mxu1 %v3622_v55 }
 0x7f9   :  { %v3977_v46 = vpop.f32.mrf.mxu0 }
 0x7fa   :  { %v3978_v38 = vadd.f32 %v3977_v46, %v9857_v43 }
 0x7ff   :  { %v4035_v1 = vpop.f32.mrf.mxu2 }
 0x800   :  { %v4036_v55 = vadd.f32 %v4035_v1, %v9860_v25 }
 0x801   :  { %v3979_v30 = vpop.f32.mrf.mxu0 }
 0x802   :  { %v3980_v36 = vadd.f32 %v3979_v30, %v9857_v43 }
 0x805   :  { %4121 = vmatmul.bf16.gmra.mxu1 %v3624_v61 }
 0x807   :  { %v4037_v48 = vpop.f32.mrf.mxu2 }
 0x808   :  { %v4038_v59 = vadd.f32 %v4037_v48, %v9860_v25 }
 0x809   :  { %v4078_v35 = vpop.f32.mrf.mxu0 }
 0x80a   :  { %v4079_v5 = vadd.f32 %v4078_v35, %v9892_v26 }
 0x811   :  { %v9888_v37 = vpop.f32.mrf.mxu0 }
 0x812   :  { %v3991_v8 = vpop.f32.mrf.mxu1  ;;  %v4081_v35 = vadd.f32 %v9888_v37, %v9892_v26 }
 0x813   :  { %v9862_v49 = vadd.f32 %v3991_v8, %v3963_v23  ;;  %v4028_v23 = vadd.f32 %v4027_v60, %v9860_v25 }
 0x818   :  { %v4049_v57 = vpop.f32.mrf.mxu3 }
 0x819   :  { %v9866_v6 = vadd.f32 %v4049_v57, %v4021_v17  ;;  %v4083_v47 = vpop.f32.mrf.mxu0  ;;  %v4026_v17 = vadd.f32 %v4025_v42, %v9860_v25 }
 0x81a   :  { %v3993_v22 = vpop.f32.mrf.mxu1  ;;  %v4084_v30 = vadd.f32 %v4083_v47, %v9892_v26 }
 0x81b   :  { %v9868_v14 = vadd.f32 %v3993_v22, %v3965_v34  ;;  %v4127_v22 = vmul.f32 0.1, %v9862_v49 }
 0x820   :  { %v4051_v45 = vpop.f32.mrf.mxu3 }
 0x821   :  { %v4052_v32 = vadd.f32 %v4051_v45, %v4023_v12  ;;  %v4085_v28 = vpop.f32.mrf.mxu0 }
 0x822   :  { %v3996_v44 = vpop.f32.mrf.mxu1 }
 0x823   :  { %v9872_v33 = vadd.f32 %v3996_v44, %v3968_v53  ;;  %v4128_v53 = vmul.f32 0.1, %v9868_v14 }
 0x825   :  { %v4129_v25 = vmul.f32 0.1, %v9872_v33 }
 0x828   :  { %v4054_v16 = vpop.f32.mrf.mxu3 }
 0x829   :  { %v4055_v57 = vadd.f32 %v4054_v16, %v4026_v17  ;;  %v4088_v34 = vpop.f32.mrf.mxu0 }
 0x82a   :  { %v3998_v50 = vpop.f32.mrf.mxu1  ;;  %v4089_v56 = vadd.f32 %v4088_v34, %v9892_v26 }
 0x82b   :  { %v9877_v54 = vadd.f32 %v3998_v50, %v3970_v0 }
 0x82d   :  { %v4130_v0 = vmul.f32 0.1, %v9877_v54 }
 0x830   :  { %v4056_v39 = vpop.f32.mrf.mxu3 }
 0x831   :  { %v4057_v62 = vadd.f32 %v4056_v39, %v4028_v23  ;;  %v4090_v12 = vpop.f32.mrf.mxu0 }
 0x832   :  { %v4001_v19 = vpop.f32.mrf.mxu1  ;;  %v4091_v46 = vadd.f32 %v4090_v12, %v9892_v26 }
 0x833   :  { %v9880_v11 = vadd.f32 %v4001_v19, %v3973_v31  ;;  %v4086_v31 = vadd.f32 %v4085_v28, %v9892_v26  ;;  %v3975_v19 = vadd.f32 %v9874_v20, %v9857_v43 }
 0x835   :  { %v4131_v33 = vmul.f32 0.1, %v9880_v11 }
 0x838   :  { %v4059_v27 = vpop.f32.mrf.mxu3 }
 0x839   :  { %v4060_v9 = vadd.f32 %v4059_v27, %v4031_v51  ;;  %v4093_v60 = vpop.f32.mrf.mxu0 }
 0x83a   :  { %v9882_v21 = vpop.f32.mrf.mxu1  ;;  %v4094_v49 = vadd.f32 %v4093_v60, %v9892_v26 }
 0x83b   :  { %v4004_v18 = vadd.f32 %v9882_v21, %v3975_v19  ;;  %v4135_v21 = vld [vmem:[%s10127_s2] sm:$0xff] }
 0x840   :  { %v4061_v40 = vpop.f32.mrf.mxu3 }
 0x841   :  { %v4062_v41 = vadd.f32 %v4061_v40, %v4033_v52  ;;  %v4095_v16 = vpop.f32.mrf.mxu0  ;;  %v4140_v52 = vld [vmem:[%s10127_s2 + $0x28] sm:$0xff] }
 0x842   :  { %v4006_v29 = vpop.f32.mrf.mxu1 }
 0x843   :  { %v9885_v63 = vadd.f32 %v4006_v29, %v3978_v38  ;;  %v4132_v38 = vmul.f32 0.1, %v4004_v18 }
 0x845   :  { %v4133_v43 = vmul.f32 0.1, %v9885_v63 }
 0x848   :  { %v4064_v10 = vpop.f32.mrf.mxu3 }
 0x849   :  { %v4065_v61 = vadd.f32 %v4064_v10, %v4036_v55  ;;  %v4139_v55 = vld [vmem:[%s10127_s2 + $0x20] sm:$0xff] }
 0x84a   :  { %v4008_v24 = vpop.f32.mrf.mxu1 }
 0x84b   :  { %v9890_v4 = vadd.f32 %v4008_v24, %v3980_v36  ;;  %v4136_v36 = vld [vmem:[%s10127_s2 + $0x8] sm:$0xff] }
 0x84d   :  { %v4134_v20 = vmul.f32 0.1, %v9890_v4  ;;  %v4137_v4 = vld [vmem:[%s10127_s2 + $0x10] sm:$0xff] }
 0x850   :  { %v4066_v15 = vpop.f32.mrf.mxu3 }
 0x851   :  { %v4067_v58 = vadd.f32 %v4066_v15, %v4038_v59  ;;  %v4138_v15 = vld [vmem:[%s10127_s2 + $0x18] sm:$0xff] }
 0x852   :  { %v4107_v2 = vpop.f32.mrf.mxu1 }
 0x853   :  { %v9897_v13 = vadd.f32 %v4107_v2, %v4079_v5  ;;  %4151 = vmatpush.xpose.msra.mxu2 %v4067_v58 }
 0x857   :  { %4152 = vmatpush.xpose.msra.mxu2 %v4065_v61 }
 0x85a   :  { %v4109_v7 = vpop.f32.mrf.mxu1 }
 0x85b   :  { %4153 = vmatpush.xpose.msra.mxu2 %v4062_v41  ;;  %v4110_v11 = vadd.f32 %v4109_v7, %v4081_v35 }
 0x85f   :  { %4154 = vmatpush.xpose.msra.mxu2 %v4060_v9  ;;  %v4141_v9 = vld [vmem:[%s10127_s2 + $0x30] sm:$0xff] }
 0x862   :  { %v4112_v8 = vpop.f32.mrf.mxu1 }
 0x863   :  { %4155 = vmatpush.xpose.msra.mxu2 %v4057_v62  ;;  %v4113_v40 = vadd.f32 %v4112_v8, %v4084_v30  ;;  %v4142_v8 = vld [vmem:[%s10127_s2 + $0x38] sm:$0xff] }
 0x867   :  { %4156 = vmatpush.xpose.msra.mxu2 %v4055_v57 }
 0x86a   :  { %v4114_v3 = vpop.f32.mrf.mxu1 }
 0x86b   :  { %4157 = vmatpush.xpose.msra.mxu2 %v4052_v32  ;;  %v4096_v32 = vadd.f32 %v4095_v16, %v9892_v26  ;;  %v4115_v27 = vadd.f32 %v4114_v3, %v4086_v31 }
 0x86f   :  { %4158 = vmatpush.xpose.msra.mxu2 %v9866_v6 }
 0x872   :  { %v4117_v45 = vpop.f32.mrf.mxu1  ;;  %4159 = vmatmul.f32.vlgmr.msra.gmra.mxu2 %v4127_v22 }
 0x873   :  { %v4118_v54 = vadd.f32 %v4117_v45, %v4089_v56 }
 0x87a   :  { %v4119_v44 = vpop.f32.mrf.mxu1  ;;  %4162 = vmatmul.f32.gmra.mxu2 %v4128_v53 }
 0x87b   :  { %v4120_v39 = vadd.f32 %v4119_v44, %v4091_v46 }
 0x882   :  { %v4122_v42 = vpop.f32.mrf.mxu1  ;;  %4165 = vmatmul.f32.gmra.mxu2 %v4129_v25 }
 0x883   :  { %v4123_v14 = vadd.f32 %v4122_v42, %v4094_v49 }
 0x88a   :  { %v4124_v6 = vpop.f32.mrf.mxu1  ;;  %4168 = vmatmul.f32.gmra.mxu2 %v4130_v0 }
 0x88b   :  { %v4125_v50 = vadd.f32 %v4124_v6, %v4096_v32 }
 0x88d   :  { %4409 = vmatpush.msra.mxu3 %v4125_v50 }
 0x88f   :  { %4410 = vmatpush.msra.mxu3 %v4123_v14 }
 0x891   :  { %4411 = vmatpush.msra.mxu3 %v4120_v39 }
 0x892   :  { %4171 = vmatmul.f32.gmra.mxu2 %v4131_v33 }
 0x893   :  { %4412 = vmatpush.msra.mxu3 %v4118_v54 }
 0x895   :  { %4413 = vmatpush.msra.mxu3 %v4115_v27 }
 0x897   :  { %4414 = vmatpush.msra.mxu3 %v4113_v40 }
 0x899   :  { %4415 = vmatpush.msra.mxu3 %v4110_v11 }
 0x89a   :  { %4174 = vmatmul.f32.gmra.mxu2 %v4132_v38 }
 0x89b   :  { %4416 = vmatpush.msra.mxu3 %v9897_v13 }
 0x8a2   :  { %4177 = vmatmul.f32.gmra.mxu2 %v4133_v43 }
 0x8aa   :  { %4180 = vmatmul.f32.gmra.mxu2 %v4134_v20 }
 0x8f5   :  { %v4160_v1 = vpop.f32.mrf.mxu2 }
 0x8f6   :  { %v4161_v29 = vadd.f32 %v4160_v1, %v4135_v21 }
 0x8f8   :  { %v4185_v10 = vsel %vm4184_vm4, %v4161_v29, -inf }
 0x8f9   :  { %4186 = vmax.xlane.f32.xlu1 %v4185_v10 }
 0x8fd   :  { %v4163_v37 = vpop.f32.mrf.mxu2 }
 0x8fe   :  { %v4164_v63 = vadd.f32 %v4163_v37, %v4136_v36 }
 0x900   :  { %v4188_v24 = vsel %vm4184_vm4, %v4164_v63, -inf }
 0x901   :  { %4189 = vmax.xlane.f32.xlu2 %v4188_v24 }
 0x905   :  { %v4166_v48 = vpop.f32.mrf.mxu2 }
 0x906   :  { %v4167_v26 = vadd.f32 %v4166_v48, %v4137_v4 }
 0x908   :  { %v4191_v59 = vsel %vm4184_vm4, %v4167_v26, -inf }
 0x909   :  { %4192 = vmax.xlane.f32.xlu0 %v4191_v59 }
 0x90d   :  { %v4169_v5 = vpop.f32.mrf.mxu2 }
 0x90e   :  { %v4170_v58 = vadd.f32 %v4169_v5, %v4138_v15 }
 0x910   :  { %v4194_v2 = vsel %vm4184_vm4, %v4170_v58, -inf }
 0x911   :  { %4195 = vmax.xlane.f32.xlu1 %v4194_v2 }
 0x915   :  { %v4172_v13 = vpop.f32.mrf.mxu2 }
 0x916   :  { %v4173_v47 = vadd.f32 %v4172_v13, %v4139_v55 }
 0x918   :  { %v4197_v61 = vsel %vm4184_vm4, %v4173_v47, -inf }
 0x919   :  { %4198 = vmax.xlane.f32.xlu2 %v4197_v61 }
 0x91d   :  { %v4175_v41 = vpop.f32.mrf.mxu2 }
 0x91e   :  { %v4176_v7 = vadd.f32 %v4175_v41, %v4140_v52 }
 0x920   :  { %v4200_v51 = vsel %vm4184_vm4, %v4176_v7, -inf }
 0x921   :  { %4201 = vmax.xlane.f32.xlu0 %v4200_v51 }
 0x925   :  { %v4178_v28 = vpop.f32.mrf.mxu2 }
 0x926   :  { %v4179_v23 = vadd.f32 %v4178_v28, %v4141_v9 }
 0x928   :  { %v4203_v62 = vsel %vm4184_vm4, %v4179_v23, -inf }
 0x929   :  { %4204 = vmax.xlane.f32.xlu1 %v4203_v62 }
 0x92d   :  { %v4181_v17 = vpop.f32.mrf.mxu2 }
 0x92e   :  { %v4182_v57 = vadd.f32 %v4181_v17, %v4142_v8 }
 0x930   :  { %v4206_v34 = vsel %vm4184_vm4, %v4182_v57, -inf }
 0x931   :  { %4207 = vmax.xlane.f32.xlu0 %v4206_v34 }
 0x96c   :  { %v4187_v3 = vpop.xlane.xlu1 %4186 }
 0x96d   :  { %v4209_v22 = vsub.f32 %v4161_v29, %v4187_v3 }
 0x96f   :  { %v4217_v12 = vmul.f32 1.442695, %v4209_v22 }
 0x971   :  { %5681 = vpow2.f32 %v4217_v12 }
 0x974   :  { %v4190_v45 = vpop.xlane.xlu2 %4189 }
 0x975   :  { %v4210_v53 = vsub.f32 %v4164_v63, %v4190_v45 }
 0x977   :  { %v9955_v44 = vpop.eup %5681  ;;  %v4219_v60 = vmul.f32 1.442695, %v4210_v53 }
 0x978   :  { %v4233_v25 = vsel %vm4184_vm4, %v9955_v44, 0.0 }
 0x979   :  { %5683 = vpow2.f32 %v4219_v60  ;;  %4234 = vadd.xlane.f32.xlu2 %v4233_v25 }
 0x97c   :  { %v4193_v42 = vpop.xlane.xlu0 %4192 }
 0x97d   :  { %v4211_v16 = vsub.f32 %v4167_v26, %v4193_v42 }
 0x97f   :  { %v9959_v0 = vpop.eup %5683  ;;  %v4221_v32 = vmul.f32 1.442695, %v4211_v16 }
 0x980   :  { %v4236_v6 = vsel %vm4184_vm4, %v9959_v0, 0.0 }
 0x981   :  { %5685 = vpow2.f32 %v4221_v32  ;;  %4237 = vadd.xlane.f32.xlu1 %v4236_v6 }
 0x984   :  { %v4196_v49 = vpop.xlane.xlu1 %4195 }
 0x985   :  { %v4212_v50 = vsub.f32 %v4170_v58, %v4196_v49 }
 0x987   :  { %v9963_v46 = vpop.eup %5685  ;;  %v4223_v14 = vmul.f32 1.442695, %v4212_v50 }
 0x988   :  { %v4239_v56 = vsel %vm4184_vm4, %v9963_v46, 0.0 }
 0x989   :  { %5687 = vpow2.f32 %v4223_v14  ;;  %4240 = vadd.xlane.f32.xlu2 %v4239_v56 }
 0x98c   :  { %v4199_v39 = vpop.xlane.xlu2 %4198 }
 0x98d   :  { %v4213_v33 = vsub.f32 %v4173_v47, %v4199_v39 }
 0x98f   :  { %v9967_v31 = vpop.eup %5687  ;;  %v4225_v54 = vmul.f32 1.442695, %v4213_v33 }
 0x990   :  { %v4242_v19 = vsel %vm4184_vm4, %v9967_v31, 0.0 }
 0x991   :  { %5689 = vpow2.f32 %v4225_v54  ;;  %4243 = vadd.xlane.f32.xlu0 %v4242_v19 }
 0x994   :  { %v4202_v30 = vpop.xlane.xlu0 %4201 }
 0x995   :  { %v4214_v27 = vsub.f32 %v4176_v7, %v4202_v30 }
 0x997   :  { %v9971_v18 = vpop.eup %5689  ;;  %v4227_v35 = vmul.f32 1.442695, %v4214_v27 }
 0x998   :  { %v4245_v40 = vsel %vm4184_vm4, %v9971_v18, 0.0 }
 0x999   :  { %5691 = vpow2.f32 %v4227_v35  ;;  %4246 = vadd.xlane.f32.xlu1 %v4245_v40 }
 0x99c   :  { %v4205_v11 = vpop.xlane.xlu1 %4204 }
 0x99d   :  { %v4215_v38 = vsub.f32 %v4179_v23, %v4205_v11 }
 0x99f   :  { %v9975_v43 = vpop.eup %5691  ;;  %v4229_v20 = vmul.f32 1.442695, %v4215_v38 }
 0x9a0   :  { %v4248_v21 = vsel %vm4184_vm4, %v9975_v43, 0.0 }
 0x9a1   :  { %5693 = vpow2.f32 %v4229_v20  ;;  %4249 = vadd.xlane.f32.xlu2 %v4248_v21 }
 0x9a4   :  { %v4208_v1 = vpop.xlane.xlu0 %4207 }
 0x9a5   :  { %v4216_v29 = vsub.f32 %v4182_v57, %v4208_v1 }
 0x9a7   :  { %v9979_v10 = vpop.eup %5693  ;;  %v4231_v36 = vmul.f32 1.442695, %v4216_v29 }
 0x9a8   :  { %v4251_v37 = vsel %vm4184_vm4, %v9979_v10, 0.0 }
 0x9a9   :  { %5695 = vpow2.f32 %v4231_v36  ;;  %4252 = vadd.xlane.f32.xlu0 %v4251_v37  ;;  %v5464_v36 = vld [vmem:[%s10128_s13 + $0x38] sm:$0xff] }
 0x9aa   :  { %4514 = vmatpush.bf16.msrb.mxu0 %v5464_v36 }
 0x9af   :  { %v9983_v63 = vpop.eup %5695 }
 0x9b0   :  { %v4254_v24 = vsel %vm4184_vm4, %v9983_v63, 0.0 }
 0x9b1   :  { %4255 = vadd.xlane.f32.xlu1 %v4254_v24 }
 0x9ec   :  { %v4235_v4 = vpop.xlane.xlu2 %4234 }
 0x9ed   :  { %5697 = vrcp.f32 %v4235_v4  ;;  %v4268_v5 = vand.u32 2147483648, %v4235_v4  ;;  %v4266_v2 = vand.u32 2147483647, %v4235_v4  ;;  %vm4262_vm6 = vweird.f32 %v4235_v4 }
 0x9ef   :  { %v4269_v47 = vor.u32 1.1754944e-38, %v4268_v5  ;;  %vm4267_vm8 = vcmp.eq.f32.partialorder %v4266_v2, 8.507059e+37  ;;  %v5462_v2 = vld [vmem:[%s10128_s13 + $0x28] sm:$0xff] }
 0x9f3   :  { %v5698_v48 = vpop.eup %5697 }
 0x9f4   :  { %v4258_v26 = vmul.f32 %v5698_v48, %v4235_v4  ;;  %v4238_v59 = vpop.xlane.xlu1 %4237  ;;  %vm4263_vm5 = vweird.f32 %v5698_v48  ;;  %v5463_v4 = vld [vmem:[%s10128_s13 + $0x30] sm:$0xff] }
 0x9f5   :  { %5699 = vrcp.f32 %v4238_v59  ;;  %vm4264_vm7 = vmor %vm4262_vm6, %vm4263_vm5  ;;  %v4283_v23 = vand.u32 2147483648, %v4238_v59  ;;  %v4281_v62 = vand.u32 2147483647, %v4238_v59  ;;  %vm4277_vm10 = vweird.f32 %v4238_v59  ;;  %4515 = vmatpush.bf16.msrb.mxu0 %v5463_v4  ;;  %v5467_v4 = vld [vmem:[%s10130_s15 + $0x10] sm:$0xff] }
 0x9f6   :  { %v4259_v15 = vsub.f32 1.0, %v4258_v26 }
 0x9f7   :  { %v4284_v57 = vor.u32 1.1754944e-38, %v4283_v23  ;;  %vm4282_vm12 = vcmp.eq.f32.partialorder %v4281_v62, 8.507059e+37 }
 0x9f8   :  { %v4260_v58 = vmul.f32 %v5698_v48, %v4259_v15 }
 0x9f9   :  { %4516 = vmatpush.bf16.msrb.mxu0 %v5462_v2 }
 0x9fa   :  { %v4261_v55 = vadd.f32 %v5698_v48, %v4260_v58 }
 0x9fb   :  { %v5700_v13 = vpop.eup %5699 }
 0x9fc   :  { %v4265_v61 = vsel %vm4264_vm7, %v5698_v48, %v4261_v55  ;;  %v4273_v52 = vmul.f32 %v5700_v13, %v4238_v59  ;;  %v4241_v41 = vpop.xlane.xlu2 %4240  ;;  %vm4278_vm9 = vweird.f32 %v5700_v13 }
 0x9fd   :  { %v4270_v7 = vsel %vm4267_vm8, %v4269_v47, %v4265_v61  ;;  %5701 = vrcp.f32 %v4241_v41  ;;  %vm4279_vm11 = vmor %vm4277_vm10, %vm4278_vm9  ;;  %v4298_v60 = vand.u32 2147483648, %v4241_v41  ;;  %v4296_v25 = vand.u32 2147483647, %v4241_v41 }
 0x9fe   :  { %v4271_v51 = vmul.f32 %v9955_v44, %v4270_v7  ;;  %v4274_v9 = vsub.f32 1.0, %v4273_v52  ;;  %vm4292_vm14 = vweird.f32 %v4241_v41 }
 0x9ff   :  { %v4299_v32 = vor.u32 1.1754944e-38, %v4298_v60  ;;  %vm4297_vm2 = vcmp.eq.f32.partialorder %v4296_v25, 8.507059e+37 }
 0xa00   :  { %v4275_v28 = vmul.f32 %v5700_v13, %v4274_v9  ;;  %5291 = vmatmul.msk.f32.vlgmr.msra.gmra.mxu3 %vm4184_vm4, %v4271_v51 }
 0xa02   :  { %v4276_v8 = vadd.f32 %v5700_v13, %v4275_v28 }
 0xa03   :  { %v5702_v17 = vpop.eup %5701 }
 0xa04   :  { %v4288_v34 = vmul.f32 %v5702_v17, %v4241_v41  ;;  %v4244_v3 = vpop.xlane.xlu0 %4243  ;;  %v4280_v22 = vsel %vm4279_vm11, %v5700_v13, %v4276_v8  ;;  %vm4293_vm13 = vweird.f32 %v5702_v17 }
 0xa05   :  { %5703 = vrcp.f32 %v4244_v3  ;;  %v4285_v45 = vsel %vm4282_vm12, %v4284_v57, %v4280_v22  ;;  %vm4294_vm15 = vmor %vm4292_vm14, %vm4293_vm13  ;;  %v4313_v33 = vand.u32 2147483648, %v4244_v3  ;;  %v4311_v54 = vand.u32 2147483647, %v4244_v3 }
 0xa06   :  { %v4289_v12 = vsub.f32 1.0, %v4288_v34  ;;  %v4286_v53 = vmul.f32 %v9959_v0, %v4285_v45  ;;  %vm4307_vm5 = vweird.f32 %v4244_v3 }
 0xa07   :  { %v4314_v27 = vor.u32 1.1754944e-38, %v4313_v33  ;;  %vm4312_vm7 = vcmp.eq.f32.partialorder %v4311_v54, 8.507059e+37 }
 0xa08   :  { %v4290_v44 = vmul.f32 %v5702_v17, %v4289_v12  ;;  %5292 = vmatmul.msk.f32.gmra.mxu3 %vm4184_vm4, %v4286_v53 }
 0xa0a   :  { %v4291_v42 = vadd.f32 %v5702_v17, %v4290_v44 }
 0xa0b   :  { %v5704_v16 = vpop.eup %5703 }
 0xa0c   :  { %v4303_v6 = vmul.f32 %v5704_v16, %v4244_v3  ;;  %v4247_v49 = vpop.xlane.xlu1 %4246  ;;  %v4295_v50 = vsel %vm4294_vm15, %v5702_v17, %v4291_v42  ;;  %vm4308_vm3 = vweird.f32 %v5704_v16  ;;  %v5460_v17 = vld [vmem:[%s10128_s13 + $0x18] sm:$0xff] }
 0xa0d   :  { %5705 = vrcp.f32 %v4247_v49  ;;  %v4300_v56 = vsel %vm4297_vm2, %v4299_v32, %v4295_v50  ;;  %vm4309_vm6 = vmor %vm4307_vm5, %vm4308_vm3  ;;  %v4328_v1 = vand.u32 2147483648, %v4247_v49  ;;  %v4326_v29 = vand.u32 2147483647, %v4247_v49 }
 0xa0e   :  { %v4304_v14 = vsub.f32 1.0, %v4303_v6  ;;  %v4301_v0 = vmul.f32 %v9963_v46, %v4300_v56  ;;  %vm4322_vm9 = vweird.f32 %v4247_v49  ;;  %v5458_v56 = vld [vmem:[%s10128_s13 + $0x8] sm:$0xff] }
 0xa0f   :  { %vm4327_vm11 = vcmp.eq.f32.partialorder %v4326_v29, 8.507059e+37  ;;  %v5468_v29 = vld [vmem:[%s10130_s15 + $0x18] sm:$0xff] }
 0xa10   :  { %v4305_v39 = vmul.f32 %v5704_v16, %v4304_v14  ;;  %5293 = vmatmul.msk.f32.gmra.mxu3 %vm4184_vm4, %v4301_v0  ;;  %v5457_v0 = vld [vmem:[%s10128_s13] sm:$0xff] }
 0xa12   :  { %v4306_v19 = vadd.f32 %v5704_v16, %v4305_v39 }
 0xa13   :  { %v5706_v30 = vpop.eup %5705 }
 0xa14   :  { %v4318_v35 = vmul.f32 %v5706_v30, %v4247_v49  ;;  %v4250_v40 = vpop.xlane.xlu2 %4249  ;;  %v4310_v11 = vsel %vm4309_vm6, %v5704_v16, %v4306_v19  ;;  %vm4323_vm8 = vweird.f32 %v5706_v30 }
 0xa15   :  { %5707 = vrcp.f32 %v4250_v40  ;;  %v4315_v20 = vsel %vm4312_vm7, %v4314_v27, %v4310_v11  ;;  %vm4324_vm10 = vmor %vm4322_vm9, %vm4323_vm8  ;;  %v4343_v13 = vand.u32 2147483648, %v4250_v40  ;;  %v4341_v47 = vand.u32 2147483647, %v4250_v40  ;;  %v4559_v27 = vld [vmem:[%s10130_s15 + $0x30] sm:$0x3] }
 0xa16   :  { %v4319_v38 = vsub.f32 1.0, %v4318_v35  ;;  %v4316_v46 = vmul.f32 %v9967_v31, %v4315_v20  ;;  %v4329_v31 = vor.u32 1.1754944e-38, %v4328_v1  ;;  %vm4337_vm13 = vweird.f32 %v4250_v40  ;;  %v5470_v20 = vld [vmem:[%s10130_s15 + $0x28] sm:$0xff] }
 0xa17   :  { %v4344_v41 = vor.u32 1.1754944e-38, %v4343_v13  ;;  %vm4342_vm15 = vcmp.eq.f32.partialorder %v4341_v47, 8.507059e+37  ;;  %v4589_v35 = vunpack.c.l.b16 %v4559_v27 }
 0xa18   :  { %v4320_v21 = vmul.f32 %v5706_v30, %v4319_v38  ;;  %5294 = vmatmul.msk.f32.gmra.mxu3 %vm4184_vm4, %v4316_v46  ;;  %v5469_v46 = vld [vmem:[%s10130_s15 + $0x20] sm:$0xff] }
 0xa1a   :  { %v4321_v37 = vadd.f32 %v5706_v30, %v4320_v21 }
 0xa1b   :  { %v5708_v24 = vpop.eup %5707 }
 0xa1c   :  { %v4333_v48 = vmul.f32 %v5708_v24, %v4250_v40  ;;  %v4253_v26 = vpop.xlane.xlu0 %4252  ;;  %v4325_v59 = vsel %vm4324_vm10, %v5706_v30, %v4321_v37  ;;  %vm4338_vm12 = vweird.f32 %v5708_v24  ;;  %v4596_v40 = vpack.c.b16 %v4589_v35, %v4589_v35 }
 0xa1d   :  { %5709 = vrcp.f32 %v4253_v26  ;;  %v4330_v5 = vsel %vm4327_vm11, %v4329_v31, %v4325_v59  ;;  %vm4339_vm14 = vmor %vm4337_vm13, %vm4338_vm12  ;;  %v4358_v62 = vand.u32 2147483648, %v4253_v26  ;;  %v4356_v34 = vand.u32 2147483647, %v4253_v26  ;;  %v5466_v31 = vld [vmem:[%s10130_s15 + $0x8] sm:$0xff]  ;;  %v5487_v59 = vld [vmem:[%s10129_s14] ss:$0 sm:$0xff] }
 0xa1e   :  { %v4334_v15 = vsub.f32 1.0, %v4333_v48  ;;  %v4331_v58 = vmul.f32 %v9971_v18, %v4330_v5  ;;  %v5461_v18 = vld [vmem:[%s10128_s13 + $0x20] sm:$0xff]  ;;  %vm4352_vm3 = vweird.f32 %v4253_v26  ;;  %v4616_v38 = vsel %vm190_vm0, %v4596_v40, 0 }
 0xa1f   :  { %4517 = vmatpush.bf16.msrb.mxu0 %v5461_v18  ;;  %v4359_v12 = vor.u32 1.1754944e-38, %v4358_v62  ;;  %vm4357_vm6 = vcmp.eq.f32.partialorder %v4356_v34, 8.507059e+37  ;;  %4619 = vmatpush.bf16.msra.mxu1 %v4616_v38  ;;  %v5465_v48 = vld [vmem:[%s10130_s15] sm:$0xff] }
 0xa20   :  { %v4335_v55 = vmul.f32 %v5708_v24, %v4334_v15  ;;  %5295 = vmatmul.msk.f32.gmra.mxu3 %vm4184_vm4, %v4331_v58 }
 0xa22   :  { %v4336_v61 = vadd.f32 %v5708_v24, %v4335_v55 }
 0xa23   :  { %v5710_v52 = vpop.eup %5709  ;;  %4518 = vmatpush.bf16.msrb.mxu0 %v5460_v17  ;;  %4620 = vmatpush.bf16.msra.mxu1 %v5470_v20 }
 0xa24   :  { %v4348_v7 = vmul.f32 %v5710_v52, %v4253_v26  ;;  %v4256_v51 = vpop.xlane.xlu1 %4255  ;;  %v4340_v9 = vsel %vm4339_vm14, %v5708_v24, %v4336_v61  ;;  %vm4353_vm2 = vweird.f32 %v5710_v52 }
 0xa25   :  { %5711 = vrcp.f32 %v4256_v51  ;;  %v4345_v23 = vsel %vm4342_vm15, %v4344_v41, %v4340_v9  ;;  %vm4354_vm5 = vmor %vm4352_vm3, %vm4353_vm2  ;;  %v4373_v25 = vand.u32 2147483648, %v4256_v51  ;;  %v4371_v16 = vand.u32 2147483647, %v4256_v51 }
 0xa26   :  { %v4349_v28 = vsub.f32 1.0, %v4348_v7  ;;  %v4346_v8 = vmul.f32 %v9975_v43, %v4345_v23  ;;  %vm4367_vm8 = vweird.f32 %v4256_v51 }
 0xa27   :  { %v4374_v6 = vor.u32 1.1754944e-38, %v4373_v25  ;;  %vm4372_vm10 = vcmp.eq.f32.partialorder %v4371_v16, 8.507059e+37  ;;  %4621 = vmatpush.bf16.msra.mxu1 %v5469_v46 }
 0xa28   :  { %v4350_v57 = vmul.f32 %v5710_v52, %v4349_v28  ;;  %5296 = vmatmul.msk.f32.gmra.mxu3 %vm4184_vm4, %v4346_v8 }
 0xa2a   :  { %v4351_v3 = vadd.f32 %v5710_v52, %v4350_v57  ;;  %v5488_v57 = vld [vmem:[%s10131_s16] ss:$0 sm:$0xff] }
 0xa2b   :  { %v5712_v22 = vpop.eup %5711  ;;  %4622 = vmatpush.bf16.msra.mxu1 %v5468_v29 }
 0xa2c   :  { %v4363_v45 = vmul.f32 %v5712_v22, %v4256_v51  ;;  %v4355_v53 = vsel %vm4354_vm5, %v5710_v52, %v4351_v3  ;;  %vm4368_vm7 = vweird.f32 %v5712_v22 }
 0xa2d   :  { %v4360_v43 = vsel %vm4357_vm6, %v4359_v12, %v4355_v53  ;;  %vm4369_vm9 = vmor %vm4367_vm8, %vm4368_vm7 }
 0xa2e   :  { %v4364_v44 = vsub.f32 1.0, %v4363_v45  ;;  %v4361_v60 = vmul.f32 %v9979_v10, %v4360_v43  ;;  %v5459_v10 = vld [vmem:[%s10128_s13 + $0x10] sm:$0xff] }
 0xa2f   :  { %4519 = vmatpush.bf16.msrb.mxu0 %v5459_v10  ;;  %4623 = vmatpush.bf16.msra.mxu1 %v5467_v4 }
 0xa30   :  { %v4365_v42 = vmul.f32 %v5712_v22, %v4364_v44  ;;  %5297 = vmatmul.msk.f32.gmra.mxu3 %vm4184_vm4, %v4361_v60 }
 0xa32   :  { %v4366_v32 = vadd.f32 %v5712_v22, %v4365_v42 }
 0xa33   :  { %4520 = vmatpush.bf16.msrb.mxu0 %v5458_v56  ;;  %4624 = vmatpush.bf16.msra.mxu1 %v5466_v31 }
 0xa34   :  { %v4370_v49 = vsel %vm4369_vm9, %v5712_v22, %v4366_v32 }
 0xa35   :  { %v4375_v50 = vsel %vm4372_vm10, %v4374_v6, %v4370_v49 }
 0xa36   :  { %v4376_v14 = vmul.f32 %v9983_v63, %v4375_v50 }
 0xa37   :  { %4521 = vmatpush.bf16.msrb.mxu0 %v5457_v0  ;;  %4625 = vmatpush.bf16.msra.mxu1 %v5465_v48 }
 0xa38   :  { %5298 = vmatmul.msk.f32.gmra.mxu3 %vm4184_vm4, %v4376_v14 }
 0xa83   :  { %v4418_v39 = vpop.f32.mrf.mxu3 }
 0xa8b   :  { %v4421_v33 = vpop.f32.mrf.mxu3 }
 0xa8c   :  { %v4442_v63 = vpack.c.bf16 %v4421_v33, %v4418_v39 }
 0xa8e   :  { %4522 = vmatmul.bf16.vlgmr.msrb.gmra.mxu0 %v4442_v63 }
 0xa93   :  { %v4424_v54 = vpop.f32.mrf.mxu3 }
 0xa9b   :  { %v4427_v19 = vpop.f32.mrf.mxu3 }
 0xa9c   :  { %v4443_v30 = vpack.c.bf16 %v4427_v19, %v4424_v54 }
 0xa9e   :  { %4527 = vmatmul.bf16.gmra.mxu0 %v4443_v30 }
 0xaa3   :  { %v4430_v11 = vpop.f32.mrf.mxu3 }
 0xaab   :  { %v4433_v21 = vpop.f32.mrf.mxu3 }
 0xaac   :  { %v4444_v1 = vpack.c.bf16 %v4433_v21, %v4430_v11 }
 0xaae   :  { %4532 = vmatmul.bf16.gmra.mxu0 %v4444_v1 }
 0xab3   :  { %v4436_v36 = vpop.f32.mrf.mxu3 }
 0xabb   :  { %v4439_v37 = vpop.f32.mrf.mxu3 }
 0xabc   :  { %v4445_v24 = vpack.c.bf16 %v4439_v37, %v4436_v36 }
 0xabe   :  { %4537 = vmatmul.bf16.gmra.mxu0 %v4445_v24 }
 0xb0b   :  { %v4523_v26 = vpop.f32.mrf.mxu0 }
 0xb0c   :  { %v4524_v5 = vadd.f32 %v5487_v59, %v4523_v26 }
 0xb13   :  { %v4525_v15 = vpop.f32.mrf.mxu0 }
 0xb14   :  { %v4526_v58 = vadd.f32 %v5487_v59, %v4525_v15 }
 0xb16   :  { %v4543_v2 = vpack.c.bf16 %v4526_v58, %v4524_v5 }
 0xb18   :  { %5355 = vmatmul.msk.bf16.vlgmr.msra.gmra.mxu1 %vm165_vm1, %v4543_v2 }
 0xb1b   :  { %v4528_v55 = vpop.f32.mrf.mxu0 }
 0xb1c   :  { %v4529_v47 = vadd.f32 %v5487_v59, %v4528_v55 }
 0xb23   :  { %v4530_v13 = vpop.f32.mrf.mxu0 }
 0xb24   :  { %v4531_v61 = vadd.f32 %v5487_v59, %v4530_v13 }
 0xb26   :  { %v4544_v52 = vpack.c.bf16 %v4531_v61, %v4529_v47 }
 0xb28   :  { %5356 = vmatmul.msk.bf16.gmra.mxu1 %vm165_vm1, %v4544_v52 }
 0xb2b   :  { %v4533_v18 = vpop.f32.mrf.mxu0 }
 0xb2c   :  { %v4534_v7 = vadd.f32 %v5487_v59, %v4533_v18 }
 0xb33   :  { %v4535_v41 = vpop.f32.mrf.mxu0 }
 0xb34   :  { %v4536_v51 = vadd.f32 %v5487_v59, %v4535_v41 }
 0xb36   :  { %v4545_v9 = vpack.c.bf16 %v4536_v51, %v4534_v7 }
 0xb38   :  { %5357 = vmatmul.msk.bf16.gmra.mxu1 %vm165_vm1, %v4545_v9 }
 0xb3b   :  { %v4538_v28 = vpop.f32.mrf.mxu0 }
 0xb3c   :  { %v4539_v62 = vadd.f32 %v5487_v59, %v4538_v28 }
 0xb43   :  { %v4540_v23 = vpop.f32.mrf.mxu0 }
 0xb44   :  { %v4541_v8 = vadd.f32 %v5487_v59, %v4540_v23 }
 0xb46   :  { %v4546_v17 = vpack.c.bf16 %v4541_v8, %v4539_v62 }
 0xb48   :  { %5358 = vmatmul.msk.bf16.gmra.mxu1 %vm165_vm1, %v4546_v17 }
 0xb95   :  { %v4627_v34 = vpop.f32.mrf.mxu1 }
 0xb96   :  { %v4628_v3 = vadd.f32 %v5488_v57, %v4627_v34 }
 0xb98   :  { %4647 = vmax.xlane.f32.xlu2 %v4628_v3 }
 0xb9d   :  { %v4629_v22 = vpop.f32.mrf.mxu1 }
 0xb9e   :  { %v4630_v12 = vadd.f32 %v5488_v57, %v4629_v22 }
 0xba0   :  { %4649 = vmax.xlane.f32.xlu0 %v4630_v12 }
 0xba5   :  { %v4632_v45 = vpop.f32.mrf.mxu1 }
 0xba6   :  { %v4633_v53 = vadd.f32 %v5488_v57, %v4632_v45 }
 0xba8   :  { %4651 = vmax.xlane.f32.xlu1 %v4633_v53 }
 0xbad   :  { %v4634_v43 = vpop.f32.mrf.mxu1 }
 0xbae   :  { %v4635_v44 = vadd.f32 %v5488_v57, %v4634_v43 }
 0xbb0   :  { %4653 = vmax.xlane.f32.xlu2 %v4635_v44 }
 0xbb5   :  { %v4637_v60 = vpop.f32.mrf.mxu1 }
 0xbb6   :  { %v4638_v25 = vadd.f32 %v5488_v57, %v4637_v60 }
 0xbb8   :  { %4655 = vmax.xlane.f32.xlu0 %v4638_v25 }
 0xbbd   :  { %v4639_v42 = vpop.f32.mrf.mxu1 }
 0xbbe   :  { %v4640_v16 = vadd.f32 %v5488_v57, %v4639_v42 }
 0xbc0   :  { %4657 = vmax.xlane.f32.xlu1 %v4640_v16 }
 0xbc5   :  { %v4642_v32 = vpop.f32.mrf.mxu1 }
 0xbc6   :  { %v4643_v6 = vadd.f32 %v5488_v57, %v4642_v32 }
 0xbc8   :  { %4659 = vmax.xlane.f32.xlu2 %v4643_v6 }
 0xbcd   :  { %v4644_v49 = vpop.f32.mrf.mxu1 }
 0xbce   :  { %v4645_v50 = vadd.f32 %v5488_v57, %v4644_v49 }
 0xbd0   :  { %4661 = vmax.xlane.f32.xlu0 %v4645_v50 }
 0xc0b   :  { %v4648_v14 = vpop.xlane.xlu2 %4647 }
 0xc0c   :  { %v4663_v10 = vsub.f32 %v4628_v3, %v4648_v14 }
 0xc0e   :  { %v4671_v56 = vmul.f32 1.442695, %v4663_v10 }
 0xc10   :  { %5713 = vpow2.f32 %v4671_v56 }
 0xc13   :  { %v4650_v0 = vpop.xlane.xlu0 %4649 }
 0xc14   :  { %v4664_v39 = vsub.f32 %v4630_v12, %v4650_v0 }
 0xc16   :  { %v10059_v33 = vpop.eup %5713  ;;  %v4673_v63 = vmul.f32 1.442695, %v4664_v39 }
 0xc17   :  { %4687 = vadd.xlane.f32.xlu1 %v10059_v33 }
 0xc18   :  { %5715 = vpow2.f32 %v4673_v63 }
 0xc1b   :  { %v4652_v54 = vpop.xlane.xlu1 %4651 }
 0xc1c   :  { %v4665_v19 = vsub.f32 %v4633_v53, %v4652_v54 }
 0xc1e   :  { %v10062_v30 = vpop.eup %5715  ;;  %v4675_v27 = vmul.f32 1.442695, %v4665_v19 }
 0xc1f   :  { %4689 = vadd.xlane.f32.xlu2 %v10062_v30 }
 0xc20   :  { %5717 = vpow2.f32 %v4675_v27 }
 0xc23   :  { %v4654_v35 = vpop.xlane.xlu2 %4653 }
 0xc24   :  { %v4666_v40 = vsub.f32 %v4635_v44, %v4654_v35 }
 0xc26   :  { %v10065_v11 = vpop.eup %5717  ;;  %v4677_v38 = vmul.f32 1.442695, %v4666_v40 }
 0xc27   :  { %4691 = vadd.xlane.f32.xlu0 %v10065_v11 }
 0xc28   :  { %5719 = vpow2.f32 %v4677_v38 }
 0xc2b   :  { %v4656_v20 = vpop.xlane.xlu0 %4655 }
 0xc2c   :  { %v4667_v46 = vsub.f32 %v4638_v25, %v4656_v20 }
 0xc2e   :  { %v10068_v21 = vpop.eup %5719  ;;  %v4679_v1 = vmul.f32 1.442695, %v4667_v46 }
 0xc2f   :  { %4693 = vadd.xlane.f32.xlu1 %v10068_v21 }
 0xc30   :  { %5721 = vpow2.f32 %v4679_v1 }
 0xc33   :  { %v4658_v29 = vpop.xlane.xlu1 %4657 }
 0xc34   :  { %v4668_v36 = vsub.f32 %v4640_v16, %v4658_v29 }
 0xc36   :  { %v10071_v37 = vpop.eup %5721  ;;  %v4681_v24 = vmul.f32 1.442695, %v4668_v36 }
 0xc37   :  { %4695 = vadd.xlane.f32.xlu2 %v10071_v37 }
 0xc38   :  { %5723 = vpow2.f32 %v4681_v24 }
 0xc3b   :  { %v4660_v4 = vpop.xlane.xlu2 %4659 }
 0xc3c   :  { %v4669_v31 = vsub.f32 %v4643_v6, %v4660_v4 }
 0xc3e   :  { %v10074_v48 = vpop.eup %5723  ;;  %v4683_v26 = vmul.f32 1.442695, %v4669_v31 }
 0xc3f   :  { %4697 = vadd.xlane.f32.xlu0 %v10074_v48 }
 0xc40   :  { %5725 = vpow2.f32 %v4683_v26 }
 0xc43   :  { %v4662_v59 = vpop.xlane.xlu0 %4661 }
 0xc44   :  { %v4670_v15 = vsub.f32 %v4645_v50, %v4662_v59 }
 0xc46   :  { %v10077_v5 = vpop.eup %5725  ;;  %v4685_v58 = vmul.f32 1.442695, %v4670_v15 }
 0xc47   :  { %4699 = vadd.xlane.f32.xlu1 %v10077_v5 }
 0xc48   :  { %5727 = vpow2.f32 %v4685_v58 }
 0xc4e   :  { %v10080_v2 = vpop.eup %5727 }
 0xc4f   :  { %4701 = vadd.xlane.f32.xlu2 %v10080_v2 }
 0xc8a   :  { %v4688_v55 = vpop.xlane.xlu1 %4687 }
 0xc8b   :  { %5729 = vrcp.f32 %v4688_v55  ;;  %v4714_v18 = vand.u32 2147483648, %v4688_v55  ;;  %v4712_v7 = vand.u32 2147483647, %v4688_v55  ;;  %vm4708_vm1 = vweird.f32 %v4688_v55 }
 0xc8d   :  { %v4715_v28 = vor.u32 1.1754944e-38, %v4714_v18  ;;  %vm4713_vm11 = vcmp.eq.f32.partialorder %v4712_v7, 8.507059e+37 }
 0xc91   :  { %v5730_v13 = vpop.eup %5729 }
 0xc92   :  { %v4704_v47 = vmul.f32 %v5730_v13, %v4688_v55  ;;  %v4690_v61 = vpop.xlane.xlu2 %4689  ;;  %vm4709_vm0 = vweird.f32 %v5730_v13 }
 0xc93   :  { %5731 = vrcp.f32 %v4690_v61  ;;  %vm4710_vm4 = vmor %vm4708_vm1, %vm4709_vm0  ;;  %v4729_v3 = vand.u32 2147483648, %v4690_v61  ;;  %v4727_v12 = vand.u32 2147483647, %v4690_v61  ;;  %vm4723_vm13 = vweird.f32 %v4690_v61 }
 0xc94   :  { %v4705_v52 = vsub.f32 1.0, %v4704_v47 }
 0xc95   :  { %v4730_v43 = vor.u32 1.1754944e-38, %v4729_v3  ;;  %vm4728_vm15 = vcmp.eq.f32.partialorder %v4727_v12, 8.507059e+37 }
 0xc96   :  { %v4706_v41 = vmul.f32 %v5730_v13, %v4705_v52 }
 0xc98   :  { %v4707_v51 = vadd.f32 %v5730_v13, %v4706_v41 }
 0xc99   :  { %v5732_v9 = vpop.eup %5731 }
 0xc9a   :  { %v4711_v23 = vsel %vm4710_vm4, %v5730_v13, %v4707_v51  ;;  %v4719_v62 = vmul.f32 %v5732_v9, %v4690_v61  ;;  %v4692_v8 = vpop.xlane.xlu0 %4691  ;;  %vm4724_vm12 = vweird.f32 %v5732_v9 }
 0xc9b   :  { %v4716_v17 = vsel %vm4713_vm11, %v4715_v28, %v4711_v23  ;;  %5733 = vrcp.f32 %v4692_v8  ;;  %vm4725_vm14 = vmor %vm4723_vm13, %vm4724_vm12  ;;  %v4744_v6 = vand.u32 2147483648, %v4692_v8  ;;  %v4742_v50 = vand.u32 2147483647, %v4692_v8 }
 0xc9c   :  { %v4717_v57 = vmul.f32 %v10059_v33, %v4716_v17  ;;  %v4720_v34 = vsub.f32 1.0, %v4719_v62  ;;  %vm4738_vm3 = vweird.f32 %v4692_v8 }
 0xc9d   :  { %v4745_v56 = vor.u32 1.1754944e-38, %v4744_v6  ;;  %vm4743_vm6 = vcmp.eq.f32.partialorder %v4742_v50, 8.507059e+37 }
 0xc9e   :  { %4823 = vst [vmem:[%s10132_s17] sm:$0xff] %v4717_v57  ;;  %v4721_v22 = vmul.f32 %v5732_v9, %v4720_v34 }
 0xca0   :  { %v4722_v45 = vadd.f32 %v5732_v9, %v4721_v22 }
 0xca1   :  { %v5734_v53 = vpop.eup %5733 }
 0xca2   :  { %v4726_v44 = vsel %vm4725_vm14, %v5732_v9, %v4722_v45  ;;  %v4734_v60 = vmul.f32 %v5734_v53, %v4692_v8  ;;  %v4694_v25 = vpop.xlane.xlu1 %4693  ;;  %vm4739_vm2 = vweird.f32 %v5734_v53 }
 0xca3   :  { %v4731_v42 = vsel %vm4728_vm15, %v4730_v43, %v4726_v44  ;;  %5735 = vrcp.f32 %v4694_v25  ;;  %vm4740_vm5 = vmor %vm4738_vm3, %vm4739_vm2  ;;  %v4757_v35 = vand.u32 2147483647, %v4694_v25  ;;  %vm4753_vm8 = vweird.f32 %v4694_v25 }
 0xca4   :  { %v4732_v16 = vmul.f32 %v10062_v30, %v4731_v42  ;;  %v4735_v32 = vsub.f32 1.0, %v4734_v60  ;;  %v4759_v30 = vand.u32 2147483648, %v4694_v25 }
 0xca5   :  { %vm4758_vm10 = vcmp.eq.f32.partialorder %v4757_v35, 8.507059e+37 }
 0xca6   :  { %4824 = vst [vmem:[%s10132_s17 + $0x8] sm:$0xff] %v4732_v16  ;;  %v4736_v49 = vmul.f32 %v5734_v53, %v4735_v32  ;;  %v4760_v20 = vor.u32 1.1754944e-38, %v4759_v30 }
 0xca8   :  { %v4737_v14 = vadd.f32 %v5734_v53, %v4736_v49 }
 0xca9   :  { %v5736_v10 = vpop.eup %5735 }
 0xcaa   :  { %v4741_v0 = vsel %vm4740_vm5, %v5734_v53, %v4737_v14  ;;  %v4749_v39 = vmul.f32 %v5736_v10, %v4694_v25  ;;  %v4696_v33 = vpop.xlane.xlu2 %4695  ;;  %vm4754_vm7 = vweird.f32 %v5736_v10 }
 0xcab   :  { %v4746_v63 = vsel %vm4743_vm6, %v4745_v56, %v4741_v0  ;;  %5737 = vrcp.f32 %v4696_v33  ;;  %vm4755_vm9 = vmor %vm4753_vm8, %vm4754_vm7  ;;  %v4774_v4 = vand.u32 2147483648, %v4696_v33  ;;  %v4772_v26 = vand.u32 2147483647, %v4696_v33 }
 0xcac   :  { %v4747_v54 = vmul.f32 %v10065_v11, %v4746_v63  ;;  %v4750_v19 = vsub.f32 1.0, %v4749_v39  ;;  %vm4768_vm1 = vweird.f32 %v4696_v33 }
 0xcad   :  { %v4775_v58 = vor.u32 1.1754944e-38, %v4774_v4  ;;  %vm4773_vm11 = vcmp.eq.f32.partialorder %v4772_v26, 8.507059e+37 }
 0xcae   :  { %4825 = vst [vmem:[%s10132_s17 + $0x10] sm:$0xff] %v4747_v54  ;;  %v4751_v27 = vmul.f32 %v5736_v10, %v4750_v19 }
 0xcb0   :  { %v4752_v40 = vadd.f32 %v5736_v10, %v4751_v27 }
 0xcb1   :  { %v5738_v38 = vpop.eup %5737 }
 0xcb2   :  { %v4756_v46 = vsel %vm4755_vm9, %v5736_v10, %v4752_v40  ;;  %v4764_v1 = vmul.f32 %v5738_v38, %v4696_v33  ;;  %v4698_v29 = vpop.xlane.xlu0 %4697  ;;  %vm4769_vm0 = vweird.f32 %v5738_v38 }
 0xcb3   :  { %v4761_v36 = vsel %vm4758_vm10, %v4760_v20, %v4756_v46  ;;  %5739 = vrcp.f32 %v4698_v29  ;;  %vm4770_vm4 = vmor %vm4768_vm1, %vm4769_vm0  ;;  %v4789_v18 = vand.u32 2147483648, %v4698_v29  ;;  %v4787_v7 = vand.u32 2147483647, %v4698_v29 }
 0xcb4   :  { %v4762_v11 = vmul.f32 %v10068_v21, %v4761_v36  ;;  %v4765_v24 = vsub.f32 1.0, %v4764_v1  ;;  %vm4783_vm13 = vweird.f32 %v4698_v29 }
 0xcb5   :  { %v4790_v28 = vor.u32 1.1754944e-38, %v4789_v18  ;;  %vm4788_vm15 = vcmp.eq.f32.partialorder %v4787_v7, 8.507059e+37 }
 0xcb6   :  { %4826 = vst [vmem:[%s10132_s17 + $0x18] sm:$0xff] %v4762_v11  ;;  %v4766_v31 = vmul.f32 %v5738_v38, %v4765_v24 }
 0xcb8   :  { %v4767_v59 = vadd.f32 %v5738_v38, %v4766_v31 }
 0xcb9   :  { %v5740_v15 = vpop.eup %5739 }
 0xcba   :  { %v4771_v55 = vsel %vm4770_vm4, %v5738_v38, %v4767_v59  ;;  %v4779_v13 = vmul.f32 %v5740_v15, %v4698_v29  ;;  %v4700_v47 = vpop.xlane.xlu1 %4699  ;;  %vm4784_vm12 = vweird.f32 %v5740_v15 }
 0xcbb   :  { %v4776_v61 = vsel %vm4773_vm11, %v4775_v58, %v4771_v55  ;;  %5741 = vrcp.f32 %v4700_v47  ;;  %vm4785_vm14 = vmor %vm4783_vm13, %vm4784_vm12  ;;  %v4804_v34 = vand.u32 2147483648, %v4700_v47  ;;  %v4802_v22 = vand.u32 2147483647, %v4700_v47 }
 0xcbc   :  { %v4777_v21 = vmul.f32 %v10071_v37, %v4776_v61  ;;  %v4780_v52 = vsub.f32 1.0, %v4779_v13  ;;  %vm4798_vm3 = vweird.f32 %v4700_v47 }
 0xcbd   :  { %v4805_v53 = vor.u32 1.1754944e-38, %v4804_v34  ;;  %vm4803_vm6 = vcmp.eq.f32.partialorder %v4802_v22, 8.507059e+37 }
 0xcbe   :  { %4827 = vst [vmem:[%s10132_s17 + $0x20] sm:$0xff] %v4777_v21  ;;  %v4781_v41 = vmul.f32 %v5740_v15, %v4780_v52 }
 0xcc0   :  { %v4782_v51 = vadd.f32 %v5740_v15, %v4781_v41 }
 0xcc1   :  { %v5742_v9 = vpop.eup %5741 }
 0xcc2   :  { %v4786_v23 = vsel %vm4785_vm14, %v5740_v15, %v4782_v51  ;;  %v4794_v62 = vmul.f32 %v5742_v9, %v4700_v47  ;;  %v4702_v8 = vpop.xlane.xlu2 %4701  ;;  %vm4799_vm2 = vweird.f32 %v5742_v9 }
 0xcc3   :  { %v4791_v17 = vsel %vm4788_vm15, %v4790_v28, %v4786_v23  ;;  %5743 = vrcp.f32 %v4702_v8  ;;  %vm4800_vm5 = vmor %vm4798_vm3, %vm4799_vm2  ;;  %v4819_v42 = vand.u32 2147483648, %v4702_v8  ;;  %v4817_v32 = vand.u32 2147483647, %v4702_v8 }
 0xcc4   :  { %v4792_v37 = vmul.f32 %v10074_v48, %v4791_v17  ;;  %v4795_v57 = vsub.f32 1.0, %v4794_v62  ;;  %vm4813_vm8 = vweird.f32 %v4702_v8 }
 0xcc5   :  { %v4820_v49 = vor.u32 1.1754944e-38, %v4819_v42  ;;  %vm4818_vm10 = vcmp.eq.f32.partialorder %v4817_v32, 8.507059e+37 }
 0xcc6   :  { %4828 = vst [vmem:[%s10132_s17 + $0x28] sm:$0xff] %v4792_v37  ;;  %v4796_v3 = vmul.f32 %v5742_v9, %v4795_v57 }
 0xcc8   :  { %v4797_v12 = vadd.f32 %v5742_v9, %v4796_v3 }
 0xcc9   :  { %v5744_v45 = vpop.eup %5743 }
 0xcca   :  { %v4801_v43 = vsel %vm4800_vm5, %v5742_v9, %v4797_v12  ;;  %v4809_v44 = vmul.f32 %v5744_v45, %v4702_v8  ;;  %vm4814_vm7 = vweird.f32 %v5744_v45 }
 0xccb   :  { %v4806_v60 = vsel %vm4803_vm6, %v4805_v53, %v4801_v43  ;;  %vm4815_vm9 = vmor %vm4813_vm8, %vm4814_vm7 }
 0xccc   :  { %v4807_v48 = vmul.f32 %v10077_v5, %v4806_v60  ;;  %v4810_v25 = vsub.f32 1.0, %v4809_v44 }
 0xcce   :  { %4829 = vst [vmem:[%s10132_s17 + $0x30] sm:$0xff] %v4807_v48  ;;  %v4811_v16 = vmul.f32 %v5744_v45, %v4810_v25 }
 0xcd0   :  { %v4812_v6 = vadd.f32 %v5744_v45, %v4811_v16 }
 0xcd2   :  { %v4816_v50 = vsel %vm4815_vm9, %v5744_v45, %v4812_v6 }
 0xcd3   :  { %v4821_v14 = vsel %vm4818_vm10, %v4820_v49, %v4816_v50 }
 0xcd4   :  { %v4822_v10 = vmul.f32 %v10080_v2, %v4821_v14 }
 0xcd6   :  { %4830 = vst [vmem:[%s10132_s17 + $0x38] sm:$0xff] %v4822_v10 }

</bundles_post_ra>
